<compile_context>
chip_gen: v7x
topology: tpu7x:2x2x1
jax: 0.10.0
libtpu: 0.0.40
codegen_flags: <defaults>
</compile_context>

<pallas_src>
import functools

import jax
import jax.numpy as jnp
from jax import lax
from jax.experimental import pallas as pl
from jax.experimental.pallas import tpu as pltpu


def _tpu_defaults():
    # v5e/v6e have 128 MiB physical VMEM -> bigger tiles reach the HBM roofline;
    # keep conservative limits on v7x (64 MiB per TensorCore) / unknown chips.
    try:
        kind = jax.devices()[0].device_kind.lower()
    except Exception:
        kind = ""
    if ("v5" in kind) or ("v6" in kind):
        return {"vmem": 64 * 1024 * 1024, "tm": 512, "tn": 1024, "tk": 1024}
    return {"vmem": 32 * 1024 * 1024, "tm": 256, "tn": 512, "tk": 512}


_DEF = _tpu_defaults()
_VMEM_LIMIT = _DEF["vmem"]


def _round_up(x, m):
    return (x + m - 1) // m * m


def _pick_tile(dim, max_tile):
    """Largest tile <= max_tile that divides dim exactly (full dim when small).
    Avoids any in-jit weight padding."""
    if dim <= max_tile:
        return dim
    start = (max_tile // 128) * 128
    for t in range(start, 0, -128):
        if dim % t == 0:
            return t
    return dim  # fallback: whole dim in one block


# ----------------------------------------------------------------------------
# In-kernel helpers (pure functions on VMEM-resident values / refs)
# ----------------------------------------------------------------------------
def _layernorm_f32(y, g_ref, b_ref):
    mean = jnp.mean(y, axis=-1, keepdims=True)
    var = jnp.mean(jnp.square(y - mean), axis=-1, keepdims=True)
    yn = (y - mean) * lax.rsqrt(var + 1e-5)
    return yn * g_ref[...].astype(jnp.float32) + b_ref[...].astype(jnp.float32)


def _mha_res_ln(xq, xkv, wqkv_ref, bqkv_ref, wo_ref, bo_ref, g_ref, b_ref, *, nhead):
    """Post-LN attention sublayer: LayerNorm(xq + out_proj(MHA(xq, xkv, xkv))).

    xq:  (Sq, E) f32 query-side activations (also the residual)
    xkv: (Skv, E) f32 key/value-side activations
    wqkv_ref: (3, H, E, dh) bf16 per-head projections (pre-transposed at prepare time)
    wo_ref:   (H, dh, E)    bf16 per-head out_proj rows
    """
    E = xq.shape[-1]
    dh = E // nhead
    scale = 1.0 / (dh ** 0.5)
    xq_b = xq.astype(jnp.bfloat16)
    xkv_b = xkv.astype(jnp.bfloat16)

    acc = jnp.zeros(xq.shape, jnp.float32)
    # Static per-head unroll: only 2-D matmuls, no in-kernel reshape/transpose.
    for h in range(nhead):
        qh = jnp.dot(xq_b, wqkv_ref[0, h], preferred_element_type=jnp.float32) + bqkv_ref[0, h]
        kh = jnp.dot(xkv_b, wqkv_ref[1, h], preferred_element_type=jnp.float32) + bqkv_ref[1, h]
        vh = jnp.dot(xkv_b, wqkv_ref[2, h], preferred_element_type=jnp.float32) + bqkv_ref[2, h]
        s = lax.dot_general(qh.astype(jnp.bfloat16), kh.astype(jnp.bfloat16),
                            (((1,), (1,)), ((), ())),
                            preferred_element_type=jnp.float32) * scale       # (Sq, Skv)
        m = jnp.max(s, axis=-1, keepdims=True)
        p = jnp.exp(s - m)
        # EUP reciprocal; ~1e-3 rel. error vs exact divide (acceptable next to bf16 matmuls).
        p = p * pl.reciprocal(jnp.sum(p, axis=-1, keepdims=True), approx=True)
        ah = jnp.dot(p.astype(jnp.bfloat16), vh.astype(jnp.bfloat16),
                     preferred_element_type=jnp.float32)                       # (Sq, dh)
        # Fold head-merge + out_proj: out_proj(concat_h ah) == sum_h ah @ Wo_h.
        acc = acc + jnp.dot(ah.astype(jnp.bfloat16), wo_ref[h],
                            preferred_element_type=jnp.float32)
    y = acc + bo_ref[...].astype(jnp.float32) + xq
    return _layernorm_f32(y, g_ref, b_ref)


def _ffn_res_ln(x, w1_ref, b1_ref, w2_ref, b2_ref, g_ref, b_ref):
    """LayerNorm(x + linear2(relu(linear1(x)))) on VMEM-resident values."""
    xb = x.astype(jnp.bfloat16)
    h = jnp.dot(xb, w1_ref[...], preferred_element_type=jnp.float32)
    h = jnp.maximum(h + b1_ref[...].astype(jnp.float32), 0.0)
    z = jnp.dot(h.astype(jnp.bfloat16), w2_ref[...], preferred_element_type=jnp.float32)
    z = z + b2_ref[...].astype(jnp.float32) + x
    return _layernorm_f32(z, g_ref, b_ref)


# ----------------------------------------------------------------------------
# Kernel bodies
# ----------------------------------------------------------------------------
def _encoder_layer_kernel(x_ref, wqkv_ref, bqkv_ref, wo_ref, bo_ref, g1_ref, b1_ref,
                          w1_ref, bf1_ref, w2_ref, bf2_ref, g2_ref, b2_ref,
                          o_ref, *, nhead):
    x = x_ref[0].astype(jnp.float32)                                   # (S, E)
    y = _mha_res_ln(x, x, wqkv_ref, bqkv_ref, wo_ref, bo_ref, g1_ref, b1_ref, nhead=nhead)
    z = _ffn_res_ln(y, w1_ref, bf1_ref, w2_ref, bf2_ref, g2_ref, b2_ref)
    o_ref[0] = z.astype(o_ref.dtype)


def _decoder_layer_kernel(x_ref, mem_ref,
                          s_wqkv_ref, s_bqkv_ref, s_wo_ref, s_bo_ref, g1_ref, b1_ref,
                          c_wqkv_ref, c_bqkv_ref, c_wo_ref, c_bo_ref, g2_ref, b2_ref,
                          w1_ref, bf1_ref, w2_ref, bf2_ref, g3_ref, b3_ref,
                          o_ref, *, nhead):
    x = x_ref[0].astype(jnp.float32)                                   # (S, E)
    mem = mem_ref[0].astype(jnp.float32)                               # (S, E)
    y = _mha_res_ln(x, x, s_wqkv_ref, s_bqkv_ref, s_wo_ref, s_bo_ref,
                    g1_ref, b1_ref, nhead=nhead)
    y = _mha_res_ln(y, mem, c_wqkv_ref, c_bqkv_ref, c_wo_ref, c_bo_ref,
                    g2_ref, b2_ref, nhead=nhead)
    z = _ffn_res_ln(y, w1_ref, bf1_ref, w2_ref, bf2_ref, g3_ref, b3_ref)
    o_ref[0] = z.astype(o_ref.dtype)


def _embed_kernel(f_ref, a_ref, wf_ref, bf_ref, wa_ref, ba_ref, o_ref):
    y = jnp.dot(f_ref[...].astype(jnp.bfloat16), wf_ref[...],
                preferred_element_type=jnp.float32)
    y += jnp.dot(a_ref[...].astype(jnp.bfloat16), wa_ref[...],
                 preferred_element_type=jnp.float32)
    y += bf_ref[...].astype(jnp.float32) + ba_ref[...].astype(jnp.float32)
    o_ref[...] = y.astype(o_ref.dtype)


def _linear_kernel(x_ref, w_ref, b_ref, o_ref, acc_ref):
    """o = x @ w + b; w pre-transposed to (in,out) bf16, f32 VMEM accumulator."""
    k = pl.program_id(2)

    @pl.when(k == 0)
    def _():
        acc_ref[...] = jnp.zeros_like(acc_ref)

    acc_ref[...] += jnp.dot(x_ref[...].astype(jnp.bfloat16), w_ref[...],
                            preferred_element_type=jnp.float32)

    @pl.when(k == pl.num_programs(2) - 1)
    def _():
        o_ref[...] = (acc_ref[...] + b_ref[...].astype(jnp.float32)).astype(o_ref.dtype)


def _ln_kernel(x_ref, g_ref, b_ref, o_ref):
    x = x_ref[...].astype(jnp.float32)
    o_ref[...] = _layernorm_f32(x, g_ref, b_ref).astype(o_ref.dtype)


# ----------------------------------------------------------------------------
# Pallas wrappers
# ----------------------------------------------------------------------------
def _full_spec(arr):
    nd = arr.ndim
    return pl.BlockSpec(arr.shape, lambda n, _z=(0,) * nd: _z)


def encoder_layer_pallas(x, p, nhead):
    """x: (N, S, E) batch-major. One fused pallas_call per layer, grid over batch."""
    N, S, E = x.shape
    weights = (p["wqkv"], p["bqkv"], p["wo"], p["bo"], p["ln1_g"], p["ln1_b"],
               p["w1"], p["b1"], p["w2"], p["b2"], p["ln2_g"], p["ln2_b"])
    return pl.pallas_call(
        functools.partial(_encoder_layer_kernel, nhead=nhead),
        out_shape=jax.ShapeDtypeStruct((N, S, E), x.dtype),
        grid=(N,),
        in_specs=[pl.BlockSpec((1, S, E), lambda n: (n, 0, 0))]
                 + [_full_spec(w) for w in weights],
        out_specs=pl.BlockSpec((1, S, E), lambda n: (n, 0, 0)),
        compiler_params=pltpu.CompilerParams(dimension_semantics=("parallel",),
                                             vmem_limit_bytes=_VMEM_LIMIT),
    )(x, *weights)


def decoder_layer_pallas(x, memory, p, nhead):
    """x, memory: (N, S, E). Self-attn + cross-attn + FFN in one pallas_call."""
    N, S, E = x.shape
    weights = (p["wqkv"], p["bqkv"], p["wo"], p["bo"], p["ln1_g"], p["ln1_b"],
               p["c_wqkv"], p["c_bqkv"], p["c_wo"], p["c_bo"], p["ln2_g"], p["ln2_b"],
               p["w1"], p["b1"], p["w2"], p["b2"], p["ln3_g"], p["ln3_b"])
    return pl.pallas_call(
        functools.partial(_decoder_layer_kernel, nhead=nhead),
        out_shape=jax.ShapeDtypeStruct((N, S, E), x.dtype),
        grid=(N,),
        in_specs=[pl.BlockSpec((1, S, E), lambda n: (n, 0, 0)),
                  pl.BlockSpec((1, S, E), lambda n: (n, 0, 0))]
                 + [_full_spec(w) for w in weights],
        out_specs=pl.BlockSpec((1, S, E), lambda n: (n, 0, 0)),
        compiler_params=pltpu.CompilerParams(dimension_semantics=("parallel",),
                                             vmem_limit_bytes=_VMEM_LIMIT),
    )(x, memory, *weights)


def embed_pallas(frames, actions, wf, bf, wa, ba, *, tm_max=512):
    """combined = frames @ wf + bf + actions @ wa + ba (weights pre-transposed bf16)."""
    S, N, Kf = frames.shape
    Ka = actions.shape[-1]
    E = wf.shape[1]
    f2 = frames.reshape(-1, Kf)
    a2 = actions.reshape(-1, Ka)
    M = f2.shape[0]
    tm, Mp = (M, M) if M <= tm_max else (tm_max, _round_up(M, tm_max))
    if Mp != M:  # activation-only pad (never weights); padded rows are sliced off below
        f2 = jnp.pad(f2, ((0, Mp - M), (0, 0)))
        a2 = jnp.pad(a2, ((0, Mp - M), (0, 0)))
    out = pl.pallas_call(
        _embed_kernel,
        out_shape=jax.ShapeDtypeStruct((Mp, E), frames.dtype),
        grid=(Mp // tm,),
        in_specs=[
            pl.BlockSpec((tm, Kf), lambda i: (i, 0)),
            pl.BlockSpec((tm, Ka), lambda i: (i, 0)),
            pl.BlockSpec((Kf, E), lambda i: (0, 0)),
            pl.BlockSpec((1, E), lambda i: (0, 0)),
            pl.BlockSpec((Ka, E), lambda i: (0, 0)),
            pl.BlockSpec((1, E), lambda i: (0, 0)),
        ],
        out_specs=pl.BlockSpec((tm, E), lambda i: (i, 0)),
        compiler_params=pltpu.CompilerParams(dimension_semantics=("parallel",),
                                             vmem_limit_bytes=_VMEM_LIMIT),
    )(f2, a2, wf, bf, wa, ba)
    if Mp != M:
        out = out[:M]
    return out.reshape(S, N, E)


def linear_pallas(x, w, b, *, tm_max=None, tn_max=None, tk_max=None):
    """y = x @ w + b; w is pre-transposed (in, out) bf16. Tiled over (M, N, K)."""
    tm_max = tm_max or _DEF["tm"]
    tn_max = tn_max or _DEF["tn"]
    tk_max = tk_max or _DEF["tk"]
    lead = x.shape[:-1]
    K, Nout = w.shape
    x2 = x.reshape(-1, K)
    M = x2.shape[0]

    tk = _pick_tile(K, tk_max)      # divides exactly -> no weight padding in-jit
    tn = _pick_tile(Nout, tn_max)
    tm, Mp = (M, M) if M <= tm_max else (tm_max, _round_up(M, tm_max))
    if Mp != M:
        x2 = jnp.pad(x2, ((0, Mp - M), (0, 0)))

    out = pl.pallas_call(
        _linear_kernel,
        out_shape=jax.ShapeDtypeStruct((Mp, Nout), x.dtype),
        grid=(Mp // tm, Nout // tn, K // tk),
        in_specs=[
            pl.BlockSpec((tm, tk), lambda i, j, k: (i, k)),
            pl.BlockSpec((tk, tn), lambda i, j, k: (k, j)),
            pl.BlockSpec((1, tn), lambda i, j, k: (0, j)),
        ],
        out_specs=pl.BlockSpec((tm, tn), lambda i, j, k: (i, j)),
        scratch_shapes=[pltpu.VMEM((tm, tn), jnp.float32)],
        compiler_params=pltpu.CompilerParams(
            dimension_semantics=("parallel", "parallel", "arbitrary"),
            vmem_limit_bytes=_VMEM_LIMIT),
    )(x2, w, b.reshape(1, Nout))
    if Mp != M:
        out = out[:M]
    return out.reshape(*lead, Nout)


def layernorm_pallas(x, gamma, beta, *, tm_max=512):
    """Plain LayerNorm for the final encoder/decoder norms."""
    lead = x.shape[:-1]
    E = x.shape[-1]
    x2 = x.reshape(-1, E)
    M = x2.shape[0]
    tm, Mp = (M, M) if M <= tm_max else (tm_max, _round_up(M, tm_max))
    if Mp != M:
        x2 = jnp.pad(x2, ((0, Mp - M), (0, 0)))
    out = pl.pallas_call(
        _ln_kernel,
        out_shape=jax.ShapeDtypeStruct((Mp, E), x.dtype),
        grid=(Mp // tm,),
        in_specs=[pl.BlockSpec((tm, E), lambda i: (i, 0)),
                  pl.BlockSpec((1, E), lambda i: (0, 0)),
                  pl.BlockSpec((1, E), lambda i: (0, 0))],
        out_specs=pl.BlockSpec((tm, E), lambda i: (i, 0)),
        compiler_params=pltpu.CompilerParams(dimension_semantics=("parallel",),
                                             vmem_limit_bytes=_VMEM_LIMIT),
    )(x2, gamma.reshape(1, E), beta.reshape(1, E))
    if Mp != M:
        out = out[:M]
    return out.reshape(*lead, E)


# ----------------------------------------------------------------------------
# Forward pass
# ----------------------------------------------------------------------------
def megatron_forward(frames, actions, params, nhead):
    S, N, _ = frames.shape
    combined = embed_pallas(frames, actions,
                            params["emb_wf"], params["emb_bf"],
                            params["emb_wa"], params["emb_ba"])        # (S, N, E)

    # Batch-major so each fused layer kernel grids over batch with full (S, E) tiles.
    x = combined.transpose(1, 0, 2)                                     # (N, S, E)

    # nn.Transformer(src=combined, tgt=combined)
    memory = x
    for lp in params["encoder_layers"]:
        memory = encoder_layer_pallas(memory, lp, nhead)
    memory = layernorm_pallas(memory, params["encoder_norm_w"], params["encoder_norm_b"])

    out = x
    for lp in params["decoder_layers"]:
        out = decoder_layer_pallas(out, memory, lp, nhead)
    out = layernorm_pallas(out, params["decoder_norm_w"], params["decoder_norm_b"])

    transformer_output = out.transpose(1, 0, 2)                         # (S, N, E)
    # fc_out on the last sequence position
    output = linear_pallas(out[:, -1, :], params["fc_out_w"], params["fc_out_b"])
    return output, transformer_output


# ----------------------------------------------------------------------------
# One-time parameter preparation (outside jit): transpose to (in,out), bf16 weights,
# per-head packing for attention. No per-forward weight transposes or pads remain.
# ----------------------------------------------------------------------------
def prepare_params(params, d_model, nhead):
    E = d_model
    H = nhead
    assert E % H == 0
    dh = E // H
    bf16 = jnp.bfloat16
    f32 = jnp.float32

    def prep_mha(p):
        w_in = p["in_proj_weight"]                         # (3E, E) PyTorch (out, in)
        b_in = p["in_proj_bias"]                           # (3E,)
        wqkv = jnp.stack(
            [w_in[i * E:(i + 1) * E].T.reshape(E, H, dh).transpose(1, 0, 2)
             for i in range(3)], axis=0).astype(bf16)      # (3, H, E, dh)
        bqkv = jnp.stack(
            [b_in[i * E:(i + 1) * E].reshape(H, 1, dh) for i in range(3)],
            axis=0).astype(f32)                            # (3, H, 1, dh)
        wo = p["out_proj_weight"].T.reshape(H, dh, E).astype(bf16)   # (H, dh, E)
        bo = p["out_proj_bias"].reshape(1, E).astype(f32)
        return wqkv, bqkv, wo, bo

    def prep_layer(p, is_decoder):
        o = {}
        o["wqkv"], o["bqkv"], o["wo"], o["bo"] = prep_mha(p["self_attn"])
        if is_decoder:
            o["c_wqkv"], o["c_bqkv"], o["c_wo"], o["c_bo"] = prep_mha(p["cross_attn"])
        o["w1"] = p["linear1_w"].T.astype(bf16)            # (E, F)
        o["b1"] = p["linear1_b"].reshape(1, -1).astype(f32)
        o["w2"] = p["linear2_w"].T.astype(bf16)            # (F, E)
        o["b2"] = p["linear2_b"].reshape(1, E).astype(f32)
        o["ln1_g"] = p["norm1_w"].reshape(1, E)
        o["ln1_b"] = p["norm1_b"].reshape(1, E)
        o["ln2_g"] = p["norm2_w"].reshape(1, E)
        o["ln2_b"] = p["norm2_b"].reshape(1, E)
        if is_decoder:
            o["ln3_g"] = p["norm3_w"].reshape(1, E)
            o["ln3_b"] = p["norm3_b"].reshape(1, E)
        return o

    return {
        "emb_wf": params["embedding_frame_w"].T.astype(bf16),     # (num_frames, E)
        "emb_bf": params["embedding_frame_b"].reshape(1, E).astype(f32),
        "emb_wa": params["embedding_action_w"].T.astype(bf16),    # (num_actions, E)
        "emb_ba": params["embedding_action_b"].reshape(1, E).astype(f32),
        "encoder_layers": [prep_layer(p, False) for p in params["encoder_layers"]],
        "decoder_layers": [prep_layer(p, True) for p in params["decoder_layers"]],
        "encoder_norm_w": params["encoder_norm_w"], "encoder_norm_b": params["encoder_norm_b"],
        "decoder_norm_w": params["decoder_norm_w"], "decoder_norm_b": params["decoder_norm_b"],
        "fc_out_w": params["fc_out_w"].T.astype(bf16),            # (E, num_frames)
        "fc_out_b": params["fc_out_b"],
    }


# ----------------------------------------------------------------------------
# Deterministic parameter init (PyTorch nn.Module layouts & shapes)
# ----------------------------------------------------------------------------
def init_params(key, num_frames, num_actions, d_model, nhead, num_layers,
                dim_feedforward=2048, num_decoder_layers=None):
    # NOTE: nn.Transformer(d_model, nhead, num_layers) in the reference would default
    # num_decoder_layers=6; we keep enc==dec==num_layers (same as prior accepted version).
    num_decoder_layers = num_decoder_layers or num_layers
    keys = iter(jax.random.split(key, 512))
    f32 = jnp.float32

    def w(shape):
        return (0.02 * jax.random.normal(next(keys), shape, f32)).astype(f32)

    def mha_params():
        return {
            "in_proj_weight": w((3 * d_model, d_model)),
            "in_proj_bias": jnp.zeros((3 * d_model,), f32),
            "out_proj_weight": w((d_model, d_model)),
            "out_proj_bias": jnp.zeros((d_model,), f32),
        }

    def enc_layer():
        return {
            "self_attn": mha_params(),
            "linear1_w": w((dim_feedforward, d_model)), "linear1_b": jnp.zeros((dim_feedforward,), f32),
            "linear2_w": w((d_model, dim_feedforward)), "linear2_b": jnp.zeros((d_model,), f32),
            "norm1_w": jnp.ones((d_model,), f32), "norm1_b": jnp.zeros((d_model,), f32),
            "norm2_w": jnp.ones((d_model,), f32), "norm2_b": jnp.zeros((d_model,), f32),
        }

    def dec_layer():
        d = enc_layer()
        d["cross_attn"] = mha_params()
        d["norm3_w"] = jnp.ones((d_model,), f32)
        d["norm3_b"] = jnp.zeros((d_model,), f32)
        return d

    return {
        "embedding_frame_w": w((d_model, num_frames)), "embedding_frame_b": jnp.zeros((d_model,), f32),
        "embedding_action_w": w((d_model, num_actions)), "embedding_action_b": jnp.zeros((d_model,), f32),
        "encoder_layers": [enc_layer() for _ in range(num_layers)],
        "decoder_layers": [dec_layer() for _ in range(num_decoder_layers)],
        "encoder_norm_w": jnp.ones((d_model,), f32), "encoder_norm_b": jnp.zeros((d_model,), f32),
        "decoder_norm_w": jnp.ones((d_model,), f32), "decoder_norm_b": jnp.zeros((d_model,), f32),
        "fc_out_w": w((num_frames, d_model)), "fc_out_b": jnp.zeros((num_frames,), f32),
    }


# ----------------------------------------------------------------------------
if __name__ == "__main__":
    num_frames, num_actions, d_model, nhead, num_layers = 16, 8, 32, 4, 2
    S, N = 8, 2   # sequence length, batch

    root = jax.random.PRNGKey(0)
    k_params, k_frames, k_actions = jax.random.split(root, 3)

    torch_layout_params = init_params(k_params, num_frames, num_actions,
                                      d_model, nhead, num_layers)
    params = prepare_params(torch_layout_params, d_model, nhead)  # one-time, outside jit

    frames = jax.random.normal(k_frames, (S, N, num_frames), jnp.float32)
    actions = jax.random.normal(k_actions, (S, N, num_actions), jnp.float32)

    fwd = jax.jit(functools.partial(megatron_forward, nhead=nhead))
    output, transformer_output = fwd(frames, actions, params)
    jax.block_until_ready((output, transformer_output))

    assert output.shape == (N, num_frames)
    assert transformer_output.shape == (S, N, d_model)
    assert bool(jnp.all(jnp.isfinite(output)))
    print("KERNEL_OK")
</pallas_src>

<mosaic_0001>
module attributes {stable_mosaic.version = 11 : i64} {
  func.func @_embed_kernel(%arg0: i32, %arg1: memref<16x16xf32, #tpu.memory_space<vmem>>, %arg2: memref<16x8xf32, #tpu.memory_space<vmem>>, %arg3: memref<16x32xbf16, #tpu.memory_space<vmem>>, %arg4: memref<1x32xf32, #tpu.memory_space<vmem>>, %arg5: memref<8x32xbf16, #tpu.memory_space<vmem>>, %arg6: memref<1x32xf32, #tpu.memory_space<vmem>>, %arg7: memref<16x32xf32, #tpu.memory_space<vmem>>) attributes {dimension_semantics = [#tpu.dimension_semantics<parallel>], iteration_bounds = array<i64: 1>, scalar_prefetch = 0 : i64, scratch_operands = 0 : i64, tpu.core_type = #tpu.core_type<tc>, window_params = [{transform_indices = @transform_0, window_bounds = array<i64: 16, 16>}, {transform_indices = @transform_1, window_bounds = array<i64: 16, 8>}, {pipeline_mode = #tpu.pipeline_mode<synchronous>, transform_indices = @transform_2, window_bounds = array<i64: 16, 32>}, {pipeline_mode = #tpu.pipeline_mode<synchronous>, transform_indices = @transform_3, window_bounds = array<i64: 1, 32>}, {pipeline_mode = #tpu.pipeline_mode<synchronous>, transform_indices = @transform_4, window_bounds = array<i64: 8, 32>}, {pipeline_mode = #tpu.pipeline_mode<synchronous>, transform_indices = @transform_5, window_bounds = array<i64: 1, 32>}, {transform_indices = @transform_6, window_bounds = array<i64: 16, 32>}]} {
    %c0 = arith.constant 0 : index
    %c0_0 = arith.constant 0 : index
    %0 = vector.load %arg1[%c0, %c0_0] : memref<16x16xf32, #tpu.memory_space<vmem>>, vector<16x16xf32>
    %1 = arith.truncf %0 : vector<16x16xf32> to vector<16x16xbf16>
    %c0_1 = arith.constant 0 : index
    %c0_2 = arith.constant 0 : index
    %2 = vector.load %arg3[%c0_1, %c0_2] : memref<16x32xbf16, #tpu.memory_space<vmem>>, vector<16x32xbf16>
    %cst = arith.constant dense<0.000000e+00> : vector<16x32xf32>
    %3 = tpu.matmul %1, %2, %cst {dimension_numbers = #tpu.dot_dimension_numbers<[1], [0], [0], [1], [0, 0, 1, 1], [], []>} : vector<16x16xbf16>, vector<16x32xbf16>, vector<16x32xf32> -> vector<16x32xf32>
    %c0_3 = arith.constant 0 : index
    %c0_4 = arith.constant 0 : index
    %4 = vector.load %arg2[%c0_3, %c0_4] : memref<16x8xf32, #tpu.memory_space<vmem>>, vector<16x8xf32>
    %5 = arith.truncf %4 : vector<16x8xf32> to vector<16x8xbf16>
    %c0_5 = arith.constant 0 : index
    %c0_6 = arith.constant 0 : index
    %6 = vector.load %arg5[%c0_5, %c0_6] : memref<8x32xbf16, #tpu.memory_space<vmem>>, vector<8x32xbf16>
    %cst_7 = arith.constant dense<0.000000e+00> : vector<16x32xf32>
    %7 = tpu.matmul %5, %6, %cst_7 {dimension_numbers = #tpu.dot_dimension_numbers<[1], [0], [0], [1], [0, 0, 1, 1], [], []>} : vector<16x8xbf16>, vector<8x32xbf16>, vector<16x32xf32> -> vector<16x32xf32>
    %8 = arith.addf %3, %7 : vector<16x32xf32>
    %c0_8 = arith.constant 0 : index
    %c0_9 = arith.constant 0 : index
    %9 = vector.load %arg4[%c0_8, %c0_9] : memref<1x32xf32, #tpu.memory_space<vmem>>, vector<1x32xf32>
    %c0_10 = arith.constant 0 : index
    %c0_11 = arith.constant 0 : index
    %10 = vector.load %arg6[%c0_10, %c0_11] : memref<1x32xf32, #tpu.memory_space<vmem>>, vector<1x32xf32>
    %11 = arith.addf %9, %10 : vector<1x32xf32>
    %12 = vector.broadcast %11 : vector<1x32xf32> to vector<16x32xf32>
    %13 = arith.addf %8, %12 : vector<16x32xf32>
    %c0_12 = arith.constant 0 : index
    %c0_13 = arith.constant 0 : index
    %14 = vector.load %arg7[%c0_12, %c0_13] : memref<16x32xf32, #tpu.memory_space<vmem>>, vector<16x32xf32>
    tpu.vector_store %arg7[%c0_12, %c0_13], %13 {strides = array<i32>} : memref<16x32xf32, #tpu.memory_space<vmem>>, vector<16x32xf32>,
    return
  }
  func.func @transform_0(%arg0: i32) -> (i32, i32) {
    %c0_i32 = arith.constant 0 : i32
    %c0_i32_0 = arith.constant 0 : i32
    return %arg0, %c0_i32 : i32, i32
  }
  func.func @transform_1(%arg0: i32) -> (i32, i32) {
    %c0_i32 = arith.constant 0 : i32
    %c0_i32_0 = arith.constant 0 : i32
    return %arg0, %c0_i32 : i32, i32
  }
  func.func @transform_2(%arg0: i32) -> (i32, i32) {
    %c0_i32 = arith.constant 0 : i32
    %c0_i32_0 = arith.constant 0 : i32
    %c0_i32_1 = arith.constant 0 : i32
    return %c0_i32, %c0_i32_0 : i32, i32
  }
  func.func @transform_3(%arg0: i32) -> (i32, i32) {
    %c0_i32 = arith.constant 0 : i32
    %c0_i32_0 = arith.constant 0 : i32
    %c0_i32_1 = arith.constant 0 : i32
    return %c0_i32, %c0_i32_0 : i32, i32
  }
  func.func @transform_4(%arg0: i32) -> (i32, i32) {
    %c0_i32 = arith.constant 0 : i32
    %c0_i32_0 = arith.constant 0 : i32
    %c0_i32_1 = arith.constant 0 : i32
    return %c0_i32, %c0_i32_0 : i32, i32
  }
  func.func @transform_5(%arg0: i32) -> (i32, i32) {
    %c0_i32 = arith.constant 0 : i32
    %c0_i32_0 = arith.constant 0 : i32
    %c0_i32_1 = arith.constant 0 : i32
    return %c0_i32, %c0_i32_0 : i32, i32
  }
  func.func @transform_6(%arg0: i32) -> (i32, i32) {
    %c0_i32 = arith.constant 0 : i32
    %c0_i32_0 = arith.constant 0 : i32
    return %arg0, %c0_i32 : i32, i32
  }
}

module attributes {stable_mosaic.version = 11 : i64} {
  func.func @_ln_kernel(%arg0: i32, %arg1: memref<16x32xf32, #tpu.memory_space<vmem>>, %arg2: memref<1x32xf32, #tpu.memory_space<vmem>>, %arg3: memref<1x32xf32, #tpu.memory_space<vmem>>, %arg4: memref<16x32xf32, #tpu.memory_space<vmem>>) attributes {dimension_semantics = [#tpu.dimension_semantics<parallel>], iteration_bounds = array<i64: 1>, scalar_prefetch = 0 : i64, scratch_operands = 0 : i64, tpu.core_type = #tpu.core_type<tc>, window_params = [{transform_indices = @transform_0, window_bounds = array<i64: 16, 32>}, {pipeline_mode = #tpu.pipeline_mode<synchronous>, transform_indices = @transform_1, window_bounds = array<i64: 1, 32>}, {pipeline_mode = #tpu.pipeline_mode<synchronous>, transform_indices = @transform_2, window_bounds = array<i64: 1, 32>}, {transform_indices = @transform_3, window_bounds = array<i64: 16, 32>}]} {
    %c0 = arith.constant 0 : index
    %c0_0 = arith.constant 0 : index
    %0 = vector.load %arg1[%c0, %c0_0] : memref<16x32xf32, #tpu.memory_space<vmem>>, vector<16x32xf32>
    %cst = arith.constant dense<0.000000e+00> : vector<16xf32>
    %1 = vector.multi_reduction <add>, %0, %cst [1] : vector<16x32xf32> to vector<16xf32>
    %2 = vector.shape_cast %1 : vector<16xf32> to vector<16x1xf32>
    %cst_1 = arith.constant 3.200000e+01 : f32
    %3 = vector.broadcast %cst_1 : f32 to vector<16x1xf32>
    %4 = arith.divf %2, %3 : vector<16x1xf32>
    %5 = vector.broadcast %4 : vector<16x1xf32> to vector<16x32xf32>
    %6 = arith.subf %0, %5 : vector<16x32xf32>
    %7 = arith.mulf %6, %6 : vector<16x32xf32>
    %cst_2 = arith.constant dense<0.000000e+00> : vector<16xf32>
    %8 = vector.multi_reduction <add>, %7, %cst_2 [1] : vector<16x32xf32> to vector<16xf32>
    %9 = vector.shape_cast %8 : vector<16xf32> to vector<16x1xf32>
    %cst_3 = arith.constant 3.200000e+01 : f32
    %10 = vector.broadcast %cst_3 : f32 to vector<16x1xf32>
    %11 = arith.divf %9, %10 : vector<16x1xf32>
    %12 = vector.broadcast %4 : vector<16x1xf32> to vector<16x32xf32>
    %13 = arith.subf %0, %12 : vector<16x32xf32>
    %cst_4 = arith.constant 9.99999974E-6 : f32
    %14 = vector.broadcast %cst_4 : f32 to vector<16x1xf32>
    %15 = arith.addf %11, %14 : vector<16x1xf32>
    %16 = math.rsqrt %15 : vector<16x1xf32>
    %17 = vector.broadcast %16 : vector<16x1xf32> to vector<16x32xf32>
    %18 = arith.mulf %13, %17 : vector<16x32xf32>
    %c0_5 = arith.constant 0 : index
    %c0_6 = arith.constant 0 : index
    %19 = vector.load %arg2[%c0_5, %c0_6] : memref<1x32xf32, #tpu.memory_space<vmem>>, vector<1x32xf32>
    %20 = vector.broadcast %19 : vector<1x32xf32> to vector<16x32xf32>
    %21 = arith.mulf %18, %20 : vector<16x32xf32>
    %c0_7 = arith.constant 0 : index
    %c0_8 = arith.constant 0 : index
    %22 = vector.load %arg3[%c0_7, %c0_8] : memref<1x32xf32, #tpu.memory_space<vmem>>, vector<1x32xf32>
    %23 = vector.broadcast %22 : vector<1x32xf32> to vector<16x32xf32>
    %24 = arith.addf %21, %23 : vector<16x32xf32>
    %c0_9 = arith.constant 0 : index
    %c0_10 = arith.constant 0 : index
    %25 = vector.load %arg4[%c0_9, %c0_10] : memref<16x32xf32, #tpu.memory_space<vmem>>, vector<16x32xf32>
    tpu.vector_store %arg4[%c0_9, %c0_10], %24 {strides = array<i32>} : memref<16x32xf32, #tpu.memory_space<vmem>>, vector<16x32xf32>,
    return
  }
  func.func @transform_0(%arg0: i32) -> (i32, i32) {
    %c0_i32 = arith.constant 0 : i32
    %c0_i32_0 = arith.constant 0 : i32
    return %arg0, %c0_i32 : i32, i32
  }
  func.func @transform_1(%arg0: i32) -> (i32, i32) {
    %c0_i32 = arith.constant 0 : i32
    %c0_i32_0 = arith.constant 0 : i32
    %c0_i32_1 = arith.constant 0 : i32
    return %c0_i32, %c0_i32_0 : i32, i32
  }
  func.func @transform_2(%arg0: i32) -> (i32, i32) {
    %c0_i32 = arith.constant 0 : i32
    %c0_i32_0 = arith.constant 0 : i32
    %c0_i32_1 = arith.constant 0 : i32
    return %c0_i32, %c0_i32_0 : i32, i32
  }
  func.func @transform_3(%arg0: i32) -> (i32, i32) {
    %c0_i32 = arith.constant 0 : i32
    %c0_i32_0 = arith.constant 0 : i32
    return %arg0, %c0_i32 : i32, i32
  }
}

module attributes {stable_mosaic.version = 11 : i64} {
  func.func @_encoder_layer_kernel(%arg0: i32, %arg1: memref<1x8x32xf32, #tpu.memory_space<vmem>>, %arg2: memref<3x4x32x8xbf16, #tpu.memory_space<vmem>>, %arg3: memref<3x4x1x8xf32, #tpu.memory_space<vmem>>, %arg4: memref<4x8x32xbf16, #tpu.memory_space<vmem>>, %arg5: memref<1x32xf32, #tpu.memory_space<vmem>>, %arg6: memref<1x32xf32, #tpu.memory_space<vmem>>, %arg7: memref<1x32xf32, #tpu.memory_space<vmem>>, %arg8: memref<32x2048xbf16, #tpu.memory_space<vmem>>, %arg9: memref<1x2048xf32, #tpu.memory_space<vmem>>, %arg10: memref<2048x32xbf16, #tpu.memory_space<vmem>>, %arg11: memref<1x32xf32, #tpu.memory_space<vmem>>, %arg12: memref<1x32xf32, #tpu.memory_space<vmem>>, %arg13: memref<1x32xf32, #tpu.memory_space<vmem>>, %arg14: memref<1x8x32xf32, #tpu.memory_space<vmem>>) attributes {dimension_semantics = [#tpu.dimension_semantics<parallel>], iteration_bounds = array<i64: 2>, scalar_prefetch = 0 : i64, scratch_operands = 0 : i64, tpu.core_type = #tpu.core_type<tc>, window_params = [{transform_indices = @transform_0, window_bounds = array<i64: 1, 8, 32>}, {pipeline_mode = #tpu.pipeline_mode<synchronous>, transform_indices = @transform_1, window_bounds = array<i64: 3, 4, 32, 8>}, {pipeline_mode = #tpu.pipeline_mode<synchronous>, transform_indices = @transform_2, window_bounds = array<i64: 3, 4, 1, 8>}, {pipeline_mode = #tpu.pipeline_mode<synchronous>, transform_indices = @transform_3, window_bounds = array<i64: 4, 8, 32>}, {pipeline_mode = #tpu.pipeline_mode<synchronous>, transform_indices = @transform_4, window_bounds = array<i64: 1, 32>}, {pipeline_mode = #tpu.pipeline_mode<synchronous>, transform_indices = @transform_5, window_bounds = array<i64: 1, 32>}, {pipeline_mode = #tpu.pipeline_mode<synchronous>, transform_indices = @transform_6, window_bounds = array<i64: 1, 32>}, {pipeline_mode = #tpu.pipeline_mode<synchronous>, transform_indices = @transform_7, window_bounds = array<i64: 32, 2048>}, {pipeline_mode = #tpu.pipeline_mode<synchronous>, transform_indices = @transform_8, window_bounds = array<i64: 1, 2048>}, {pipeline_mode = #tpu.pipeline_mode<synchronous>, transform_indices = @transform_9, window_bounds = array<i64: 2048, 32>}, {pipeline_mode = #tpu.pipeline_mode<synchronous>, transform_indices = @transform_10, window_bounds = array<i64: 1, 32>}, {pipeline_mode = #tpu.pipeline_mode<synchronous>, transform_indices = @transform_11, window_bounds = array<i64: 1, 32>}, {pipeline_mode = #tpu.pipeline_mode<synchronous>, transform_indices = @transform_12, window_bounds = array<i64: 1, 32>}, {transform_indices = @transform_13, window_bounds = array<i64: 1, 8, 32>}]} {
    %c0 = arith.constant 0 : index
    %c0_0 = arith.constant 0 : index
    %c0_1 = arith.constant 0 : index
    %0 = vector.load %arg1[%c0, %c0_0, %c0_1] : memref<1x8x32xf32, #tpu.memory_space<vmem>>, vector<1x8x32xf32>
    %1 = vector.shape_cast %0 : vector<1x8x32xf32> to vector<8x32xf32>
    %2 = arith.truncf %1 : vector<8x32xf32> to vector<8x32xbf16>
    %3 = arith.truncf %1 : vector<8x32xf32> to vector<8x32xbf16>
    %cst = arith.constant 0.000000e+00 : f32
    %4 = vector.broadcast %cst : f32 to vector<8x32xf32>
    %c0_2 = arith.constant 0 : index
    %c0_3 = arith.constant 0 : index
    %c0_4 = arith.constant 0 : index
    %c0_5 = arith.constant 0 : index
    %5 = vector.load %arg2[%c0_2, %c0_3, %c0_4, %c0_5] : memref<3x4x32x8xbf16, #tpu.memory_space<vmem>>, vector<1x1x32x8xbf16>
    %6 = vector.shape_cast %5 : vector<1x1x32x8xbf16> to vector<32x8xbf16>
    %cst_6 = arith.constant dense<0.000000e+00> : vector<8x8xf32>
    %7 = tpu.matmul %2, %6, %cst_6 {dimension_numbers = #tpu.dot_dimension_numbers<[1], [0], [0], [1], [0, 0, 1, 1], [], []>} : vector<8x32xbf16>, vector<32x8xbf16>, vector<8x8xf32> -> vector<8x8xf32>
    %c0_7 = arith.constant 0 : index
    %c0_8 = arith.constant 0 : index
    %c0_9 = arith.constant 0 : index
    %c0_10 = arith.constant 0 : index
    %8 = vector.load %arg3[%c0_7, %c0_8, %c0_9, %c0_10] : memref<3x4x1x8xf32, #tpu.memory_space<vmem>>, vector<1x1x1x8xf32>
    %9 = vector.shape_cast %8 : vector<1x1x1x8xf32> to vector<1x8xf32>
    %10 = vector.broadcast %9 : vector<1x8xf32> to vector<8x8xf32>
    %11 = arith.addf %7, %10 : vector<8x8xf32>
    %c1 = arith.constant 1 : index
    %c0_11 = arith.constant 0 : index
    %c0_12 = arith.constant 0 : index
    %c0_13 = arith.constant 0 : index
    %12 = vector.load %arg2[%c1, %c0_11, %c0_12, %c0_13] : memref<3x4x32x8xbf16, #tpu.memory_space<vmem>>, vector<1x1x32x8xbf16>
    %13 = vector.shape_cast %12 : vector<1x1x32x8xbf16> to vector<32x8xbf16>
    %cst_14 = arith.constant dense<0.000000e+00> : vector<8x8xf32>
    %14 = tpu.matmul %3, %13, %cst_14 {dimension_numbers = #tpu.dot_dimension_numbers<[1], [0], [0], [1], [0, 0, 1, 1], [], []>} : vector<8x32xbf16>, vector<32x8xbf16>, vector<8x8xf32> -> vector<8x8xf32>
    %c1_15 = arith.constant 1 : index
    %c0_16 = arith.constant 0 : index
    %c0_17 = arith.constant 0 : index
    %c0_18 = arith.constant 0 : index
    %15 = vector.load %arg3[%c1_15, %c0_16, %c0_17, %c0_18] : memref<3x4x1x8xf32, #tpu.memory_space<vmem>>, vector<1x1x1x8xf32>
    %16 = vector.shape_cast %15 : vector<1x1x1x8xf32> to vector<1x8xf32>
    %17 = vector.broadcast %16 : vector<1x8xf32> to vector<8x8xf32>
    %18 = arith.addf %14, %17 : vector<8x8xf32>
    %c2 = arith.constant 2 : index
    %c0_19 = arith.constant 0 : index
    %c0_20 = arith.constant 0 : index
    %c0_21 = arith.constant 0 : index
    %19 = vector.load %arg2[%c2, %c0_19, %c0_20, %c0_21] : memref<3x4x32x8xbf16, #tpu.memory_space<vmem>>, vector<1x1x32x8xbf16>
    %20 = vector.shape_cast %19 : vector<1x1x32x8xbf16> to vector<32x8xbf16>
    %cst_22 = arith.constant dense<0.000000e+00> : vector<8x8xf32>
    %21 = tpu.matmul %3, %20, %cst_22 {dimension_numbers = #tpu.dot_dimension_numbers<[1], [0], [0], [1], [0, 0, 1, 1], [], []>} : vector<8x32xbf16>, vector<32x8xbf16>, vector<8x8xf32> -> vector<8x8xf32>
    %c2_23 = arith.constant 2 : index
    %c0_24 = arith.constant 0 : index
    %c0_25 = arith.constant 0 : index
    %c0_26 = arith.constant 0 : index
    %22 = vector.load %arg3[%c2_23, %c0_24, %c0_25, %c0_26] : memref<3x4x1x8xf32, #tpu.memory_space<vmem>>, vector<1x1x1x8xf32>
    %23 = vector.shape_cast %22 : vector<1x1x1x8xf32> to vector<1x8xf32>
    %24 = vector.broadcast %23 : vector<1x8xf32> to vector<8x8xf32>
    %25 = arith.addf %21, %24 : vector<8x8xf32>
    %26 = arith.truncf %11 : vector<8x8xf32> to vector<8x8xbf16>
    %27 = arith.truncf %18 : vector<8x8xf32> to vector<8x8xbf16>
    %cst_27 = arith.constant dense<0.000000e+00> : vector<8x8xf32>
    %28 = tpu.matmul %26, %27, %cst_27 {dimension_numbers = #tpu.dot_dimension_numbers<[1], [1], [0], [0], [0, 0, 1, 0], [], []>} : vector<8x8xbf16>, vector<8x8xbf16>, vector<8x8xf32> -> vector<8x8xf32>
    %cst_28 = arith.constant 0.353553385 : f32
    %29 = vector.broadcast %cst_28 : f32 to vector<8x8xf32>
    %30 = arith.mulf %28, %29 : vector<8x8xf32>
    %cst_29 = arith.constant dense<0xFF800000> : vector<8xf32>
    %31 = vector.multi_reduction <maximumf>, %30, %cst_29 [1] : vector<8x8xf32> to vector<8xf32>
    %32 = vector.shape_cast %31 : vector<8xf32> to vector<8x1xf32>
    %33 = vector.broadcast %32 : vector<8x1xf32> to vector<8x8xf32>
    %34 = arith.subf %30, %33 : vector<8x8xf32>
    %35 = math.exp %34 : vector<8x8xf32>
    %cst_30 = arith.constant dense<0.000000e+00> : vector<8xf32>
    %36 = vector.multi_reduction <add>, %35, %cst_30 [1] : vector<8x8xf32> to vector<8xf32>
    %37 = vector.shape_cast %36 : vector<8xf32> to vector<8x1xf32>
    %38 = tpu.reciprocal %37 {approx = true} : vector<8x1xf32> -> vector<8x1xf32>
    %39 = vector.broadcast %38 : vector<8x1xf32> to vector<8x8xf32>
    %40 = arith.mulf %35, %39 : vector<8x8xf32>
    %41 = arith.truncf %40 : vector<8x8xf32> to vector<8x8xbf16>
    %42 = arith.truncf %25 : vector<8x8xf32> to vector<8x8xbf16>
    %cst_31 = arith.constant dense<0.000000e+00> : vector<8x8xf32>
    %43 = tpu.matmul %41, %42, %cst_31 {dimension_numbers = #tpu.dot_dimension_numbers<[1], [0], [0], [1], [0, 0, 1, 1], [], []>} : vector<8x8xbf16>, vector<8x8xbf16>, vector<8x8xf32> -> vector<8x8xf32>
    %44 = arith.truncf %43 : vector<8x8xf32> to vector<8x8xbf16>
    %c0_32 = arith.constant 0 : index
    %c0_33 = arith.constant 0 : index
    %c0_34 = arith.constant 0 : index
    %45 = vector.load %arg4[%c0_32, %c0_33, %c0_34] : memref<4x8x32xbf16, #tpu.memory_space<vmem>>, vector<1x8x32xbf16>
    %46 = vector.shape_cast %45 : vector<1x8x32xbf16> to vector<8x32xbf16>
    %cst_35 = arith.constant dense<0.000000e+00> : vector<8x32xf32>
    %47 = tpu.matmul %44, %46, %cst_35 {dimension_numbers = #tpu.dot_dimension_numbers<[1], [0], [0], [1], [0, 0, 1, 1], [], []>} : vector<8x8xbf16>, vector<8x32xbf16>, vector<8x32xf32> -> vector<8x32xf32>
    %48 = arith.addf %4, %47 : vector<8x32xf32>
    %c0_36 = arith.constant 0 : index
    %c1_37 = arith.constant 1 : index
    %c0_38 = arith.constant 0 : index
    %c0_39 = arith.constant 0 : index
    %49 = vector.load %arg2[%c0_36, %c1_37, %c0_38, %c0_39] : memref<3x4x32x8xbf16, #tpu.memory_space<vmem>>, vector<1x1x32x8xbf16>
    %50 = vector.shape_cast %49 : vector<1x1x32x8xbf16> to vector<32x8xbf16>
    %cst_40 = arith.constant dense<0.000000e+00> : vector<8x8xf32>
    %51 = tpu.matmul %2, %50, %cst_40 {dimension_numbers = #tpu.dot_dimension_numbers<[1], [0], [0], [1], [0, 0, 1, 1], [], []>} : vector<8x32xbf16>, vector<32x8xbf16>, vector<8x8xf32> -> vector<8x8xf32>
    %c0_41 = arith.constant 0 : index
    %c1_42 = arith.constant 1 : index
    %c0_43 = arith.constant 0 : index
    %c0_44 = arith.constant 0 : index
    %52 = vector.load %arg3[%c0_41, %c1_42, %c0_43, %c0_44] : memref<3x4x1x8xf32, #tpu.memory_space<vmem>>, vector<1x1x1x8xf32>
    %53 = vector.shape_cast %52 : vector<1x1x1x8xf32> to vector<1x8xf32>
    %54 = vector.broadcast %53 : vector<1x8xf32> to vector<8x8xf32>
    %55 = arith.addf %51, %54 : vector<8x8xf32>
    %c1_45 = arith.constant 1 : index
    %c1_46 = arith.constant 1 : index
    %c0_47 = arith.constant 0 : index
    %c0_48 = arith.constant 0 : index
    %56 = vector.load %arg2[%c1_45, %c1_46, %c0_47, %c0_48] : memref<3x4x32x8xbf16, #tpu.memory_space<vmem>>, vector<1x1x32x8xbf16>
    %57 = vector.shape_cast %56 : vector<1x1x32x8xbf16> to vector<32x8xbf16>
    %cst_49 = arith.constant dense<0.000000e+00> : vector<8x8xf32>
    %58 = tpu.matmul %3, %57, %cst_49 {dimension_numbers = #tpu.dot_dimension_numbers<[1], [0], [0], [1], [0, 0, 1, 1], [], []>} : vector<8x32xbf16>, vector<32x8xbf16>, vector<8x8xf32> -> vector<8x8xf32>
    %c1_50 = arith.constant 1 : index
    %c1_51 = arith.constant 1 : index
    %c0_52 = arith.constant 0 : index
    %c0_53 = arith.constant 0 : index
    %59 = vector.load %arg3[%c1_50, %c1_51, %c0_52, %c0_53] : memref<3x4x1x8xf32, #tpu.memory_space<vmem>>, vector<1x1x1x8xf32>
    %60 = vector.shape_cast %59 : vector<1x1x1x8xf32> to vector<1x8xf32>
    %61 = vector.broadcast %60 : vector<1x8xf32> to vector<8x8xf32>
    %62 = arith.addf %58, %61 : vector<8x8xf32>
    %c2_54 = arith.constant 2 : index
    %c1_55 = arith.constant 1 : index
    %c0_56 = arith.constant 0 : index
    %c0_57 = arith.constant 0 : index
    %63 = vector.load %arg2[%c2_54, %c1_55, %c0_56, %c0_57] : memref<3x4x32x8xbf16, #tpu.memory_space<vmem>>, vector<1x1x32x8xbf16>
    %64 = vector.shape_cast %63 : vector<1x1x32x8xbf16> to vector<32x8xbf16>
    %cst_58 = arith.constant dense<0.000000e+00> : vector<8x8xf32>
    %65 = tpu.matmul %3, %64, %cst_58 {dimension_numbers = #tpu.dot_dimension_numbers<[1], [0], [0], [1], [0, 0, 1, 1], [], []>} : vector<8x32xbf16>, vector<32x8xbf16>, vector<8x8xf32> -> vector<8x8xf32>
    %c2_59 = arith.constant 2 : index
    %c1_60 = arith.constant 1 : index
    %c0_61 = arith.constant 0 : index
    %c0_62 = arith.constant 0 : index
    %66 = vector.load %arg3[%c2_59, %c1_60, %c0_61, %c0_62] : memref<3x4x1x8xf32, #tpu.memory_space<vmem>>, vector<1x1x1x8xf32>
    %67 = vector.shape_cast %66 : vector<1x1x1x8xf32> to vector<1x8xf32>
    %68 = vector.broadcast %67 : vector<1x8xf32> to vector<8x8xf32>
    %69 = arith.addf %65, %68 : vector<8x8xf32>
    %70 = arith.truncf %55 : vector<8x8xf32> to vector<8x8xbf16>
    %71 = arith.truncf %62 : vector<8x8xf32> to vector<8x8xbf16>
    %cst_63 = arith.constant dense<0.000000e+00> : vector<8x8xf32>
    %72 = tpu.matmul %70, %71, %cst_63 {dimension_numbers = #tpu.dot_dimension_numbers<[1], [1], [0], [0], [0, 0, 1, 0], [], []>} : vector<8x8xbf16>, vector<8x8xbf16>, vector<8x8xf32> -> vector<8x8xf32>
    %cst_64 = arith.constant 0.353553385 : f32
    %73 = vector.broadcast %cst_64 : f32 to vector<8x8xf32>
    %74 = arith.mulf %72, %73 : vector<8x8xf32>
    %cst_65 = arith.constant dense<0xFF800000> : vector<8xf32>
    %75 = vector.multi_reduction <maximumf>, %74, %cst_65 [1] : vector<8x8xf32> to vector<8xf32>
    %76 = vector.shape_cast %75 : vector<8xf32> to vector<8x1xf32>
    %77 = vector.broadcast %76 : vector<8x1xf32> to vector<8x8xf32>
    %78 = arith.subf %74, %77 : vector<8x8xf32>
    %79 = math.exp %78 : vector<8x8xf32>
    %cst_66 = arith.constant dense<0.000000e+00> : vector<8xf32>
    %80 = vector.multi_reduction <add>, %79, %cst_66 [1] : vector<8x8xf32> to vector<8xf32>
    %81 = vector.shape_cast %80 : vector<8xf32> to vector<8x1xf32>
    %82 = tpu.reciprocal %81 {approx = true} : vector<8x1xf32> -> vector<8x1xf32>
    %83 = vector.broadcast %82 : vector<8x1xf32> to vector<8x8xf32>
    %84 = arith.mulf %79, %83 : vector<8x8xf32>
    %85 = arith.truncf %84 : vector<8x8xf32> to vector<8x8xbf16>
    %86 = arith.truncf %69 : vector<8x8xf32> to vector<8x8xbf16>
    %cst_67 = arith.constant dense<0.000000e+00> : vector<8x8xf32>
    %87 = tpu.matmul %85, %86, %cst_67 {dimension_numbers = #tpu.dot_dimension_numbers<[1], [0], [0], [1], [0, 0, 1, 1], [], []>} : vector<8x8xbf16>, vector<8x8xbf16>, vector<8x8xf32> -> vector<8x8xf32>
    %88 = arith.truncf %87 : vector<8x8xf32> to vector<8x8xbf16>
    %c1_68 = arith.constant 1 : index
    %c0_69 = arith.constant 0 : index
    %c0_70 = arith.constant 0 : index
    %89 = vector.load %arg4[%c1_68, %c0_69, %c0_70] : memref<4x8x32xbf16, #tpu.memory_space<vmem>>, vector<1x8x32xbf16>
    %90 = vector.shape_cast %89 : vector<1x8x32xbf16> to vector<8x32xbf16>
    %cst_71 = arith.constant dense<0.000000e+00> : vector<8x32xf32>
    %91 = tpu.matmul %88, %90, %cst_71 {dimension_numbers = #tpu.dot_dimension_numbers<[1], [0], [0], [1], [0, 0, 1, 1], [], []>} : vector<8x8xbf16>, vector<8x32xbf16>, vector<8x32xf32> -> vector<8x32xf32>
    %92 = arith.addf %48, %91 : vector<8x32xf32>
    %c0_72 = arith.constant 0 : index
    %c2_73 = arith.constant 2 : index
    %c0_74 = arith.constant 0 : index
    %c0_75 = arith.constant 0 : index
    %93 = vector.load %arg2[%c0_72, %c2_73, %c0_74, %c0_75] : memref<3x4x32x8xbf16, #tpu.memory_space<vmem>>, vector<1x1x32x8xbf16>
    %94 = vector.shape_cast %93 : vector<1x1x32x8xbf16> to vector<32x8xbf16>
    %cst_76 = arith.constant dense<0.000000e+00> : vector<8x8xf32>
    %95 = tpu.matmul %2, %94, %cst_76 {dimension_numbers = #tpu.dot_dimension_numbers<[1], [0], [0], [1], [0, 0, 1, 1], [], []>} : vector<8x32xbf16>, vector<32x8xbf16>, vector<8x8xf32> -> vector<8x8xf32>
    %c0_77 = arith.constant 0 : index
    %c2_78 = arith.constant 2 : index
    %c0_79 = arith.constant 0 : index
    %c0_80 = arith.constant 0 : index
    %96 = vector.load %arg3[%c0_77, %c2_78, %c0_79, %c0_80] : memref<3x4x1x8xf32, #tpu.memory_space<vmem>>, vector<1x1x1x8xf32>
    %97 = vector.shape_cast %96 : vector<1x1x1x8xf32> to vector<1x8xf32>
    %98 = vector.broadcast %97 : vector<1x8xf32> to vector<8x8xf32>
    %99 = arith.addf %95, %98 : vector<8x8xf32>
    %c1_81 = arith.constant 1 : index
    %c2_82 = arith.constant 2 : index
    %c0_83 = arith.constant 0 : index
    %c0_84 = arith.constant 0 : index
    %100 = vector.load %arg2[%c1_81, %c2_82, %c0_83, %c0_84] : memref<3x4x32x8xbf16, #tpu.memory_space<vmem>>, vector<1x1x32x8xbf16>
    %101 = vector.shape_cast %100 : vector<1x1x32x8xbf16> to vector<32x8xbf16>
    %cst_85 = arith.constant dense<0.000000e+00> : vector<8x8xf32>
    %102 = tpu.matmul %3, %101, %cst_85 {dimension_numbers = #tpu.dot_dimension_numbers<[1], [0], [0], [1], [0, 0, 1, 1], [], []>} : vector<8x32xbf16>, vector<32x8xbf16>, vector<8x8xf32> -> vector<8x8xf32>
    %c1_86 = arith.constant 1 : index
    %c2_87 = arith.constant 2 : index
    %c0_88 = arith.constant 0 : index
    %c0_89 = arith.constant 0 : index
    %103 = vector.load %arg3[%c1_86, %c2_87, %c0_88, %c0_89] : memref<3x4x1x8xf32, #tpu.memory_space<vmem>>, vector<1x1x1x8xf32>
    %104 = vector.shape_cast %103 : vector<1x1x1x8xf32> to vector<1x8xf32>
    %105 = vector.broadcast %104 : vector<1x8xf32> to vector<8x8xf32>
    %106 = arith.addf %102, %105 : vector<8x8xf32>
    %c2_90 = arith.constant 2 : index
    %c2_91 = arith.constant 2 : index
    %c0_92 = arith.constant 0 : index
    %c0_93 = arith.constant 0 : index
    %107 = vector.load %arg2[%c2_90, %c2_91, %c0_92, %c0_93] : memref<3x4x32x8xbf16, #tpu.memory_space<vmem>>, vector<1x1x32x8xbf16>
    %108 = vector.shape_cast %107 : vector<1x1x32x8xbf16> to vector<32x8xbf16>
    %cst_94 = arith.constant dense<0.000000e+00> : vector<8x8xf32>
    %109 = tpu.matmul %3, %108, %cst_94 {dimension_numbers = #tpu.dot_dimension_numbers<[1], [0], [0], [1], [0, 0, 1, 1], [], []>} : vector<8x32xbf16>, vector<32x8xbf16>, vector<8x8xf32> -> vector<8x8xf32>
    %c2_95 = arith.constant 2 : index
    %c2_96 = arith.constant 2 : index
    %c0_97 = arith.constant 0 : index
    %c0_98 = arith.constant 0 : index
    %110 = vector.load %arg3[%c2_95, %c2_96, %c0_97, %c0_98] : memref<3x4x1x8xf32, #tpu.memory_space<vmem>>, vector<1x1x1x8xf32>
    %111 = vector.shape_cast %110 : vector<1x1x1x8xf32> to vector<1x8xf32>
    %112 = vector.broadcast %111 : vector<1x8xf32> to vector<8x8xf32>
    %113 = arith.addf %109, %112 : vector<8x8xf32>
    %114 = arith.truncf %99 : vector<8x8xf32> to vector<8x8xbf16>
    %115 = arith.truncf %106 : vector<8x8xf32> to vector<8x8xbf16>
    %cst_99 = arith.constant dense<0.000000e+00> : vector<8x8xf32>
    %116 = tpu.matmul %114, %115, %cst_99 {dimension_numbers = #tpu.dot_dimension_numbers<[1], [1], [0], [0], [0, 0, 1, 0], [], []>} : vector<8x8xbf16>, vector<8x8xbf16>, vector<8x8xf32> -> vector<8x8xf32>
    %cst_100 = arith.constant 0.353553385 : f32
    %117 = vector.broadcast %cst_100 : f32 to vector<8x8xf32>
    %118 = arith.mulf %116, %117 : vector<8x8xf32>
    %cst_101 = arith.constant dense<0xFF800000> : vector<8xf32>
    %119 = vector.multi_reduction <maximumf>, %118, %cst_101 [1] : vector<8x8xf32> to vector<8xf32>
    %120 = vector.shape_cast %119 : vector<8xf32> to vector<8x1xf32>
    %121 = vector.broadcast %120 : vector<8x1xf32> to vector<8x8xf32>
    %122 = arith.subf %118, %121 : vector<8x8xf32>
    %123 = math.exp %122 : vector<8x8xf32>
    %cst_102 = arith.constant dense<0.000000e+00> : vector<8xf32>
    %124 = vector.multi_reduction <add>, %123, %cst_102 [1] : vector<8x8xf32> to vector<8xf32>
    %125 = vector.shape_cast %124 : vector<8xf32> to vector<8x1xf32>
    %126 = tpu.reciprocal %125 {approx = true} : vector<8x1xf32> -> vector<8x1xf32>
    %127 = vector.broadcast %126 : vector<8x1xf32> to vector<8x8xf32>
    %128 = arith.mulf %123, %127 : vector<8x8xf32>
    %129 = arith.truncf %128 : vector<8x8xf32> to vector<8x8xbf16>
    %130 = arith.truncf %113 : vector<8x8xf32> to vector<8x8xbf16>
    %cst_103 = arith.constant dense<0.000000e+00> : vector<8x8xf32>
    %131 = tpu.matmul %129, %130, %cst_103 {dimension_numbers = #tpu.dot_dimension_numbers<[1], [0], [0], [1], [0, 0, 1, 1], [], []>} : vector<8x8xbf16>, vector<8x8xbf16>, vector<8x8xf32> -> vector<8x8xf32>
    %132 = arith.truncf %131 : vector<8x8xf32> to vector<8x8xbf16>
    %c2_104 = arith.constant 2 : index
    %c0_105 = arith.constant 0 : index
    %c0_106 = arith.constant 0 : index
    %133 = vector.load %arg4[%c2_104, %c0_105, %c0_106] : memref<4x8x32xbf16, #tpu.memory_space<vmem>>, vector<1x8x32xbf16>
    %134 = vector.shape_cast %133 : vector<1x8x32xbf16> to vector<8x32xbf16>
    %cst_107 = arith.constant dense<0.000000e+00> : vector<8x32xf32>
    %135 = tpu.matmul %132, %134, %cst_107 {dimension_numbers = #tpu.dot_dimension_numbers<[1], [0], [0], [1], [0, 0, 1, 1], [], []>} : vector<8x8xbf16>, vector<8x32xbf16>, vector<8x32xf32> -> vector<8x32xf32>
    %136 = arith.addf %92, %135 : vector<8x32xf32>
    %c0_108 = arith.constant 0 : index
    %c3 = arith.constant 3 : index
    %c0_109 = arith.constant 0 : index
    %c0_110 = arith.constant 0 : index
    %137 = vector.load %arg2[%c0_108, %c3, %c0_109, %c0_110] : memref<3x4x32x8xbf16, #tpu.memory_space<vmem>>, vector<1x1x32x8xbf16>
    %138 = vector.shape_cast %137 : vector<1x1x32x8xbf16> to vector<32x8xbf16>
    %cst_111 = arith.constant dense<0.000000e+00> : vector<8x8xf32>
    %139 = tpu.matmul %2, %138, %cst_111 {dimension_numbers = #tpu.dot_dimension_numbers<[1], [0], [0], [1], [0, 0, 1, 1], [], []>} : vector<8x32xbf16>, vector<32x8xbf16>, vector<8x8xf32> -> vector<8x8xf32>
    %c0_112 = arith.constant 0 : index
    %c3_113 = arith.constant 3 : index
    %c0_114 = arith.constant 0 : index
    %c0_115 = arith.constant 0 : index
    %140 = vector.load %arg3[%c0_112, %c3_113, %c0_114, %c0_115] : memref<3x4x1x8xf32, #tpu.memory_space<vmem>>, vector<1x1x1x8xf32>
    %141 = vector.shape_cast %140 : vector<1x1x1x8xf32> to vector<1x8xf32>
    %142 = vector.broadcast %141 : vector<1x8xf32> to vector<8x8xf32>
    %143 = arith.addf %139, %142 : vector<8x8xf32>
    %c1_116 = arith.constant 1 : index
    %c3_117 = arith.constant 3 : index
    %c0_118 = arith.constant 0 : index
    %c0_119 = arith.constant 0 : index
    %144 = vector.load %arg2[%c1_116, %c3_117, %c0_118, %c0_119] : memref<3x4x32x8xbf16, #tpu.memory_space<vmem>>, vector<1x1x32x8xbf16>
    %145 = vector.shape_cast %144 : vector<1x1x32x8xbf16> to vector<32x8xbf16>
    %cst_120 = arith.constant dense<0.000000e+00> : vector<8x8xf32>
    %146 = tpu.matmul %3, %145, %cst_120 {dimension_numbers = #tpu.dot_dimension_numbers<[1], [0], [0], [1], [0, 0, 1, 1], [], []>} : vector<8x32xbf16>, vector<32x8xbf16>, vector<8x8xf32> -> vector<8x8xf32>
    %c1_121 = arith.constant 1 : index
    %c3_122 = arith.constant 3 : index
    %c0_123 = arith.constant 0 : index
    %c0_124 = arith.constant 0 : index
    %147 = vector.load %arg3[%c1_121, %c3_122, %c0_123, %c0_124] : memref<3x4x1x8xf32, #tpu.memory_space<vmem>>, vector<1x1x1x8xf32>
    %148 = vector.shape_cast %147 : vector<1x1x1x8xf32> to vector<1x8xf32>
    %149 = vector.broadcast %148 : vector<1x8xf32> to vector<8x8xf32>
    %150 = arith.addf %146, %149 : vector<8x8xf32>
    %c2_125 = arith.constant 2 : index
    %c3_126 = arith.constant 3 : index
    %c0_127 = arith.constant 0 : index
    %c0_128 = arith.constant 0 : index
    %151 = vector.load %arg2[%c2_125, %c3_126, %c0_127, %c0_128] : memref<3x4x32x8xbf16, #tpu.memory_space<vmem>>, vector<1x1x32x8xbf16>
    %152 = vector.shape_cast %151 : vector<1x1x32x8xbf16> to vector<32x8xbf16>
    %cst_129 = arith.constant dense<0.000000e+00> : vector<8x8xf32>
    %153 = tpu.matmul %3, %152, %cst_129 {dimension_numbers = #tpu.dot_dimension_numbers<[1], [0], [0], [1], [0, 0, 1, 1], [], []>} : vector<8x32xbf16>, vector<32x8xbf16>, vector<8x8xf32> -> vector<8x8xf32>
    %c2_130 = arith.constant 2 : index
    %c3_131 = arith.constant 3 : index
    %c0_132 = arith.constant 0 : index
    %c0_133 = arith.constant 0 : index
    %154 = vector.load %arg3[%c2_130, %c3_131, %c0_132, %c0_133] : memref<3x4x1x8xf32, #tpu.memory_space<vmem>>, vector<1x1x1x8xf32>
    %155 = vector.shape_cast %154 : vector<1x1x1x8xf32> to vector<1x8xf32>
    %156 = vector.broadcast %155 : vector<1x8xf32> to vector<8x8xf32>
    %157 = arith.addf %153, %156 : vector<8x8xf32>
    %158 = arith.truncf %143 : vector<8x8xf32> to vector<8x8xbf16>
    %159 = arith.truncf %150 : vector<8x8xf32> to vector<8x8xbf16>
    %cst_134 = arith.constant dense<0.000000e+00> : vector<8x8xf32>
    %160 = tpu.matmul %158, %159, %cst_134 {dimension_numbers = #tpu.dot_dimension_numbers<[1], [1], [0], [0], [0, 0, 1, 0], [], []>} : vector<8x8xbf16>, vector<8x8xbf16>, vector<8x8xf32> -> vector<8x8xf32>
    %cst_135 = arith.constant 0.353553385 : f32
    %161 = vector.broadcast %cst_135 : f32 to vector<8x8xf32>
    %162 = arith.mulf %160, %161 : vector<8x8xf32>
    %cst_136 = arith.constant dense<0xFF800000> : vector<8xf32>
    %163 = vector.multi_reduction <maximumf>, %162, %cst_136 [1] : vector<8x8xf32> to vector<8xf32>
    %164 = vector.shape_cast %163 : vector<8xf32> to vector<8x1xf32>
    %165 = vector.broadcast %164 : vector<8x1xf32> to vector<8x8xf32>
    %166 = arith.subf %162, %165 : vector<8x8xf32>
    %167 = math.exp %166 : vector<8x8xf32>
    %cst_137 = arith.constant dense<0.000000e+00> : vector<8xf32>
    %168 = vector.multi_reduction <add>, %167, %cst_137 [1] : vector<8x8xf32> to vector<8xf32>
    %169 = vector.shape_cast %168 : vector<8xf32> to vector<8x1xf32>
    %170 = tpu.reciprocal %169 {approx = true} : vector<8x1xf32> -> vector<8x1xf32>
    %171 = vector.broadcast %170 : vector<8x1xf32> to vector<8x8xf32>
    %172 = arith.mulf %167, %171 : vector<8x8xf32>
    %173 = arith.truncf %172 : vector<8x8xf32> to vector<8x8xbf16>
    %174 = arith.truncf %157 : vector<8x8xf32> to vector<8x8xbf16>
    %cst_138 = arith.constant dense<0.000000e+00> : vector<8x8xf32>
    %175 = tpu.matmul %173, %174, %cst_138 {dimension_numbers = #tpu.dot_dimension_numbers<[1], [0], [0], [1], [0, 0, 1, 1], [], []>} : vector<8x8xbf16>, vector<8x8xbf16>, vector<8x8xf32> -> vector<8x8xf32>
    %176 = arith.truncf %175 : vector<8x8xf32> to vector<8x8xbf16>
    %c3_139 = arith.constant 3 : index
    %c0_140 = arith.constant 0 : index
    %c0_141 = arith.constant 0 : index
    %177 = vector.load %arg4[%c3_139, %c0_140, %c0_141] : memref<4x8x32xbf16, #tpu.memory_space<vmem>>, vector<1x8x32xbf16>
    %178 = vector.shape_cast %177 : vector<1x8x32xbf16> to vector<8x32xbf16>
    %cst_142 = arith.constant dense<0.000000e+00> : vector<8x32xf32>
    %179 = tpu.matmul %176, %178, %cst_142 {dimension_numbers = #tpu.dot_dimension_numbers<[1], [0], [0], [1], [0, 0, 1, 1], [], []>} : vector<8x8xbf16>, vector<8x32xbf16>, vector<8x32xf32> -> vector<8x32xf32>
    %180 = arith.addf %136, %179 : vector<8x32xf32>
    %c0_143 = arith.constant 0 : index
    %c0_144 = arith.constant 0 : index
    %181 = vector.load %arg5[%c0_143, %c0_144] : memref<1x32xf32, #tpu.memory_space<vmem>>, vector<1x32xf32>
    %182 = vector.broadcast %181 : vector<1x32xf32> to vector<8x32xf32>
    %183 = arith.addf %180, %182 : vector<8x32xf32>
    %184 = arith.addf %183, %1 : vector<8x32xf32>
    %cst_145 = arith.constant dense<0.000000e+00> : vector<8xf32>
    %185 = vector.multi_reduction <add>, %184, %cst_145 [1] : vector<8x32xf32> to vector<8xf32>
    %186 = vector.shape_cast %185 : vector<8xf32> to vector<8x1xf32>
    %cst_146 = arith.constant 3.200000e+01 : f32
    %187 = vector.broadcast %cst_146 : f32 to vector<8x1xf32>
    %188 = arith.divf %186, %187 : vector<8x1xf32>
    %189 = vector.broadcast %188 : vector<8x1xf32> to vector<8x32xf32>
    %190 = arith.subf %184, %189 : vector<8x32xf32>
    %191 = arith.mulf %190, %190 : vector<8x32xf32>
    %cst_147 = arith.constant dense<0.000000e+00> : vector<8xf32>
    %192 = vector.multi_reduction <add>, %191, %cst_147 [1] : vector<8x32xf32> to vector<8xf32>
    %193 = vector.shape_cast %192 : vector<8xf32> to vector<8x1xf32>
    %cst_148 = arith.constant 3.200000e+01 : f32
    %194 = vector.broadcast %cst_148 : f32 to vector<8x1xf32>
    %195 = arith.divf %193, %194 : vector<8x1xf32>
    %196 = vector.broadcast %188 : vector<8x1xf32> to vector<8x32xf32>
    %197 = arith.subf %184, %196 : vector<8x32xf32>
    %cst_149 = arith.constant 9.99999974E-6 : f32
    %198 = vector.broadcast %cst_149 : f32 to vector<8x1xf32>
    %199 = arith.addf %195, %198 : vector<8x1xf32>
    %200 = math.rsqrt %199 : vector<8x1xf32>
    %201 = vector.broadcast %200 : vector<8x1xf32> to vector<8x32xf32>
    %202 = arith.mulf %197, %201 : vector<8x32xf32>
    %c0_150 = arith.constant 0 : index
    %c0_151 = arith.constant 0 : index
    %203 = vector.load %arg6[%c0_150, %c0_151] : memref<1x32xf32, #tpu.memory_space<vmem>>, vector<1x32xf32>
    %204 = vector.broadcast %203 : vector<1x32xf32> to vector<8x32xf32>
    %205 = arith.mulf %202, %204 : vector<8x32xf32>
    %c0_152 = arith.constant 0 : index
    %c0_153 = arith.constant 0 : index
    %206 = vector.load %arg7[%c0_152, %c0_153] : memref<1x32xf32, #tpu.memory_space<vmem>>, vector<1x32xf32>
    %207 = vector.broadcast %206 : vector<1x32xf32> to vector<8x32xf32>
    %208 = arith.addf %205, %207 : vector<8x32xf32>
    %209 = arith.truncf %208 : vector<8x32xf32> to vector<8x32xbf16>
    %c0_154 = arith.constant 0 : index
    %c0_155 = arith.constant 0 : index
    %210 = vector.load %arg8[%c0_154, %c0_155] : memref<32x2048xbf16, #tpu.memory_space<vmem>>, vector<32x2048xbf16>
    %cst_156 = arith.constant dense<0.000000e+00> : vector<8x2048xf32>
    %211 = tpu.matmul %209, %210, %cst_156 {dimension_numbers = #tpu.dot_dimension_numbers<[1], [0], [0], [1], [0, 0, 1, 1], [], []>} : vector<8x32xbf16>, vector<32x2048xbf16>, vector<8x2048xf32> -> vector<8x2048xf32>
    %c0_157 = arith.constant 0 : index
    %c0_158 = arith.constant 0 : index
    %212 = vector.load %arg9[%c0_157, %c0_158] : memref<1x2048xf32, #tpu.memory_space<vmem>>, vector<1x2048xf32>
    %213 = vector.broadcast %212 : vector<1x2048xf32> to vector<8x2048xf32>
    %214 = arith.addf %211, %213 : vector<8x2048xf32>
    %cst_159 = arith.constant 0.000000e+00 : f32
    %215 = vector.broadcast %cst_159 : f32 to vector<8x2048xf32>
    %216 = arith.maximumf %214, %215 : vector<8x2048xf32>
    %217 = arith.truncf %216 : vector<8x2048xf32> to vector<8x2048xbf16>
    %c0_160 = arith.constant 0 : index
    %c0_161 = arith.constant 0 : index
    %218 = vector.load %arg10[%c0_160, %c0_161] : memref<2048x32xbf16, #tpu.memory_space<vmem>>, vector<2048x32xbf16>
    %cst_162 = arith.constant dense<0.000000e+00> : vector<8x32xf32>
    %219 = tpu.matmul %217, %218, %cst_162 {dimension_numbers = #tpu.dot_dimension_numbers<[1], [0], [0], [1], [0, 0, 1, 1], [], []>} : vector<8x2048xbf16>, vector<2048x32xbf16>, vector<8x32xf32> -> vector<8x32xf32>
    %c0_163 = arith.constant 0 : index
    %c0_164 = arith.constant 0 : index
    %220 = vector.load %arg11[%c0_163, %c0_164] : memref<1x32xf32, #tpu.memory_space<vmem>>, vector<1x32xf32>
    %221 = vector.broadcast %220 : vector<1x32xf32> to vector<8x32xf32>
    %222 = arith.addf %219, %221 : vector<8x32xf32>
    %223 = arith.addf %222, %208 : vector<8x32xf32>
    %cst_165 = arith.constant dense<0.000000e+00> : vector<8xf32>
    %224 = vector.multi_reduction <add>, %223, %cst_165 [1] : vector<8x32xf32> to vector<8xf32>
    %225 = vector.shape_cast %224 : vector<8xf32> to vector<8x1xf32>
    %cst_166 = arith.constant 3.200000e+01 : f32
    %226 = vector.broadcast %cst_166 : f32 to vector<8x1xf32>
    %227 = arith.divf %225, %226 : vector<8x1xf32>
    %228 = vector.broadcast %227 : vector<8x1xf32> to vector<8x32xf32>
    %229 = arith.subf %223, %228 : vector<8x32xf32>
    %230 = arith.mulf %229, %229 : vector<8x32xf32>
    %cst_167 = arith.constant dense<0.000000e+00> : vector<8xf32>
    %231 = vector.multi_reduction <add>, %230, %cst_167 [1] : vector<8x32xf32> to vector<8xf32>
    %232 = vector.shape_cast %231 : vector<8xf32> to vector<8x1xf32>
    %cst_168 = arith.constant 3.200000e+01 : f32
    %233 = vector.broadcast %cst_168 : f32 to vector<8x1xf32>
    %234 = arith.divf %232, %233 : vector<8x1xf32>
    %235 = vector.broadcast %227 : vector<8x1xf32> to vector<8x32xf32>
    %236 = arith.subf %223, %235 : vector<8x32xf32>
    %cst_169 = arith.constant 9.99999974E-6 : f32
    %237 = vector.broadcast %cst_169 : f32 to vector<8x1xf32>
    %238 = arith.addf %234, %237 : vector<8x1xf32>
    %239 = math.rsqrt %238 : vector<8x1xf32>
    %240 = vector.broadcast %239 : vector<8x1xf32> to vector<8x32xf32>
    %241 = arith.mulf %236, %240 : vector<8x32xf32>
    %c0_170 = arith.constant 0 : index
    %c0_171 = arith.constant 0 : index
    %242 = vector.load %arg12[%c0_170, %c0_171] : memref<1x32xf32, #tpu.memory_space<vmem>>, vector<1x32xf32>
    %243 = vector.broadcast %242 : vector<1x32xf32> to vector<8x32xf32>
    %244 = arith.mulf %241, %243 : vector<8x32xf32>
    %c0_172 = arith.constant 0 : index
    %c0_173 = arith.constant 0 : index
    %245 = vector.load %arg13[%c0_172, %c0_173] : memref<1x32xf32, #tpu.memory_space<vmem>>, vector<1x32xf32>
    %246 = vector.broadcast %245 : vector<1x32xf32> to vector<8x32xf32>
    %247 = arith.addf %244, %246 : vector<8x32xf32>
    %c0_174 = arith.constant 0 : index
    %c0_175 = arith.constant 0 : index
    %c0_176 = arith.constant 0 : index
    %248 = vector.load %arg14[%c0_174, %c0_175, %c0_176] : memref<1x8x32xf32, #tpu.memory_space<vmem>>, vector<1x8x32xf32>
    %249 = vector.shape_cast %248 : vector<1x8x32xf32> to vector<8x32xf32>
    %250 = vector.shape_cast %247 : vector<8x32xf32> to vector<1x8x32xf32>
    tpu.vector_store %arg14[%c0_174, %c0_175, %c0_176], %250 {strides = array<i32>} : memref<1x8x32xf32, #tpu.memory_space<vmem>>, vector<1x8x32xf32>,
    return
  }
  func.func @transform_0(%arg0: i32) -> (i32, i32, i32) {
    %c0_i32 = arith.constant 0 : i32
    %c0_i32_0 = arith.constant 0 : i32
    %c0_i32_1 = arith.constant 0 : i32
    return %arg0, %c0_i32, %c0_i32_0 : i32, i32, i32
  }
  func.func @transform_1(%arg0: i32) -> (i32, i32, i32, i32) {
    %c0_i32 = arith.constant 0 : i32
    %c0_i32_0 = arith.constant 0 : i32
    %c0_i32_1 = arith.constant 0 : i32
    %c0_i32_2 = arith.constant 0 : i32
    %c0_i32_3 = arith.constant 0 : i32
    return %c0_i32, %c0_i32_0, %c0_i32_1, %c0_i32_2 : i32, i32, i32, i32
  }
  func.func @transform_2(%arg0: i32) -> (i32, i32, i32, i32) {
    %c0_i32 = arith.constant 0 : i32
    %c0_i32_0 = arith.constant 0 : i32
    %c0_i32_1 = arith.constant 0 : i32
    %c0_i32_2 = arith.constant 0 : i32
    %c0_i32_3 = arith.constant 0 : i32
    return %c0_i32, %c0_i32_0, %c0_i32_1, %c0_i32_2 : i32, i32, i32, i32
  }
  func.func @transform_3(%arg0: i32) -> (i32, i32, i32) {
    %c0_i32 = arith.constant 0 : i32
    %c0_i32_0 = arith.constant 0 : i32
    %c0_i32_1 = arith.constant 0 : i32
    %c0_i32_2 = arith.constant 0 : i32
    return %c0_i32, %c0_i32_0, %c0_i32_1 : i32, i32, i32
  }
  func.func @transform_4(%arg0: i32) -> (i32, i32) {
    %c0_i32 = arith.constant 0 : i32
    %c0_i32_0 = arith.constant 0 : i32
    %c0_i32_1 = arith.constant 0 : i32
    return %c0_i32, %c0_i32_0 : i32, i32
  }
  func.func @transform_5(%arg0: i32) -> (i32, i32) {
    %c0_i32 = arith.constant 0 : i32
    %c0_i32_0 = arith.constant 0 : i32
    %c0_i32_1 = arith.constant 0 : i32
    return %c0_i32, %c0_i32_0 : i32, i32
  }
  func.func @transform_6(%arg0: i32) -> (i32, i32) {
    %c0_i32 = arith.constant 0 : i32
    %c0_i32_0 = arith.constant 0 : i32
    %c0_i32_1 = arith.constant 0 : i32
    return %c0_i32, %c0_i32_0 : i32, i32
  }
  func.func @transform_7(%arg0: i32) -> (i32, i32) {
    %c0_i32 = arith.constant 0 : i32
    %c0_i32_0 = arith.constant 0 : i32
    %c0_i32_1 = arith.constant 0 : i32
    return %c0_i32, %c0_i32_0 : i32, i32
  }
  func.func @transform_8(%arg0: i32) -> (i32, i32) {
    %c0_i32 = arith.constant 0 : i32
    %c0_i32_0 = arith.constant 0 : i32
    %c0_i32_1 = arith.constant 0 : i32
    return %c0_i32, %c0_i32_0 : i32, i32
  }
  func.func @transform_9(%arg0: i32) -> (i32, i32) {
    %c0_i32 = arith.constant 0 : i32
    %c0_i32_0 = arith.constant 0 : i32
    %c0_i32_1 = arith.constant 0 : i32
    return %c0_i32, %c0_i32_0 : i32, i32
  }
  func.func @transform_10(%arg0: i32) -> (i32, i32) {
    %c0_i32 = arith.constant 0 : i32
    %c0_i32_0 = arith.constant 0 : i32
    %c0_i32_1 = arith.constant 0 : i32
    return %c0_i32, %c0_i32_0 : i32, i32
  }
  func.func @transform_11(%arg0: i32) -> (i32, i32) {
    %c0_i32 = arith.constant 0 : i32
    %c0_i32_0 = arith.constant 0 : i32
    %c0_i32_1 = arith.constant 0 : i32
    return %c0_i32, %c0_i32_0 : i32, i32
  }
  func.func @transform_12(%arg0: i32) -> (i32, i32) {
    %c0_i32 = arith.constant 0 : i32
    %c0_i32_0 = arith.constant 0 : i32
    %c0_i32_1 = arith.constant 0 : i32
    return %c0_i32, %c0_i32_0 : i32, i32
  }
  func.func @transform_13(%arg0: i32) -> (i32, i32, i32) {
    %c0_i32 = arith.constant 0 : i32
    %c0_i32_0 = arith.constant 0 : i32
    %c0_i32_1 = arith.constant 0 : i32
    return %arg0, %c0_i32, %c0_i32_0 : i32, i32, i32
  }
}

module attributes {stable_mosaic.version = 11 : i64} {
  func.func @_decoder_layer_kernel(%arg0: i32, %arg1: memref<1x8x32xf32, #tpu.memory_space<vmem>>, %arg2: memref<1x8x32xf32, #tpu.memory_space<vmem>>, %arg3: memref<3x4x32x8xbf16, #tpu.memory_space<vmem>>, %arg4: memref<3x4x1x8xf32, #tpu.memory_space<vmem>>, %arg5: memref<4x8x32xbf16, #tpu.memory_space<vmem>>, %arg6: memref<1x32xf32, #tpu.memory_space<vmem>>, %arg7: memref<1x32xf32, #tpu.memory_space<vmem>>, %arg8: memref<1x32xf32, #tpu.memory_space<vmem>>, %arg9: memref<3x4x32x8xbf16, #tpu.memory_space<vmem>>, %arg10: memref<3x4x1x8xf32, #tpu.memory_space<vmem>>, %arg11: memref<4x8x32xbf16, #tpu.memory_space<vmem>>, %arg12: memref<1x32xf32, #tpu.memory_space<vmem>>, %arg13: memref<1x32xf32, #tpu.memory_space<vmem>>, %arg14: memref<1x32xf32, #tpu.memory_space<vmem>>, %arg15: memref<32x2048xbf16, #tpu.memory_space<vmem>>, %arg16: memref<1x2048xf32, #tpu.memory_space<vmem>>, %arg17: memref<2048x32xbf16, #tpu.memory_space<vmem>>, %arg18: memref<1x32xf32, #tpu.memory_space<vmem>>, %arg19: memref<1x32xf32, #tpu.memory_space<vmem>>, %arg20: memref<1x32xf32, #tpu.memory_space<vmem>>, %arg21: memref<1x8x32xf32, #tpu.memory_space<vmem>>) attributes {dimension_semantics = [#tpu.dimension_semantics<parallel>], iteration_bounds = array<i64: 2>, scalar_prefetch = 0 : i64, scratch_operands = 0 : i64, tpu.core_type = #tpu.core_type<tc>, window_params = [{transform_indices = @transform_0, window_bounds = array<i64: 1, 8, 32>}, {transform_indices = @transform_1, window_bounds = array<i64: 1, 8, 32>}, {pipeline_mode = #tpu.pipeline_mode<synchronous>, transform_indices = @transform_2, window_bounds = array<i64: 3, 4, 32, 8>}, {pipeline_mode = #tpu.pipeline_mode<synchronous>, transform_indices = @transform_3, window_bounds = array<i64: 3, 4, 1, 8>}, {pipeline_mode = #tpu.pipeline_mode<synchronous>, transform_indices = @transform_4, window_bounds = array<i64: 4, 8, 32>}, {pipeline_mode = #tpu.pipeline_mode<synchronous>, transform_indices = @transform_5, window_bounds = array<i64: 1, 32>}, {pipeline_mode = #tpu.pipeline_mode<synchronous>, transform_indices = @transform_6, window_bounds = array<i64: 1, 32>}, {pipeline_mode = #tpu.pipeline_mode<synchronous>, transform_indices = @transform_7, window_bounds = array<i64: 1, 32>}, {pipeline_mode = #tpu.pipeline_mode<synchronous>, transform_indices = @transform_8, window_bounds = array<i64: 3, 4, 32, 8>}, {pipeline_mode = #tpu.pipeline_mode<synchronous>, transform_indices = @transform_9, window_bounds = array<i64: 3, 4, 1, 8>}, {pipeline_mode = #tpu.pipeline_mode<synchronous>, transform_indices = @transform_10, window_bounds = array<i64: 4, 8, 32>}, {pipeline_mode = #tpu.pipeline_mode<synchronous>, transform_indices = @transform_11, window_bounds = array<i64: 1, 32>}, {pipeline_mode = #tpu.pipeline_mode<synchronous>, transform_indices = @transform_12, window_bounds = array<i64: 1, 32>}, {pipeline_mode = #tpu.pipeline_mode<synchronous>, transform_indices = @transform_13, window_bounds = array<i64: 1, 32>}, {pipeline_mode = #tpu.pipeline_mode<synchronous>, transform_indices = @transform_14, window_bounds = array<i64: 32, 2048>}, {pipeline_mode = #tpu.pipeline_mode<synchronous>, transform_indices = @transform_15, window_bounds = array<i64: 1, 2048>}, {pipeline_mode = #tpu.pipeline_mode<synchronous>, transform_indices = @transform_16, window_bounds = array<i64: 2048, 32>}, {pipeline_mode = #tpu.pipeline_mode<synchronous>, transform_indices = @transform_17, window_bounds = array<i64: 1, 32>}, {pipeline_mode = #tpu.pipeline_mode<synchronous>, transform_indices = @transform_18, window_bounds = array<i64: 1, 32>}, {pipeline_mode = #tpu.pipeline_mode<synchronous>, transform_indices = @transform_19, window_bounds = array<i64: 1, 32>}, {transform_indices = @transform_20, window_bounds = array<i64: 1, 8, 32>}]} {
    %c0 = arith.constant 0 : index
    %c0_0 = arith.constant 0 : index
    %c0_1 = arith.constant 0 : index
    %0 = vector.load %arg1[%c0, %c0_0, %c0_1] : memref<1x8x32xf32, #tpu.memory_space<vmem>>, vector<1x8x32xf32>
    %1 = vector.shape_cast %0 : vector<1x8x32xf32> to vector<8x32xf32>
    %c0_2 = arith.constant 0 : index
    %c0_3 = arith.constant 0 : index
    %c0_4 = arith.constant 0 : index
    %2 = vector.load %arg2[%c0_2, %c0_3, %c0_4] : memref<1x8x32xf32, #tpu.memory_space<vmem>>, vector<1x8x32xf32>
    %3 = vector.shape_cast %2 : vector<1x8x32xf32> to vector<8x32xf32>
    %4 = arith.truncf %1 : vector<8x32xf32> to vector<8x32xbf16>
    %5 = arith.truncf %1 : vector<8x32xf32> to vector<8x32xbf16>
    %cst = arith.constant 0.000000e+00 : f32
    %6 = vector.broadcast %cst : f32 to vector<8x32xf32>
    %c0_5 = arith.constant 0 : index
    %c0_6 = arith.constant 0 : index
    %c0_7 = arith.constant 0 : index
    %c0_8 = arith.constant 0 : index
    %7 = vector.load %arg3[%c0_5, %c0_6, %c0_7, %c0_8] : memref<3x4x32x8xbf16, #tpu.memory_space<vmem>>, vector<1x1x32x8xbf16>
    %8 = vector.shape_cast %7 : vector<1x1x32x8xbf16> to vector<32x8xbf16>
    %cst_9 = arith.constant dense<0.000000e+00> : vector<8x8xf32>
    %9 = tpu.matmul %4, %8, %cst_9 {dimension_numbers = #tpu.dot_dimension_numbers<[1], [0], [0], [1], [0, 0, 1, 1], [], []>} : vector<8x32xbf16>, vector<32x8xbf16>, vector<8x8xf32> -> vector<8x8xf32>
    %c0_10 = arith.constant 0 : index
    %c0_11 = arith.constant 0 : index
    %c0_12 = arith.constant 0 : index
    %c0_13 = arith.constant 0 : index
    %10 = vector.load %arg4[%c0_10, %c0_11, %c0_12, %c0_13] : memref<3x4x1x8xf32, #tpu.memory_space<vmem>>, vector<1x1x1x8xf32>
    %11 = vector.shape_cast %10 : vector<1x1x1x8xf32> to vector<1x8xf32>
    %12 = vector.broadcast %11 : vector<1x8xf32> to vector<8x8xf32>
    %13 = arith.addf %9, %12 : vector<8x8xf32>
    %c1 = arith.constant 1 : index
    %c0_14 = arith.constant 0 : index
    %c0_15 = arith.constant 0 : index
    %c0_16 = arith.constant 0 : index
    %14 = vector.load %arg3[%c1, %c0_14, %c0_15, %c0_16] : memref<3x4x32x8xbf16, #tpu.memory_space<vmem>>, vector<1x1x32x8xbf16>
    %15 = vector.shape_cast %14 : vector<1x1x32x8xbf16> to vector<32x8xbf16>
    %cst_17 = arith.constant dense<0.000000e+00> : vector<8x8xf32>
    %16 = tpu.matmul %5, %15, %cst_17 {dimension_numbers = #tpu.dot_dimension_numbers<[1], [0], [0], [1], [0, 0, 1, 1], [], []>} : vector<8x32xbf16>, vector<32x8xbf16>, vector<8x8xf32> -> vector<8x8xf32>
    %c1_18 = arith.constant 1 : index
    %c0_19 = arith.constant 0 : index
    %c0_20 = arith.constant 0 : index
    %c0_21 = arith.constant 0 : index
    %17 = vector.load %arg4[%c1_18, %c0_19, %c0_20, %c0_21] : memref<3x4x1x8xf32, #tpu.memory_space<vmem>>, vector<1x1x1x8xf32>
    %18 = vector.shape_cast %17 : vector<1x1x1x8xf32> to vector<1x8xf32>
    %19 = vector.broadcast %18 : vector<1x8xf32> to vector<8x8xf32>
    %20 = arith.addf %16, %19 : vector<8x8xf32>
    %c2 = arith.constant 2 : index
    %c0_22 = arith.constant 0 : index
    %c0_23 = arith.constant 0 : index
    %c0_24 = arith.constant 0 : index
    %21 = vector.load %arg3[%c2, %c0_22, %c0_23, %c0_24] : memref<3x4x32x8xbf16, #tpu.memory_space<vmem>>, vector<1x1x32x8xbf16>
    %22 = vector.shape_cast %21 : vector<1x1x32x8xbf16> to vector<32x8xbf16>
    %cst_25 = arith.constant dense<0.000000e+00> : vector<8x8xf32>
    %23 = tpu.matmul %5, %22, %cst_25 {dimension_numbers = #tpu.dot_dimension_numbers<[1], [0], [0], [1], [0, 0, 1, 1], [], []>} : vector<8x32xbf16>, vector<32x8xbf16>, vector<8x8xf32> -> vector<8x8xf32>
    %c2_26 = arith.constant 2 : index
    %c0_27 = arith.constant 0 : index
    %c0_28 = arith.constant 0 : index
    %c0_29 = arith.constant 0 : index
    %24 = vector.load %arg4[%c2_26, %c0_27, %c0_28, %c0_29] : memref<3x4x1x8xf32, #tpu.memory_space<vmem>>, vector<1x1x1x8xf32>
    %25 = vector.shape_cast %24 : vector<1x1x1x8xf32> to vector<1x8xf32>
    %26 = vector.broadcast %25 : vector<1x8xf32> to vector<8x8xf32>
    %27 = arith.addf %23, %26 : vector<8x8xf32>
    %28 = arith.truncf %13 : vector<8x8xf32> to vector<8x8xbf16>
    %29 = arith.truncf %20 : vector<8x8xf32> to vector<8x8xbf16>
    %cst_30 = arith.constant dense<0.000000e+00> : vector<8x8xf32>
    %30 = tpu.matmul %28, %29, %cst_30 {dimension_numbers = #tpu.dot_dimension_numbers<[1], [1], [0], [0], [0, 0, 1, 0], [], []>} : vector<8x8xbf16>, vector<8x8xbf16>, vector<8x8xf32> -> vector<8x8xf32>
    %cst_31 = arith.constant 0.353553385 : f32
    %31 = vector.broadcast %cst_31 : f32 to vector<8x8xf32>
    %32 = arith.mulf %30, %31 : vector<8x8xf32>
    %cst_32 = arith.constant dense<0xFF800000> : vector<8xf32>
    %33 = vector.multi_reduction <maximumf>, %32, %cst_32 [1] : vector<8x8xf32> to vector<8xf32>
    %34 = vector.shape_cast %33 : vector<8xf32> to vector<8x1xf32>
    %35 = vector.broadcast %34 : vector<8x1xf32> to vector<8x8xf32>
    %36 = arith.subf %32, %35 : vector<8x8xf32>
    %37 = math.exp %36 : vector<8x8xf32>
    %cst_33 = arith.constant dense<0.000000e+00> : vector<8xf32>
    %38 = vector.multi_reduction <add>, %37, %cst_33 [1] : vector<8x8xf32> to vector<8xf32>
    %39 = vector.shape_cast %38 : vector<8xf32> to vector<8x1xf32>
    %40 = tpu.reciprocal %39 {approx = true} : vector<8x1xf32> -> vector<8x1xf32>
    %41 = vector.broadcast %40 : vector<8x1xf32> to vector<8x8xf32>
    %42 = arith.mulf %37, %41 : vector<8x8xf32>
    %43 = arith.truncf %42 : vector<8x8xf32> to vector<8x8xbf16>
    %44 = arith.truncf %27 : vector<8x8xf32> to vector<8x8xbf16>
    %cst_34 = arith.constant dense<0.000000e+00> : vector<8x8xf32>
    %45 = tpu.matmul %43, %44, %cst_34 {dimension_numbers = #tpu.dot_dimension_numbers<[1], [0], [0], [1], [0, 0, 1, 1], [], []>} : vector<8x8xbf16>, vector<8x8xbf16>, vector<8x8xf32> -> vector<8x8xf32>
    %46 = arith.truncf %45 : vector<8x8xf32> to vector<8x8xbf16>
    %c0_35 = arith.constant 0 : index
    %c0_36 = arith.constant 0 : index
    %c0_37 = arith.constant 0 : index
    %47 = vector.load %arg5[%c0_35, %c0_36, %c0_37] : memref<4x8x32xbf16, #tpu.memory_space<vmem>>, vector<1x8x32xbf16>
    %48 = vector.shape_cast %47 : vector<1x8x32xbf16> to vector<8x32xbf16>
    %cst_38 = arith.constant dense<0.000000e+00> : vector<8x32xf32>
    %49 = tpu.matmul %46, %48, %cst_38 {dimension_numbers = #tpu.dot_dimension_numbers<[1], [0], [0], [1], [0, 0, 1, 1], [], []>} : vector<8x8xbf16>, vector<8x32xbf16>, vector<8x32xf32> -> vector<8x32xf32>
    %50 = arith.addf %6, %49 : vector<8x32xf32>
    %c0_39 = arith.constant 0 : index
    %c1_40 = arith.constant 1 : index
    %c0_41 = arith.constant 0 : index
    %c0_42 = arith.constant 0 : index
    %51 = vector.load %arg3[%c0_39, %c1_40, %c0_41, %c0_42] : memref<3x4x32x8xbf16, #tpu.memory_space<vmem>>, vector<1x1x32x8xbf16>
    %52 = vector.shape_cast %51 : vector<1x1x32x8xbf16> to vector<32x8xbf16>
    %cst_43 = arith.constant dense<0.000000e+00> : vector<8x8xf32>
    %53 = tpu.matmul %4, %52, %cst_43 {dimension_numbers = #tpu.dot_dimension_numbers<[1], [0], [0], [1], [0, 0, 1, 1], [], []>} : vector<8x32xbf16>, vector<32x8xbf16>, vector<8x8xf32> -> vector<8x8xf32>
    %c0_44 = arith.constant 0 : index
    %c1_45 = arith.constant 1 : index
    %c0_46 = arith.constant 0 : index
    %c0_47 = arith.constant 0 : index
    %54 = vector.load %arg4[%c0_44, %c1_45, %c0_46, %c0_47] : memref<3x4x1x8xf32, #tpu.memory_space<vmem>>, vector<1x1x1x8xf32>
    %55 = vector.shape_cast %54 : vector<1x1x1x8xf32> to vector<1x8xf32>
    %56 = vector.broadcast %55 : vector<1x8xf32> to vector<8x8xf32>
    %57 = arith.addf %53, %56 : vector<8x8xf32>
    %c1_48 = arith.constant 1 : index
    %c1_49 = arith.constant 1 : index
    %c0_50 = arith.constant 0 : index
    %c0_51 = arith.constant 0 : index
    %58 = vector.load %arg3[%c1_48, %c1_49, %c0_50, %c0_51] : memref<3x4x32x8xbf16, #tpu.memory_space<vmem>>, vector<1x1x32x8xbf16>
    %59 = vector.shape_cast %58 : vector<1x1x32x8xbf16> to vector<32x8xbf16>
    %cst_52 = arith.constant dense<0.000000e+00> : vector<8x8xf32>
    %60 = tpu.matmul %5, %59, %cst_52 {dimension_numbers = #tpu.dot_dimension_numbers<[1], [0], [0], [1], [0, 0, 1, 1], [], []>} : vector<8x32xbf16>, vector<32x8xbf16>, vector<8x8xf32> -> vector<8x8xf32>
    %c1_53 = arith.constant 1 : index
    %c1_54 = arith.constant 1 : index
    %c0_55 = arith.constant 0 : index
    %c0_56 = arith.constant 0 : index
    %61 = vector.load %arg4[%c1_53, %c1_54, %c0_55, %c0_56] : memref<3x4x1x8xf32, #tpu.memory_space<vmem>>, vector<1x1x1x8xf32>
    %62 = vector.shape_cast %61 : vector<1x1x1x8xf32> to vector<1x8xf32>
    %63 = vector.broadcast %62 : vector<1x8xf32> to vector<8x8xf32>
    %64 = arith.addf %60, %63 : vector<8x8xf32>
    %c2_57 = arith.constant 2 : index
    %c1_58 = arith.constant 1 : index
    %c0_59 = arith.constant 0 : index
    %c0_60 = arith.constant 0 : index
    %65 = vector.load %arg3[%c2_57, %c1_58, %c0_59, %c0_60] : memref<3x4x32x8xbf16, #tpu.memory_space<vmem>>, vector<1x1x32x8xbf16>
    %66 = vector.shape_cast %65 : vector<1x1x32x8xbf16> to vector<32x8xbf16>
    %cst_61 = arith.constant dense<0.000000e+00> : vector<8x8xf32>
    %67 = tpu.matmul %5, %66, %cst_61 {dimension_numbers = #tpu.dot_dimension_numbers<[1], [0], [0], [1], [0, 0, 1, 1], [], []>} : vector<8x32xbf16>, vector<32x8xbf16>, vector<8x8xf32> -> vector<8x8xf32>
    %c2_62 = arith.constant 2 : index
    %c1_63 = arith.constant 1 : index
    %c0_64 = arith.constant 0 : index
    %c0_65 = arith.constant 0 : index
    %68 = vector.load %arg4[%c2_62, %c1_63, %c0_64, %c0_65] : memref<3x4x1x8xf32, #tpu.memory_space<vmem>>, vector<1x1x1x8xf32>
    %69 = vector.shape_cast %68 : vector<1x1x1x8xf32> to vector<1x8xf32>
    %70 = vector.broadcast %69 : vector<1x8xf32> to vector<8x8xf32>
    %71 = arith.addf %67, %70 : vector<8x8xf32>
    %72 = arith.truncf %57 : vector<8x8xf32> to vector<8x8xbf16>
    %73 = arith.truncf %64 : vector<8x8xf32> to vector<8x8xbf16>
    %cst_66 = arith.constant dense<0.000000e+00> : vector<8x8xf32>
    %74 = tpu.matmul %72, %73, %cst_66 {dimension_numbers = #tpu.dot_dimension_numbers<[1], [1], [0], [0], [0, 0, 1, 0], [], []>} : vector<8x8xbf16>, vector<8x8xbf16>, vector<8x8xf32> -> vector<8x8xf32>
    %cst_67 = arith.constant 0.353553385 : f32
    %75 = vector.broadcast %cst_67 : f32 to vector<8x8xf32>
    %76 = arith.mulf %74, %75 : vector<8x8xf32>
    %cst_68 = arith.constant dense<0xFF800000> : vector<8xf32>
    %77 = vector.multi_reduction <maximumf>, %76, %cst_68 [1] : vector<8x8xf32> to vector<8xf32>
    %78 = vector.shape_cast %77 : vector<8xf32> to vector<8x1xf32>
    %79 = vector.broadcast %78 : vector<8x1xf32> to vector<8x8xf32>
    %80 = arith.subf %76, %79 : vector<8x8xf32>
    %81 = math.exp %80 : vector<8x8xf32>
    %cst_69 = arith.constant dense<0.000000e+00> : vector<8xf32>
    %82 = vector.multi_reduction <add>, %81, %cst_69 [1] : vector<8x8xf32> to vector<8xf32>
    %83 = vector.shape_cast %82 : vector<8xf32> to vector<8x1xf32>
    %84 = tpu.reciprocal %83 {approx = true} : vector<8x1xf32> -> vector<8x1xf32>
    %85 = vector.broadcast %84 : vector<8x1xf32> to vector<8x8xf32>
    %86 = arith.mulf %81, %85 : vector<8x8xf32>
    %87 = arith.truncf %86 : vector<8x8xf32> to vector<8x8xbf16>
    %88 = arith.truncf %71 : vector<8x8xf32> to vector<8x8xbf16>
    %cst_70 = arith.constant dense<0.000000e+00> : vector<8x8xf32>
    %89 = tpu.matmul %87, %88, %cst_70 {dimension_numbers = #tpu.dot_dimension_numbers<[1], [0], [0], [1], [0, 0, 1, 1], [], []>} : vector<8x8xbf16>, vector<8x8xbf16>, vector<8x8xf32> -> vector<8x8xf32>
    %90 = arith.truncf %89 : vector<8x8xf32> to vector<8x8xbf16>
    %c1_71 = arith.constant 1 : index
    %c0_72 = arith.constant 0 : index
    %c0_73 = arith.constant 0 : index
    %91 = vector.load %arg5[%c1_71, %c0_72, %c0_73] : memref<4x8x32xbf16, #tpu.memory_space<vmem>>, vector<1x8x32xbf16>
    %92 = vector.shape_cast %91 : vector<1x8x32xbf16> to vector<8x32xbf16>
    %cst_74 = arith.constant dense<0.000000e+00> : vector<8x32xf32>
    %93 = tpu.matmul %90, %92, %cst_74 {dimension_numbers = #tpu.dot_dimension_numbers<[1], [0], [0], [1], [0, 0, 1, 1], [], []>} : vector<8x8xbf16>, vector<8x32xbf16>, vector<8x32xf32> -> vector<8x32xf32>
    %94 = arith.addf %50, %93 : vector<8x32xf32>
    %c0_75 = arith.constant 0 : index
    %c2_76 = arith.constant 2 : index
    %c0_77 = arith.constant 0 : index
    %c0_78 = arith.constant 0 : index
    %95 = vector.load %arg3[%c0_75, %c2_76, %c0_77, %c0_78] : memref<3x4x32x8xbf16, #tpu.memory_space<vmem>>, vector<1x1x32x8xbf16>
    %96 = vector.shape_cast %95 : vector<1x1x32x8xbf16> to vector<32x8xbf16>
    %cst_79 = arith.constant dense<0.000000e+00> : vector<8x8xf32>
    %97 = tpu.matmul %4, %96, %cst_79 {dimension_numbers = #tpu.dot_dimension_numbers<[1], [0], [0], [1], [0, 0, 1, 1], [], []>} : vector<8x32xbf16>, vector<32x8xbf16>, vector<8x8xf32> -> vector<8x8xf32>
    %c0_80 = arith.constant 0 : index
    %c2_81 = arith.constant 2 : index
    %c0_82 = arith.constant 0 : index
    %c0_83 = arith.constant 0 : index
    %98 = vector.load %arg4[%c0_80, %c2_81, %c0_82, %c0_83] : memref<3x4x1x8xf32, #tpu.memory_space<vmem>>, vector<1x1x1x8xf32>
    %99 = vector.shape_cast %98 : vector<1x1x1x8xf32> to vector<1x8xf32>
    %100 = vector.broadcast %99 : vector<1x8xf32> to vector<8x8xf32>
    %101 = arith.addf %97, %100 : vector<8x8xf32>
    %c1_84 = arith.constant 1 : index
    %c2_85 = arith.constant 2 : index
    %c0_86 = arith.constant 0 : index
    %c0_87 = arith.constant 0 : index
    %102 = vector.load %arg3[%c1_84, %c2_85, %c0_86, %c0_87] : memref<3x4x32x8xbf16, #tpu.memory_space<vmem>>, vector<1x1x32x8xbf16>
    %103 = vector.shape_cast %102 : vector<1x1x32x8xbf16> to vector<32x8xbf16>
    %cst_88 = arith.constant dense<0.000000e+00> : vector<8x8xf32>
    %104 = tpu.matmul %5, %103, %cst_88 {dimension_numbers = #tpu.dot_dimension_numbers<[1], [0], [0], [1], [0, 0, 1, 1], [], []>} : vector<8x32xbf16>, vector<32x8xbf16>, vector<8x8xf32> -> vector<8x8xf32>
    %c1_89 = arith.constant 1 : index
    %c2_90 = arith.constant 2 : index
    %c0_91 = arith.constant 0 : index
    %c0_92 = arith.constant 0 : index
    %105 = vector.load %arg4[%c1_89, %c2_90, %c0_91, %c0_92] : memref<3x4x1x8xf32, #tpu.memory_space<vmem>>, vector<1x1x1x8xf32>
    %106 = vector.shape_cast %105 : vector<1x1x1x8xf32> to vector<1x8xf32>
    %107 = vector.broadcast %106 : vector<1x8xf32> to vector<8x8xf32>
    %108 = arith.addf %104, %107 : vector<8x8xf32>
    %c2_93 = arith.constant 2 : index
    %c2_94 = arith.constant 2 : index
    %c0_95 = arith.constant 0 : index
    %c0_96 = arith.constant 0 : index
    %109 = vector.load %arg3[%c2_93, %c2_94, %c0_95, %c0_96] : memref<3x4x32x8xbf16, #tpu.memory_space<vmem>>, vector<1x1x32x8xbf16>
    %110 = vector.shape_cast %109 : vector<1x1x32x8xbf16> to vector<32x8xbf16>
    %cst_97 = arith.constant dense<0.000000e+00> : vector<8x8xf32>
    %111 = tpu.matmul %5, %110, %cst_97 {dimension_numbers = #tpu.dot_dimension_numbers<[1], [0], [0], [1], [0, 0, 1, 1], [], []>} : vector<8x32xbf16>, vector<32x8xbf16>, vector<8x8xf32> -> vector<8x8xf32>
    %c2_98 = arith.constant 2 : index
    %c2_99 = arith.constant 2 : index
    %c0_100 = arith.constant 0 : index
    %c0_101 = arith.constant 0 : index
    %112 = vector.load %arg4[%c2_98, %c2_99, %c0_100, %c0_101] : memref<3x4x1x8xf32, #tpu.memory_space<vmem>>, vector<1x1x1x8xf32>
    %113 = vector.shape_cast %112 : vector<1x1x1x8xf32> to vector<1x8xf32>
    %114 = vector.broadcast %113 : vector<1x8xf32> to vector<8x8xf32>
    %115 = arith.addf %111, %114 : vector<8x8xf32>
    %116 = arith.truncf %101 : vector<8x8xf32> to vector<8x8xbf16>
    %117 = arith.truncf %108 : vector<8x8xf32> to vector<8x8xbf16>
    %cst_102 = arith.constant dense<0.000000e+00> : vector<8x8xf32>
    %118 = tpu.matmul %116, %117, %cst_102 {dimension_numbers = #tpu.dot_dimension_numbers<[1], [1], [0], [0], [0, 0, 1, 0], [], []>} : vector<8x8xbf16>, vector<8x8xbf16>, vector<8x8xf32> -> vector<8x8xf32>
    %cst_103 = arith.constant 0.353553385 : f32
    %119 = vector.broadcast %cst_103 : f32 to vector<8x8xf32>
    %120 = arith.mulf %118, %119 : vector<8x8xf32>
    %cst_104 = arith.constant dense<0xFF800000> : vector<8xf32>
    %121 = vector.multi_reduction <maximumf>, %120, %cst_104 [1] : vector<8x8xf32> to vector<8xf32>
    %122 = vector.shape_cast %121 : vector<8xf32> to vector<8x1xf32>
    %123 = vector.broadcast %122 : vector<8x1xf32> to vector<8x8xf32>
    %124 = arith.subf %120, %123 : vector<8x8xf32>
    %125 = math.exp %124 : vector<8x8xf32>
    %cst_105 = arith.constant dense<0.000000e+00> : vector<8xf32>
    %126 = vector.multi_reduction <add>, %125, %cst_105 [1] : vector<8x8xf32> to vector<8xf32>
    %127 = vector.shape_cast %126 : vector<8xf32> to vector<8x1xf32>
    %128 = tpu.reciprocal %127 {approx = true} : vector<8x1xf32> -> vector<8x1xf32>
    %129 = vector.broadcast %128 : vector<8x1xf32> to vector<8x8xf32>
    %130 = arith.mulf %125, %129 : vector<8x8xf32>
    %131 = arith.truncf %130 : vector<8x8xf32> to vector<8x8xbf16>
    %132 = arith.truncf %115 : vector<8x8xf32> to vector<8x8xbf16>
    %cst_106 = arith.constant dense<0.000000e+00> : vector<8x8xf32>
    %133 = tpu.matmul %131, %132, %cst_106 {dimension_numbers = #tpu.dot_dimension_numbers<[1], [0], [0], [1], [0, 0, 1, 1], [], []>} : vector<8x8xbf16>, vector<8x8xbf16>, vector<8x8xf32> -> vector<8x8xf32>
    %134 = arith.truncf %133 : vector<8x8xf32> to vector<8x8xbf16>
    %c2_107 = arith.constant 2 : index
    %c0_108 = arith.constant 0 : index
    %c0_109 = arith.constant 0 : index
    %135 = vector.load %arg5[%c2_107, %c0_108, %c0_109] : memref<4x8x32xbf16, #tpu.memory_space<vmem>>, vector<1x8x32xbf16>
    %136 = vector.shape_cast %135 : vector<1x8x32xbf16> to vector<8x32xbf16>
    %cst_110 = arith.constant dense<0.000000e+00> : vector<8x32xf32>
    %137 = tpu.matmul %134, %136, %cst_110 {dimension_numbers = #tpu.dot_dimension_numbers<[1], [0], [0], [1], [0, 0, 1, 1], [], []>} : vector<8x8xbf16>, vector<8x32xbf16>, vector<8x32xf32> -> vector<8x32xf32>
    %138 = arith.addf %94, %137 : vector<8x32xf32>
    %c0_111 = arith.constant 0 : index
    %c3 = arith.constant 3 : index
    %c0_112 = arith.constant 0 : index
    %c0_113 = arith.constant 0 : index
    %139 = vector.load %arg3[%c0_111, %c3, %c0_112, %c0_113] : memref<3x4x32x8xbf16, #tpu.memory_space<vmem>>, vector<1x1x32x8xbf16>
    %140 = vector.shape_cast %139 : vector<1x1x32x8xbf16> to vector<32x8xbf16>
    %cst_114 = arith.constant dense<0.000000e+00> : vector<8x8xf32>
    %141 = tpu.matmul %4, %140, %cst_114 {dimension_numbers = #tpu.dot_dimension_numbers<[1], [0], [0], [1], [0, 0, 1, 1], [], []>} : vector<8x32xbf16>, vector<32x8xbf16>, vector<8x8xf32> -> vector<8x8xf32>
    %c0_115 = arith.constant 0 : index
    %c3_116 = arith.constant 3 : index
    %c0_117 = arith.constant 0 : index
    %c0_118 = arith.constant 0 : index
    %142 = vector.load %arg4[%c0_115, %c3_116, %c0_117, %c0_118] : memref<3x4x1x8xf32, #tpu.memory_space<vmem>>, vector<1x1x1x8xf32>
    %143 = vector.shape_cast %142 : vector<1x1x1x8xf32> to vector<1x8xf32>
    %144 = vector.broadcast %143 : vector<1x8xf32> to vector<8x8xf32>
    %145 = arith.addf %141, %144 : vector<8x8xf32>
    %c1_119 = arith.constant 1 : index
    %c3_120 = arith.constant 3 : index
    %c0_121 = arith.constant 0 : index
    %c0_122 = arith.constant 0 : index
    %146 = vector.load %arg3[%c1_119, %c3_120, %c0_121, %c0_122] : memref<3x4x32x8xbf16, #tpu.memory_space<vmem>>, vector<1x1x32x8xbf16>
    %147 = vector.shape_cast %146 : vector<1x1x32x8xbf16> to vector<32x8xbf16>
    %cst_123 = arith.constant dense<0.000000e+00> : vector<8x8xf32>
    %148 = tpu.matmul %5, %147, %cst_123 {dimension_numbers = #tpu.dot_dimension_numbers<[1], [0], [0], [1], [0, 0, 1, 1], [], []>} : vector<8x32xbf16>, vector<32x8xbf16>, vector<8x8xf32> -> vector<8x8xf32>
    %c1_124 = arith.constant 1 : index
    %c3_125 = arith.constant 3 : index
    %c0_126 = arith.constant 0 : index
    %c0_127 = arith.constant 0 : index
    %149 = vector.load %arg4[%c1_124, %c3_125, %c0_126, %c0_127] : memref<3x4x1x8xf32, #tpu.memory_space<vmem>>, vector<1x1x1x8xf32>
    %150 = vector.shape_cast %149 : vector<1x1x1x8xf32> to vector<1x8xf32>
    %151 = vector.broadcast %150 : vector<1x8xf32> to vector<8x8xf32>
    %152 = arith.addf %148, %151 : vector<8x8xf32>
    %c2_128 = arith.constant 2 : index
    %c3_129 = arith.constant 3 : index
    %c0_130 = arith.constant 0 : index
    %c0_131 = arith.constant 0 : index
    %153 = vector.load %arg3[%c2_128, %c3_129, %c0_130, %c0_131] : memref<3x4x32x8xbf16, #tpu.memory_space<vmem>>, vector<1x1x32x8xbf16>
    %154 = vector.shape_cast %153 : vector<1x1x32x8xbf16> to vector<32x8xbf16>
    %cst_132 = arith.constant dense<0.000000e+00> : vector<8x8xf32>
    %155 = tpu.matmul %5, %154, %cst_132 {dimension_numbers = #tpu.dot_dimension_numbers<[1], [0], [0], [1], [0, 0, 1, 1], [], []>} : vector<8x32xbf16>, vector<32x8xbf16>, vector<8x8xf32> -> vector<8x8xf32>
    %c2_133 = arith.constant 2 : index
    %c3_134 = arith.constant 3 : index
    %c0_135 = arith.constant 0 : index
    %c0_136 = arith.constant 0 : index
    %156 = vector.load %arg4[%c2_133, %c3_134, %c0_135, %c0_136] : memref<3x4x1x8xf32, #tpu.memory_space<vmem>>, vector<1x1x1x8xf32>
    %157 = vector.shape_cast %156 : vector<1x1x1x8xf32> to vector<1x8xf32>
    %158 = vector.broadcast %157 : vector<1x8xf32> to vector<8x8xf32>
    %159 = arith.addf %155, %158 : vector<8x8xf32>
    %160 = arith.truncf %145 : vector<8x8xf32> to vector<8x8xbf16>
    %161 = arith.truncf %152 : vector<8x8xf32> to vector<8x8xbf16>
    %cst_137 = arith.constant dense<0.000000e+00> : vector<8x8xf32>
    %162 = tpu.matmul %160, %161, %cst_137 {dimension_numbers = #tpu.dot_dimension_numbers<[1], [1], [0], [0], [0, 0, 1, 0], [], []>} : vector<8x8xbf16>, vector<8x8xbf16>, vector<8x8xf32> -> vector<8x8xf32>
    %cst_138 = arith.constant 0.353553385 : f32
    %163 = vector.broadcast %cst_138 : f32 to vector<8x8xf32>
    %164 = arith.mulf %162, %163 : vector<8x8xf32>
    %cst_139 = arith.constant dense<0xFF800000> : vector<8xf32>
    %165 = vector.multi_reduction <maximumf>, %164, %cst_139 [1] : vector<8x8xf32> to vector<8xf32>
    %166 = vector.shape_cast %165 : vector<8xf32> to vector<8x1xf32>
    %167 = vector.broadcast %166 : vector<8x1xf32> to vector<8x8xf32>
    %168 = arith.subf %164, %167 : vector<8x8xf32>
    %169 = math.exp %168 : vector<8x8xf32>
    %cst_140 = arith.constant dense<0.000000e+00> : vector<8xf32>
    %170 = vector.multi_reduction <add>, %169, %cst_140 [1] : vector<8x8xf32> to vector<8xf32>
    %171 = vector.shape_cast %170 : vector<8xf32> to vector<8x1xf32>
    %172 = tpu.reciprocal %171 {approx = true} : vector<8x1xf32> -> vector<8x1xf32>
    %173 = vector.broadcast %172 : vector<8x1xf32> to vector<8x8xf32>
    %174 = arith.mulf %169, %173 : vector<8x8xf32>
    %175 = arith.truncf %174 : vector<8x8xf32> to vector<8x8xbf16>
    %176 = arith.truncf %159 : vector<8x8xf32> to vector<8x8xbf16>
    %cst_141 = arith.constant dense<0.000000e+00> : vector<8x8xf32>
    %177 = tpu.matmul %175, %176, %cst_141 {dimension_numbers = #tpu.dot_dimension_numbers<[1], [0], [0], [1], [0, 0, 1, 1], [], []>} : vector<8x8xbf16>, vector<8x8xbf16>, vector<8x8xf32> -> vector<8x8xf32>
    %178 = arith.truncf %177 : vector<8x8xf32> to vector<8x8xbf16>
    %c3_142 = arith.constant 3 : index
    %c0_143 = arith.constant 0 : index
    %c0_144 = arith.constant 0 : index
    %179 = vector.load %arg5[%c3_142, %c0_143, %c0_144] : memref<4x8x32xbf16, #tpu.memory_space<vmem>>, vector<1x8x32xbf16>
    %180 = vector.shape_cast %179 : vector<1x8x32xbf16> to vector<8x32xbf16>
    %cst_145 = arith.constant dense<0.000000e+00> : vector<8x32xf32>
    %181 = tpu.matmul %178, %180, %cst_145 {dimension_numbers = #tpu.dot_dimension_numbers<[1], [0], [0], [1], [0, 0, 1, 1], [], []>} : vector<8x8xbf16>, vector<8x32xbf16>, vector<8x32xf32> -> vector<8x32xf32>
    %182 = arith.addf %138, %181 : vector<8x32xf32>
    %c0_146 = arith.constant 0 : index
    %c0_147 = arith.constant 0 : index
    %183 = vector.load %arg6[%c0_146, %c0_147] : memref<1x32xf32, #tpu.memory_space<vmem>>, vector<1x32xf32>
    %184 = vector.broadcast %183 : vector<1x32xf32> to vector<8x32xf32>
    %185 = arith.addf %182, %184 : vector<8x32xf32>
    %186 = arith.addf %185, %1 : vector<8x32xf32>
    %cst_148 = arith.constant dense<0.000000e+00> : vector<8xf32>
    %187 = vector.multi_reduction <add>, %186, %cst_148 [1] : vector<8x32xf32> to vector<8xf32>
    %188 = vector.shape_cast %187 : vector<8xf32> to vector<8x1xf32>
    %cst_149 = arith.constant 3.200000e+01 : f32
    %189 = vector.broadcast %cst_149 : f32 to vector<8x1xf32>
    %190 = arith.divf %188, %189 : vector<8x1xf32>
    %191 = vector.broadcast %190 : vector<8x1xf32> to vector<8x32xf32>
    %192 = arith.subf %186, %191 : vector<8x32xf32>
    %193 = arith.mulf %192, %192 : vector<8x32xf32>
    %cst_150 = arith.constant dense<0.000000e+00> : vector<8xf32>
    %194 = vector.multi_reduction <add>, %193, %cst_150 [1] : vector<8x32xf32> to vector<8xf32>
    %195 = vector.shape_cast %194 : vector<8xf32> to vector<8x1xf32>
    %cst_151 = arith.constant 3.200000e+01 : f32
    %196 = vector.broadcast %cst_151 : f32 to vector<8x1xf32>
    %197 = arith.divf %195, %196 : vector<8x1xf32>
    %198 = vector.broadcast %190 : vector<8x1xf32> to vector<8x32xf32>
    %199 = arith.subf %186, %198 : vector<8x32xf32>
    %cst_152 = arith.constant 9.99999974E-6 : f32
    %200 = vector.broadcast %cst_152 : f32 to vector<8x1xf32>
    %201 = arith.addf %197, %200 : vector<8x1xf32>
    %202 = math.rsqrt %201 : vector<8x1xf32>
    %203 = vector.broadcast %202 : vector<8x1xf32> to vector<8x32xf32>
    %204 = arith.mulf %199, %203 : vector<8x32xf32>
    %c0_153 = arith.constant 0 : index
    %c0_154 = arith.constant 0 : index
    %205 = vector.load %arg7[%c0_153, %c0_154] : memref<1x32xf32, #tpu.memory_space<vmem>>, vector<1x32xf32>
    %206 = vector.broadcast %205 : vector<1x32xf32> to vector<8x32xf32>
    %207 = arith.mulf %204, %206 : vector<8x32xf32>
    %c0_155 = arith.constant 0 : index
    %c0_156 = arith.constant 0 : index
    %208 = vector.load %arg8[%c0_155, %c0_156] : memref<1x32xf32, #tpu.memory_space<vmem>>, vector<1x32xf32>
    %209 = vector.broadcast %208 : vector<1x32xf32> to vector<8x32xf32>
    %210 = arith.addf %207, %209 : vector<8x32xf32>
    %211 = arith.truncf %210 : vector<8x32xf32> to vector<8x32xbf16>
    %212 = arith.truncf %3 : vector<8x32xf32> to vector<8x32xbf16>
    %cst_157 = arith.constant 0.000000e+00 : f32
    %213 = vector.broadcast %cst_157 : f32 to vector<8x32xf32>
    %c0_158 = arith.constant 0 : index
    %c0_159 = arith.constant 0 : index
    %c0_160 = arith.constant 0 : index
    %c0_161 = arith.constant 0 : index
    %214 = vector.load %arg9[%c0_158, %c0_159, %c0_160, %c0_161] : memref<3x4x32x8xbf16, #tpu.memory_space<vmem>>, vector<1x1x32x8xbf16>
    %215 = vector.shape_cast %214 : vector<1x1x32x8xbf16> to vector<32x8xbf16>
    %cst_162 = arith.constant dense<0.000000e+00> : vector<8x8xf32>
    %216 = tpu.matmul %211, %215, %cst_162 {dimension_numbers = #tpu.dot_dimension_numbers<[1], [0], [0], [1], [0, 0, 1, 1], [], []>} : vector<8x32xbf16>, vector<32x8xbf16>, vector<8x8xf32> -> vector<8x8xf32>
    %c0_163 = arith.constant 0 : index
    %c0_164 = arith.constant 0 : index
    %c0_165 = arith.constant 0 : index
    %c0_166 = arith.constant 0 : index
    %217 = vector.load %arg10[%c0_163, %c0_164, %c0_165, %c0_166] : memref<3x4x1x8xf32, #tpu.memory_space<vmem>>, vector<1x1x1x8xf32>
    %218 = vector.shape_cast %217 : vector<1x1x1x8xf32> to vector<1x8xf32>
    %219 = vector.broadcast %218 : vector<1x8xf32> to vector<8x8xf32>
    %220 = arith.addf %216, %219 : vector<8x8xf32>
    %c1_167 = arith.constant 1 : index
    %c0_168 = arith.constant 0 : index
    %c0_169 = arith.constant 0 : index
    %c0_170 = arith.constant 0 : index
    %221 = vector.load %arg9[%c1_167, %c0_168, %c0_169, %c0_170] : memref<3x4x32x8xbf16, #tpu.memory_space<vmem>>, vector<1x1x32x8xbf16>
    %222 = vector.shape_cast %221 : vector<1x1x32x8xbf16> to vector<32x8xbf16>
    %cst_171 = arith.constant dense<0.000000e+00> : vector<8x8xf32>
    %223 = tpu.matmul %212, %222, %cst_171 {dimension_numbers = #tpu.dot_dimension_numbers<[1], [0], [0], [1], [0, 0, 1, 1], [], []>} : vector<8x32xbf16>, vector<32x8xbf16>, vector<8x8xf32> -> vector<8x8xf32>
    %c1_172 = arith.constant 1 : index
    %c0_173 = arith.constant 0 : index
    %c0_174 = arith.constant 0 : index
    %c0_175 = arith.constant 0 : index
    %224 = vector.load %arg10[%c1_172, %c0_173, %c0_174, %c0_175] : memref<3x4x1x8xf32, #tpu.memory_space<vmem>>, vector<1x1x1x8xf32>
    %225 = vector.shape_cast %224 : vector<1x1x1x8xf32> to vector<1x8xf32>
    %226 = vector.broadcast %225 : vector<1x8xf32> to vector<8x8xf32>
    %227 = arith.addf %223, %226 : vector<8x8xf32>
    %c2_176 = arith.constant 2 : index
    %c0_177 = arith.constant 0 : index
    %c0_178 = arith.constant 0 : index
    %c0_179 = arith.constant 0 : index
    %228 = vector.load %arg9[%c2_176, %c0_177, %c0_178, %c0_179] : memref<3x4x32x8xbf16, #tpu.memory_space<vmem>>, vector<1x1x32x8xbf16>
    %229 = vector.shape_cast %228 : vector<1x1x32x8xbf16> to vector<32x8xbf16>
    %cst_180 = arith.constant dense<0.000000e+00> : vector<8x8xf32>
    %230 = tpu.matmul %212, %229, %cst_180 {dimension_numbers = #tpu.dot_dimension_numbers<[1], [0], [0], [1], [0, 0, 1, 1], [], []>} : vector<8x32xbf16>, vector<32x8xbf16>, vector<8x8xf32> -> vector<8x8xf32>
    %c2_181 = arith.constant 2 : index
    %c0_182 = arith.constant 0 : index
    %c0_183 = arith.constant 0 : index
    %c0_184 = arith.constant 0 : index
    %231 = vector.load %arg10[%c2_181, %c0_182, %c0_183, %c0_184] : memref<3x4x1x8xf32, #tpu.memory_space<vmem>>, vector<1x1x1x8xf32>
    %232 = vector.shape_cast %231 : vector<1x1x1x8xf32> to vector<1x8xf32>
    %233 = vector.broadcast %232 : vector<1x8xf32> to vector<8x8xf32>
    %234 = arith.addf %230, %233 : vector<8x8xf32>
    %235 = arith.truncf %220 : vector<8x8xf32> to vector<8x8xbf16>
    %236 = arith.truncf %227 : vector<8x8xf32> to vector<8x8xbf16>
    %cst_185 = arith.constant dense<0.000000e+00> : vector<8x8xf32>
    %237 = tpu.matmul %235, %236, %cst_185 {dimension_numbers = #tpu.dot_dimension_numbers<[1], [1], [0], [0], [0, 0, 1, 0], [], []>} : vector<8x8xbf16>, vector<8x8xbf16>, vector<8x8xf32> -> vector<8x8xf32>
    %cst_186 = arith.constant 0.353553385 : f32
    %238 = vector.broadcast %cst_186 : f32 to vector<8x8xf32>
    %239 = arith.mulf %237, %238 : vector<8x8xf32>
    %cst_187 = arith.constant dense<0xFF800000> : vector<8xf32>
    %240 = vector.multi_reduction <maximumf>, %239, %cst_187 [1] : vector<8x8xf32> to vector<8xf32>
    %241 = vector.shape_cast %240 : vector<8xf32> to vector<8x1xf32>
    %242 = vector.broadcast %241 : vector<8x1xf32> to vector<8x8xf32>
    %243 = arith.subf %239, %242 : vector<8x8xf32>
    %244 = math.exp %243 : vector<8x8xf32>
    %cst_188 = arith.constant dense<0.000000e+00> : vector<8xf32>
    %245 = vector.multi_reduction <add>, %244, %cst_188 [1] : vector<8x8xf32> to vector<8xf32>
    %246 = vector.shape_cast %245 : vector<8xf32> to vector<8x1xf32>
    %247 = tpu.reciprocal %246 {approx = true} : vector<8x1xf32> -> vector<8x1xf32>
    %248 = vector.broadcast %247 : vector<8x1xf32> to vector<8x8xf32>
    %249 = arith.mulf %244, %248 : vector<8x8xf32>
    %250 = arith.truncf %249 : vector<8x8xf32> to vector<8x8xbf16>
    %251 = arith.truncf %234 : vector<8x8xf32> to vector<8x8xbf16>
    %cst_189 = arith.constant dense<0.000000e+00> : vector<8x8xf32>
    %252 = tpu.matmul %250, %251, %cst_189 {dimension_numbers = #tpu.dot_dimension_numbers<[1], [0], [0], [1], [0, 0, 1, 1], [], []>} : vector<8x8xbf16>, vector<8x8xbf16>, vector<8x8xf32> -> vector<8x8xf32>
    %253 = arith.truncf %252 : vector<8x8xf32> to vector<8x8xbf16>
    %c0_190 = arith.constant 0 : index
    %c0_191 = arith.constant 0 : index
    %c0_192 = arith.constant 0 : index
    %254 = vector.load %arg11[%c0_190, %c0_191, %c0_192] : memref<4x8x32xbf16, #tpu.memory_space<vmem>>, vector<1x8x32xbf16>
    %255 = vector.shape_cast %254 : vector<1x8x32xbf16> to vector<8x32xbf16>
    %cst_193 = arith.constant dense<0.000000e+00> : vector<8x32xf32>
    %256 = tpu.matmul %253, %255, %cst_193 {dimension_numbers = #tpu.dot_dimension_numbers<[1], [0], [0], [1], [0, 0, 1, 1], [], []>} : vector<8x8xbf16>, vector<8x32xbf16>, vector<8x32xf32> -> vector<8x32xf32>
    %257 = arith.addf %213, %256 : vector<8x32xf32>
    %c0_194 = arith.constant 0 : index
    %c1_195 = arith.constant 1 : index
    %c0_196 = arith.constant 0 : index
    %c0_197 = arith.constant 0 : index
    %258 = vector.load %arg9[%c0_194, %c1_195, %c0_196, %c0_197] : memref<3x4x32x8xbf16, #tpu.memory_space<vmem>>, vector<1x1x32x8xbf16>
    %259 = vector.shape_cast %258 : vector<1x1x32x8xbf16> to vector<32x8xbf16>
    %cst_198 = arith.constant dense<0.000000e+00> : vector<8x8xf32>
    %260 = tpu.matmul %211, %259, %cst_198 {dimension_numbers = #tpu.dot_dimension_numbers<[1], [0], [0], [1], [0, 0, 1, 1], [], []>} : vector<8x32xbf16>, vector<32x8xbf16>, vector<8x8xf32> -> vector<8x8xf32>
    %c0_199 = arith.constant 0 : index
    %c1_200 = arith.constant 1 : index
    %c0_201 = arith.constant 0 : index
    %c0_202 = arith.constant 0 : index
    %261 = vector.load %arg10[%c0_199, %c1_200, %c0_201, %c0_202] : memref<3x4x1x8xf32, #tpu.memory_space<vmem>>, vector<1x1x1x8xf32>
    %262 = vector.shape_cast %261 : vector<1x1x1x8xf32> to vector<1x8xf32>
    %263 = vector.broadcast %262 : vector<1x8xf32> to vector<8x8xf32>
    %264 = arith.addf %260, %263 : vector<8x8xf32>
    %c1_203 = arith.constant 1 : index
    %c1_204 = arith.constant 1 : index
    %c0_205 = arith.constant 0 : index
    %c0_206 = arith.constant 0 : index
    %265 = vector.load %arg9[%c1_203, %c1_204, %c0_205, %c0_206] : memref<3x4x32x8xbf16, #tpu.memory_space<vmem>>, vector<1x1x32x8xbf16>
    %266 = vector.shape_cast %265 : vector<1x1x32x8xbf16> to vector<32x8xbf16>
    %cst_207 = arith.constant dense<0.000000e+00> : vector<8x8xf32>
    %267 = tpu.matmul %212, %266, %cst_207 {dimension_numbers = #tpu.dot_dimension_numbers<[1], [0], [0], [1], [0, 0, 1, 1], [], []>} : vector<8x32xbf16>, vector<32x8xbf16>, vector<8x8xf32> -> vector<8x8xf32>
    %c1_208 = arith.constant 1 : index
    %c1_209 = arith.constant 1 : index
    %c0_210 = arith.constant 0 : index
    %c0_211 = arith.constant 0 : index
    %268 = vector.load %arg10[%c1_208, %c1_209, %c0_210, %c0_211] : memref<3x4x1x8xf32, #tpu.memory_space<vmem>>, vector<1x1x1x8xf32>
    %269 = vector.shape_cast %268 : vector<1x1x1x8xf32> to vector<1x8xf32>
    %270 = vector.broadcast %269 : vector<1x8xf32> to vector<8x8xf32>
    %271 = arith.addf %267, %270 : vector<8x8xf32>
    %c2_212 = arith.constant 2 : index
    %c1_213 = arith.constant 1 : index
    %c0_214 = arith.constant 0 : index
    %c0_215 = arith.constant 0 : index
    %272 = vector.load %arg9[%c2_212, %c1_213, %c0_214, %c0_215] : memref<3x4x32x8xbf16, #tpu.memory_space<vmem>>, vector<1x1x32x8xbf16>
    %273 = vector.shape_cast %272 : vector<1x1x32x8xbf16> to vector<32x8xbf16>
    %cst_216 = arith.constant dense<0.000000e+00> : vector<8x8xf32>
    %274 = tpu.matmul %212, %273, %cst_216 {dimension_numbers = #tpu.dot_dimension_numbers<[1], [0], [0], [1], [0, 0, 1, 1], [], []>} : vector<8x32xbf16>, vector<32x8xbf16>, vector<8x8xf32> -> vector<8x8xf32>
    %c2_217 = arith.constant 2 : index
    %c1_218 = arith.constant 1 : index
    %c0_219 = arith.constant 0 : index
    %c0_220 = arith.constant 0 : index
    %275 = vector.load %arg10[%c2_217, %c1_218, %c0_219, %c0_220] : memref<3x4x1x8xf32, #tpu.memory_space<vmem>>, vector<1x1x1x8xf32>
    %276 = vector.shape_cast %275 : vector<1x1x1x8xf32> to vector<1x8xf32>
    %277 = vector.broadcast %276 : vector<1x8xf32> to vector<8x8xf32>
    %278 = arith.addf %274, %277 : vector<8x8xf32>
    %279 = arith.truncf %264 : vector<8x8xf32> to vector<8x8xbf16>
    %280 = arith.truncf %271 : vector<8x8xf32> to vector<8x8xbf16>
    %cst_221 = arith.constant dense<0.000000e+00> : vector<8x8xf32>
    %281 = tpu.matmul %279, %280, %cst_221 {dimension_numbers = #tpu.dot_dimension_numbers<[1], [1], [0], [0], [0, 0, 1, 0], [], []>} : vector<8x8xbf16>, vector<8x8xbf16>, vector<8x8xf32> -> vector<8x8xf32>
    %cst_222 = arith.constant 0.353553385 : f32
    %282 = vector.broadcast %cst_222 : f32 to vector<8x8xf32>
    %283 = arith.mulf %281, %282 : vector<8x8xf32>
    %cst_223 = arith.constant dense<0xFF800000> : vector<8xf32>
    %284 = vector.multi_reduction <maximumf>, %283, %cst_223 [1] : vector<8x8xf32> to vector<8xf32>
    %285 = vector.shape_cast %284 : vector<8xf32> to vector<8x1xf32>
    %286 = vector.broadcast %285 : vector<8x1xf32> to vector<8x8xf32>
    %287 = arith.subf %283, %286 : vector<8x8xf32>
    %288 = math.exp %287 : vector<8x8xf32>
    %cst_224 = arith.constant dense<0.000000e+00> : vector<8xf32>
    %289 = vector.multi_reduction <add>, %288, %cst_224 [1] : vector<8x8xf32> to vector<8xf32>
    %290 = vector.shape_cast %289 : vector<8xf32> to vector<8x1xf32>
    %291 = tpu.reciprocal %290 {approx = true} : vector<8x1xf32> -> vector<8x1xf32>
    %292 = vector.broadcast %291 : vector<8x1xf32> to vector<8x8xf32>
    %293 = arith.mulf %288, %292 : vector<8x8xf32>
    %294 = arith.truncf %293 : vector<8x8xf32> to vector<8x8xbf16>
    %295 = arith.truncf %278 : vector<8x8xf32> to vector<8x8xbf16>
    %cst_225 = arith.constant dense<0.000000e+00> : vector<8x8xf32>
    %296 = tpu.matmul %294, %295, %cst_225 {dimension_numbers = #tpu.dot_dimension_numbers<[1], [0], [0], [1], [0, 0, 1, 1], [], []>} : vector<8x8xbf16>, vector<8x8xbf16>, vector<8x8xf32> -> vector<8x8xf32>
    %297 = arith.truncf %296 : vector<8x8xf32> to vector<8x8xbf16>
    %c1_226 = arith.constant 1 : index
    %c0_227 = arith.constant 0 : index
    %c0_228 = arith.constant 0 : index
    %298 = vector.load %arg11[%c1_226, %c0_227, %c0_228] : memref<4x8x32xbf16, #tpu.memory_space<vmem>>, vector<1x8x32xbf16>
    %299 = vector.shape_cast %298 : vector<1x8x32xbf16> to vector<8x32xbf16>
    %cst_229 = arith.constant dense<0.000000e+00> : vector<8x32xf32>
    %300 = tpu.matmul %297, %299, %cst_229 {dimension_numbers = #tpu.dot_dimension_numbers<[1], [0], [0], [1], [0, 0, 1, 1], [], []>} : vector<8x8xbf16>, vector<8x32xbf16>, vector<8x32xf32> -> vector<8x32xf32>
    %301 = arith.addf %257, %300 : vector<8x32xf32>
    %c0_230 = arith.constant 0 : index
    %c2_231 = arith.constant 2 : index
    %c0_232 = arith.constant 0 : index
    %c0_233 = arith.constant 0 : index
    %302 = vector.load %arg9[%c0_230, %c2_231, %c0_232, %c0_233] : memref<3x4x32x8xbf16, #tpu.memory_space<vmem>>, vector<1x1x32x8xbf16>
    %303 = vector.shape_cast %302 : vector<1x1x32x8xbf16> to vector<32x8xbf16>
    %cst_234 = arith.constant dense<0.000000e+00> : vector<8x8xf32>
    %304 = tpu.matmul %211, %303, %cst_234 {dimension_numbers = #tpu.dot_dimension_numbers<[1], [0], [0], [1], [0, 0, 1, 1], [], []>} : vector<8x32xbf16>, vector<32x8xbf16>, vector<8x8xf32> -> vector<8x8xf32>
    %c0_235 = arith.constant 0 : index
    %c2_236 = arith.constant 2 : index
    %c0_237 = arith.constant 0 : index
    %c0_238 = arith.constant 0 : index
    %305 = vector.load %arg10[%c0_235, %c2_236, %c0_237, %c0_238] : memref<3x4x1x8xf32, #tpu.memory_space<vmem>>, vector<1x1x1x8xf32>
    %306 = vector.shape_cast %305 : vector<1x1x1x8xf32> to vector<1x8xf32>
    %307 = vector.broadcast %306 : vector<1x8xf32> to vector<8x8xf32>
    %308 = arith.addf %304, %307 : vector<8x8xf32>
    %c1_239 = arith.constant 1 : index
    %c2_240 = arith.constant 2 : index
    %c0_241 = arith.constant 0 : index
    %c0_242 = arith.constant 0 : index
    %309 = vector.load %arg9[%c1_239, %c2_240, %c0_241, %c0_242] : memref<3x4x32x8xbf16, #tpu.memory_space<vmem>>, vector<1x1x32x8xbf16>
    %310 = vector.shape_cast %309 : vector<1x1x32x8xbf16> to vector<32x8xbf16>
    %cst_243 = arith.constant dense<0.000000e+00> : vector<8x8xf32>
    %311 = tpu.matmul %212, %310, %cst_243 {dimension_numbers = #tpu.dot_dimension_numbers<[1], [0], [0], [1], [0, 0, 1, 1], [], []>} : vector<8x32xbf16>, vector<32x8xbf16>, vector<8x8xf32> -> vector<8x8xf32>
    %c1_244 = arith.constant 1 : index
    %c2_245 = arith.constant 2 : index
    %c0_246 = arith.constant 0 : index
    %c0_247 = arith.constant 0 : index
    %312 = vector.load %arg10[%c1_244, %c2_245, %c0_246, %c0_247] : memref<3x4x1x8xf32, #tpu.memory_space<vmem>>, vector<1x1x1x8xf32>
    %313 = vector.shape_cast %312 : vector<1x1x1x8xf32> to vector<1x8xf32>
    %314 = vector.broadcast %313 : vector<1x8xf32> to vector<8x8xf32>
    %315 = arith.addf %311, %314 : vector<8x8xf32>
    %c2_248 = arith.constant 2 : index
    %c2_249 = arith.constant 2 : index
    %c0_250 = arith.constant 0 : index
    %c0_251 = arith.constant 0 : index
    %316 = vector.load %arg9[%c2_248, %c2_249, %c0_250, %c0_251] : memref<3x4x32x8xbf16, #tpu.memory_space<vmem>>, vector<1x1x32x8xbf16>
    %317 = vector.shape_cast %316 : vector<1x1x32x8xbf16> to vector<32x8xbf16>
    %cst_252 = arith.constant dense<0.000000e+00> : vector<8x8xf32>
    %318 = tpu.matmul %212, %317, %cst_252 {dimension_numbers = #tpu.dot_dimension_numbers<[1], [0], [0], [1], [0, 0, 1, 1], [], []>} : vector<8x32xbf16>, vector<32x8xbf16>, vector<8x8xf32> -> vector<8x8xf32>
    %c2_253 = arith.constant 2 : index
    %c2_254 = arith.constant 2 : index
    %c0_255 = arith.constant 0 : index
    %c0_256 = arith.constant 0 : index
    %319 = vector.load %arg10[%c2_253, %c2_254, %c0_255, %c0_256] : memref<3x4x1x8xf32, #tpu.memory_space<vmem>>, vector<1x1x1x8xf32>
    %320 = vector.shape_cast %319 : vector<1x1x1x8xf32> to vector<1x8xf32>
    %321 = vector.broadcast %320 : vector<1x8xf32> to vector<8x8xf32>
    %322 = arith.addf %318, %321 : vector<8x8xf32>
    %323 = arith.truncf %308 : vector<8x8xf32> to vector<8x8xbf16>
    %324 = arith.truncf %315 : vector<8x8xf32> to vector<8x8xbf16>
    %cst_257 = arith.constant dense<0.000000e+00> : vector<8x8xf32>
    %325 = tpu.matmul %323, %324, %cst_257 {dimension_numbers = #tpu.dot_dimension_numbers<[1], [1], [0], [0], [0, 0, 1, 0], [], []>} : vector<8x8xbf16>, vector<8x8xbf16>, vector<8x8xf32> -> vector<8x8xf32>
    %cst_258 = arith.constant 0.353553385 : f32
    %326 = vector.broadcast %cst_258 : f32 to vector<8x8xf32>
    %327 = arith.mulf %325, %326 : vector<8x8xf32>
    %cst_259 = arith.constant dense<0xFF800000> : vector<8xf32>
    %328 = vector.multi_reduction <maximumf>, %327, %cst_259 [1] : vector<8x8xf32> to vector<8xf32>
    %329 = vector.shape_cast %328 : vector<8xf32> to vector<8x1xf32>
    %330 = vector.broadcast %329 : vector<8x1xf32> to vector<8x8xf32>
    %331 = arith.subf %327, %330 : vector<8x8xf32>
    %332 = math.exp %331 : vector<8x8xf32>
    %cst_260 = arith.constant dense<0.000000e+00> : vector<8xf32>
    %333 = vector.multi_reduction <add>, %332, %cst_260 [1] : vector<8x8xf32> to vector<8xf32>
    %334 = vector.shape_cast %333 : vector<8xf32> to vector<8x1xf32>
    %335 = tpu.reciprocal %334 {approx = true} : vector<8x1xf32> -> vector<8x1xf32>
    %336 = vector.broadcast %335 : vector<8x1xf32> to vector<8x8xf32>
    %337 = arith.mulf %332, %336 : vector<8x8xf32>
    %338 = arith.truncf %337 : vector<8x8xf32> to vector<8x8xbf16>
    %339 = arith.truncf %322 : vector<8x8xf32> to vector<8x8xbf16>
    %cst_261 = arith.constant dense<0.000000e+00> : vector<8x8xf32>
    %340 = tpu.matmul %338, %339, %cst_261 {dimension_numbers = #tpu.dot_dimension_numbers<[1], [0], [0], [1], [0, 0, 1, 1], [], []>} : vector<8x8xbf16>, vector<8x8xbf16>, vector<8x8xf32> -> vector<8x8xf32>
    %341 = arith.truncf %340 : vector<8x8xf32> to vector<8x8xbf16>
    %c2_262 = arith.constant 2 : index
    %c0_263 = arith.constant 0 : index
    %c0_264 = arith.constant 0 : index
    %342 = vector.load %arg11[%c2_262, %c0_263, %c0_264] : memref<4x8x32xbf16, #tpu.memory_space<vmem>>, vector<1x8x32xbf16>
    %343 = vector.shape_cast %342 : vector<1x8x32xbf16> to vector<8x32xbf16>
    %cst_265 = arith.constant dense<0.000000e+00> : vector<8x32xf32>
    %344 = tpu.matmul %341, %343, %cst_265 {dimension_numbers = #tpu.dot_dimension_numbers<[1], [0], [0], [1], [0, 0, 1, 1], [], []>} : vector<8x8xbf16>, vector<8x32xbf16>, vector<8x32xf32> -> vector<8x32xf32>
    %345 = arith.addf %301, %344 : vector<8x32xf32>
    %c0_266 = arith.constant 0 : index
    %c3_267 = arith.constant 3 : index
    %c0_268 = arith.constant 0 : index
    %c0_269 = arith.constant 0 : index
    %346 = vector.load %arg9[%c0_266, %c3_267, %c0_268, %c0_269] : memref<3x4x32x8xbf16, #tpu.memory_space<vmem>>, vector<1x1x32x8xbf16>
    %347 = vector.shape_cast %346 : vector<1x1x32x8xbf16> to vector<32x8xbf16>
    %cst_270 = arith.constant dense<0.000000e+00> : vector<8x8xf32>
    %348 = tpu.matmul %211, %347, %cst_270 {dimension_numbers = #tpu.dot_dimension_numbers<[1], [0], [0], [1], [0, 0, 1, 1], [], []>} : vector<8x32xbf16>, vector<32x8xbf16>, vector<8x8xf32> -> vector<8x8xf32>
    %c0_271 = arith.constant 0 : index
    %c3_272 = arith.constant 3 : index
    %c0_273 = arith.constant 0 : index
    %c0_274 = arith.constant 0 : index
    %349 = vector.load %arg10[%c0_271, %c3_272, %c0_273, %c0_274] : memref<3x4x1x8xf32, #tpu.memory_space<vmem>>, vector<1x1x1x8xf32>
    %350 = vector.shape_cast %349 : vector<1x1x1x8xf32> to vector<1x8xf32>
    %351 = vector.broadcast %350 : vector<1x8xf32> to vector<8x8xf32>
    %352 = arith.addf %348, %351 : vector<8x8xf32>
    %c1_275 = arith.constant 1 : index
    %c3_276 = arith.constant 3 : index
    %c0_277 = arith.constant 0 : index
    %c0_278 = arith.constant 0 : index
    %353 = vector.load %arg9[%c1_275, %c3_276, %c0_277, %c0_278] : memref<3x4x32x8xbf16, #tpu.memory_space<vmem>>, vector<1x1x32x8xbf16>
    %354 = vector.shape_cast %353 : vector<1x1x32x8xbf16> to vector<32x8xbf16>
    %cst_279 = arith.constant dense<0.000000e+00> : vector<8x8xf32>
    %355 = tpu.matmul %212, %354, %cst_279 {dimension_numbers = #tpu.dot_dimension_numbers<[1], [0], [0], [1], [0, 0, 1, 1], [], []>} : vector<8x32xbf16>, vector<32x8xbf16>, vector<8x8xf32> -> vector<8x8xf32>
    %c1_280 = arith.constant 1 : index
    %c3_281 = arith.constant 3 : index
    %c0_282 = arith.constant 0 : index
    %c0_283 = arith.constant 0 : index
    %356 = vector.load %arg10[%c1_280, %c3_281, %c0_282, %c0_283] : memref<3x4x1x8xf32, #tpu.memory_space<vmem>>, vector<1x1x1x8xf32>
    %357 = vector.shape_cast %356 : vector<1x1x1x8xf32> to vector<1x8xf32>
    %358 = vector.broadcast %357 : vector<1x8xf32> to vector<8x8xf32>
    %359 = arith.addf %355, %358 : vector<8x8xf32>
    %c2_284 = arith.constant 2 : index
    %c3_285 = arith.constant 3 : index
    %c0_286 = arith.constant 0 : index
    %c0_287 = arith.constant 0 : index
    %360 = vector.load %arg9[%c2_284, %c3_285, %c0_286, %c0_287] : memref<3x4x32x8xbf16, #tpu.memory_space<vmem>>, vector<1x1x32x8xbf16>
    %361 = vector.shape_cast %360 : vector<1x1x32x8xbf16> to vector<32x8xbf16>
    %cst_288 = arith.constant dense<0.000000e+00> : vector<8x8xf32>
    %362 = tpu.matmul %212, %361, %cst_288 {dimension_numbers = #tpu.dot_dimension_numbers<[1], [0], [0], [1], [0, 0, 1, 1], [], []>} : vector<8x32xbf16>, vector<32x8xbf16>, vector<8x8xf32> -> vector<8x8xf32>
    %c2_289 = arith.constant 2 : index
    %c3_290 = arith.constant 3 : index
    %c0_291 = arith.constant 0 : index
    %c0_292 = arith.constant 0 : index
    %363 = vector.load %arg10[%c2_289, %c3_290, %c0_291, %c0_292] : memref<3x4x1x8xf32, #tpu.memory_space<vmem>>, vector<1x1x1x8xf32>
    %364 = vector.shape_cast %363 : vector<1x1x1x8xf32> to vector<1x8xf32>
    %365 = vector.broadcast %364 : vector<1x8xf32> to vector<8x8xf32>
    %366 = arith.addf %362, %365 : vector<8x8xf32>
    %367 = arith.truncf %352 : vector<8x8xf32> to vector<8x8xbf16>
    %368 = arith.truncf %359 : vector<8x8xf32> to vector<8x8xbf16>
    %cst_293 = arith.constant dense<0.000000e+00> : vector<8x8xf32>
    %369 = tpu.matmul %367, %368, %cst_293 {dimension_numbers = #tpu.dot_dimension_numbers<[1], [1], [0], [0], [0, 0, 1, 0], [], []>} : vector<8x8xbf16>, vector<8x8xbf16>, vector<8x8xf32> -> vector<8x8xf32>
    %cst_294 = arith.constant 0.353553385 : f32
    %370 = vector.broadcast %cst_294 : f32 to vector<8x8xf32>
    %371 = arith.mulf %369, %370 : vector<8x8xf32>
    %cst_295 = arith.constant dense<0xFF800000> : vector<8xf32>
    %372 = vector.multi_reduction <maximumf>, %371, %cst_295 [1] : vector<8x8xf32> to vector<8xf32>
    %373 = vector.shape_cast %372 : vector<8xf32> to vector<8x1xf32>
    %374 = vector.broadcast %373 : vector<8x1xf32> to vector<8x8xf32>
    %375 = arith.subf %371, %374 : vector<8x8xf32>
    %376 = math.exp %375 : vector<8x8xf32>
    %cst_296 = arith.constant dense<0.000000e+00> : vector<8xf32>
    %377 = vector.multi_reduction <add>, %376, %cst_296 [1] : vector<8x8xf32> to vector<8xf32>
    %378 = vector.shape_cast %377 : vector<8xf32> to vector<8x1xf32>
    %379 = tpu.reciprocal %378 {approx = true} : vector<8x1xf32> -> vector<8x1xf32>
    %380 = vector.broadcast %379 : vector<8x1xf32> to vector<8x8xf32>
    %381 = arith.mulf %376, %380 : vector<8x8xf32>
    %382 = arith.truncf %381 : vector<8x8xf32> to vector<8x8xbf16>
    %383 = arith.truncf %366 : vector<8x8xf32> to vector<8x8xbf16>
    %cst_297 = arith.constant dense<0.000000e+00> : vector<8x8xf32>
    %384 = tpu.matmul %382, %383, %cst_297 {dimension_numbers = #tpu.dot_dimension_numbers<[1], [0], [0], [1], [0, 0, 1, 1], [], []>} : vector<8x8xbf16>, vector<8x8xbf16>, vector<8x8xf32> -> vector<8x8xf32>
    %385 = arith.truncf %384 : vector<8x8xf32> to vector<8x8xbf16>
    %c3_298 = arith.constant 3 : index
    %c0_299 = arith.constant 0 : index
    %c0_300 = arith.constant 0 : index
    %386 = vector.load %arg11[%c3_298, %c0_299, %c0_300] : memref<4x8x32xbf16, #tpu.memory_space<vmem>>, vector<1x8x32xbf16>
    %387 = vector.shape_cast %386 : vector<1x8x32xbf16> to vector<8x32xbf16>
    %cst_301 = arith.constant dense<0.000000e+00> : vector<8x32xf32>
    %388 = tpu.matmul %385, %387, %cst_301 {dimension_numbers = #tpu.dot_dimension_numbers<[1], [0], [0], [1], [0, 0, 1, 1], [], []>} : vector<8x8xbf16>, vector<8x32xbf16>, vector<8x32xf32> -> vector<8x32xf32>
    %389 = arith.addf %345, %388 : vector<8x32xf32>
    %c0_302 = arith.constant 0 : index
    %c0_303 = arith.constant 0 : index
    %390 = vector.load %arg12[%c0_302, %c0_303] : memref<1x32xf32, #tpu.memory_space<vmem>>, vector<1x32xf32>
    %391 = vector.broadcast %390 : vector<1x32xf32> to vector<8x32xf32>
    %392 = arith.addf %389, %391 : vector<8x32xf32>
    %393 = arith.addf %392, %210 : vector<8x32xf32>
    %cst_304 = arith.constant dense<0.000000e+00> : vector<8xf32>
    %394 = vector.multi_reduction <add>, %393, %cst_304 [1] : vector<8x32xf32> to vector<8xf32>
    %395 = vector.shape_cast %394 : vector<8xf32> to vector<8x1xf32>
    %cst_305 = arith.constant 3.200000e+01 : f32
    %396 = vector.broadcast %cst_305 : f32 to vector<8x1xf32>
    %397 = arith.divf %395, %396 : vector<8x1xf32>
    %398 = vector.broadcast %397 : vector<8x1xf32> to vector<8x32xf32>
    %399 = arith.subf %393, %398 : vector<8x32xf32>
    %400 = arith.mulf %399, %399 : vector<8x32xf32>
    %cst_306 = arith.constant dense<0.000000e+00> : vector<8xf32>
    %401 = vector.multi_reduction <add>, %400, %cst_306 [1] : vector<8x32xf32> to vector<8xf32>
    %402 = vector.shape_cast %401 : vector<8xf32> to vector<8x1xf32>
    %cst_307 = arith.constant 3.200000e+01 : f32
    %403 = vector.broadcast %cst_307 : f32 to vector<8x1xf32>
    %404 = arith.divf %402, %403 : vector<8x1xf32>
    %405 = vector.broadcast %397 : vector<8x1xf32> to vector<8x32xf32>
    %406 = arith.subf %393, %405 : vector<8x32xf32>
    %cst_308 = arith.constant 9.99999974E-6 : f32
    %407 = vector.broadcast %cst_308 : f32 to vector<8x1xf32>
    %408 = arith.addf %404, %407 : vector<8x1xf32>
    %409 = math.rsqrt %408 : vector<8x1xf32>
    %410 = vector.broadcast %409 : vector<8x1xf32> to vector<8x32xf32>
    %411 = arith.mulf %406, %410 : vector<8x32xf32>
    %c0_309 = arith.constant 0 : index
    %c0_310 = arith.constant 0 : index
    %412 = vector.load %arg13[%c0_309, %c0_310] : memref<1x32xf32, #tpu.memory_space<vmem>>, vector<1x32xf32>
    %413 = vector.broadcast %412 : vector<1x32xf32> to vector<8x32xf32>
    %414 = arith.mulf %411, %413 : vector<8x32xf32>
    %c0_311 = arith.constant 0 : index
    %c0_312 = arith.constant 0 : index
    %415 = vector.load %arg14[%c0_311, %c0_312] : memref<1x32xf32, #tpu.memory_space<vmem>>, vector<1x32xf32>
    %416 = vector.broadcast %415 : vector<1x32xf32> to vector<8x32xf32>
    %417 = arith.addf %414, %416 : vector<8x32xf32>
    %418 = arith.truncf %417 : vector<8x32xf32> to vector<8x32xbf16>
    %c0_313 = arith.constant 0 : index
    %c0_314 = arith.constant 0 : index
    %419 = vector.load %arg15[%c0_313, %c0_314] : memref<32x2048xbf16, #tpu.memory_space<vmem>>, vector<32x2048xbf16>
    %cst_315 = arith.constant dense<0.000000e+00> : vector<8x2048xf32>
    %420 = tpu.matmul %418, %419, %cst_315 {dimension_numbers = #tpu.dot_dimension_numbers<[1], [0], [0], [1], [0, 0, 1, 1], [], []>} : vector<8x32xbf16>, vector<32x2048xbf16>, vector<8x2048xf32> -> vector<8x2048xf32>
    %c0_316 = arith.constant 0 : index
    %c0_317 = arith.constant 0 : index
    %421 = vector.load %arg16[%c0_316, %c0_317] : memref<1x2048xf32, #tpu.memory_space<vmem>>, vector<1x2048xf32>
    %422 = vector.broadcast %421 : vector<1x2048xf32> to vector<8x2048xf32>
    %423 = arith.addf %420, %422 : vector<8x2048xf32>
    %cst_318 = arith.constant 0.000000e+00 : f32
    %424 = vector.broadcast %cst_318 : f32 to vector<8x2048xf32>
    %425 = arith.maximumf %423, %424 : vector<8x2048xf32>
    %426 = arith.truncf %425 : vector<8x2048xf32> to vector<8x2048xbf16>
    %c0_319 = arith.constant 0 : index
    %c0_320 = arith.constant 0 : index
    %427 = vector.load %arg17[%c0_319, %c0_320] : memref<2048x32xbf16, #tpu.memory_space<vmem>>, vector<2048x32xbf16>
    %cst_321 = arith.constant dense<0.000000e+00> : vector<8x32xf32>
    %428 = tpu.matmul %426, %427, %cst_321 {dimension_numbers = #tpu.dot_dimension_numbers<[1], [0], [0], [1], [0, 0, 1, 1], [], []>} : vector<8x2048xbf16>, vector<2048x32xbf16>, vector<8x32xf32> -> vector<8x32xf32>
    %c0_322 = arith.constant 0 : index
    %c0_323 = arith.constant 0 : index
    %429 = vector.load %arg18[%c0_322, %c0_323] : memref<1x32xf32, #tpu.memory_space<vmem>>, vector<1x32xf32>
    %430 = vector.broadcast %429 : vector<1x32xf32> to vector<8x32xf32>
    %431 = arith.addf %428, %430 : vector<8x32xf32>
    %432 = arith.addf %431, %417 : vector<8x32xf32>
    %cst_324 = arith.constant dense<0.000000e+00> : vector<8xf32>
    %433 = vector.multi_reduction <add>, %432, %cst_324 [1] : vector<8x32xf32> to vector<8xf32>
    %434 = vector.shape_cast %433 : vector<8xf32> to vector<8x1xf32>
    %cst_325 = arith.constant 3.200000e+01 : f32
    %435 = vector.broadcast %cst_325 : f32 to vector<8x1xf32>
    %436 = arith.divf %434, %435 : vector<8x1xf32>
    %437 = vector.broadcast %436 : vector<8x1xf32> to vector<8x32xf32>
    %438 = arith.subf %432, %437 : vector<8x32xf32>
    %439 = arith.mulf %438, %438 : vector<8x32xf32>
    %cst_326 = arith.constant dense<0.000000e+00> : vector<8xf32>
    %440 = vector.multi_reduction <add>, %439, %cst_326 [1] : vector<8x32xf32> to vector<8xf32>
    %441 = vector.shape_cast %440 : vector<8xf32> to vector<8x1xf32>
    %cst_327 = arith.constant 3.200000e+01 : f32
    %442 = vector.broadcast %cst_327 : f32 to vector<8x1xf32>
    %443 = arith.divf %441, %442 : vector<8x1xf32>
    %444 = vector.broadcast %436 : vector<8x1xf32> to vector<8x32xf32>
    %445 = arith.subf %432, %444 : vector<8x32xf32>
    %cst_328 = arith.constant 9.99999974E-6 : f32
    %446 = vector.broadcast %cst_328 : f32 to vector<8x1xf32>
    %447 = arith.addf %443, %446 : vector<8x1xf32>
    %448 = math.rsqrt %447 : vector<8x1xf32>
    %449 = vector.broadcast %448 : vector<8x1xf32> to vector<8x32xf32>
    %450 = arith.mulf %445, %449 : vector<8x32xf32>
    %c0_329 = arith.constant 0 : index
    %c0_330 = arith.constant 0 : index
    %451 = vector.load %arg19[%c0_329, %c0_330] : memref<1x32xf32, #tpu.memory_space<vmem>>, vector<1x32xf32>
    %452 = vector.broadcast %451 : vector<1x32xf32> to vector<8x32xf32>
    %453 = arith.mulf %450, %452 : vector<8x32xf32>
    %c0_331 = arith.constant 0 : index
    %c0_332 = arith.constant 0 : index
    %454 = vector.load %arg20[%c0_331, %c0_332] : memref<1x32xf32, #tpu.memory_space<vmem>>, vector<1x32xf32>
    %455 = vector.broadcast %454 : vector<1x32xf32> to vector<8x32xf32>
    %456 = arith.addf %453, %455 : vector<8x32xf32>
    %c0_333 = arith.constant 0 : index
    %c0_334 = arith.constant 0 : index
    %c0_335 = arith.constant 0 : index
    %457 = vector.load %arg21[%c0_333, %c0_334, %c0_335] : memref<1x8x32xf32, #tpu.memory_space<vmem>>, vector<1x8x32xf32>
    %458 = vector.shape_cast %457 : vector<1x8x32xf32> to vector<8x32xf32>
    %459 = vector.shape_cast %456 : vector<8x32xf32> to vector<1x8x32xf32>
    tpu.vector_store %arg21[%c0_333, %c0_334, %c0_335], %459 {strides = array<i32>} : memref<1x8x32xf32, #tpu.memory_space<vmem>>, vector<1x8x32xf32>,
    return
  }
  func.func @transform_0(%arg0: i32) -> (i32, i32, i32) {
    %c0_i32 = arith.constant 0 : i32
    %c0_i32_0 = arith.constant 0 : i32
    %c0_i32_1 = arith.constant 0 : i32
    return %arg0, %c0_i32, %c0_i32_0 : i32, i32, i32
  }
  func.func @transform_1(%arg0: i32) -> (i32, i32, i32) {
    %c0_i32 = arith.constant 0 : i32
    %c0_i32_0 = arith.constant 0 : i32
    %c0_i32_1 = arith.constant 0 : i32
    return %arg0, %c0_i32, %c0_i32_0 : i32, i32, i32
  }
  func.func @transform_2(%arg0: i32) -> (i32, i32, i32, i32) {
    %c0_i32 = arith.constant 0 : i32
    %c0_i32_0 = arith.constant 0 : i32
    %c0_i32_1 = arith.constant 0 : i32
    %c0_i32_2 = arith.constant 0 : i32
    %c0_i32_3 = arith.constant 0 : i32
    return %c0_i32, %c0_i32_0, %c0_i32_1, %c0_i32_2 : i32, i32, i32, i32
  }
  func.func @transform_3(%arg0: i32) -> (i32, i32, i32, i32) {
    %c0_i32 = arith.constant 0 : i32
    %c0_i32_0 = arith.constant 0 : i32
    %c0_i32_1 = arith.constant 0 : i32
    %c0_i32_2 = arith.constant 0 : i32
    %c0_i32_3 = arith.constant 0 : i32
    return %c0_i32, %c0_i32_0, %c0_i32_1, %c0_i32_2 : i32, i32, i32, i32
  }
  func.func @transform_4(%arg0: i32) -> (i32, i32, i32) {
    %c0_i32 = arith.constant 0 : i32
    %c0_i32_0 = arith.constant 0 : i32
    %c0_i32_1 = arith.constant 0 : i32
    %c0_i32_2 = arith.constant 0 : i32
    return %c0_i32, %c0_i32_0, %c0_i32_1 : i32, i32, i32
  }
  func.func @transform_5(%arg0: i32) -> (i32, i32) {
    %c0_i32 = arith.constant 0 : i32
    %c0_i32_0 = arith.constant 0 : i32
    %c0_i32_1 = arith.constant 0 : i32
    return %c0_i32, %c0_i32_0 : i32, i32
  }
  func.func @transform_6(%arg0: i32) -> (i32, i32) {
    %c0_i32 = arith.constant 0 : i32
    %c0_i32_0 = arith.constant 0 : i32
    %c0_i32_1 = arith.constant 0 : i32
    return %c0_i32, %c0_i32_0 : i32, i32
  }
  func.func @transform_7(%arg0: i32) -> (i32, i32) {
    %c0_i32 = arith.constant 0 : i32
    %c0_i32_0 = arith.constant 0 : i32
    %c0_i32_1 = arith.constant 0 : i32
    return %c0_i32, %c0_i32_0 : i32, i32
  }
  func.func @transform_8(%arg0: i32) -> (i32, i32, i32, i32) {
    %c0_i32 = arith.constant 0 : i32
    %c0_i32_0 = arith.constant 0 : i32
    %c0_i32_1 = arith.constant 0 : i32
    %c0_i32_2 = arith.constant 0 : i32
    %c0_i32_3 = arith.constant 0 : i32
    return %c0_i32, %c0_i32_0, %c0_i32_1, %c0_i32_2 : i32, i32, i32, i32
  }
  func.func @transform_9(%arg0: i32) -> (i32, i32, i32, i32) {
    %c0_i32 = arith.constant 0 : i32
    %c0_i32_0 = arith.constant 0 : i32
    %c0_i32_1 = arith.constant 0 : i32
    %c0_i32_2 = arith.constant 0 : i32
    %c0_i32_3 = arith.constant 0 : i32
    return %c0_i32, %c0_i32_0, %c0_i32_1, %c0_i32_2 : i32, i32, i32, i32
  }
  func.func @transform_10(%arg0: i32) -> (i32, i32, i32) {
    %c0_i32 = arith.constant 0 : i32
    %c0_i32_0 = arith.constant 0 : i32
    %c0_i32_1 = arith.constant 0 : i32
    %c0_i32_2 = arith.constant 0 : i32
    return %c0_i32, %c0_i32_0, %c0_i32_1 : i32, i32, i32
  }
  func.func @transform_11(%arg0: i32) -> (i32, i32) {
    %c0_i32 = arith.constant 0 : i32
    %c0_i32_0 = arith.constant 0 : i32
    %c0_i32_1 = arith.constant 0 : i32
    return %c0_i32, %c0_i32_0 : i32, i32
  }
  func.func @transform_12(%arg0: i32) -> (i32, i32) {
    %c0_i32 = arith.constant 0 : i32
    %c0_i32_0 = arith.constant 0 : i32
    %c0_i32_1 = arith.constant 0 : i32
    return %c0_i32, %c0_i32_0 : i32, i32
  }
  func.func @transform_13(%arg0: i32) -> (i32, i32) {
    %c0_i32 = arith.constant 0 : i32
    %c0_i32_0 = arith.constant 0 : i32
    %c0_i32_1 = arith.constant 0 : i32
    return %c0_i32, %c0_i32_0 : i32, i32
  }
  func.func @transform_14(%arg0: i32) -> (i32, i32) {
    %c0_i32 = arith.constant 0 : i32
    %c0_i32_0 = arith.constant 0 : i32
    %c0_i32_1 = arith.constant 0 : i32
    return %c0_i32, %c0_i32_0 : i32, i32
  }
  func.func @transform_15(%arg0: i32) -> (i32, i32) {
    %c0_i32 = arith.constant 0 : i32
    %c0_i32_0 = arith.constant 0 : i32
    %c0_i32_1 = arith.constant 0 : i32
    return %c0_i32, %c0_i32_0 : i32, i32
  }
  func.func @transform_16(%arg0: i32) -> (i32, i32) {
    %c0_i32 = arith.constant 0 : i32
    %c0_i32_0 = arith.constant 0 : i32
    %c0_i32_1 = arith.constant 0 : i32
    return %c0_i32, %c0_i32_0 : i32, i32
  }
  func.func @transform_17(%arg0: i32) -> (i32, i32) {
    %c0_i32 = arith.constant 0 : i32
    %c0_i32_0 = arith.constant 0 : i32
    %c0_i32_1 = arith.constant 0 : i32
    return %c0_i32, %c0_i32_0 : i32, i32
  }
  func.func @transform_18(%arg0: i32) -> (i32, i32) {
    %c0_i32 = arith.constant 0 : i32
    %c0_i32_0 = arith.constant 0 : i32
    %c0_i32_1 = arith.constant 0 : i32
    return %c0_i32, %c0_i32_0 : i32, i32
  }
  func.func @transform_19(%arg0: i32) -> (i32, i32) {
    %c0_i32 = arith.constant 0 : i32
    %c0_i32_0 = arith.constant 0 : i32
    %c0_i32_1 = arith.constant 0 : i32
    return %c0_i32, %c0_i32_0 : i32, i32
  }
  func.func @transform_20(%arg0: i32) -> (i32, i32, i32) {
    %c0_i32 = arith.constant 0 : i32
    %c0_i32_0 = arith.constant 0 : i32
    %c0_i32_1 = arith.constant 0 : i32
    return %arg0, %c0_i32, %c0_i32_0 : i32, i32, i32
  }
}

module attributes {stable_mosaic.version = 11 : i64} {
  func.func @_linear_kernel(%arg0: i32, %arg1: i32, %arg2: i32, %arg3: memref<2x32xf32, #tpu.memory_space<vmem>>, %arg4: memref<32x16xbf16, #tpu.memory_space<vmem>>, %arg5: memref<1x16xf32, #tpu.memory_space<vmem>>, %arg6: memref<2x16xf32, #tpu.memory_space<vmem>>, %arg7: memref<2x16xf32, #tpu.memory_space<vmem>>) attributes {dimension_semantics = [#tpu.dimension_semantics<parallel>, #tpu.dimension_semantics<parallel>, #tpu.dimension_semantics<arbitrary>], iteration_bounds = array<i64: 1, 1, 1>, scalar_prefetch = 0 : i64, scratch_operands = 1 : i64, tpu.core_type = #tpu.core_type<tc>, window_params = [{transform_indices = @transform_0, window_bounds = array<i64: 2, 32>}, {transform_indices = @transform_1, window_bounds = array<i64: 32, 16>}, {transform_indices = @transform_2, window_bounds = array<i64: 1, 16>}, {transform_indices = @transform_3, window_bounds = array<i64: 2, 16>}]} {
    %c0_i32 = arith.constant 0 : i32
    %0 = arith.cmpi eq, %arg2, %c0_i32 : i32
    %1 = arith.extui %0 : i1 to i32
    %c0_i32_0 = arith.constant 0 : i32
    %2 = arith.cmpi ne, %1, %c0_i32_0 : i32
    scf.if %2 {
      %cst_10 = arith.constant 0.000000e+00 : f32
      %13 = vector.broadcast %cst_10 : f32 to vector<2x16xf32>
      %c0_11 = arith.constant 0 : index
      %c0_12 = arith.constant 0 : index
      %14 = vector.load %arg7[%c0_11, %c0_12] : memref<2x16xf32, #tpu.memory_space<vmem>>, vector<2x16xf32>
      tpu.vector_store %arg7[%c0_11, %c0_12], %13 {strides = array<i32>} : memref<2x16xf32, #tpu.memory_space<vmem>>, vector<2x16xf32>,
    } else {
    }
    %c0 = arith.constant 0 : index
    %c0_1 = arith.constant 0 : index
    %3 = vector.load %arg7[%c0, %c0_1] : memref<2x16xf32, #tpu.memory_space<vmem>>, vector<2x16xf32>
    %c0_2 = arith.constant 0 : index
    %c0_3 = arith.constant 0 : index
    %4 = vector.load %arg3[%c0_2, %c0_3] : memref<2x32xf32, #tpu.memory_space<vmem>>, vector<2x32xf32>
    %5 = arith.truncf %4 : vector<2x32xf32> to vector<2x32xbf16>
    %c0_4 = arith.constant 0 : index
    %c0_5 = arith.constant 0 : index
    %6 = vector.load %arg4[%c0_4, %c0_5] : memref<32x16xbf16, #tpu.memory_space<vmem>>, vector<32x16xbf16>
    %cst = arith.constant dense<0.000000e+00> : vector<2x16xf32>
    %7 = tpu.matmul %5, %6, %cst {dimension_numbers = #tpu.dot_dimension_numbers<[1], [0], [0], [1], [0, 0, 1, 1], [], []>} : vector<2x32xbf16>, vector<32x16xbf16>, vector<2x16xf32> -> vector<2x16xf32>
    %8 = arith.addf %3, %7 : vector<2x16xf32>
    %c0_6 = arith.constant 0 : index
    %c0_7 = arith.constant 0 : index
    %9 = vector.load %arg7[%c0_6, %c0_7] : memref<2x16xf32, #tpu.memory_space<vmem>>, vector<2x16xf32>
    tpu.vector_store %arg7[%c0_6, %c0_7], %8 {strides = array<i32>} : memref<2x16xf32, #tpu.memory_space<vmem>>, vector<2x16xf32>,
    %c0_i32_8 = arith.constant 0 : i32
    %10 = arith.cmpi eq, %arg2, %c0_i32_8 : i32
    %11 = arith.extui %10 : i1 to i32
    %c0_i32_9 = arith.constant 0 : i32
    %12 = arith.cmpi ne, %11, %c0_i32_9 : i32
    scf.if %12 {
      %c0_10 = arith.constant 0 : index
      %c0_11 = arith.constant 0 : index
      %13 = vector.load %arg7[%c0_10, %c0_11] : memref<2x16xf32, #tpu.memory_space<vmem>>, vector<2x16xf32>
      %c0_12 = arith.constant 0 : index
      %c0_13 = arith.constant 0 : index
      %14 = vector.load %arg5[%c0_12, %c0_13] : memref<1x16xf32, #tpu.memory_space<vmem>>, vector<1x16xf32>
      %15 = vector.broadcast %14 : vector<1x16xf32> to vector<2x16xf32>
      %16 = arith.addf %13, %15 : vector<2x16xf32>
      %c0_14 = arith.constant 0 : index
      %c0_15 = arith.constant 0 : index
      %17 = vector.load %arg6[%c0_14, %c0_15] : memref<2x16xf32, #tpu.memory_space<vmem>>, vector<2x16xf32>
      tpu.vector_store %arg6[%c0_14, %c0_15], %16 {strides = array<i32>} : memref<2x16xf32, #tpu.memory_space<vmem>>, vector<2x16xf32>,
    } else {
    }
    return
  }
  func.func @transform_0(%arg0: i32, %arg1: i32, %arg2: i32) -> (i32, i32) {
    %c0_i32 = arith.constant 0 : i32
    return %arg0, %arg2 : i32, i32
  }
  func.func @transform_1(%arg0: i32, %arg1: i32, %arg2: i32) -> (i32, i32) {
    %c0_i32 = arith.constant 0 : i32
    return %arg2, %arg1 : i32, i32
  }
  func.func @transform_2(%arg0: i32, %arg1: i32, %arg2: i32) -> (i32, i32) {
    %c0_i32 = arith.constant 0 : i32
    %c0_i32_0 = arith.constant 0 : i32
    return %c0_i32, %arg1 : i32, i32
  }
  func.func @transform_3(%arg0: i32, %arg1: i32, %arg2: i32) -> (i32, i32) {
    %c0_i32 = arith.constant 0 : i32
    return %arg0, %arg1 : i32, i32
  }
}

</mosaic_0001>

<bundles_post_ra>
// kernel: megatron_forward.8
= control target key start
LH: loop header
LB: loop body
LE: loop exit
PB: predicated region body
PF: predicated region fallthrough
CT: control target
= control target key end

     0   :  { %vm37_vm0 = vcmask 1043456   ;;  %v173_v0 = vmov 0.0   ;;  %vm174_vm1 = vmmov 0   ;;  %vm33_vm2 = vcmask 64512   ;;  %s240_s4 = inlined_call_operand.vmem [shape: bf16[8,32], index: 4, kind: input, shape index: {}]   ;;  %s241_s2 = inlined_call_operand.vmem [shape: bf16[16,32], index: 2, kind: input, shape index: {}]   ;;  %s242_s1 = inlined_call_operand.vmem [shape: f32[16,8], index: 1, kind: input, shape index: {}]   ;;  %s243_s0 = inlined_call_operand.vmem [shape: f32[16,16], index: 0, kind: input, shape index: {}]   ;;  %s244_s3 = inlined_call_operand.vmem [shape: f32[1,32], index: 3, kind: input, shape index: {}]   ;;  %s245_s5 = inlined_call_operand.vmem [shape: f32[1,32], index: 5, kind: input, shape index: {}]   ;;  %s246_s6 = inlined_call_operand.vmem [shape: f32[16,32], index: 6, kind: output, shape index: {}]  }
   0x1   :  { %158 = vmatprep.subr.bf16.mxu0 %v173_v0  ;;  %v32_v1 = vld [vmem:[%s240_s4] sm:$0xf]  ;;  %164 = vmatprep.subr.bf16.mxu1 %v173_v0  ;;  %v30_v5 = vld [vmem:[%s242_s1 + $0x8] sm:$0xff]  ;;  %vm88_vm3 = vcmask 130048   ;;  %v137_v10 = vlaneseq  ;;  %vm144_vm4 = vcmask 261120  }
   0x2   :  { %v39_v2 = vsel %vm37_vm0, %v32_v1, 0  ;;  %v172_v3 = vld [vmem:[%s241_s2] sm:$0xff]   ;;  %160 = vmatprep.mubr.msk.bf16.mxu0 %vm174_vm1, %v173_v0  ;;  %166 = vmatprep.mubr.msk.bf16.mxu1 %vm174_vm1, %v173_v0  ;;  %v25_v8 = vld [vmem:[%s243_s0 + $0x8] sm:$0xff] }
   0x3   :  { %v29_v4 = vld [vmem:[%s242_s1] sm:$0xff]  ;;  %159 = vmatpush3.bf16.msra.mxu0 %v39_v2  ;;  %165 = vmatpush3.bf16.msra.mxu1 %v172_v3  ;;  %v138_v11 = vshrl.u32 %v137_v10, 7 }
   0x4   :  { %v31_v6 = vpack.c.bf16 %v30_v5, %v29_v4  ;;  %v24_v7 = vld [vmem:[%s243_s0] sm:$0xff] }
   0x5   :  { %v26_v9 = vpack.c.bf16 %v25_v8, %v24_v7  ;;  %v133_v12 = vld [vmem:[%s244_s3] sm:$0x1]  ;;  %v139_v15 = vsub.s32 0, %v138_v11 }
   0x6   :  { %161 = vmatmul.mubr.msk.bf16.vlgmr.msra.gmra.mrb[0].mxu0 %vm33_vm2, %v31_v6  ;;  %v134_v13 = vld [vmem:[%s245_s5] sm:$0x1] }
   0x7   :  { %167 = vmatmul.mubr.msk.bf16.vlgmr.msra.gmra.mrb[0].mxu1 %vm88_vm3, %v26_v9  ;;  %v135_v14 = vadd.f32 %v134_v13, %v133_v12 }
   0x9   :  { %v140_v17 = vrot.slane %v135_v14, %v139_v15 }
  0xd9   :  { %v75_v16 = vpop.f32.mrb[0].mxu0 }
  0xda   :  { %v162_v18 = vpop.f32.mrb[1].mxu0  ;;  %v126_v19 = vpop.f32.mrb[0].mxu1 }
  0xdb   :  { %v127_v20 = vadd.f32 %v126_v19, %v75_v16  ;;  %v78_v21 = vpop.f32.mrb[2].mxu0  ;;  %v168_v22 = vpop.f32.mrb[1].mxu1 }
  0xdc   :  { %v163_v23 = vpop.f32.mrb[3].mxu0  ;;  %v129_v24 = vpop.f32.mrb[2].mxu1 }
  0xdd   :  { %v142_v25 = vadd.f32 %v140_v17, %v127_v20  ;;  %v130_v26 = vadd.f32 %v129_v24, %v78_v21  ;;  %v169_v27 = vpop.f32.mrb[3].mxu1 }
  0xdf   :  { %145 = vst.msk [vmem:[%s246_s6] sm:$0xff] %vm144_vm4, %v142_v25  ;;  %v143_v28 = vadd.f32 %v140_v17, %v130_v26 }
  0xe1   :  { %146 = vst.msk [vmem:[%s246_s6 + $0x8] sm:$0xff] %vm144_vm4, %v143_v28 }

// kernel: megatron_forward.11
= control target key start
LH: loop header
LB: loop body
LE: loop exit
PB: predicated region body
PF: predicated region fallthrough
CT: control target
= control target key end

     0   :  { %vm16_vm0 = vcmask 261120   ;;  %s118_s0 = inlined_call_operand.vmem [shape: f32[16,32], index: 0, kind: input, shape index: {}]   ;;  %s119_s1 = inlined_call_operand.vmem [shape: f32[1,32], index: 1, kind: input, shape index: {}]   ;;  %s120_s2 = inlined_call_operand.vmem [shape: f32[1,32], index: 2, kind: input, shape index: {}]   ;;  %s121_s3 = inlined_call_operand.vmem [shape: f32[16,32], index: 3, kind: output, shape index: {}]  }
   0x1   :  { %v14_v0 = vld [vmem:[%s118_s0] sm:$0xff]  ;;  %v15_v1 = vld [vmem:[%s118_s0 + $0x8] sm:$0xff] }
   0x2   :  { %v17_v2 = vsel %vm16_vm0, %v14_v0, 0.0  ;;  %v20_v3 = vsel %vm16_vm0, %v15_v1, 0.0  ;;  %v68_v21 = vld [vmem:[%s119_s1] ss:$0 sm:$0xff] }
   0x3   :  { %18 = vadd.xlane.f32.xlu0 %v17_v2  ;;  %v69_v23 = vld [vmem:[%s120_s2] ss:$0 sm:$0xff] }
   0x7   :  { %21 = vadd.xlane.f32.xlu0 %v20_v3 }
  0x90   :  { %v19_v4 = vpop.xlane.xlu0 %18 }
  0x91   :  { %v24_v5 = vmul.f32 0.03125, %v19_v4 }
  0x93   :  { %v26_v6 = vsub.f32 %v14_v0, %v24_v5 }
  0x94   :  { %v22_v7 = vpop.xlane.xlu0 %21 }
  0x95   :  { %v25_v8 = vmul.f32 0.03125, %v22_v7  ;;  %v28_v9 = vmul.f32 %v26_v6, %v26_v6 }
  0x97   :  { %v27_v10 = vsub.f32 %v15_v1, %v25_v8  ;;  %v30_v11 = vsel %vm16_vm0, %v28_v9, 0.0 }
  0x98   :  { %31 = vadd.xlane.f32.xlu1 %v30_v11 }
  0x99   :  { %v29_v12 = vmul.f32 %v27_v10, %v27_v10 }
  0x9b   :  { %v33_v13 = vsel %vm16_vm0, %v29_v12, 0.0 }
  0x9c   :  { %34 = vadd.xlane.f32.xlu1 %v33_v13 }
 0x125   :  { %v32_v14 = vpop.xlane.xlu1 %31 }
 0x126   :  { %v36_v15 = vmul.f32 0.03125, %v32_v14 }
 0x128   :  { %v38_v16 = vadd.f32 1e-05, %v36_v15 }
 0x129   :  { %v35_v17 = vpop.xlane.xlu1 %34 }
 0x12a   :  { %70 = vrsqrt.f32 %v38_v16  ;;  %v37_v18 = vmul.f32 0.03125, %v35_v17 }
 0x12c   :  { %v39_v19 = vadd.f32 1e-05, %v37_v18 }
 0x12e   :  { %72 = vrsqrt.f32 %v39_v19 }
 0x134   :  { %v71_v20 = vpop.eup %70 }
 0x135   :  { %v42_v22 = vmul.f32 %v71_v20, %v26_v6 }
 0x137   :  { %v51_v24 = vmul.f32 %v68_v21, %v42_v22 }
 0x138   :  { %v73_v25 = vpop.eup %72 }
 0x139   :  { %v60_v26 = vadd.f32 %v69_v23, %v51_v24  ;;  %v43_v27 = vmul.f32 %v73_v25, %v27_v10 }
 0x13b   :  { %62 = vst.msk [vmem:[%s121_s3] sm:$0xff] %vm16_vm0, %v60_v26  ;;  %v52_v28 = vmul.f32 %v68_v21, %v43_v27 }
 0x13d   :  { %v61_v29 = vadd.f32 %v69_v23, %v52_v28 }
 0x13f   :  { %63 = vst.msk [vmem:[%s121_s3 + $0x8] sm:$0xff] %vm16_vm0, %v61_v29 }

// kernel: megatron_forward.15
= control target key start
LH: loop header
LB: loop body
LE: loop exit
PB: predicated region body
PF: predicated region fallthrough
CT: control target
= control target key end

     0   :  { %v159_v1 = vmov 0.0   ;;  %vm160_vm0 = vmmov 0   ;;  %vm20_vm1 = vcmask 123904   ;;  %s209_s0 = inlined_call_operand.vmem [shape: f32[2,32], index: 0, kind: input, shape index: {}]   ;;  %s210_s1 = inlined_call_operand.vmem [shape: bf16[32,16], index: 1, kind: input, shape index: {}]   ;;  %s211_s2 = inlined_call_operand.vmem [shape: f32[1,16], index: 2, kind: input, shape index: {}]   ;;  %s212_s3 = inlined_call_operand.hbm [shape: f32[2,16], index: 3, kind: output, shape index: {}]  }
   0x1   :  { %v133_v0 = vld [vmem:[%s210_s1] sm:$0xff]   ;;  %122 = vmatprep.subr.bf16.mxu0 %v159_v1  ;;  %v134_v2 = vld [vmem:[%s210_s1 + $0x8] sm:$0xff]   ;;  %126 = vmatprep.mubr.msk.bf16.mxu0 %vm160_vm0, %v159_v1 }
   0x2   :  { %123 = vmatpush3.bf16.msra.mxu0 %v133_v0  ;;  %v23_v3 = vld [vmem:[%s209_s0] sm:$0x3] }
   0x3   :  { %8 = vsyncpa [#allocation4], 0  ;;  %124 = vmatprep.subr.bf16.mxu0 %v159_v1  ;;  %21 = vst.msk [vmem:[#allocation2] sm:$0x3] %vm20_vm1, %v159_v1  ;;  %v24_v4 = vpack.c.bf16 %v23_v3, %v23_v3  ;;  %vm41_vm2 = vcmask 261120   ;;  %s161_s0 = smov [#allocation3]  }
   0x4   :  { %v118_v11 = vld [vmem:[%s211_s2] ss:$0 sm:$0xff]  ;;  %s107_s19 = sshll.u32 %s161_s0, 4  ;;  %s108_s19 = int_to_ptr.vmem [resolvable:$true] %s107_s19 }
   0x5   :  { %s135_s20 = scalar_lea.vmem %s108_s19, 32  ;;  %p140_p1 = scmp.lt.s32.totalorder %s108_s19, %s108_s19 }
   0x6   :  { %125 = vmatpush3.bf16.msra.mxu0 %v134_v2  ;;  %p136_p0 = scmp.ne.s32.totalorder %s108_s19, %s135_s20  ;;  %p141_p2 = scmp.lt.s32.totalorder %s135_s20, %s135_s20 }
   0x8   :  { %p142_p3 = por %p141_p2, %p140_p1 }
   0x9   :  { %127 = vmatmul.mubr.msk.bf16.vlgmr.msra.gmra.mrb[0].mxu0 %vm41_vm2, %v24_v4 }
   0xa   :  { %v22_v5 = vld [vmem:[#allocation2] sm:$0x3]  ;;  %p143_p4 = pnand %p142_p3, %p136_p0 }
  0xdc   :  { %v79_v6 = vpop.f32.mrb[0].mxu0 }
  0xdd   :  { %v85_v7 = vadd.f32 %v79_v6, %v22_v5  ;;  %v128_v8 = vpop.f32.mrb[1].mxu0 }
  0xde   :  { %v82_v9 = vpop.f32.mrb[2].mxu0 }
  0xdf   :  { %87 = vst.msk [vmem:[#allocation2] sm:$0x3] %vm20_vm1, %v85_v7  ;;  %v129_v10 = vpop.f32.mrb[3].mxu0 }
  0xe6   :  { %v91_v12 = vld [vmem:[#allocation2] sm:$0x3] }
  0xe7   :  { %v99_v13 = vadd.f32 %v118_v11, %v91_v12 }
  0xe9   :  { %100 = vst.msk [vmem:[#allocation3] sm:$0x3] %vm20_vm1, %v99_v13 }
  0xea   :  { %146 = shalt.err (!%p143_p4)
}
  0xeb   :  { %s147_s23 = scalar_lea.hbm %s212_s3, 32 }
  0xec   :  { %p148_p5 = scmp.ne.s32.totalorder %s212_s3, %s147_s23  ;;  %p151_p6 = scmp.lt.u32.totalorder %s147_s23, %s212_s3 }
  0xee   :  { %p153_p7 = pnand %p151_p6, %p148_p5 }
  0xf0   :  { %156 = shalt.err (!%p153_p7)
}
  0xf1   :  { %110 = dma.vmem_to_hbm [thread:$0]  %s108_s19, 32, %s212_s3, [#allocation4]  }
  0xf2   :  { %157 = dma.done.wait [#allocation4], 32  }
  0xf3   :  { %158 = vsyncadd [#allocation4], 4294967264 }
  0xf4   :  { %114 = vsyncpa [#allocation4], 1 }

// kernel: megatron_forward.9
= control target key start
LH: loop header
LB: loop body
LE: loop exit
PB: predicated region body
PF: predicated region fallthrough
CT: control target
= control target key end

     0   :  { %s4936_s25 = smov 0   ;;  %s5853_s0 = inlined_call_operand.vmem [shape: f32[2,8,32], index: 0, kind: input, shape index: {}]   ;;  %s5854_s1 = inlined_call_operand.vmem [shape: bf16[3,4,32,8], index: 1, kind: input, shape index: {}]   ;;  %s5855_s2 = inlined_call_operand.vmem [shape: f32[3,4,1,8], index: 2, kind: input, shape index: {}]   ;;  %s5856_s3 = inlined_call_operand.vmem [shape: bf16[4,8,32], index: 3, kind: input, shape index: {}]   ;;  %s5857_s4 = inlined_call_operand.vmem [shape: f32[1,32], index: 4, kind: input, shape index: {}]   ;;  %s5858_s5 = inlined_call_operand.vmem [shape: f32[1,32], index: 5, kind: input, shape index: {}]   ;;  %s5859_s6 = inlined_call_operand.vmem [shape: f32[1,32], index: 6, kind: input, shape index: {}]   ;;  %s5860_s7 = inlined_call_operand.vmem [shape: bf16[32,2048], index: 7, kind: input, shape index: {}]   ;;  %s5861_s8 = inlined_call_operand.vmem [shape: f32[1,2048], index: 8, kind: input, shape index: {}]   ;;  %s5862_s9 = inlined_call_operand.vmem [shape: bf16[2048,32], index: 9, kind: input, shape index: {}]   ;;  %s5863_s10 = inlined_call_operand.vmem [shape: f32[1,32], index: 10, kind: input, shape index: {}]   ;;  %s5864_s11 = inlined_call_operand.vmem [shape: f32[1,32], index: 11, kind: input, shape index: {}]   ;;  %s5865_s12 = inlined_call_operand.vmem [shape: f32[1,32], index: 12, kind: input, shape index: {}]   ;;  %s5866_s13 = inlined_call_operand.vmem [shape: f32[2,8,32], index: 13, kind: output, shape index: {}]  }
   0x1 LB: > { %s3966_s26 = sadd.s32 4294967295, %s4861_s25   ;;  %p3970_p0 = scmp.ge.s32.totalorder %s4861_s25, 1  ;;  %s4861_s25 = sphi %s4936_s25, %s23_s25  }
   0x2   : > { %p386_p1 = scmp.lt.s32.totalorder %s4861_s25, 3 }
   0x4   : > { %p387_p2 = pnand %p3970_p0, %p386_p1 }
   0x5   : > { %v4682_v0 = vld [vmem:[%s5854_s1 + $0x40] sm:$0xff] (!%p387_p2)   ;;  %v4863_v1 = vmov (!%p387_p2), 0.0   ;;  %v4683_v2 = vld [vmem:[%s5854_s1 + $0x48] sm:$0xff] (!%p387_p2)   ;;  %vm4864_vm0 = vmmov (!%p387_p2), 0   ;;  %p428_p3 = scmp.lt.s32.totalorder (!%p387_p2), %s3966_s26, 1  ;;  %vm462_vm1 = vcmask (!%p387_p2), 261120  }
   0x6   : > { %390 = sbr.rel (%p387_p2) target bundleno = 5077 (0x13d5), region = 72  ;;  %4511 = vmatprep.subr.bf16.mxu1 (!%p387_p2), %v4863_v1  ;;  %4503 = vmatprep.subr.bf16.mxu0 (!%p387_p2), %v4863_v1  ;;  %v4684_v3 = vld [vmem:[%s5854_s1] sm:$0xff] (!%p387_p2)   ;;  %v4685_v4 = vld [vmem:[%s5854_s1 + $0x8] sm:$0xff] (!%p387_p2)   ;;  %vm638_vm2 = vcmask (!%p387_p2), 64512   ;;  %vm702_vm3 = vcmask (!%p387_p2), 1043456   ;;  %v4690_v43 = vld [vmem:[%s5854_s1 + $0x10] sm:$0xff] (!%p387_p2)  }
   0x7   : > { %4512 = vmatpush3.bf16.msra.mxu1 (!%p387_p2), %v4682_v0  ;;  %4515 = vmatprep.mubr.msk.bf16.mxu1 (!%p387_p2), %vm4864_vm0, %v4863_v1  ;;  %v3982_v7 = vld [vmem:[%s5855_s2 + $0x4] ss:$0 sm:$0xff] (!%p387_p2)  ;;  %v3973_v14 = vld [vmem:[%s5855_s2] ss:$0 sm:$0xff] (!%p387_p2)  ;;  %v4687_v23 = vld [vmem:[%s5854_s1 + $0x88] sm:$0xff] (!%p387_p2)  }
   0x8   : > { %4513 = vmatprep.subr.bf16.mxu1 (!%p387_p2), %v4863_v1  ;;  %4507 = vmatprep.mubr.msk.bf16.mxu0 (!%p387_p2), %vm4864_vm0, %v4863_v1  ;;  %v4686_v22 = vld [vmem:[%s5854_s1 + $0x80] sm:$0xff] (!%p387_p2)   ;;  %v3991_v38 = vld [vmem:[%s5855_s2 + $0x8] ss:$0 sm:$0xff] (!%p387_p2)  ;;  %v4691_v44 = vld [vmem:[%s5854_s1 + $0x18] sm:$0xff] (!%p387_p2)  }
   0x9   : > { %4504 = vmatpush3.bf16.msra.mxu0 (!%p387_p2), %v4684_v3  ;;  %v4688_v48 = vld [vmem:[%s5854_s1 + $0x50] sm:$0xff] (!%p387_p2)   ;;  %v4689_v50 = vld [vmem:[%s5854_s1 + $0x58] sm:$0xff] (!%p387_p2)   ;;  %v4011_v59 = vld [vmem:[%s5855_s2 + $0x5] ss:$0 sm:$0xff] (!%p387_p2) }
   0xa   : > { %4505 = vmatprep.subr.bf16.mxu0 (!%p387_p2), %v4863_v1  ;;  %v4002_v0 = vld [vmem:[%s5855_s2 + $0x1] ss:$0 sm:$0xff] (!%p387_p2) }
   0xb   : > { %4514 = vmatpush3.bf16.msra.mxu1 (!%p387_p2), %v4683_v2 }
   0xc   : > { %4527 = vmatprep.subr.bf16.mxu1 (!%p387_p2), %v4863_v1 }
   0xd   : > { %s5868_s26 = smov (!%p428_p3, %s3966_s26), 1  ;;  %4506 = vmatpush3.bf16.msra.mxu0 %v4685_v4 }
   0xe   : > { %s3971_s18 = sshll.u32 %s5868_s26, 3  ;;  %4519 = vmatprep.subr.bf16.mxu0 %v4863_v1 }
   0xf   : > { %s4972_s21 = scalar_lea.vmem %s5853_s0, %s3971_s18  ;;  %s435_s16 = scalar_lea.vmem %s5866_s13, %s3971_s18 }
  0x10   : > { %v437_v5 = vld [vmem:[%s4972_s21] sm:$0xff] }
  0x11   : > { %v4976_v6 = vpack.c.bf16 %v437_v5, %v437_v5 }
  0x13   : > { %4516 = vmatmul.mubr.msk.bf16.vlgmr.msra.gmra.mrb[0].mxu1 %vm462_vm1, %v4976_v6  ;;  %4508 = vmatmul.mubr.msk.bf16.vlgmr.msra.gmra.mrb[0].mxu0 %vm462_vm1, %v4976_v6 }
  0x14   : > { %4529 = vmatprep.mubr.msk.bf16.mxu1 %vm4864_vm0, %v4863_v1  ;;  %4523 = vmatprep.mubr.msk.bf16.mxu0 %vm4864_vm0, %v4863_v1 }
  0x15   : > { %4520 = vmatpush3.bf16.msra.mxu0 %v4686_v22 }
  0x16   : > { %4521 = vmatprep.subr.bf16.mxu0 %v4863_v1 }
  0x19   : > { %4522 = vmatpush3.bf16.msra.mxu0 %v4687_v23 }
  0x1a   : > { %4533 = vmatprep.subr.bf16.mxu0 %v4863_v1 }
  0x1c   : > { %4524 = vmatmul.mubr.msk.bf16.vlgmr.msra.gmra.mrb[4].mxu0 %vm462_vm1, %v4976_v6 }
  0x1d   : > { %4535 = vmatprep.mubr.msk.bf16.mxu0 %vm4864_vm0, %v4863_v1 }
  0xe6   : > { %v565_v8 = vpop.f32.mrb[0].mxu1  ;;  %v500_v9 = vpop.f32.mrb[0].mxu0 }
  0xe7   : > { %v566_v10 = vadd.f32 %v3982_v7, %v565_v8  ;;  %v4517_v11 = vpop.f32.mrb[1].mxu1  ;;  %v4509_v12 = vpop.f32.mrb[1].mxu0  ;;  %v501_v20 = vadd.f32 %v3973_v14, %v500_v9  ;;  %v4692_v8 = vld [vmem:[%s5854_s1 + $0x90] sm:$0xff]   ;;  %v4693_v9 = vld [vmem:[%s5854_s1 + $0x98] sm:$0xff]  }
  0xe8   : > { %v568_v13 = vpop.f32.mrb[2].mxu1  ;;  %v503_v15 = vpop.f32.mrb[2].mxu0 }
  0xe9   : > { %v637_v16 = vpack.c.bf16 %v566_v10, %v566_v10  ;;  %v4518_v17 = vpop.f32.mrb[3].mxu1  ;;  %v4510_v18 = vpop.f32.mrb[3].mxu0  ;;  %v636_v21 = vpack.c.bf16 %v501_v20, %v501_v20 }
  0xeb   : > { %v643_v19 = vsel %vm638_vm2, %v637_v16, 0  ;;  %v4020_v16 = vld [vmem:[%s5855_s2 + $0x9] ss:$0 sm:$0xff] }
  0xec   : > { %4528 = vmatpush3.bf16.xpose.msra.mxu1 %v643_v19 }
  0xed   : > { %4539 = vmatprep.subr.bf16.mxu1 %v4863_v1 }
  0xef   : > { %v630_v35 = vpop.f32.mrb[4].mxu0 }
  0xf0   : > { %v4525_v36 = vpop.f32.mrb[5].mxu0  ;;  %v631_v40 = vadd.f32 %v3991_v38, %v630_v35 }
  0xf1   : > { %v633_v37 = vpop.f32.mrb[6].mxu0 }
  0xf2   : > { %v4526_v39 = vpop.f32.mrb[7].mxu0  ;;  %v698_v41 = vpack.c.bf16 %v631_v40, %v631_v40  ;;  %v4694_v37 = vld [vmem:[%s5854_s1 + $0x60] sm:$0xff]  }
  0xf3   : > { %4530 = vmatmul.mubr.msk.bf16.vlgmr.msra.gmra.mrb[4].mxu1 %vm638_vm2, %v636_v21  ;;  %v4695_v39 = vld [vmem:[%s5854_s1 + $0x68] sm:$0xff]  }
  0xf4   : > { %4543 = vmatprep.mubr.msk.bf16.mxu1 %vm4864_vm0, %v4863_v1  ;;  %v704_v42 = vsel %vm702_vm3, %v698_v41, 0  ;;  %4540 = vmatpush3.bf16.msra.mxu1 %v4690_v43  ;;  %v4696_v41 = vld [vmem:[%s5854_s1 + $0x20] sm:$0xff]  }
  0xf5   : > { %4534 = vmatpush3.bf16.msra.mxu0 %v704_v42  ;;  %4541 = vmatprep.subr.bf16.mxu1 %v4863_v1 }
  0xf6   : > { %4547 = vmatprep.subr.bf16.mxu0 %v4863_v1 }
  0xf8   : > { %4542 = vmatpush3.bf16.msra.mxu1 %v4691_v44 }
  0xf9   : > { %4555 = vmatprep.subr.bf16.mxu1 %v4863_v1 }
  0xfb   : > { %4544 = vmatmul.mubr.msk.bf16.vlgmr.msra.gmra.mrb[8].mxu1 %vm462_vm1, %v4976_v6 }
  0xfc   : > { %4559 = vmatprep.mubr.msk.bf16.mxu1 %vm4864_vm0, %v4863_v1  ;;  %4556 = vmatpush3.bf16.msra.mxu1 %v4692_v8 }
  0xfd   : > { %4557 = vmatprep.subr.bf16.mxu1 %v4863_v1 }
 0x100   : > { %4558 = vmatpush3.bf16.msra.mxu1 %v4693_v9  ;;  %v4698_v9 = vld [vmem:[%s5854_s1 + $0xa0] sm:$0xff]  }
 0x101   : > { %4569 = vmatprep.subr.bf16.mxu1 %v4863_v1 }
 0x103   : > { %4560 = vmatmul.mubr.msk.bf16.vlgmr.msra.gmra.mrb[12].mxu1 %vm462_vm1, %v4976_v6 }
 0x104   : > { %4571 = vmatprep.mubr.msk.bf16.mxu1 %vm4864_vm0, %v4863_v1 }
 0x1c6   : > { %v679_v24 = vpop.f32.mrb[4].mxu1 }
 0x1c7   : > { %v685_v25 = vmul.f32 0.35355338, %v679_v24  ;;  %v4531_v26 = vpop.f32.mrb[5].mxu1 }
 0x1c8   : > { %v682_v27 = vpop.f32.mrb[6].mxu1 }
 0x1c9   : > { %v4532_v28 = vpop.f32.mrb[7].mxu1  ;;  %v686_v29 = vsel %vm638_vm2, %v685_v25, -inf }
 0x1ca   : > { %687 = vmax.xlane.f32.xlu0 %v686_v29  ;;  %v4026_v29 = vld [vmem:[%s5856_s3 + $0x4] sm:$0xf] }
 0x1ce   : > { %v807_v51 = vpop.f32.mrb[8].mxu1 }
 0x1cf   : > { %v4545_v52 = vpop.f32.mrb[9].mxu1  ;;  %v808_v5 = vadd.f32 %v4002_v0, %v807_v51  ;;  %v4043_v51 = vld [vmem:[%s5855_s2 + $0x6] ss:$0 sm:$0xff]  ;;  %v4034_v0 = vld [vmem:[%s5855_s2 + $0x2] ss:$0 sm:$0xff] }
 0x1d0   : > { %v810_v53 = vpop.f32.mrb[10].mxu1 }
 0x1d1   : > { %v4546_v54 = vpop.f32.mrb[11].mxu1  ;;  %v943_v7 = vpack.c.bf16 %v808_v5, %v808_v5 }
 0x1d6   : > { %v937_v17 = vpop.f32.mrb[12].mxu1 }
 0x1d7   : > { %v938_v18 = vadd.f32 %v4020_v16, %v937_v17  ;;  %v4561_v19 = vpop.f32.mrb[13].mxu1 }
 0x1d8   : > { %v940_v20 = vpop.f32.mrb[14].mxu1 }
 0x1d9   : > { %v1004_v21 = vpack.c.bf16 %v938_v18, %v938_v18  ;;  %v4562_v22 = vpop.f32.mrb[15].mxu1 }
 0x1db   : > { %v1009_v23 = vsel %vm702_vm3, %v1004_v21, 0 }
 0x1dc   : > { %4570 = vmatpush3.bf16.msra.mxu1 %v1009_v23 }
 0x1dd   : > { %4581 = vmatprep.subr.bf16.mxu1 %v4863_v1 }
 0x257   : > { %v688_v30 = vpop.xlane.xlu0 %687 }
 0x258   : > { %v689_v31 = vsub.f32 %v685_v25, %v688_v30  ;;  %v1058_v30 = vsel %vm702_vm3, %v4026_v29, 0 }
 0x25a   : > { %v690_v32 = vmul.f32 1.442695, %v689_v31 }
 0x25c   : > { %4834 = vpow2.f32 %v690_v32 }
 0x266   : > { %v4835_v33 = vpop.eup %4834 }
 0x267   : > { %v692_v34 = vsel %vm638_vm2, %v4835_v33, 0.0 }
 0x268   : > { %693 = vadd.xlane.f32.xlu0 %v692_v34 }
 0x2f5   : > { %v694_v45 = vpop.xlane.xlu0 %693 }
 0x2f6   : > { %4836 = vrcp.f32 %v694_v45 }
 0x300   : > { %v4837_v46 = vpop.eup %4836 }
 0x301   : > { %v696_v47 = vmul.f32 %v4837_v46, %v4835_v33  ;;  %v747_v33 = vld [vmem:[%s5856_s3] sm:$0xf]  ;;  %v4697_v46 = vld [vmem:[%s5854_s1 + $0x28] sm:$0xff]  }
 0x302   : > { %v1104_v36 = vsel %vm702_vm3, %v747_v33, 0 }
 0x303   : > { %v697_v49 = vpack.c.bf16 %v696_v47, %v696_v47 }
 0x305   : > { %4536 = vmatmul.mubr.msk.bf16.vlgmr.msra.gmra.mrb[8].mxu0 %vm638_vm2, %v697_v49 }
 0x306   : > { %4548 = vmatpush3.bf16.msra.mxu0 %v4688_v48  ;;  %4551 = vmatprep.mubr.msk.bf16.mxu0 %vm4864_vm0, %v4863_v1 }
 0x307   : > { %4549 = vmatprep.subr.bf16.mxu0 %v4863_v1 }
 0x30a   : > { %4550 = vmatpush3.bf16.msra.mxu0 %v4689_v50 }
 0x30b   : > { %4563 = vmatprep.subr.bf16.mxu0 %v4863_v1 }
 0x30d   : > { %4552 = vmatmul.mubr.msk.bf16.vlgmr.msra.gmra.mrb[12].mxu0 %vm462_vm1, %v4976_v6 }
 0x30e   : > { %4565 = vmatprep.mubr.msk.bf16.mxu0 %vm4864_vm0, %v4863_v1 }
 0x3d8   : > { %v5044_v55 = vpop.f32.mrb[8].mxu0 }
 0x3d9   : > { %v4537_v56 = vpop.f32.mrb[9].mxu0  ;;  %v746_v38 = vpack.c.bf16 %v5044_v55, %v5044_v55 }
 0x3da   : > { %v743_v57 = vpop.f32.mrb[10].mxu0 }
 0x3db   : > { %v4538_v58 = vpop.f32.mrb[11].mxu0 }
 0x3e0   : > { %v872_v60 = vpop.f32.mrb[12].mxu0 }
 0x3e1   : > { %v873_v61 = vadd.f32 %v4011_v59, %v872_v60  ;;  %v4553_v62 = vpop.f32.mrb[13].mxu0 }
 0x3e2   : > { %v875_v63 = vpop.f32.mrb[14].mxu0 }
 0x3e3   : > { %v944_v2 = vpack.c.bf16 %v873_v61, %v873_v61  ;;  %v4554_v3 = vpop.f32.mrb[15].mxu0 }
 0x3e5   : > { %v949_v4 = vsel %vm638_vm2, %v944_v2, 0 }
 0x3e6   : > { %4564 = vmatpush3.bf16.xpose.msra.mxu0 %v949_v4 }
 0x3e7   : > { %4575 = vmatprep.subr.bf16.mxu0 %v4863_v1 }
 0x3ed   : > { %4566 = vmatmul.mubr.msk.bf16.vlgmr.msra.gmra.mrb[16].mxu0 %vm638_vm2, %v943_v7 }
 0x3ee   : > { %4577 = vmatprep.mubr.msk.bf16.mxu0 %vm4864_vm0, %v4863_v1  ;;  %4576 = vmatpush3.bf16.msra.mxu0 %v1058_v30  ;;  %v4058_v30 = vld [vmem:[%s5856_s3 + $0x8] sm:$0xf] }
 0x3ef   : > { %4587 = vmatprep.subr.bf16.mxu0 %v4863_v1 }
 0x4c0   : > { %v985_v10 = vpop.f32.mrb[16].mxu0 }
 0x4c1   : > { %v991_v11 = vmul.f32 0.35355338, %v985_v10  ;;  %v4567_v12 = vpop.f32.mrb[17].mxu0  ;;  %v4699_v10 = vld [vmem:[%s5854_s1 + $0xa8] sm:$0xff]  }
 0x4c2   : > { %v988_v13 = vpop.f32.mrb[18].mxu0 }
 0x4c3   : > { %v4568_v14 = vpop.f32.mrb[19].mxu0  ;;  %v992_v15 = vsel %vm638_vm2, %v991_v11, -inf }
 0x4c4   : > { %993 = vmax.xlane.f32.xlu1 %v992_v15 }
 0x551   : > { %v994_v24 = vpop.xlane.xlu1 %993 }
 0x552   : > { %v995_v25 = vsub.f32 %v991_v11, %v994_v24 }
 0x554   : > { %v996_v26 = vmul.f32 1.442695, %v995_v25  ;;  %v4052_v25 = vld [vmem:[%s5855_s2 + $0xa] ss:$0 sm:$0xff] }
 0x556   : > { %4838 = vpow2.f32 %v996_v26 }
 0x560   : > { %v4839_v27 = vpop.eup %4838 }
 0x561   : > { %v998_v28 = vsel %vm638_vm2, %v4839_v27, 0.0 }
 0x562   : > { %999 = vadd.xlane.f32.xlu1 %v998_v28 }
 0x5ef   : > { %v1000_v31 = vpop.xlane.xlu1 %999 }
 0x5f0   : > { %4840 = vrcp.f32 %v1000_v31  ;;  %v1456_v31 = vsel %vm702_vm3, %v4058_v30, 0 }
 0x5fa   : > { %v4841_v32 = vpop.eup %4840 }
 0x5fb   : > { %v1002_v34 = vmul.f32 %v4841_v32, %v4839_v27 }
 0x5fd   : > { %v1003_v35 = vpack.c.bf16 %v1002_v34, %v1002_v34 }
 0x5ff   : > { %4572 = vmatmul.mubr.msk.bf16.vlgmr.msra.gmra.mrb[16].mxu1 %vm638_vm2, %v1003_v35 }
 0x600   : > { %4582 = vmatpush3.bf16.msra.mxu1 %v1104_v36  ;;  %4583 = vmatprep.mubr.msk.bf16.mxu1 %vm4864_vm0, %v4863_v1  ;;  %v4702_v36 = vld [vmem:[%s5854_s1 + $0x30] sm:$0xff]  }
 0x601   : > { %4595 = vmatprep.subr.bf16.mxu1 %v4863_v1 }
 0x607   : > { %4584 = vmatmul.mubr.msk.bf16.vlgmr.msra.gmra.mrb[20].mxu1 %vm638_vm2, %v746_v38 }
 0x608   : > { %4596 = vmatpush3.bf16.msra.mxu1 %v4694_v37  ;;  %4599 = vmatprep.mubr.msk.bf16.mxu1 %vm4864_vm0, %v4863_v1  ;;  %v4703_v37 = vld [vmem:[%s5854_s1 + $0x38] sm:$0xff]  }
 0x609   : > { %4597 = vmatprep.subr.bf16.mxu1 %v4863_v1 }
 0x60c   : > { %4598 = vmatpush3.bf16.msra.mxu1 %v4695_v39  ;;  %v4700_v39 = vld [vmem:[%s5854_s1 + $0x70] sm:$0xff]  }
 0x60d   : > { %4611 = vmatprep.subr.bf16.mxu1 %v4863_v1 }
 0x60f   : > { %4600 = vmatmul.mubr.msk.bf16.vlgmr.msra.gmra.mrb[24].mxu1 %vm462_vm1, %v4976_v6 }
 0x610   : > { %4613 = vmatprep.mubr.msk.bf16.mxu1 %vm4864_vm0, %v4863_v1 }
 0x6d2   : > { %v1045_v40 = vpop.f32.mrb[16].mxu1 }
 0x6d3   : > { %v1051_v42 = vpack.c.bf16 %v1045_v40, %v1045_v40  ;;  %v4573_v43 = vpop.f32.mrb[17].mxu1 }
 0x6d4   : > { %v1048_v44 = vpop.f32.mrb[18].mxu1 }
 0x6d5   : > { %v4574_v45 = vpop.f32.mrb[19].mxu1  ;;  %4578 = vmatmul.mubr.msk.bf16.vlgmr.msra.gmra.mrb[20].mxu0 %vm638_vm2, %v1051_v42  ;;  %v4701_v44 = vld [vmem:[%s5854_s1 + $0x78] sm:$0xff]  }
 0x6d6   : > { %4588 = vmatpush3.bf16.msra.mxu0 %v4696_v41  ;;  %4591 = vmatprep.mubr.msk.bf16.mxu0 %vm4864_vm0, %v4863_v1 }
 0x6d7   : > { %4589 = vmatprep.subr.bf16.mxu0 %v4863_v1 }
 0x6da   : > { %v1140_v47 = vpop.f32.mrb[20].mxu1  ;;  %4590 = vmatpush3.bf16.msra.mxu0 %v4697_v46 }
 0x6db   : > { %v4585_v48 = vpop.f32.mrb[21].mxu1  ;;  %4603 = vmatprep.subr.bf16.mxu0 %v4863_v1 }
 0x6dc   : > { %v1143_v49 = vpop.f32.mrb[22].mxu1 }
 0x6dd   : > { %v4586_v50 = vpop.f32.mrb[23].mxu1  ;;  %4592 = vmatmul.mubr.msk.bf16.vlgmr.msra.gmra.mrb[24].mxu0 %vm462_vm1, %v4976_v6 }
 0x6de   : > { %4607 = vmatprep.mubr.msk.bf16.mxu0 %vm4864_vm0, %v4863_v1  ;;  %4604 = vmatpush3.bf16.msra.mxu0 %v4698_v9 }
 0x6df   : > { %4605 = vmatprep.subr.bf16.mxu0 %v4863_v1 }
 0x6e2   : > { %v1270_v52 = vpop.f32.mrb[24].mxu1  ;;  %4606 = vmatpush3.bf16.msra.mxu0 %v4699_v10 }
 0x6e3   : > { %v1271_v53 = vadd.f32 %v4043_v51, %v1270_v52  ;;  %v4601_v54 = vpop.f32.mrb[25].mxu1  ;;  %4617 = vmatprep.subr.bf16.mxu0 %v4863_v1 }
 0x6e4   : > { %v1273_v55 = vpop.f32.mrb[26].mxu1  ;;  %v4074_v54 = vld [vmem:[%s5855_s2 + $0x7] ss:$0 sm:$0xff] }
 0x6e5   : > { %v1342_v56 = vpack.c.bf16 %v1271_v53, %v1271_v53  ;;  %v4602_v57 = vpop.f32.mrb[27].mxu1  ;;  %4608 = vmatmul.mubr.msk.bf16.vlgmr.msra.gmra.mrb[28].mxu0 %vm462_vm1, %v4976_v6 }
 0x6e6   : > { %4619 = vmatprep.mubr.msk.bf16.mxu0 %vm4864_vm0, %v4863_v1 }
 0x6e7   : > { %v1347_v58 = vsel %vm638_vm2, %v1342_v56, 0 }
 0x6e8   : > { %4612 = vmatpush3.bf16.xpose.msra.mxu1 %v1347_v58 }
 0x6e9   : > { %4623 = vmatprep.subr.bf16.mxu1 %v4863_v1 }
 0x7a8   : > { %v1094_v59 = vpop.f32.mrb[20].mxu0 }
 0x7a9   : > { %v5126_v60 = vadd.f32 %v1140_v47, %v1094_v59  ;;  %v4579_v61 = vpop.f32.mrb[21].mxu0  ;;  %v4065_v59 = vld [vmem:[%s5855_s2 + $0x3] ss:$0 sm:$0xff] }
 0x7aa   : > { %v1097_v62 = vpop.f32.mrb[22].mxu0 }
 0x7ab   : > { %v4580_v63 = vpop.f32.mrb[23].mxu0 }
 0x7b0   : > { %v1205_v2 = vpop.f32.mrb[24].mxu0 }
 0x7b1   : > { %v1206_v3 = vadd.f32 %v4034_v0, %v1205_v2  ;;  %v4593_v4 = vpop.f32.mrb[25].mxu0  ;;  %v4704_v2 = vld [vmem:[%s5854_s1 + $0xb0] sm:$0xff]  }
 0x7b2   : > { %v1208_v5 = vpop.f32.mrb[26].mxu0 }
 0x7b3   : > { %v1341_v7 = vpack.c.bf16 %v1206_v3, %v1206_v3  ;;  %v4594_v8 = vpop.f32.mrb[27].mxu0  ;;  %v4705_v3 = vld [vmem:[%s5854_s1 + $0xb8] sm:$0xff]  }
 0x7b5   : > { %4614 = vmatmul.mubr.msk.bf16.vlgmr.msra.gmra.mrb[28].mxu1 %vm638_vm2, %v1341_v7 }
 0x7b6   : > { %4625 = vmatprep.mubr.msk.bf16.mxu1 %vm4864_vm0, %v4863_v1  ;;  %4624 = vmatpush3.bf16.msra.mxu1 %v1456_v31 }
 0x7b7   : > { %4637 = vmatprep.subr.bf16.mxu1 %v4863_v1 }
 0x7b8   : > { %v1335_v22 = vpop.f32.mrb[28].mxu0 }
 0x7b9   : > { %v4609_v23 = vpop.f32.mrb[29].mxu0  ;;  %v1336_v27 = vadd.f32 %v4052_v25, %v1335_v22  ;;  %v4089_v22 = vld [vmem:[%s5856_s3 + $0xc] sm:$0xf] }
 0x7ba   : > { %v1338_v24 = vpop.f32.mrb[30].mxu0  ;;  %v1809_v23 = vsel %vm702_vm3, %v4089_v22, 0 }
 0x7bb   : > { %v4610_v26 = vpop.f32.mrb[31].mxu0  ;;  %v1402_v28 = vpack.c.bf16 %v1336_v27, %v1336_v27 }
 0x7bd   : > { %v1407_v29 = vsel %vm702_vm3, %v1402_v28, 0 }
 0x7be   : > { %4618 = vmatpush3.bf16.msra.mxu0 %v1407_v29 }
 0x7bf   : > { %4629 = vmatprep.subr.bf16.mxu0 %v4863_v1 }
 0x888   : > { %v1383_v11 = vpop.f32.mrb[28].mxu1 }
 0x889   : > { %v1389_v12 = vmul.f32 0.35355338, %v1383_v11  ;;  %v4615_v13 = vpop.f32.mrb[29].mxu1 }
 0x88a   : > { %v1386_v14 = vpop.f32.mrb[30].mxu1 }
 0x88b   : > { %v4616_v15 = vpop.f32.mrb[31].mxu1  ;;  %v1390_v16 = vsel %vm638_vm2, %v1389_v12, -inf }
 0x88c   : > { %1391 = vmax.xlane.f32.xlu0 %v1390_v16 }
 0x919   : > { %v1392_v17 = vpop.xlane.xlu0 %1391 }
 0x91a   : > { %v1393_v18 = vsub.f32 %v1389_v12, %v1392_v17 }
 0x91c   : > { %v1394_v19 = vmul.f32 1.442695, %v1393_v18 }
 0x91e   : > { %4842 = vpow2.f32 %v1394_v19 }
 0x928   : > { %v4843_v20 = vpop.eup %4842 }
 0x929   : > { %v1396_v21 = vsel %vm638_vm2, %v4843_v20, 0.0 }
 0x92a   : > { %1397 = vadd.xlane.f32.xlu1 %v1396_v21 }
 0x9b7   : > { %v1398_v32 = vpop.xlane.xlu1 %1397 }
 0x9b8   : > { %4844 = vrcp.f32 %v1398_v32 }
 0x9c2   : > { %v4845_v33 = vpop.eup %4844 }
 0x9c3   : > { %v1400_v34 = vmul.f32 %v4845_v33, %v4843_v20 }
 0x9c5   : > { %v1401_v35 = vpack.c.bf16 %v1400_v34, %v1400_v34  ;;  %v4091_v34 = vld [vmem:[%s5857_s4] ss:$0 sm:$0xff] }
 0x9c7   : > { %4620 = vmatmul.mubr.msk.bf16.vlgmr.msra.gmra.mrb[32].mxu0 %vm638_vm2, %v1401_v35 }
 0x9c8   : > { %4633 = vmatprep.mubr.msk.bf16.mxu0 %vm4864_vm0, %v4863_v1  ;;  %4630 = vmatpush3.bf16.msra.mxu0 %v4702_v36 }
 0x9c9   : > { %4631 = vmatprep.subr.bf16.mxu0 %v4863_v1 }
 0x9cc   : > { %4632 = vmatpush3.bf16.msra.mxu0 %v4703_v37 }
 0x9cd   : > { %4645 = vmatprep.subr.bf16.mxu0 %v4863_v1 }
 0x9cf   : > { %4634 = vmatmul.mubr.msk.bf16.vlgmr.msra.gmra.mrb[36].mxu0 %vm462_vm1, %v4976_v6 }
 0x9d0   : > { %4649 = vmatprep.mubr.msk.bf16.mxu0 %vm4864_vm0, %v4863_v1  ;;  %4646 = vmatpush3.bf16.msra.mxu0 %v4704_v2  ;;  %v1902_v2 = vld [vmem:[%s5860_s7 + $0x50] sm:$0xff] }
 0x9d1   : > { %4647 = vmatprep.subr.bf16.mxu0 %v4863_v1 }
 0x9d4   : > { %4648 = vmatpush3.bf16.msra.mxu0 %v4705_v3  ;;  %v1895_v3 = vld [vmem:[%s5860_s7 + $0x18] sm:$0xff] }
 0x9d5   : > { %4659 = vmatprep.subr.bf16.mxu0 %v4863_v1 }
 0x9d7   : > { %4650 = vmatmul.mubr.msk.bf16.vlgmr.msra.gmra.mrb[40].mxu0 %vm462_vm1, %v4976_v6 }
 0x9d8   : > { %4661 = vmatprep.mubr.msk.bf16.mxu0 %vm4864_vm0, %v4863_v1 }
 0xa9a   : > { %v1443_v38 = vpop.f32.mrb[32].mxu0 }
 0xa9b   : > { %v1449_v40 = vpack.c.bf16 %v1443_v38, %v1443_v38  ;;  %v4621_v41 = vpop.f32.mrb[33].mxu0 }
 0xa9c   : > { %v1446_v42 = vpop.f32.mrb[34].mxu0 }
 0xa9d   : > { %v4622_v43 = vpop.f32.mrb[35].mxu0  ;;  %4626 = vmatmul.mubr.msk.bf16.vlgmr.msra.gmra.mrb[32].mxu1 %vm638_vm2, %v1449_v40  ;;  %v4854_v40 = vld [vmem:[%s4972_s21] sm:$0xff] }
 0xa9e   : > { %4638 = vmatpush3.bf16.msra.mxu1 %v4700_v39  ;;  %4641 = vmatprep.mubr.msk.bf16.mxu1 %vm4864_vm0, %v4863_v1 }
 0xa9f   : > { %4639 = vmatprep.subr.bf16.mxu1 %v4863_v1 }
 0xaa2   : > { %4640 = vmatpush3.bf16.msra.mxu1 %v4701_v44  ;;  %v1558_v45 = vpop.f32.mrb[36].mxu0 }
 0xaa3   : > { %4653 = vmatprep.subr.bf16.mxu1 %v4863_v1  ;;  %v4635_v46 = vpop.f32.mrb[37].mxu0  ;;  %v1559_v63 = vadd.f32 %v4065_v59, %v1558_v45 }
 0xaa4   : > { %v1561_v47 = vpop.f32.mrb[38].mxu0 }
 0xaa5   : > { %4642 = vmatmul.mubr.msk.bf16.vlgmr.msra.gmra.mrb[36].mxu1 %vm462_vm1, %v4976_v6  ;;  %v4636_v48 = vpop.f32.mrb[39].mxu0  ;;  %v1694_v0 = vpack.c.bf16 %v1559_v63, %v1559_v63 }
 0xaa6   : > { %4655 = vmatprep.mubr.msk.bf16.mxu1 %vm4864_vm0, %v4863_v1  ;;  %v1892_v48 = vld [vmem:[%s5860_s7] sm:$0xff] }
 0xaaa   : > { %v1688_v6 = vpop.f32.mrb[40].mxu0 }
 0xaab   : > { %v4651_v16 = vpop.f32.mrb[41].mxu0 }
 0xaac   : > { %v1691_v17 = vpop.f32.mrb[42].mxu0  ;;  %v4093_v16 = vld [vmem:[%s5859_s6] ss:$0 sm:$0xff] }
 0xaad   : > { %v4652_v18 = vpop.f32.mrb[43].mxu0 }
 0xaae   : > { %v1918_v18 = vld [vmem:[%s5860_s7 + $0xd0] sm:$0xff] }
 0xb70   : > { %v1492_v49 = vpop.f32.mrb[32].mxu1 }
 0xb71   : > { %v5189_v50 = vadd.f32 %v1492_v49, %v5126_v60  ;;  %v4627_v51 = vpop.f32.mrb[33].mxu1  ;;  %v1900_v49 = vld [vmem:[%s5860_s7 + $0x40] sm:$0xff] }
 0xb72   : > { %v1495_v52 = vpop.f32.mrb[34].mxu1  ;;  %v4095_v51 = vcombine.high %v1892_v48, %v1900_v49 }
 0xb73   : > { %v4628_v53 = vpop.f32.mrb[35].mxu1  ;;  %v1901_v52 = vld [vmem:[%s5860_s7 + $0x48] sm:$0xff] }
 0xb74   : > { %v4094_v53 = vcombine.low %v1892_v48, %v1900_v49  ;;  %v1914_v49 = vld [vmem:[%s5860_s7 + $0xb0] sm:$0xff] }
 0xb78   : > { %v1623_v55 = vpop.f32.mrb[36].mxu1 }
 0xb79   : > { %v1624_v56 = vadd.f32 %v4074_v54, %v1623_v55  ;;  %v4643_v57 = vpop.f32.mrb[37].mxu1 }
 0xb7a   : > { %v1626_v58 = vpop.f32.mrb[38].mxu1  ;;  %v1916_v57 = vld [vmem:[%s5860_s7 + $0xc0] sm:$0xff] }
 0xb7b   : > { %v1695_v61 = vpack.c.bf16 %v1624_v56, %v1624_v56  ;;  %v4644_v62 = vpop.f32.mrb[39].mxu1  ;;  %v1908_v56 = vld [vmem:[%s5860_s7 + $0x80] sm:$0xff]  ;;  %v1909_v58 = vld [vmem:[%s5860_s7 + $0x88] sm:$0xff] }
 0xb7c   : > { %v4111_v59 = vcombine.high %v1908_v56, %v1916_v57  ;;  %v4110_v62 = vcombine.low %v1908_v56, %v1916_v57 }
 0xb7d   : > { %v1700_v60 = vsel %vm638_vm2, %v1695_v61, 0  ;;  %v1917_v61 = vld [vmem:[%s5860_s7 + $0xc8] sm:$0xff] }
 0xb7e   : > { %4654 = vmatpush3.bf16.xpose.msra.mxu1 %v1700_v60  ;;  %v4112_v60 = vcombine.low %v1909_v58, %v1917_v61  ;;  %v4113_v63 = vcombine.high %v1909_v58, %v1917_v61  ;;  %v4707_v61 = vld [vmem:[%s5862_s9 + $0xc0] sm:$0xff]  }
 0xb7f   : > { %4665 = vmatprep.subr.bf16.mxu1 %v4863_v1 }
 0xb85   : > { %4656 = vmatmul.mubr.msk.bf16.vlgmr.msra.gmra.mrb[40].mxu1 %vm638_vm2, %v1694_v0  ;;  %v1894_v0 = vld [vmem:[%s5860_s7 + $0x10] sm:$0xff] }
 0xb86   : > { %4667 = vmatprep.mubr.msk.bf16.mxu1 %vm4864_vm0, %v4863_v1  ;;  %v4083_v1 = vld [vmem:[%s5855_s2 + $0xb] ss:$0 sm:$0xff]  ;;  %4666 = vmatpush3.bf16.msra.mxu1 %v1809_v23 }
 0xb87   : > { %v1689_v19 = vadd.f32 %v4083_v1, %v1688_v6  ;;  %v1910_v1 = vld [vmem:[%s5860_s7 + $0x90] sm:$0xff] }
 0xb88   : > { %v4115_v23 = vcombine.high %v1910_v1, %v1918_v18 }
 0xb89   : > { %v1755_v20 = vpack.c.bf16 %v1689_v19, %v1689_v19  ;;  %v1911_v19 = vld [vmem:[%s5860_s7 + $0x98] sm:$0xff] }
 0xb8b   : > { %v1760_v21 = vsel %vm702_vm3, %v1755_v20, 0  ;;  %v1919_v20 = vld [vmem:[%s5860_s7 + $0xd8] sm:$0xff] }
 0xb8c   : > { %4660 = vmatpush3.bf16.msra.mxu0 %v1760_v21 }
 0xb8d   : > { %2171 = vmatprep.subr.bf16.mxu0 %v4095_v51  ;;  %v1915_v51 = vld [vmem:[%s5860_s7 + $0xb8] sm:$0xff] }
 0xc58   : > { %v1736_v4 = vpop.f32.mrb[40].mxu1 }
 0xc59   : > { %v1742_v5 = vmul.f32 0.35355338, %v1736_v4  ;;  %v4657_v7 = vpop.f32.mrb[41].mxu1  ;;  %v4099_v4 = vcombine.high %v1894_v0, %v1902_v2 }
 0xc5a   : > { %v1739_v8 = vpop.f32.mrb[42].mxu1  ;;  %v4865_v7 = vmov 0  }
 0xc5b   : > { %v4658_v9 = vpop.f32.mrb[43].mxu1  ;;  %v1743_v10 = vsel %vm638_vm2, %v1742_v5, -inf  ;;  %v4098_v8 = vcombine.low %v1894_v0, %v1902_v2  ;;  %v4711_v0 = vld [vmem:[%s5862_s9 + $0xc8] sm:$0xff]  }
 0xc5c   : > { %1744 = vmax.xlane.f32.xlu0 %v1743_v10  ;;  %v4712_v2 = vld [vmem:[%s5862_s9 + $0x8] sm:$0xff]  }
 0xce9   : > { %v1745_v11 = vpop.xlane.xlu0 %1744 }
 0xcea   : > { %v1746_v12 = vsub.f32 %v1742_v5, %v1745_v11  ;;  %v1903_v5 = vld [vmem:[%s5860_s7 + $0x58] sm:$0xff] }
 0xceb   : > { %v4100_v9 = vcombine.low %v1895_v3, %v1903_v5  ;;  %v4101_v10 = vcombine.high %v1895_v3, %v1903_v5  ;;  %v4713_v3 = vld [vmem:[%s5862_s9 + $0x88] sm:$0xff]   ;;  %v4715_v5 = vld [vmem:[%s5862_s9 + $0xd0] sm:$0xff]  }
 0xcec   : > { %v1747_v13 = vmul.f32 1.442695, %v1746_v12 }
 0xcee   : > { %4846 = vpow2.f32 %v1747_v13 }
 0xcf8   : > { %v4847_v14 = vpop.eup %4846 }
 0xcf9   : > { %v1749_v15 = vsel %vm638_vm2, %v4847_v14, 0.0 }
 0xcfa   : > { %1750 = vadd.xlane.f32.xlu1 %v1749_v15  ;;  %v4092_v15 = vld [vmem:[%s5858_s5] ss:$0 sm:$0xff] }
 0xd87   : > { %v1751_v24 = vpop.xlane.xlu1 %1750 }
 0xd88   : > { %4848 = vrcp.f32 %v1751_v24  ;;  %v4117_v24 = vcombine.high %v1911_v19, %v1919_v20 }
 0xd92   : > { %v4849_v25 = vpop.eup %4848 }
 0xd93   : > { %v1753_v26 = vmul.f32 %v4849_v25, %v4847_v14  ;;  %v1896_v25 = vld [vmem:[%s5860_s7 + $0x20] sm:$0xff] }
 0xd95   : > { %v1754_v27 = vpack.c.bf16 %v1753_v26, %v1753_v26  ;;  %v1904_v26 = vld [vmem:[%s5860_s7 + $0x60] sm:$0xff] }
 0xd97   : > { %4662 = vmatmul.mubr.msk.bf16.vlgmr.msra.gmra.mrb[44].mxu0 %vm638_vm2, %v1754_v27  ;;  %v1897_v27 = vld [vmem:[%s5860_s7 + $0x28] sm:$0xff] }
 0xd98   : > { %2172 = vmatpush1.bf16.msra.mxu0 %v4094_v53  ;;  %2203 = vmatprep.mubr.bf16.mxu0 %v4865_v7 }
 0xd99   : > { %2173 = vmatprep.subr.bf16.mxu0 %v4111_v59  ;;  %v4706_v59 = vld [vmem:[%s5862_s9 + $0x40] sm:$0xff]  }
 0xd9c   : > { %2174 = vmatpush1.bf16.msra.mxu0 %v4110_v62  ;;  %v4708_v62 = vld [vmem:[%s5862_s9] sm:$0xff]  }
 0xd9d   : > { %2253 = vmatprep.subr.bf16.mxu0 %v4099_v4  ;;  %v4714_v4 = vld [vmem:[%s5862_s9 + $0x50] sm:$0xff]  }
 0xe6a   : > { %v1796_v28 = vpop.f32.mrb[44].mxu0 }
 0xe6b   : > { %v1802_v29 = vpack.c.bf16 %v1796_v28, %v1796_v28  ;;  %v4663_v30 = vpop.f32.mrb[45].mxu0  ;;  %v1905_v28 = vld [vmem:[%s5860_s7 + $0x68] sm:$0xff] }
 0xe6c   : > { %v1799_v31 = vpop.f32.mrb[46].mxu0  ;;  %v4116_v30 = vcombine.low %v1911_v19, %v1919_v20  ;;  %v4730_v19 = vld [vmem:[%s5862_s9 + $0x70] sm:$0xff]  }
 0xe6d   : > { %v4664_v32 = vpop.f32.mrb[47].mxu0  ;;  %4668 = vmatmul.mubr.msk.bf16.vlgmr.msra.gmra.mrb[44].mxu1 %vm638_vm2, %v1802_v29  ;;  %v4114_v29 = vcombine.low %v1910_v1, %v1918_v18  ;;  %v4103_v31 = vcombine.high %v1896_v25, %v1904_v26  ;;  %v4728_v1 = vld [vmem:[%s5862_s9 + $0x28] sm:$0xff]   ;;  %v4731_v20 = vld [vmem:[%s5862_s9 + $0xf0] sm:$0xff]  }
 0xe6e   : > { %2244 = vmatprep.mubr.bf16.mxu1 %v4865_v7  ;;  %v4105_v32 = vcombine.high %v1897_v27, %v1905_v28  ;;  %v4729_v18 = vld [vmem:[%s5862_s9 + $0xa8] sm:$0xff]  }
 0xf40   : > { %v1845_v33 = vpop.f32.mrb[44].mxu1 }
 0xf41   : > { %v1851_v35 = vadd.f32 %v1845_v33, %v5189_v50  ;;  %v4669_v36 = vpop.f32.mrb[45].mxu1  ;;  %v1893_v50 = vld [vmem:[%s5860_s7 + $0x8] sm:$0xff]  ;;  %v1912_v33 = vld [vmem:[%s5860_s7 + $0xa0] sm:$0xff] }
 0xf42   : > { %v1848_v37 = vpop.f32.mrb[46].mxu1  ;;  %v4096_v54 = vcombine.low %v1893_v50, %v1901_v52  ;;  %v4097_v55 = vcombine.high %v1893_v50, %v1901_v52  ;;  %v1921_v36 = vld [vmem:[%s5860_s7 + $0xe8] sm:$0xff]  ;;  %v1922_v50 = vld [vmem:[%s5860_s7 + $0xf0] sm:$0xff]  ;;  %v1923_v52 = vld [vmem:[%s5860_s7 + $0xf8] sm:$0xff] }
 0xf43   : > { %v1859_v38 = vadd.f32 %v4091_v34, %v1851_v35  ;;  %v4670_v39 = vpop.f32.mrb[47].mxu1  ;;  %v1920_v34 = vld [vmem:[%s5860_s7 + $0xe0] sm:$0xff]  ;;  %v1913_v35 = vld [vmem:[%s5860_s7 + $0xa8] sm:$0xff]  ;;  %v4102_v37 = vcombine.low %v1896_v25, %v1904_v26  ;;  %v4125_v56 = vcombine.high %v1915_v51, %v1923_v52  ;;  %v4122_v57 = vcombine.low %v1914_v49, %v1922_v50  ;;  %v4735_v25 = vld [vmem:[%s5862_s9 + $0xf8] sm:$0xff]  }
 0xf44   : > { %2212 = vmatprep.subr.bf16.mxu1 %v4097_v55  ;;  %v4119_v39 = vcombine.high %v1912_v33, %v1920_v34  ;;  %v4123_v55 = vcombine.high %v1914_v49, %v1922_v50  ;;  %v4124_v58 = vcombine.low %v1915_v51, %v1923_v52  ;;  %v4736_v26 = vld [vmem:[%s5862_s9 + $0x38] sm:$0xff]  }
 0xf45   : > { %v1860_v41 = vadd.f32 %v4854_v40, %v1859_v38  ;;  %2213 = vmatpush1.bf16.msra.mxu1 %v4096_v54  ;;  %v4104_v38 = vcombine.low %v1897_v27, %v1905_v28  ;;  %v4121_v40 = vcombine.high %v1913_v35, %v1921_v36  ;;  %v4737_v27 = vld [vmem:[%s5862_s9 + $0xb8] sm:$0xff]   ;;  %v4738_v28 = vld [vmem:[%s5862_s9 + $0x140] sm:$0xff]  }
 0xf46   : > { %2214 = vmatprep.subr.bf16.mxu1 %v4113_v63  ;;  %v4710_v63 = vld [vmem:[%s5862_s9 + $0x48] sm:$0xff]  }
 0xf47   : > { %v1861_v42 = vsel %vm462_vm1, %v1860_v41, 0.0 }
 0xf48   : > { %1862 = vadd.xlane.f32.xlu0 %v1861_v42  ;;  %v1906_v42 = vld [vmem:[%s5860_s7 + $0x70] sm:$0xff] }
 0xf49   : > { %2215 = vmatpush1.bf16.msra.mxu1 %v4112_v60  ;;  %v4709_v60 = vld [vmem:[%s5862_s9 + $0x80] sm:$0xff]  }
 0xf4a   : > { %2294 = vmatprep.subr.bf16.mxu1 %v4101_v10  ;;  %v4719_v10 = vld [vmem:[%s5862_s9 + $0xd8] sm:$0xff]  }
 0xfd5   : > { %v1863_v43 = vpop.xlane.xlu0 %1862 }
 0xfd6   : > { %v1865_v44 = vmul.f32 0.03125, %v1863_v43  ;;  %v1899_v43 = vld [vmem:[%s5860_s7 + $0x38] sm:$0xff] }
 0xfd8   : > { %v1866_v45 = vsub.f32 %v1860_v41, %v1865_v44  ;;  %v1898_v41 = vld [vmem:[%s5860_s7 + $0x30] sm:$0xff]  ;;  %v1907_v44 = vld [vmem:[%s5860_s7 + $0x78] sm:$0xff] }
 0xfd9   : > { %v4109_v48 = vcombine.high %v1899_v43, %v1907_v44  ;;  %v4106_v53 = vcombine.low %v1898_v41, %v1906_v42  ;;  %v4108_v54 = vcombine.low %v1899_v43, %v1907_v44 }
 0xfda   : > { %v1867_v46 = vmul.f32 %v1866_v45, %v1866_v45 }
 0xfdc   : > { %v1868_v47 = vsel %vm462_vm1, %v1867_v46, 0.0  ;;  %v4120_v46 = vcombine.low %v1913_v35, %v1921_v36 }
 0xfdd   : > { %1869 = vadd.xlane.f32.xlu1 %v1868_v47  ;;  %v4107_v47 = vcombine.high %v1898_v41, %v1906_v42 }
0x106a   : > { %v1870_v11 = vpop.xlane.xlu1 %1869 }
0x106b   : > { %v1871_v12 = vmul.f32 0.03125, %v1870_v11  ;;  %v4720_v11 = vld [vmem:[%s5862_s9 + $0x18] sm:$0xff]  }
0x106d   : > { %v1872_v13 = vadd.f32 1e-05, %v1871_v12  ;;  %v4721_v12 = vld [vmem:[%s5862_s9 + $0x98] sm:$0xff]  }
0x106f   : > { %4850 = vrsqrt.f32 %v1872_v13  ;;  %v4722_v13 = vld [vmem:[%s5862_s9 + $0x60] sm:$0xff]  }
0x1079   : > { %v4851_v14 = vpop.eup %4850 }
0x107a   : > { %v1874_v6 = vmul.f32 %v4851_v14, %v1866_v45  ;;  %v4118_v45 = vcombine.low %v1912_v33, %v1920_v34  ;;  %v4723_v14 = vld [vmem:[%s5862_s9 + $0xe0] sm:$0xff]   ;;  %v5473_v33 = vld [vmem:[%s5861_s8 + $0x8] sm:$0xff] }
0x107c   : > { %v1882_v17 = vmul.f32 %v4092_v15, %v1874_v6  ;;  %v4724_v15 = vld [vmem:[%s5862_s9 + $0x20] sm:$0xff]  }
0x107d   : > { %v4725_v6 = vld [vmem:[%s5862_s9 + $0xa0] sm:$0xff]  }
0x107e   : > { %v5289_v21 = vadd.f32 %v4093_v16, %v1882_v17  ;;  %v4726_v16 = vld [vmem:[%s5862_s9 + $0x68] sm:$0xff]  }
0x107f   : > { %v4727_v17 = vld [vmem:[%s5862_s9 + $0xe8] sm:$0xff]  }
0x1080   : > { %v5293_v22 = vpack.c.bf16 %v5289_v21, %v5289_v21 }
0x1082   : > { %4126 = vmatmul.mubr.msk.bf16.vlgmr.msra.gmra.mrb[48].mxu0 %vm462_vm1, %v5293_v22  ;;  %4127 = vmatmul.mubr.msk.bf16.vlgmr.msra.gmra.mrb[48].mxu1 %vm462_vm1, %v5293_v22 }
0x1083   : > { %2254 = vmatpush1.bf16.msra.mxu0 %v4098_v8  ;;  %2295 = vmatpush1.bf16.msra.mxu1 %v4100_v9  ;;  %v4717_v8 = vld [vmem:[%s5862_s9 + $0x90] sm:$0xff]   ;;  %v4718_v9 = vld [vmem:[%s5862_s9 + $0x58] sm:$0xff]  }
0x1084   : > { %2255 = vmatprep.subr.bf16.mxu0 %v4115_v23  ;;  %2296 = vmatprep.subr.bf16.mxu1 %v4117_v24  ;;  %v4733_v23 = vld [vmem:[%s5862_s9 + $0xb0] sm:$0xff]   ;;  %v4734_v24 = vld [vmem:[%s5862_s9 + $0x78] sm:$0xff]  }
0x1085   : > { %2285 = vmatprep.mubr.bf16.mxu0 %v4865_v7  ;;  %2326 = vmatprep.mubr.bf16.mxu1 %v4865_v7 }
0x1087   : > { %2256 = vmatpush1.bf16.msra.mxu0 %v4114_v29  ;;  %2297 = vmatpush1.bf16.msra.mxu1 %v4116_v30  ;;  %v4739_v29 = vld [vmem:[%s5862_s9 + $0x1c0] sm:$0xff]   ;;  %v1928_v30 = vlaneseq }
0x1088   : > { %2335 = vmatprep.subr.bf16.mxu0 %v4103_v31  ;;  %2376 = vmatprep.subr.bf16.mxu1 %v4105_v32 }
0x1089   : > { %v5467_v31 = vshrl.u32 %v1928_v30, 7  ;;  %v4749_v30 = vld [vmem:[%s5862_s9 + $0x190] sm:$0xff]  }
0x108a   : > { %4128 = vmatmul.mubr.msk.bf16.vlgmr.msra.gmra.mrb[52].mxu0 %vm462_vm1, %v5293_v22  ;;  %4129 = vmatmul.mubr.msk.bf16.vlgmr.msra.gmra.mrb[52].mxu1 %vm462_vm1, %v5293_v22 }
0x108b   : > { %2336 = vmatpush1.bf16.msra.mxu0 %v4102_v37  ;;  %2377 = vmatpush1.bf16.msra.mxu1 %v4104_v38  ;;  %v1954_v32 = vsub.s32 6, %v5467_v31  ;;  %v1930_v35 = vsub.s32 0, %v5467_v31  ;;  %v1938_v36 = vsub.s32 2, %v5467_v31  ;;  %v5485_v37 = vld [vmem:[%s5861_s8] sm:$0xff]  ;;  %v1934_v38 = vsub.s32 1, %v5467_v31 }
0x108c   : > { %2337 = vmatprep.subr.bf16.mxu0 %v4119_v39  ;;  %2378 = vmatprep.subr.bf16.mxu1 %v4121_v40  ;;  %v1942_v39 = vsub.s32 3, %v5467_v31 }
0x108d   : > { %2367 = vmatprep.mubr.bf16.mxu0 %v4865_v7  ;;  %2408 = vmatprep.mubr.bf16.mxu1 %v4865_v7  ;;  %v5478_v34 = vrot.slane %v5473_v33, %v1954_v32  ;;  %v1931_v40 = vrot.slane %v5485_v37, %v1930_v35  ;;  %v1939_v41 = vrot.slane %v5485_v37, %v1938_v36 }
0x108e   : > { %v1935_v42 = vrot.slane %v5485_v37, %v1934_v38  ;;  %v1943_v43 = vrot.slane %v5485_v37, %v1942_v39 }
0x108f   : > { %2338 = vmatpush1.bf16.msra.mxu0 %v4118_v45  ;;  %2379 = vmatpush1.bf16.msra.mxu1 %v4120_v46 }
0x1090   : > { %2417 = vmatprep.subr.bf16.mxu0 %v4107_v47  ;;  %2458 = vmatprep.subr.bf16.mxu1 %v4109_v48 }
0x1092   : > { %4130 = vmatmul.mubr.msk.bf16.vlgmr.msra.gmra.mrb[56].mxu0 %vm462_vm1, %v5293_v22  ;;  %4131 = vmatmul.mubr.msk.bf16.vlgmr.msra.gmra.mrb[56].mxu1 %vm462_vm1, %v5293_v22 }
0x1093   : > { %2418 = vmatpush1.bf16.msra.mxu0 %v4106_v53  ;;  %2459 = vmatpush1.bf16.msra.mxu1 %v4108_v54  ;;  %v1950_v54 = vsub.s32 5, %v5467_v31 }
0x1094   : > { %2419 = vmatprep.subr.bf16.mxu0 %v4123_v55  ;;  %2460 = vmatprep.subr.bf16.mxu1 %v4125_v56  ;;  %v1958_v55 = vsub.s32 7, %v5467_v31 }
0x1095   : > { %2449 = vmatprep.mubr.bf16.mxu0 %v4865_v7  ;;  %2490 = vmatprep.mubr.bf16.mxu1 %v4865_v7  ;;  %v4716_v7 = vld [vmem:[%s5862_s9 + $0x10] sm:$0xff]  }
0x1097   : > { %2420 = vmatpush1.bf16.msra.mxu0 %v4122_v57  ;;  %2461 = vmatpush1.bf16.msra.mxu1 %v4124_v58 }
0x1098   : > { %4327 = vmatprep.subr.bf16.mxu0 %v4706_v59  ;;  %4349 = vmatprep.subr.bf16.mxu1 %v4707_v61 }
0x109a   : > { %4132 = vmatmul.mubr.msk.bf16.vlgmr.msra.gmra.mrb[60].mxu0 %vm462_vm1, %v5293_v22  ;;  %4133 = vmatmul.mubr.msk.bf16.vlgmr.msra.gmra.mrb[60].mxu1 %vm462_vm1, %v5293_v22  ;;  %v4732_v22 = vld [vmem:[%s5862_s9 + $0x30] sm:$0xff]  }
0x109b   : > { %4328 = vmatpush3.bf16.msra.mxu0 %v4708_v62  ;;  %4350 = vmatpush3.bf16.msra.mxu1 %v4709_v60 }
0x109c   : > { %4329 = vmatprep.subr.bf16.mxu0 %v4710_v63  ;;  %4351 = vmatprep.subr.bf16.mxu1 %v4711_v0  ;;  %v1951_v0 = vrot.slane %v5485_v37, %v1950_v54 }
0x109f   : > { %4330 = vmatpush3.bf16.msra.mxu0 %v4712_v2  ;;  %4352 = vmatpush3.bf16.msra.mxu1 %v4713_v3  ;;  %v1959_v2 = vrot.slane %v5485_v37, %v1958_v55  ;;  %v4740_v3 = vld [vmem:[%s5862_s9 + $0x100] sm:$0xff]  }
0x10a0   : > { %4331 = vmatprep.subr.bf16.mxu0 %v4714_v4  ;;  %4353 = vmatprep.subr.bf16.mxu1 %v4715_v5  ;;  %v4741_v4 = vld [vmem:[%s5862_s9 + $0x180] sm:$0xff]  }
0x10a3   : > { %4332 = vmatpush3.bf16.msra.mxu0 %v4716_v7  ;;  %4354 = vmatpush3.bf16.msra.mxu1 %v4717_v8  ;;  %v4742_v8 = vld [vmem:[%s5862_s9 + $0x148] sm:$0xff]  }
0x10a4   : > { %4333 = vmatprep.subr.bf16.mxu0 %v4718_v9  ;;  %4355 = vmatprep.subr.bf16.mxu1 %v4719_v10  ;;  %v4743_v9 = vld [vmem:[%s5862_s9 + $0x1c8] sm:$0xff]  }
0x10a7   : > { %4334 = vmatpush3.bf16.msra.mxu0 %v4720_v11  ;;  %4356 = vmatpush3.bf16.msra.mxu1 %v4721_v12 }
0x10a8   : > { %4335 = vmatprep.subr.bf16.mxu0 %v4722_v13  ;;  %4357 = vmatprep.subr.bf16.mxu1 %v4723_v14 }
0x10ab   : > { %4336 = vmatpush3.bf16.msra.mxu0 %v4724_v15  ;;  %4358 = vmatpush3.bf16.msra.mxu1 %v4725_v6 }
0x10ac   : > { %4337 = vmatprep.subr.bf16.mxu0 %v4726_v16  ;;  %4359 = vmatprep.subr.bf16.mxu1 %v4727_v17  ;;  %v4744_v17 = vld [vmem:[%s5862_s9 + $0x108] sm:$0xff]  }
0x10af   : > { %4338 = vmatpush3.bf16.msra.mxu0 %v4728_v1  ;;  %4360 = vmatpush3.bf16.msra.mxu1 %v4729_v18  ;;  %v4745_v1 = vld [vmem:[%s5862_s9 + $0x188] sm:$0xff]  }
0x10b0   : > { %4339 = vmatprep.subr.bf16.mxu0 %v4730_v19  ;;  %4361 = vmatprep.subr.bf16.mxu1 %v4731_v20  ;;  %v4746_v20 = vld [vmem:[%s5862_s9 + $0x150] sm:$0xff]  }
0x10b3   : > { %4340 = vmatpush3.bf16.msra.mxu0 %v4732_v22  ;;  %4362 = vmatpush3.bf16.msra.mxu1 %v4733_v23  ;;  %v4747_v22 = vld [vmem:[%s5862_s9 + $0x1d0] sm:$0xff]  }
0x10b4   : > { %4341 = vmatprep.subr.bf16.mxu0 %v4734_v24  ;;  %4363 = vmatprep.subr.bf16.mxu1 %v4735_v25  ;;  %v1963_v25 = vrot.slane %v5473_v33, %v1930_v35  ;;  %v4750_v35 = vld [vmem:[%s5862_s9 + $0x158] sm:$0xff]  }
0x10b7   : > { %4342 = vmatpush3.bf16.msra.mxu0 %v4736_v26  ;;  %4364 = vmatpush3.bf16.msra.mxu1 %v4737_v27  ;;  %v1971_v26 = vrot.slane %v5473_v33, %v1938_v36  ;;  %v4751_v36 = vld [vmem:[%s5862_s9 + $0x1d8] sm:$0xff]  }
0x10b8   : > { %4371 = vmatprep.subr.bf16.mxu0 %v4738_v28  ;;  %4393 = vmatprep.subr.bf16.mxu1 %v4739_v29  ;;  %v4748_v29 = vld [vmem:[%s5862_s9 + $0x110] sm:$0xff]  }
0x1155   : > { %v2205_v44 = vpop.f32.mrb[48].mxu0  ;;  %v2246_v45 = vpop.f32.mrb[48].mxu1 }
0x1156   : > { %v2206_v46 = vadd.f32 %v2205_v44, %v1931_v40  ;;  %v2247_v47 = vadd.f32 %v2246_v45, %v1939_v41  ;;  %v2207_v48 = vpop.f32.mrb[49].mxu0  ;;  %v2248_v49 = vpop.f32.mrb[49].mxu1 }
0x1157   : > { %v2208_v50 = vadd.f32 %v2207_v48, %v1935_v42  ;;  %v2249_v51 = vadd.f32 %v2248_v49, %v1943_v43  ;;  %v2209_v52 = vpop.f32.mrb[50].mxu0  ;;  %v2250_v53 = vpop.f32.mrb[50].mxu1  ;;  %v4752_v48 = vld [vmem:[%s5862_s9 + $0x118] sm:$0xff]  }
0x1158   : > { %v2499_v56 = vmax.f32 %v2206_v46, 0.0  ;;  %v2501_v57 = vmax.f32 %v2247_v47, 0.0  ;;  %v2210_v58 = vpop.f32.mrb[51].mxu0  ;;  %v2251_v59 = vpop.f32.mrb[51].mxu1  ;;  %v4753_v49 = vld [vmem:[%s5862_s9 + $0x198] sm:$0xff]   ;;  %v4754_v53 = vld [vmem:[%s5862_s9 + $0x160] sm:$0xff]  }
0x1159   : > { %v2500_v61 = vmax.f32 %v2208_v50, 0.0  ;;  %v2502_v62 = vmax.f32 %v2249_v51, 0.0  ;;  %v1946_v50 = vsub.s32 4, %v5467_v31  ;;  %v4756_v58 = vld [vmem:[%s5862_s9 + $0x120] sm:$0xff]   ;;  %v4799_v31 = vld [vmem:[%s5862_s9 + $0x2f8] sm:$0xff]  }
0x115a   : > { %v2515_v5 = vpack.c.bf16 %v2499_v56, %v2499_v56  ;;  %v2517_v7 = vpack.c.bf16 %v2501_v57, %v2501_v57  ;;  %v4755_v56 = vld [vmem:[%s5862_s9 + $0x1e0] sm:$0xff]  }
0x115b   : > { %v2516_v60 = vpack.c.bf16 %v2500_v61, %v2500_v61  ;;  %v2518_v63 = vpack.c.bf16 %v2502_v62, %v2502_v62  ;;  %v1979_v57 = vrot.slane %v5473_v33, %v1946_v50  ;;  %v4757_v59 = vld [vmem:[%s5862_s9 + $0x1a0] sm:$0xff]   ;;  %v4758_v61 = vld [vmem:[%s5862_s9 + $0x168] sm:$0xff]  }
0x115c   : > { %v4759_v62 = vld [vmem:[%s5862_s9 + $0x1e8] sm:$0xff]  }
0x115d   : > { %v5517_v10 = vpop.f32.mrb[52].mxu0  ;;  %v5519_v11 = vpop.f32.mrb[52].mxu1  ;;  %3594 = vmatprep.mubr.bf16.mxu0 %v2516_v60  ;;  %3634 = vmatprep.mubr.bf16.mxu1 %v2518_v63 }
0x115e   : > { %v2289_v12 = vpop.f32.mrb[53].mxu0  ;;  %v2330_v13 = vpop.f32.mrb[53].mxu1  ;;  %3595 = vmatmul.mubr.bf16.vlgmr.msra.gmra.mrb[64].mxu0 %v2515_v5  ;;  %3635 = vmatmul.mubr.bf16.vlgmr.msra.gmra.mrb[64].mxu1 %v2517_v7 }
0x115f   : > { %v2290_v14 = vadd.f32 %v2289_v12, %v1951_v0  ;;  %v2331_v15 = vadd.f32 %v2330_v13, %v1959_v2  ;;  %4372 = vmatpush3.bf16.msra.mxu0 %v4740_v3  ;;  %4394 = vmatpush3.bf16.msra.mxu1 %v4741_v4  ;;  %v2291_v6 = vpop.f32.mrb[54].mxu0  ;;  %v2332_v16 = vpop.f32.mrb[54].mxu1  ;;  %v1947_v12 = vrot.slane %v5485_v37, %v1946_v50  ;;  %v4781_v50 = vld [vmem:[%s5862_s9 + $0x290] sm:$0xff]  }
0x1160   : > { %v2292_v18 = vpop.f32.mrb[55].mxu0  ;;  %v2333_v19 = vpop.f32.mrb[55].mxu1  ;;  %4373 = vmatprep.subr.bf16.mxu0 %v4742_v8  ;;  %4395 = vmatprep.subr.bf16.mxu1 %v4743_v9  ;;  %v4760_v8 = vld [vmem:[%s5862_s9 + $0x128] sm:$0xff]   ;;  %v4763_v6 = vld [vmem:[%s5862_s9 + $0x1f0] sm:$0xff]   ;;  %v1967_v16 = vrot.slane %v5473_v33, %v1934_v38  ;;  %v4766_v38 = vld [vmem:[%s5862_s9 + $0x178] sm:$0xff]  }
0x1161   : > { %v2504_v23 = vmax.f32 %v2290_v14, 0.0  ;;  %v2506_v24 = vmax.f32 %v2331_v15, 0.0  ;;  %v4761_v9 = vld [vmem:[%s5862_s9 + $0x1a8] sm:$0xff]   ;;  %v4762_v15 = vld [vmem:[%s5862_s9 + $0x170] sm:$0xff]  }
0x1163   : > { %v2520_v27 = vpack.c.bf16 %v2504_v23, %v2504_v23  ;;  %v2522_v28 = vpack.c.bf16 %v2506_v24, %v2506_v24  ;;  %4374 = vmatpush3.bf16.msra.mxu0 %v4744_v17  ;;  %4396 = vmatpush3.bf16.msra.mxu1 %v4745_v1  ;;  %v4765_v17 = vld [vmem:[%s5862_s9 + $0x1b0] sm:$0xff]   ;;  %v2288_v1 = vadd.f32 %v5517_v10, %v1947_v12  ;;  %v4768_v10 = vld [vmem:[%s5862_s9 + $0x138] sm:$0xff]   ;;  %v4770_v24 = vld [vmem:[%s5862_s9 + $0x240] sm:$0xff]  }
0x1164   : > { %4375 = vmatprep.subr.bf16.mxu0 %v4746_v20  ;;  %4397 = vmatprep.subr.bf16.mxu1 %v4747_v22  ;;  %v1991_v12 = vrot.slane %v5473_v33, %v1958_v55  ;;  %v4800_v55 = vld [vmem:[%s5862_s9 + $0x238] sm:$0xff]  }
0x1165   : > { %v2369_v40 = vpop.f32.mrb[56].mxu0  ;;  %v2410_v41 = vpop.f32.mrb[56].mxu1  ;;  %3674 = vmatprep.mubr.bf16.mxu0 %v2520_v27  ;;  %3714 = vmatprep.mubr.bf16.mxu1 %v2522_v28  ;;  %v2503_v22 = vmax.f32 %v2288_v1, 0.0  ;;  %v4772_v28 = vld [vmem:[%s5862_s9 + $0x200] sm:$0xff]  }
0x1166   : > { %v5547_v42 = vadd.f32 %v2369_v40, %v1963_v25  ;;  %v5549_v43 = vadd.f32 %v2410_v41, %v1971_v26  ;;  %v2371_v44 = vpop.f32.mrb[57].mxu0  ;;  %v2412_v45 = vpop.f32.mrb[57].mxu1  ;;  %v4771_v25 = vld [vmem:[%s5862_s9 + $0x2c0] sm:$0xff]   ;;  %v4774_v40 = vld [vmem:[%s5862_s9 + $0x248] sm:$0xff]  }
0x1167   : > { %4376 = vmatpush3.bf16.msra.mxu0 %v4748_v29  ;;  %4398 = vmatpush3.bf16.msra.mxu1 %v4749_v30  ;;  %v2373_v46 = vpop.f32.mrb[58].mxu0  ;;  %v2414_v47 = vpop.f32.mrb[58].mxu1  ;;  %v2372_v19 = vadd.f32 %v2371_v44, %v1967_v16  ;;  %v2519_v29 = vpack.c.bf16 %v2503_v22, %v2503_v22  ;;  %v4775_v41 = vld [vmem:[%s5862_s9 + $0x2c8] sm:$0xff]   ;;  %v4802_v16 = vld [vmem:[%s5862_s9 + $0x340] sm:$0xff]   ;;  %v4811_v22 = vld [vmem:[%s5862_s9 + $0x3d0] sm:$0xff]  }
0x1168   : > { %v2374_v51 = vpop.f32.mrb[59].mxu0  ;;  %v2415_v52 = vpop.f32.mrb[59].mxu1  ;;  %4377 = vmatprep.subr.bf16.mxu0 %v4750_v35  ;;  %4399 = vmatprep.subr.bf16.mxu1 %v4751_v36  ;;  %v4773_v35 = vld [vmem:[%s5862_s9 + $0x280] sm:$0xff]   ;;  %v4777_v46 = vld [vmem:[%s5862_s9 + $0x288] sm:$0xff]   ;;  %v4778_v47 = vld [vmem:[%s5862_s9 + $0x250] sm:$0xff]  }
0x1169   : > { %v2508_v26 = vmax.f32 %v2372_v19, 0.0  ;;  %v4782_v51 = vld [vmem:[%s5862_s9 + $0x258] sm:$0xff]   ;;  %v4805_v1 = vld [vmem:[%s5862_s9 + $0x380] sm:$0xff]  }
0x116a   : > { %v4783_v52 = vld [vmem:[%s5862_s9 + $0x2d8] sm:$0xff]  }
0x116b   : > { %4378 = vmatpush3.bf16.msra.mxu0 %v4752_v48  ;;  %4400 = vmatpush3.bf16.msra.mxu1 %v4753_v49  ;;  %v2524_v36 = vpack.c.bf16 %v2508_v26, %v2508_v26  ;;  %v4779_v48 = vld [vmem:[%s5862_s9 + $0x2d0] sm:$0xff]   ;;  %v4815_v26 = vld [vmem:[%s5862_s9 + $0x3d8] sm:$0xff]  }
0x116c   : > { %4379 = vmatprep.subr.bf16.mxu0 %v4754_v53  ;;  %4401 = vmatprep.subr.bf16.mxu1 %v4755_v56  ;;  %v4780_v49 = vld [vmem:[%s5862_s9 + $0x210] sm:$0xff]   ;;  %v4784_v53 = vld [vmem:[%s5862_s9 + $0x218] sm:$0xff]  }
0x116d   : > { %v2451_v60 = vpop.f32.mrb[60].mxu0  ;;  %v2492_v63 = vpop.f32.mrb[60].mxu1  ;;  %v4785_v56 = vld [vmem:[%s5862_s9 + $0x298] sm:$0xff]  }
0x116e   : > { %v5577_v0 = vadd.f32 %v2451_v60, %v1979_v57  ;;  %v5580_v2 = vadd.f32 %v2492_v63, %v5478_v34  ;;  %v5582_v3 = vpop.f32.mrb[61].mxu0  ;;  %v5584_v4 = vpop.f32.mrb[61].mxu1  ;;  %v1955_v34 = vrot.slane %v5485_v37, %v1954_v32  ;;  %v1975_v32 = vrot.slane %v5473_v33, %v1942_v39  ;;  %v4764_v37 = vld [vmem:[%s5862_s9 + $0x130] sm:$0xff]   ;;  %v4767_v39 = vld [vmem:[%s5862_s9 + $0x1f8] sm:$0xff]   ;;  %v4786_v57 = vld [vmem:[%s5862_s9 + $0x260] sm:$0xff]  }
0x116f   : > { %4380 = vmatpush3.bf16.msra.mxu0 %v4756_v58  ;;  %4402 = vmatpush3.bf16.msra.mxu1 %v4757_v59  ;;  %v2455_v5 = vpop.f32.mrb[62].mxu0  ;;  %v2496_v7 = vpop.f32.mrb[62].mxu1  ;;  %v4787_v58 = vld [vmem:[%s5862_s9 + $0x2e0] sm:$0xff]   ;;  %v4791_v60 = vld [vmem:[%s5862_s9 + $0x2e8] sm:$0xff]  }
0x1170   : > { %v2456_v13 = vpop.f32.mrb[63].mxu0  ;;  %v2497_v14 = vpop.f32.mrb[63].mxu1  ;;  %4381 = vmatprep.subr.bf16.mxu0 %v4758_v61  ;;  %4403 = vmatprep.subr.bf16.mxu1 %v4759_v62  ;;  %v2329_v18 = vadd.f32 %v5519_v11, %v1955_v34  ;;  %v2413_v20 = vadd.f32 %v2412_v45, %v1975_v32  ;;  %v4769_v11 = vld [vmem:[%s5862_s9 + $0x1b8] sm:$0xff]   ;;  %v4776_v45 = vld [vmem:[%s5862_s9 + $0x208] sm:$0xff]   ;;  %v4788_v59 = vld [vmem:[%s5862_s9 + $0x220] sm:$0xff]  }
0x1171   : > { %v4789_v61 = vld [vmem:[%s5862_s9 + $0x2a0] sm:$0xff]   ;;  %v4790_v62 = vld [vmem:[%s5862_s9 + $0x268] sm:$0xff]   ;;  %v4794_v7 = vld [vmem:[%s5862_s9 + $0x270] sm:$0xff]  }
0x1172   : > { %v2505_v23 = vmax.f32 %v2329_v18, 0.0  ;;  %v2510_v27 = vmax.f32 %v2413_v20, 0.0  ;;  %v4792_v63 = vld [vmem:[%s5862_s9 + $0x228] sm:$0xff]   ;;  %v4796_v34 = vld [vmem:[%s5862_s9 + $0x230] sm:$0xff]   ;;  %v4798_v14 = vld [vmem:[%s5862_s9 + $0x278] sm:$0xff]  }
0x1173   : > { %4382 = vmatpush3.bf16.msra.mxu0 %v4760_v8  ;;  %4404 = vmatpush3.bf16.msra.mxu1 %v4761_v9  ;;  %v4793_v5 = vld [vmem:[%s5862_s9 + $0x2a8] sm:$0xff]   ;;  %v4795_v8 = vld [vmem:[%s5862_s9 + $0x2f0] sm:$0xff]   ;;  %v1983_v9 = vrot.slane %v5473_v33, %v1950_v54  ;;  %v2495_v54 = vadd.f32 %v5584_v4, %v1991_v12  ;;  %v4803_v4 = vld [vmem:[%s5862_s9 + $0x3c0] sm:$0xff]  }
0x1174   : > { %4383 = vmatprep.subr.bf16.mxu0 %v4762_v15  ;;  %4405 = vmatprep.subr.bf16.mxu1 %v4763_v6  ;;  %v2521_v30 = vpack.c.bf16 %v2505_v23, %v2505_v23  ;;  %v2526_v44 = vpack.c.bf16 %v2510_v27, %v2510_v27  ;;  %v4797_v13 = vld [vmem:[%s5862_s9 + $0x2b0] sm:$0xff]   ;;  %v2507_v15 = vmax.f32 %v5547_v42, 0.0  ;;  %v4801_v6 = vld [vmem:[%s5862_s9 + $0x2b8] sm:$0xff]   ;;  %v4804_v42 = vld [vmem:[%s5862_s9 + $0x300] sm:$0xff]  }
0x1175   : > { %v2454_v33 = vadd.f32 %v5582_v3, %v1983_v9  ;;  %v2509_v3 = vmax.f32 %v5549_v43, 0.0  ;;  %v4806_v18 = vld [vmem:[%s5862_s9 + $0x348] sm:$0xff]   ;;  %v4812_v23 = vld [vmem:[%s5862_s9 + $0x310] sm:$0xff]   ;;  %v4816_v27 = vld [vmem:[%s5862_s9 + $0x318] sm:$0xff]  }
0x1176   : > { %v4808_v20 = vld [vmem:[%s5862_s9 + $0x308] sm:$0xff]  }
0x1177   : > { %4384 = vmatpush3.bf16.msra.mxu0 %v4764_v37  ;;  %4406 = vmatpush3.bf16.msra.mxu1 %v4765_v17  ;;  %v2512_v32 = vmax.f32 %v2454_v33, 0.0  ;;  %v2514_v37 = vmax.f32 %v2495_v54, 0.0  ;;  %v2523_v17 = vpack.c.bf16 %v2507_v15, %v2507_v15  ;;  %v2525_v43 = vpack.c.bf16 %v2509_v3, %v2509_v3 }
0x1178   : > { %4385 = vmatprep.subr.bf16.mxu0 %v4766_v38  ;;  %4407 = vmatprep.subr.bf16.mxu1 %v4767_v39  ;;  %v4807_v39 = vld [vmem:[%s5862_s9 + $0x3c8] sm:$0xff]  }
0x1179   : > { %v2528_v38 = vpack.c.bf16 %v2512_v32, %v2512_v32  ;;  %v2530_v19 = vpack.c.bf16 %v2514_v37, %v2514_v37 }
0x117b   : > { %4386 = vmatpush3.bf16.msra.mxu0 %v4768_v10  ;;  %4408 = vmatpush3.bf16.msra.mxu1 %v4769_v11  ;;  %v4809_v10 = vld [vmem:[%s5862_s9 + $0x388] sm:$0xff]   ;;  %v4810_v11 = vld [vmem:[%s5862_s9 + $0x350] sm:$0xff]  }
0x117c   : > { %4415 = vmatprep.subr.bf16.mxu0 %v4770_v24  ;;  %4437 = vmatprep.subr.bf16.mxu1 %v4771_v25  ;;  %v4813_v24 = vld [vmem:[%s5862_s9 + $0x390] sm:$0xff]   ;;  %v4814_v25 = vld [vmem:[%s5862_s9 + $0x358] sm:$0xff]  }
0x117e   : > { %3675 = vmatmul.mubr.bf16.vlgmr.msra.gmra.mrb[68].mxu0 %v2519_v29  ;;  %3715 = vmatmul.mubr.bf16.vlgmr.msra.gmra.mrb[68].mxu1 %v2521_v30  ;;  %v4818_v29 = vld [vmem:[%s5862_s9 + $0x360] sm:$0xff]  }
0x117f   : > { %4416 = vmatpush3.bf16.msra.mxu0 %v4772_v28  ;;  %3754 = vmatprep.mubr.bf16.mxu0 %v2524_v36  ;;  %v4817_v28 = vld [vmem:[%s5862_s9 + $0x398] sm:$0xff]   ;;  %v4819_v30 = vld [vmem:[%s5862_s9 + $0x3e0] sm:$0xff]  }
0x1180   : > { %4438 = vmatpush3.bf16.msra.mxu1 %v4773_v35  ;;  %3794 = vmatprep.mubr.bf16.mxu1 %v2526_v44  ;;  %v4820_v35 = vld [vmem:[%s5862_s9 + $0x320] sm:$0xff]   ;;  %v4824_v44 = vld [vmem:[%s5862_s9 + $0x328] sm:$0xff]  }
0x1181   : > { %4417 = vmatprep.subr.bf16.mxu0 %v4774_v40  ;;  %4439 = vmatprep.subr.bf16.mxu1 %v4775_v41  ;;  %v4821_v36 = vld [vmem:[%s5862_s9 + $0x3a0] sm:$0xff]   ;;  %v4822_v40 = vld [vmem:[%s5862_s9 + $0x368] sm:$0xff]  }
0x1182   : > { %v4823_v41 = vld [vmem:[%s5862_s9 + $0x3e8] sm:$0xff]  }
0x1183   : > { %4418 = vmatpush3.bf16.msra.mxu0 %v4776_v45  ;;  %v4825_v45 = vld [vmem:[%s5862_s9 + $0x3a8] sm:$0xff]  }
0x1184   : > { %4440 = vmatpush3.bf16.msra.mxu1 %v4777_v46  ;;  %4419 = vmatprep.subr.bf16.mxu0 %v4778_v47  ;;  %v4826_v46 = vld [vmem:[%s5862_s9 + $0x370] sm:$0xff]  }
0x1185   : > { %4441 = vmatprep.subr.bf16.mxu1 %v4779_v48  ;;  %v4827_v47 = vld [vmem:[%s5862_s9 + $0x3f0] sm:$0xff]  }
0x1186   : > { %v4828_v48 = vld [vmem:[%s5862_s9 + $0x330] sm:$0xff]  }
0x1187   : > { %4420 = vmatpush3.bf16.msra.mxu0 %v4780_v49  ;;  %v4829_v49 = vld [vmem:[%s5862_s9 + $0x3b0] sm:$0xff]  }
0x1188   : > { %4442 = vmatpush3.bf16.msra.mxu1 %v4781_v50  ;;  %4421 = vmatprep.subr.bf16.mxu0 %v4782_v51  ;;  %v4830_v50 = vld [vmem:[%s5862_s9 + $0x378] sm:$0xff]  }
0x1189   : > { %4443 = vmatprep.subr.bf16.mxu1 %v4783_v52  ;;  %v4831_v51 = vld [vmem:[%s5862_s9 + $0x3f8] sm:$0xff]  }
0x118a   : > { %v4832_v52 = vld [vmem:[%s5862_s9 + $0x338] sm:$0xff]  }
0x118b   : > { %4422 = vmatpush3.bf16.msra.mxu0 %v4784_v53  ;;  %v2511_v53 = vmax.f32 %v5577_v0, 0.0  ;;  %v4134_v0 = vld [vmem:[%s5863_s10] ss:$0 sm:$0xff] }
0x118c   : > { %4444 = vmatpush3.bf16.msra.mxu1 %v4785_v56  ;;  %4423 = vmatprep.subr.bf16.mxu0 %v4786_v57  ;;  %v4833_v56 = vld [vmem:[%s5862_s9 + $0x3b8] sm:$0xff]   ;;  %v2513_v57 = vmax.f32 %v5580_v2, 0.0 }
0x118d   : > { %4445 = vmatprep.subr.bf16.mxu1 %v4787_v58  ;;  %v2527_v58 = vpack.c.bf16 %v2511_v53, %v2511_v53 }
0x118f   : > { %4424 = vmatpush3.bf16.msra.mxu0 %v4788_v59  ;;  %v2529_v59 = vpack.c.bf16 %v2513_v57, %v2513_v57 }
0x1190   : > { %4446 = vmatpush3.bf16.msra.mxu1 %v4789_v61  ;;  %4425 = vmatprep.subr.bf16.mxu0 %v4790_v62 }
0x1191   : > { %4447 = vmatprep.subr.bf16.mxu1 %v4791_v60 }
0x1193   : > { %4426 = vmatpush3.bf16.msra.mxu0 %v4792_v63 }
0x1194   : > { %4448 = vmatpush3.bf16.msra.mxu1 %v4793_v5  ;;  %4427 = vmatprep.subr.bf16.mxu0 %v4794_v7 }
0x1195   : > { %4449 = vmatprep.subr.bf16.mxu1 %v4795_v8 }
0x1197   : > { %4428 = vmatpush3.bf16.msra.mxu0 %v4796_v34 }
0x1198   : > { %4450 = vmatpush3.bf16.msra.mxu1 %v4797_v13  ;;  %4429 = vmatprep.subr.bf16.mxu0 %v4798_v14 }
0x1199   : > { %4451 = vmatprep.subr.bf16.mxu1 %v4799_v31 }
0x119b   : > { %4430 = vmatpush3.bf16.msra.mxu0 %v4800_v55 }
0x119c   : > { %4452 = vmatpush3.bf16.msra.mxu1 %v4801_v6  ;;  %4459 = vmatprep.subr.bf16.mxu0 %v4802_v16 }
0x119d   : > { %4481 = vmatprep.subr.bf16.mxu1 %v4803_v4 }
0x119e   : > { %3755 = vmatmul.mubr.bf16.vlgmr.msra.gmra.mrb[72].mxu0 %v2523_v17 }
0x119f   : > { %3795 = vmatmul.mubr.bf16.vlgmr.msra.gmra.mrb[72].mxu1 %v2525_v43  ;;  %4460 = vmatpush3.bf16.msra.mxu0 %v4804_v42 }
0x11a0   : > { %3834 = vmatprep.mubr.bf16.mxu0 %v2528_v38  ;;  %4482 = vmatpush3.bf16.msra.mxu1 %v4805_v1 }
0x11a1   : > { %3874 = vmatprep.mubr.bf16.mxu1 %v2530_v19  ;;  %4461 = vmatprep.subr.bf16.mxu0 %v4806_v18 }
0x11a2   : > { %4483 = vmatprep.subr.bf16.mxu1 %v4807_v39 }
0x11a3   : > { %4462 = vmatpush3.bf16.msra.mxu0 %v4808_v20 }
0x11a4   : > { %4484 = vmatpush3.bf16.msra.mxu1 %v4809_v10  ;;  %4463 = vmatprep.subr.bf16.mxu0 %v4810_v11 }
0x11a5   : > { %4485 = vmatprep.subr.bf16.mxu1 %v4811_v22 }
0x11a7   : > { %4464 = vmatpush3.bf16.msra.mxu0 %v4812_v23 }
0x11a8   : > { %4486 = vmatpush3.bf16.msra.mxu1 %v4813_v24  ;;  %4465 = vmatprep.subr.bf16.mxu0 %v4814_v25 }
0x11a9   : > { %4487 = vmatprep.subr.bf16.mxu1 %v4815_v26 }
0x11ab   : > { %4466 = vmatpush3.bf16.msra.mxu0 %v4816_v27 }
0x11ac   : > { %4488 = vmatpush3.bf16.msra.mxu1 %v4817_v28  ;;  %4467 = vmatprep.subr.bf16.mxu0 %v4818_v29 }
0x11ad   : > { %4489 = vmatprep.subr.bf16.mxu1 %v4819_v30 }
0x11af   : > { %4468 = vmatpush3.bf16.msra.mxu0 %v4820_v35 }
0x11b0   : > { %4490 = vmatpush3.bf16.msra.mxu1 %v4821_v36  ;;  %4469 = vmatprep.subr.bf16.mxu0 %v4822_v40 }
0x11b1   : > { %4491 = vmatprep.subr.bf16.mxu1 %v4823_v41 }
0x11b3   : > { %4470 = vmatpush3.bf16.msra.mxu0 %v4824_v44 }
0x11b4   : > { %4492 = vmatpush3.bf16.msra.mxu1 %v4825_v45  ;;  %4471 = vmatprep.subr.bf16.mxu0 %v4826_v46 }
0x11b5   : > { %4493 = vmatprep.subr.bf16.mxu1 %v4827_v47 }
0x11b7   : > { %4472 = vmatpush3.bf16.msra.mxu0 %v4828_v48 }
0x11b8   : > { %4494 = vmatpush3.bf16.msra.mxu1 %v4829_v49  ;;  %4473 = vmatprep.subr.bf16.mxu0 %v4830_v50 }
0x11b9   : > { %4495 = vmatprep.subr.bf16.mxu1 %v4831_v51 }
0x11bb   : > { %4474 = vmatpush3.bf16.msra.mxu0 %v4832_v52 }
0x11bc   : > { %4496 = vmatpush3.bf16.msra.mxu1 %v4833_v56 }
0x11be   : > { %3835 = vmatmul.mubr.bf16.vlgmr.msra.gmra.mrb[76].mxu0 %v2527_v58  ;;  %v4264_v58 = vld [vmem:[%s5865_s12] ss:$0 sm:$0xff] }
0x11bf   : > { %3875 = vmatmul.mubr.bf16.vlgmr.msra.gmra.mrb[76].mxu1 %v2529_v59 }
0x1231   : > { %v4343_v61 = vpop.f32.mrb[64].mxu0  ;;  %v4365_v62 = vpop.f32.mrb[64].mxu1 }
0x1232   : > { %v4344_v60 = vpop.f32.mrb[65].mxu0  ;;  %v4366_v63 = vpop.f32.mrb[65].mxu1 }
0x1233   : > { %v4345_v5 = vadd.f32 %v4344_v60, %v4343_v61  ;;  %v4367_v7 = vadd.f32 %v4366_v63, %v4365_v62  ;;  %v4346_v8 = vpop.f32.mrb[66].mxu0  ;;  %v4368_v9 = vpop.f32.mrb[66].mxu1 }
0x1234   : > { %v4347_v2 = vpop.f32.mrb[67].mxu0  ;;  %v4369_v12 = vpop.f32.mrb[67].mxu1 }
0x1235   : > { %v3597_v34 = vadd.f32 %v4345_v5, %v4134_v0 }
0x1237   : > { %v3637_v13 = vadd.f32 %v4367_v7, %v3597_v34 }
0x1251   : > { %v4387_v14 = vpop.f32.mrb[68].mxu0  ;;  %v4409_v31 = vpop.f32.mrb[68].mxu1 }
0x1252   : > { %v4388_v33 = vpop.f32.mrb[69].mxu0  ;;  %v4410_v54 = vpop.f32.mrb[69].mxu1 }
0x1253   : > { %v4389_v55 = vadd.f32 %v4388_v33, %v4387_v14  ;;  %v4411_v15 = vadd.f32 %v4410_v54, %v4409_v31  ;;  %v4390_v6 = vpop.f32.mrb[70].mxu0  ;;  %v4412_v16 = vpop.f32.mrb[70].mxu1 }
0x1254   : > { %v4391_v3 = vpop.f32.mrb[71].mxu0  ;;  %v4413_v4 = vpop.f32.mrb[71].mxu1 }
0x1255   : > { %v3677_v32 = vadd.f32 %v4389_v55, %v3637_v13 }
0x1257   : > { %v3717_v37 = vadd.f32 %v4411_v15, %v3677_v32 }
0x1271   : > { %v4431_v42 = vpop.f32.mrb[72].mxu0 }
0x1272   : > { %v4453_v17 = vpop.f32.mrb[72].mxu1  ;;  %v4432_v1 = vpop.f32.mrb[73].mxu0 }
0x1273   : > { %v4433_v43 = vadd.f32 %v4432_v1, %v4431_v42  ;;  %v4454_v18 = vpop.f32.mrb[73].mxu1  ;;  %v4434_v38 = vpop.f32.mrb[74].mxu0 }
0x1274   : > { %v4455_v39 = vadd.f32 %v4454_v18, %v4453_v17  ;;  %v4456_v19 = vpop.f32.mrb[74].mxu1  ;;  %v4435_v20 = vpop.f32.mrb[75].mxu0 }
0x1275   : > { %v3757_v10 = vadd.f32 %v4433_v43, %v3717_v37  ;;  %v4457_v11 = vpop.f32.mrb[75].mxu1 }
0x1277   : > { %v3797_v22 = vadd.f32 %v4455_v39, %v3757_v10 }
0x1291   : > { %v4475_v23 = vpop.f32.mrb[76].mxu0 }
0x1292   : > { %v4497_v24 = vpop.f32.mrb[76].mxu1  ;;  %v4476_v25 = vpop.f32.mrb[77].mxu0 }
0x1293   : > { %v4477_v26 = vadd.f32 %v4476_v25, %v4475_v23  ;;  %v4498_v27 = vpop.f32.mrb[77].mxu1  ;;  %v4478_v28 = vpop.f32.mrb[78].mxu0 }
0x1294   : > { %v4499_v29 = vadd.f32 %v4498_v27, %v4497_v24  ;;  %v4500_v30 = vpop.f32.mrb[78].mxu1  ;;  %v4479_v35 = vpop.f32.mrb[79].mxu0 }
0x1295   : > { %v3837_v36 = vadd.f32 %v4477_v26, %v3797_v22  ;;  %v4501_v40 = vpop.f32.mrb[79].mxu1 }
0x1297   : > { %v3877_v41 = vadd.f32 %v4499_v29, %v3837_v36 }
0x1299   : > { %v3882_v44 = vadd.f32 %v3877_v41, %v5289_v21  ;;  %v4263_v21 = vld [vmem:[%s5864_s11] ss:$0 sm:$0xff] }
0x129b   : > { %v3883_v45 = vsel %vm462_vm1, %v3882_v44, 0.0 }
0x129c   : > { %3884 = vadd.xlane.f32.xlu0 %v3883_v45 }
0x1329   : > { %v3885_v46 = vpop.xlane.xlu0 %3884 }
0x132a   : > { %v3886_v47 = vmul.f32 0.03125, %v3885_v46 }
0x132c   : > { %v3887_v48 = vsub.f32 %v3882_v44, %v3886_v47 }
0x132e   : > { %v3888_v49 = vmul.f32 %v3887_v48, %v3887_v48 }
0x1330   : > { %v3889_v50 = vsel %vm462_vm1, %v3888_v49, 0.0 }
0x1331   : > { %3890 = vadd.xlane.f32.xlu1 %v3889_v50 }
0x13be   : > { %v3891_v51 = vpop.xlane.xlu1 %3890 }
0x13bf   : > { %v3892_v52 = vmul.f32 0.03125, %v3891_v51 }
0x13c1   : > { %v3893_v53 = vadd.f32 1e-05, %v3892_v52 }
0x13c3   : > { %4852 = vrsqrt.f32 %v3893_v53 }
0x13cd   : > { %v4853_v56 = vpop.eup %4852 }
0x13ce   : > { %v3895_v57 = vmul.f32 %v4853_v56, %v3887_v48 }
0x13d0   : > { %v3903_v59 = vmul.f32 %v4263_v21, %v3895_v57 }
0x13d2   : > { %v3911_v61 = vadd.f32 %v4264_v58, %v3903_v59 }
0x13d4   : > { %3912 = vst.msk [vmem:[%s435_s16] sm:$0xff] %vm462_vm1, %v3911_v61 }
0x13d5 PF: > { %s23_s25 = sadd.s32 1, %s4861_s25  }
0x13d6   : > { %p20_p4 = scmp.ge.s32.totalorder %s23_s25, 4  }
0x13d8   :  { %22 = sbr.rel (!%p20_p4) target bundleno = 1 (0x1), region = 127 }

// kernel: megatron_forward.12
= control target key start
LH: loop header
LB: loop body
LE: loop exit
PB: predicated region body
PF: predicated region fallthrough
CT: control target
= control target key end

     0   :  { %s8243_s0 = inlined_call_operand.vmem [shape: f32[2,8,32], index: 0, kind: input, shape index: {}]   ;;  %s8244_s1 = inlined_call_operand.vmem [shape: f32[2,8,32], index: 1, kind: input, shape index: {}]   ;;  %s8245_s2 = inlined_call_operand.vmem [shape: bf16[3,4,32,8], index: 2, kind: input, shape index: {}]   ;;  %s8246_s3 = inlined_call_operand.vmem [shape: f32[3,4,1,8], index: 3, kind: input, shape index: {}]   ;;  %s8247_s4 = inlined_call_operand.vmem [shape: bf16[4,8,32], index: 4, kind: input, shape index: {}]   ;;  %s8248_s5 = inlined_call_operand.vmem [shape: f32[1,32], index: 5, kind: input, shape index: {}]   ;;  %s8249_s6 = inlined_call_operand.vmem [shape: f32[1,32], index: 6, kind: input, shape index: {}]   ;;  %s8250_s7 = inlined_call_operand.vmem [shape: f32[1,32], index: 7, kind: input, shape index: {}]   ;;  %s8251_s8 = inlined_call_operand.vmem [shape: bf16[3,4,32,8], index: 8, kind: input, shape index: {}]   ;;  %s8252_s9 = inlined_call_operand.vmem [shape: f32[3,4,1,8], index: 9, kind: input, shape index: {}]   ;;  %s8253_s10 = inlined_call_operand.vmem [shape: bf16[4,8,32], index: 10, kind: input, shape index: {}]   ;;  %s8254_s11 = inlined_call_operand.vmem [shape: f32[1,32], index: 11, kind: input, shape index: {}]   ;;  %s8255_s12 = inlined_call_operand.vmem [shape: f32[1,32], index: 12, kind: input, shape index: {}]   ;;  %s8256_s13 = inlined_call_operand.vmem [shape: f32[1,32], index: 13, kind: input, shape index: {}]   ;;  %s8257_s14 = inlined_call_operand.vmem [shape: bf16[32,2048], index: 14, kind: input, shape index: {}]   ;;  %s8258_s15 = inlined_call_operand.vmem [shape: f32[1,2048], index: 15, kind: input, shape index: {}]   ;;  %s8259_s16 = inlined_call_operand.vmem [shape: bf16[2048,32], index: 16, kind: input, shape index: {}]   ;;  %s8260_s17 = inlined_call_operand.vmem [shape: f32[1,32], index: 17, kind: input, shape index: {}]   ;;  %s8261_s18 = inlined_call_operand.vmem [shape: f32[1,32], index: 18, kind: input, shape index: {}]   ;;  %s8262_s19 = inlined_call_operand.vmem [shape: f32[1,32], index: 19, kind: input, shape index: {}]   ;;  %s8263_s20 = inlined_call_operand.vmem [shape: f32[2,8,32], index: 20, kind: output, shape index: {}]  }
   0x1   :  { %8267 = sst [smem:[#allocation2_spill]] %s8243_s0 }
   0x2   :  { %8268 = sst [smem:[#allocation3_spill]] %s8244_s1  ;;  %s7035_s1 = smov 0  }
   0x3   :  { %8269 = sst [smem:[#allocation4_spill]] %s8245_s2 }
   0x4   :  { %8270 = sst [smem:[#allocation5_spill]] %s8246_s3 }
   0x5   :  { %8271 = sst [smem:[#allocation6_spill]] %s8247_s4 }
   0x6 LB: > { %s5638_s22 = sadd.s32 4294967295, %s6925_s1   ;;  %p5642_p0 = scmp.ge.s32.totalorder %s6925_s1, 1  ;;  %s6925_s1 = sphi %s7035_s1, %s30_s1  }
   0x7   : > { %p570_p1 = scmp.lt.s32.totalorder %s6925_s1, 3 }
   0x9   : > { %p571_p2 = pnand %p5642_p0, %p570_p1 }
   0xa   : > { %s8272_s2 = sld [smem:[#allocation4_spill]] (!%p571_p2)  ;;  %v6927_v1 = vmov (!%p571_p2), 0.0   ;;  %vm6928_vm0 = vmmov (!%p571_p2), 0   ;;  %p630_p3 = scmp.lt.s32.totalorder (!%p571_p2), %s5638_s22, 1  ;;  %vm669_vm1 = vcmask (!%p571_p2), 261120   ;;  %vm845_vm2 = vcmask (!%p571_p2), 64512  }
   0xb   : > { %574 = sbr.rel (%p571_p2) target bundleno = 9281 (0x2441), region = 100  ;;  %6365 = vmatprep.subr.bf16.mxu1 (!%p571_p2), %v6927_v1  ;;  %6357 = vmatprep.subr.bf16.mxu0 (!%p571_p2), %v6927_v1  ;;  %s8273_s21 = sld [smem:[#allocation2_spill]] (!%p571_p2)  ;;  %vm909_vm3 = vcmask (!%p571_p2), 1043456  }
   0xc   : > { %6369 = vmatprep.mubr.msk.bf16.mxu1 (!%p571_p2), %vm6928_vm0, %v6927_v1  ;;  %6361 = vmatprep.mubr.msk.bf16.mxu0 (!%p571_p2), %vm6928_vm0, %v6927_v1  ;;  %s8274_s25 = sld [smem:[#allocation5_spill]] (!%p571_p2)  ;;  %s8276_s28 = sld [smem:[#allocation3_spill]] (!%p571_p2) }
  0x10   : > { %v6704_v0 = vld [vmem:[%s8272_s2 + $0x40] sm:$0xff] (!%p571_p2)   ;;  %v6705_v2 = vld [vmem:[%s8272_s2 + $0x48] sm:$0xff] (!%p571_p2)   ;;  %v6712_v43 = vld [vmem:[%s8272_s2 + $0x10] sm:$0xff] (!%p571_p2)  }
  0x11   : > { %6366 = vmatpush3.bf16.msra.mxu1 (!%p571_p2), %v6704_v0  ;;  %v6706_v3 = vld [vmem:[%s8272_s2] sm:$0xff] (!%p571_p2)   ;;  %v6707_v4 = vld [vmem:[%s8272_s2 + $0x8] sm:$0xff] (!%p571_p2)   ;;  %v6713_v44 = vld [vmem:[%s8272_s2 + $0x18] sm:$0xff] (!%p571_p2)  }
  0x12   : > { %6367 = vmatprep.subr.bf16.mxu1 %v6927_v1  ;;  %6358 = vmatpush3.bf16.msra.mxu0 %v6706_v3  ;;  %s8278_s22 = smov (!%p630_p3, %s5638_s22), 1  ;;  %v5655_v7 = vld [vmem:[%s8274_s25 + $0x4] ss:$0 sm:$0xff]  ;;  %v5646_v14 = vld [vmem:[%s8274_s25] ss:$0 sm:$0xff]  ;;  %v6709_v23 = vld [vmem:[%s8272_s2 + $0x88] sm:$0xff]  }
  0x13   : > { %6359 = vmatprep.subr.bf16.mxu0 %v6927_v1  ;;  %s7063_s29 = sshll.u32 %s8278_s22, 3  ;;  %v6708_v22 = vld [vmem:[%s8272_s2 + $0x80] sm:$0xff]   ;;  %v5664_v38 = vld [vmem:[%s8274_s25 + $0x8] ss:$0 sm:$0xff]  ;;  %v6710_v48 = vld [vmem:[%s8272_s2 + $0x50] sm:$0xff]   ;;  %s8275_s22 = sld [smem:[#allocation6_spill]] }
  0x14   : > { %s7069_s23 = scalar_lea.vmem %s8273_s21, %s7063_s29  ;;  %v6711_v50 = vld [vmem:[%s8272_s2 + $0x58] sm:$0xff]   ;;  %v5684_v59 = vld [vmem:[%s8274_s25 + $0x5] ss:$0 sm:$0xff]  ;;  %v5675_v0 = vld [vmem:[%s8274_s25 + $0x1] ss:$0 sm:$0xff]  ;;  %s637_s4 = scalar_lea.vmem %s8276_s28, %s7063_s29 }
  0x15   : > { %6368 = vmatpush3.bf16.msra.mxu1 %v6705_v2  ;;  %v643_v5 = vld [vmem:[%s7069_s23] sm:$0xff]  ;;  %s641_s28 = scalar_lea.vmem %s8263_s20, %s7063_s29 }
  0x16   : > { %6381 = vmatprep.subr.bf16.mxu1 %v6927_v1  ;;  %6360 = vmatpush3.bf16.msra.mxu0 %v6707_v4  ;;  %v7073_v6 = vpack.c.bf16 %v643_v5, %v643_v5 }
  0x17   : > { %6373 = vmatprep.subr.bf16.mxu0 %v6927_v1 }
  0x18   : > { %6370 = vmatmul.mubr.msk.bf16.vlgmr.msra.gmra.mrb[0].mxu1 %vm669_vm1, %v7073_v6 }
  0x19   : > { %6362 = vmatmul.mubr.msk.bf16.vlgmr.msra.gmra.mrb[0].mxu0 %vm669_vm1, %v7073_v6  ;;  %6383 = vmatprep.mubr.msk.bf16.mxu1 %vm6928_vm0, %v6927_v1 }
  0x1a   : > { %6377 = vmatprep.mubr.msk.bf16.mxu0 %vm6928_vm0, %v6927_v1  ;;  %6374 = vmatpush3.bf16.msra.mxu0 %v6708_v22 }
  0x1b   : > { %6375 = vmatprep.subr.bf16.mxu0 %v6927_v1 }
  0x1e   : > { %6376 = vmatpush3.bf16.msra.mxu0 %v6709_v23 }
  0x1f   : > { %6387 = vmatprep.subr.bf16.mxu0 %v6927_v1 }
  0x21   : > { %6378 = vmatmul.mubr.msk.bf16.vlgmr.msra.gmra.mrb[4].mxu0 %vm669_vm1, %v7073_v6 }
  0x22   : > { %6389 = vmatprep.mubr.msk.bf16.mxu0 %vm6928_vm0, %v6927_v1 }
  0xeb   : > { %v772_v8 = vpop.f32.mrb[0].mxu1 }
  0xec   : > { %v707_v9 = vpop.f32.mrb[0].mxu0  ;;  %v773_v10 = vadd.f32 %v5655_v7, %v772_v8  ;;  %v6371_v11 = vpop.f32.mrb[1].mxu1  ;;  %v6714_v8 = vld [vmem:[%s8272_s2 + $0x90] sm:$0xff]  }
  0xed   : > { %v6363_v12 = vpop.f32.mrb[1].mxu0  ;;  %v775_v13 = vpop.f32.mrb[2].mxu1  ;;  %v708_v20 = vadd.f32 %v5646_v14, %v707_v9  ;;  %v6715_v9 = vld [vmem:[%s8272_s2 + $0x98] sm:$0xff]  }
  0xee   : > { %v710_v15 = vpop.f32.mrb[2].mxu0  ;;  %v844_v16 = vpack.c.bf16 %v773_v10, %v773_v10  ;;  %v6372_v17 = vpop.f32.mrb[3].mxu1 }
  0xef   : > { %v6364_v18 = vpop.f32.mrb[3].mxu0  ;;  %v843_v21 = vpack.c.bf16 %v708_v20, %v708_v20 }
  0xf0   : > { %v850_v19 = vsel %vm845_vm2, %v844_v16, 0  ;;  %v5693_v16 = vld [vmem:[%s8274_s25 + $0x9] ss:$0 sm:$0xff] }
  0xf1   : > { %6382 = vmatpush3.bf16.xpose.msra.mxu1 %v850_v19 }
  0xf2   : > { %6393 = vmatprep.subr.bf16.mxu1 %v6927_v1 }
  0xf4   : > { %v837_v35 = vpop.f32.mrb[4].mxu0 }
  0xf5   : > { %v6379_v36 = vpop.f32.mrb[5].mxu0  ;;  %v838_v40 = vadd.f32 %v5664_v38, %v837_v35 }
  0xf6   : > { %v840_v37 = vpop.f32.mrb[6].mxu0 }
  0xf7   : > { %v6380_v39 = vpop.f32.mrb[7].mxu0  ;;  %v905_v41 = vpack.c.bf16 %v838_v40, %v838_v40  ;;  %v6716_v37 = vld [vmem:[%s8272_s2 + $0x60] sm:$0xff]  }
  0xf8   : > { %6384 = vmatmul.mubr.msk.bf16.vlgmr.msra.gmra.mrb[4].mxu1 %vm845_vm2, %v843_v21  ;;  %v6717_v39 = vld [vmem:[%s8272_s2 + $0x68] sm:$0xff]  }
  0xf9   : > { %6397 = vmatprep.mubr.msk.bf16.mxu1 %vm6928_vm0, %v6927_v1  ;;  %v911_v42 = vsel %vm909_vm3, %v905_v41, 0  ;;  %6394 = vmatpush3.bf16.msra.mxu1 %v6712_v43  ;;  %v6718_v41 = vld [vmem:[%s8272_s2 + $0x20] sm:$0xff]  }
  0xfa   : > { %6388 = vmatpush3.bf16.msra.mxu0 %v911_v42  ;;  %6395 = vmatprep.subr.bf16.mxu1 %v6927_v1 }
  0xfb   : > { %6401 = vmatprep.subr.bf16.mxu0 %v6927_v1 }
  0xfd   : > { %6396 = vmatpush3.bf16.msra.mxu1 %v6713_v44 }
  0xfe   : > { %6409 = vmatprep.subr.bf16.mxu1 %v6927_v1 }
 0x100   : > { %6398 = vmatmul.mubr.msk.bf16.vlgmr.msra.gmra.mrb[8].mxu1 %vm669_vm1, %v7073_v6 }
 0x101   : > { %6413 = vmatprep.mubr.msk.bf16.mxu1 %vm6928_vm0, %v6927_v1  ;;  %6410 = vmatpush3.bf16.msra.mxu1 %v6714_v8 }
 0x102   : > { %6411 = vmatprep.subr.bf16.mxu1 %v6927_v1 }
 0x105   : > { %6412 = vmatpush3.bf16.msra.mxu1 %v6715_v9  ;;  %v6720_v9 = vld [vmem:[%s8272_s2 + $0xa0] sm:$0xff]  }
 0x106   : > { %6423 = vmatprep.subr.bf16.mxu1 %v6927_v1 }
 0x108   : > { %6414 = vmatmul.mubr.msk.bf16.vlgmr.msra.gmra.mrb[12].mxu1 %vm669_vm1, %v7073_v6 }
 0x109   : > { %6425 = vmatprep.mubr.msk.bf16.mxu1 %vm6928_vm0, %v6927_v1 }
 0x1cb   : > { %v886_v24 = vpop.f32.mrb[4].mxu1 }
 0x1cc   : > { %v892_v25 = vmul.f32 0.35355338, %v886_v24  ;;  %v6385_v26 = vpop.f32.mrb[5].mxu1 }
 0x1cd   : > { %v889_v27 = vpop.f32.mrb[6].mxu1 }
 0x1ce   : > { %v6386_v28 = vpop.f32.mrb[7].mxu1  ;;  %v893_v29 = vsel %vm845_vm2, %v892_v25, -inf }
 0x1cf   : > { %894 = vmax.xlane.f32.xlu0 %v893_v29  ;;  %v5699_v29 = vld [vmem:[%s8275_s22 + $0x4] sm:$0xf] }
 0x1d3   : > { %v1014_v51 = vpop.f32.mrb[8].mxu1 }
 0x1d4   : > { %v6399_v52 = vpop.f32.mrb[9].mxu1  ;;  %v1015_v5 = vadd.f32 %v5675_v0, %v1014_v51  ;;  %v5716_v51 = vld [vmem:[%s8274_s25 + $0x6] ss:$0 sm:$0xff]  ;;  %v5707_v0 = vld [vmem:[%s8274_s25 + $0x2] ss:$0 sm:$0xff] }
 0x1d5   : > { %v1017_v53 = vpop.f32.mrb[10].mxu1 }
 0x1d6   : > { %v6400_v54 = vpop.f32.mrb[11].mxu1  ;;  %v1150_v7 = vpack.c.bf16 %v1015_v5, %v1015_v5 }
 0x1db   : > { %v1144_v17 = vpop.f32.mrb[12].mxu1 }
 0x1dc   : > { %v1145_v18 = vadd.f32 %v5693_v16, %v1144_v17  ;;  %v6415_v19 = vpop.f32.mrb[13].mxu1 }
 0x1dd   : > { %v1147_v20 = vpop.f32.mrb[14].mxu1 }
 0x1de   : > { %v1211_v21 = vpack.c.bf16 %v1145_v18, %v1145_v18  ;;  %v6416_v22 = vpop.f32.mrb[15].mxu1 }
 0x1e0   : > { %v1216_v23 = vsel %vm909_vm3, %v1211_v21, 0 }
 0x1e1   : > { %6424 = vmatpush3.bf16.msra.mxu1 %v1216_v23 }
 0x1e2   : > { %6435 = vmatprep.subr.bf16.mxu1 %v6927_v1 }
 0x25c   : > { %v895_v30 = vpop.xlane.xlu0 %894 }
 0x25d   : > { %v896_v31 = vsub.f32 %v892_v25, %v895_v30  ;;  %v1265_v30 = vsel %vm909_vm3, %v5699_v29, 0 }
 0x25f   : > { %v897_v32 = vmul.f32 1.442695, %v896_v31 }
 0x261   : > { %6880 = vpow2.f32 %v897_v32 }
 0x26b   : > { %v6881_v33 = vpop.eup %6880 }
 0x26c   : > { %v899_v34 = vsel %vm845_vm2, %v6881_v33, 0.0 }
 0x26d   : > { %900 = vadd.xlane.f32.xlu0 %v899_v34 }
 0x2fa   : > { %v901_v45 = vpop.xlane.xlu0 %900 }
 0x2fb   : > { %6882 = vrcp.f32 %v901_v45 }
 0x305   : > { %v6883_v46 = vpop.eup %6882 }
 0x306   : > { %v903_v47 = vmul.f32 %v6883_v46, %v6881_v33  ;;  %v954_v33 = vld [vmem:[%s8275_s22] sm:$0xf]  ;;  %v6719_v46 = vld [vmem:[%s8272_s2 + $0x28] sm:$0xff]  }
 0x307   : > { %v1311_v36 = vsel %vm909_vm3, %v954_v33, 0 }
 0x308   : > { %v904_v49 = vpack.c.bf16 %v903_v47, %v903_v47 }
 0x30a   : > { %6390 = vmatmul.mubr.msk.bf16.vlgmr.msra.gmra.mrb[8].mxu0 %vm845_vm2, %v904_v49 }
 0x30b   : > { %6402 = vmatpush3.bf16.msra.mxu0 %v6710_v48  ;;  %6405 = vmatprep.mubr.msk.bf16.mxu0 %vm6928_vm0, %v6927_v1 }
 0x30c   : > { %6403 = vmatprep.subr.bf16.mxu0 %v6927_v1 }
 0x30f   : > { %6404 = vmatpush3.bf16.msra.mxu0 %v6711_v50 }
 0x310   : > { %6417 = vmatprep.subr.bf16.mxu0 %v6927_v1 }
 0x312   : > { %6406 = vmatmul.mubr.msk.bf16.vlgmr.msra.gmra.mrb[12].mxu0 %vm669_vm1, %v7073_v6 }
 0x313   : > { %6419 = vmatprep.mubr.msk.bf16.mxu0 %vm6928_vm0, %v6927_v1 }
 0x3dd   : > { %v7141_v55 = vpop.f32.mrb[8].mxu0 }
 0x3de   : > { %v6391_v56 = vpop.f32.mrb[9].mxu0  ;;  %v953_v38 = vpack.c.bf16 %v7141_v55, %v7141_v55 }
 0x3df   : > { %v950_v57 = vpop.f32.mrb[10].mxu0 }
 0x3e0   : > { %v6392_v58 = vpop.f32.mrb[11].mxu0 }
 0x3e5   : > { %v1079_v60 = vpop.f32.mrb[12].mxu0 }
 0x3e6   : > { %v1080_v61 = vadd.f32 %v5684_v59, %v1079_v60  ;;  %v6407_v62 = vpop.f32.mrb[13].mxu0 }
 0x3e7   : > { %v1082_v63 = vpop.f32.mrb[14].mxu0 }
 0x3e8   : > { %v1151_v2 = vpack.c.bf16 %v1080_v61, %v1080_v61  ;;  %v6408_v3 = vpop.f32.mrb[15].mxu0 }
 0x3ea   : > { %v1156_v4 = vsel %vm845_vm2, %v1151_v2, 0 }
 0x3eb   : > { %6418 = vmatpush3.bf16.xpose.msra.mxu0 %v1156_v4 }
 0x3ec   : > { %6429 = vmatprep.subr.bf16.mxu0 %v6927_v1 }
 0x3f2   : > { %6420 = vmatmul.mubr.msk.bf16.vlgmr.msra.gmra.mrb[16].mxu0 %vm845_vm2, %v1150_v7 }
 0x3f3   : > { %6431 = vmatprep.mubr.msk.bf16.mxu0 %vm6928_vm0, %v6927_v1  ;;  %6430 = vmatpush3.bf16.msra.mxu0 %v1265_v30  ;;  %v5731_v30 = vld [vmem:[%s8275_s22 + $0x8] sm:$0xf] }
 0x3f4   : > { %6441 = vmatprep.subr.bf16.mxu0 %v6927_v1 }
 0x4c5   : > { %v1192_v10 = vpop.f32.mrb[16].mxu0 }
 0x4c6   : > { %v1198_v11 = vmul.f32 0.35355338, %v1192_v10  ;;  %v6421_v12 = vpop.f32.mrb[17].mxu0  ;;  %v6721_v10 = vld [vmem:[%s8272_s2 + $0xa8] sm:$0xff]  }
 0x4c7   : > { %v1195_v13 = vpop.f32.mrb[18].mxu0 }
 0x4c8   : > { %v6422_v14 = vpop.f32.mrb[19].mxu0  ;;  %v1199_v15 = vsel %vm845_vm2, %v1198_v11, -inf }
 0x4c9   : > { %1200 = vmax.xlane.f32.xlu1 %v1199_v15 }
 0x556   : > { %v1201_v24 = vpop.xlane.xlu1 %1200 }
 0x557   : > { %v1202_v25 = vsub.f32 %v1198_v11, %v1201_v24 }
 0x559   : > { %v1203_v26 = vmul.f32 1.442695, %v1202_v25  ;;  %v5725_v25 = vld [vmem:[%s8274_s25 + $0xa] ss:$0 sm:$0xff] }
 0x55b   : > { %6884 = vpow2.f32 %v1203_v26 }
 0x565   : > { %v6885_v27 = vpop.eup %6884 }
 0x566   : > { %v1205_v28 = vsel %vm845_vm2, %v6885_v27, 0.0 }
 0x567   : > { %1206 = vadd.xlane.f32.xlu1 %v1205_v28 }
 0x5f4   : > { %v1207_v31 = vpop.xlane.xlu1 %1206 }
 0x5f5   : > { %6886 = vrcp.f32 %v1207_v31  ;;  %v1663_v31 = vsel %vm909_vm3, %v5731_v30, 0 }
 0x5ff   : > { %v6887_v32 = vpop.eup %6886 }
 0x600   : > { %v1209_v34 = vmul.f32 %v6887_v32, %v6885_v27 }
 0x602   : > { %v1210_v35 = vpack.c.bf16 %v1209_v34, %v1209_v34 }
 0x604   : > { %6426 = vmatmul.mubr.msk.bf16.vlgmr.msra.gmra.mrb[16].mxu1 %vm845_vm2, %v1210_v35 }
 0x605   : > { %6436 = vmatpush3.bf16.msra.mxu1 %v1311_v36  ;;  %6437 = vmatprep.mubr.msk.bf16.mxu1 %vm6928_vm0, %v6927_v1  ;;  %v6724_v36 = vld [vmem:[%s8272_s2 + $0x30] sm:$0xff]  }
 0x606   : > { %6449 = vmatprep.subr.bf16.mxu1 %v6927_v1 }
 0x60c   : > { %6438 = vmatmul.mubr.msk.bf16.vlgmr.msra.gmra.mrb[20].mxu1 %vm845_vm2, %v953_v38 }
 0x60d   : > { %6450 = vmatpush3.bf16.msra.mxu1 %v6716_v37  ;;  %6453 = vmatprep.mubr.msk.bf16.mxu1 %vm6928_vm0, %v6927_v1  ;;  %v6725_v37 = vld [vmem:[%s8272_s2 + $0x38] sm:$0xff]  }
 0x60e   : > { %6451 = vmatprep.subr.bf16.mxu1 %v6927_v1 }
 0x611   : > { %6452 = vmatpush3.bf16.msra.mxu1 %v6717_v39  ;;  %v6722_v39 = vld [vmem:[%s8272_s2 + $0x70] sm:$0xff]  }
 0x612   : > { %6465 = vmatprep.subr.bf16.mxu1 %v6927_v1 }
 0x614   : > { %6454 = vmatmul.mubr.msk.bf16.vlgmr.msra.gmra.mrb[24].mxu1 %vm669_vm1, %v7073_v6 }
 0x615   : > { %6467 = vmatprep.mubr.msk.bf16.mxu1 %vm6928_vm0, %v6927_v1 }
 0x6d7   : > { %v1252_v40 = vpop.f32.mrb[16].mxu1 }
 0x6d8   : > { %v1258_v42 = vpack.c.bf16 %v1252_v40, %v1252_v40  ;;  %v6427_v43 = vpop.f32.mrb[17].mxu1 }
 0x6d9   : > { %v1255_v44 = vpop.f32.mrb[18].mxu1 }
 0x6da   : > { %v6428_v45 = vpop.f32.mrb[19].mxu1  ;;  %6432 = vmatmul.mubr.msk.bf16.vlgmr.msra.gmra.mrb[20].mxu0 %vm845_vm2, %v1258_v42  ;;  %v6723_v44 = vld [vmem:[%s8272_s2 + $0x78] sm:$0xff]  }
 0x6db   : > { %6442 = vmatpush3.bf16.msra.mxu0 %v6718_v41  ;;  %6445 = vmatprep.mubr.msk.bf16.mxu0 %vm6928_vm0, %v6927_v1 }
 0x6dc   : > { %6443 = vmatprep.subr.bf16.mxu0 %v6927_v1 }
 0x6df   : > { %v1347_v47 = vpop.f32.mrb[20].mxu1  ;;  %6444 = vmatpush3.bf16.msra.mxu0 %v6719_v46 }
 0x6e0   : > { %v6439_v48 = vpop.f32.mrb[21].mxu1  ;;  %6457 = vmatprep.subr.bf16.mxu0 %v6927_v1 }
 0x6e1   : > { %v1350_v49 = vpop.f32.mrb[22].mxu1 }
 0x6e2   : > { %v6440_v50 = vpop.f32.mrb[23].mxu1  ;;  %6446 = vmatmul.mubr.msk.bf16.vlgmr.msra.gmra.mrb[24].mxu0 %vm669_vm1, %v7073_v6 }
 0x6e3   : > { %6461 = vmatprep.mubr.msk.bf16.mxu0 %vm6928_vm0, %v6927_v1  ;;  %6458 = vmatpush3.bf16.msra.mxu0 %v6720_v9 }
 0x6e4   : > { %6459 = vmatprep.subr.bf16.mxu0 %v6927_v1 }
 0x6e7   : > { %v1477_v52 = vpop.f32.mrb[24].mxu1  ;;  %6460 = vmatpush3.bf16.msra.mxu0 %v6721_v10 }
 0x6e8   : > { %v1478_v53 = vadd.f32 %v5716_v51, %v1477_v52  ;;  %v6455_v54 = vpop.f32.mrb[25].mxu1  ;;  %6471 = vmatprep.subr.bf16.mxu0 %v6927_v1 }
 0x6e9   : > { %v1480_v55 = vpop.f32.mrb[26].mxu1  ;;  %v5747_v54 = vld [vmem:[%s8274_s25 + $0x7] ss:$0 sm:$0xff] }
 0x6ea   : > { %v1549_v56 = vpack.c.bf16 %v1478_v53, %v1478_v53  ;;  %v6456_v57 = vpop.f32.mrb[27].mxu1  ;;  %6462 = vmatmul.mubr.msk.bf16.vlgmr.msra.gmra.mrb[28].mxu0 %vm669_vm1, %v7073_v6 }
 0x6eb   : > { %6473 = vmatprep.mubr.msk.bf16.mxu0 %vm6928_vm0, %v6927_v1 }
 0x6ec   : > { %v1554_v58 = vsel %vm845_vm2, %v1549_v56, 0 }
 0x6ed   : > { %6466 = vmatpush3.bf16.xpose.msra.mxu1 %v1554_v58 }
 0x6ee   : > { %6477 = vmatprep.subr.bf16.mxu1 %v6927_v1 }
 0x7ad   : > { %v1301_v59 = vpop.f32.mrb[20].mxu0 }
 0x7ae   : > { %v7223_v60 = vadd.f32 %v1347_v47, %v1301_v59  ;;  %v6433_v61 = vpop.f32.mrb[21].mxu0  ;;  %v5738_v59 = vld [vmem:[%s8274_s25 + $0x3] ss:$0 sm:$0xff] }
 0x7af   : > { %v1304_v62 = vpop.f32.mrb[22].mxu0 }
 0x7b0   : > { %v6434_v63 = vpop.f32.mrb[23].mxu0 }
 0x7b5   : > { %v1412_v2 = vpop.f32.mrb[24].mxu0 }
 0x7b6   : > { %v1413_v3 = vadd.f32 %v5707_v0, %v1412_v2  ;;  %v6447_v4 = vpop.f32.mrb[25].mxu0  ;;  %v6726_v2 = vld [vmem:[%s8272_s2 + $0xb0] sm:$0xff]  }
 0x7b7   : > { %v1415_v5 = vpop.f32.mrb[26].mxu0 }
 0x7b8   : > { %v1548_v7 = vpack.c.bf16 %v1413_v3, %v1413_v3  ;;  %v6448_v8 = vpop.f32.mrb[27].mxu0  ;;  %v6727_v3 = vld [vmem:[%s8272_s2 + $0xb8] sm:$0xff]  }
 0x7ba   : > { %6468 = vmatmul.mubr.msk.bf16.vlgmr.msra.gmra.mrb[28].mxu1 %vm845_vm2, %v1548_v7 }
 0x7bb   : > { %6479 = vmatprep.mubr.msk.bf16.mxu1 %vm6928_vm0, %v6927_v1  ;;  %6478 = vmatpush3.bf16.msra.mxu1 %v1663_v31 }
 0x7bc   : > { %6491 = vmatprep.subr.bf16.mxu1 %v6927_v1 }
 0x7bd   : > { %v1542_v22 = vpop.f32.mrb[28].mxu0 }
 0x7be   : > { %v6463_v23 = vpop.f32.mrb[29].mxu0  ;;  %v1543_v27 = vadd.f32 %v5725_v25, %v1542_v22 }
 0x7bf   : > { %v1545_v24 = vpop.f32.mrb[30].mxu0  ;;  %v5762_v23 = vld [vmem:[%s8275_s22 + $0xc] sm:$0xf] }
 0x7c0   : > { %v6464_v26 = vpop.f32.mrb[31].mxu0  ;;  %v1609_v28 = vpack.c.bf16 %v1543_v27, %v1543_v27  ;;  %v2016_v24 = vsel %vm909_vm3, %v5762_v23, 0 }
 0x7c2   : > { %v1614_v29 = vsel %vm909_vm3, %v1609_v28, 0 }
 0x7c3   : > { %6472 = vmatpush3.bf16.msra.mxu0 %v1614_v29 }
 0x7c4   : > { %6483 = vmatprep.subr.bf16.mxu0 %v6927_v1 }
 0x88d   : > { %v1590_v11 = vpop.f32.mrb[28].mxu1 }
 0x88e   : > { %v1596_v12 = vmul.f32 0.35355338, %v1590_v11  ;;  %v6469_v13 = vpop.f32.mrb[29].mxu1 }
 0x88f   : > { %v1593_v14 = vpop.f32.mrb[30].mxu1 }
 0x890   : > { %v6470_v15 = vpop.f32.mrb[31].mxu1  ;;  %v1597_v16 = vsel %vm845_vm2, %v1596_v12, -inf }
 0x891   : > { %1598 = vmax.xlane.f32.xlu0 %v1597_v16 }
 0x91e   : > { %v1599_v17 = vpop.xlane.xlu0 %1598 }
 0x91f   : > { %v1600_v18 = vsub.f32 %v1596_v12, %v1599_v17 }
 0x921   : > { %v1601_v19 = vmul.f32 1.442695, %v1600_v18  ;;  %v5756_v18 = vld [vmem:[%s8274_s25 + $0xb] ss:$0 sm:$0xff] }
 0x923   : > { %6888 = vpow2.f32 %v1601_v19 }
 0x92d   : > { %v6889_v20 = vpop.eup %6888 }
 0x92e   : > { %v1603_v21 = vsel %vm845_vm2, %v6889_v20, 0.0 }
 0x92f   : > { %1604 = vadd.xlane.f32.xlu1 %v1603_v21 }
 0x9bc   : > { %v1605_v32 = vpop.xlane.xlu1 %1604 }
 0x9bd   : > { %6890 = vrcp.f32 %v1605_v32 }
 0x9c7   : > { %v6891_v33 = vpop.eup %6890 }
 0x9c8   : > { %v1607_v34 = vmul.f32 %v6891_v33, %v6889_v20 }
 0x9ca   : > { %v1608_v35 = vpack.c.bf16 %v1607_v34, %v1607_v34 }
 0x9cc   : > { %6474 = vmatmul.mubr.msk.bf16.vlgmr.msra.gmra.mrb[32].mxu0 %vm845_vm2, %v1608_v35  ;;  %v5764_v35 = vld [vmem:[%s8248_s5] ss:$0 sm:$0xff] }
 0x9cd   : > { %6487 = vmatprep.mubr.msk.bf16.mxu0 %vm6928_vm0, %v6927_v1  ;;  %6484 = vmatpush3.bf16.msra.mxu0 %v6724_v36 }
 0x9ce   : > { %6485 = vmatprep.subr.bf16.mxu0 %v6927_v1 }
 0x9d1   : > { %6486 = vmatpush3.bf16.msra.mxu0 %v6725_v37 }
 0x9d2   : > { %6499 = vmatprep.subr.bf16.mxu0 %v6927_v1 }
 0x9d4   : > { %6488 = vmatmul.mubr.msk.bf16.vlgmr.msra.gmra.mrb[36].mxu0 %vm669_vm1, %v7073_v6 }
 0x9d5   : > { %6503 = vmatprep.mubr.msk.bf16.mxu0 %vm6928_vm0, %v6927_v1  ;;  %6500 = vmatpush3.bf16.msra.mxu0 %v6726_v2  ;;  %v5776_v2 = vld [vmem:[%s8252_s9 + $0x4] ss:$0 sm:$0xff] }
 0x9d6   : > { %6501 = vmatprep.subr.bf16.mxu0 %v6927_v1 }
 0x9d9   : > { %6502 = vmatpush3.bf16.msra.mxu0 %v6727_v3 }
 0x9da   : > { %6513 = vmatprep.subr.bf16.mxu0 %v6927_v1 }
 0x9dc   : > { %6504 = vmatmul.mubr.msk.bf16.vlgmr.msra.gmra.mrb[40].mxu0 %vm669_vm1, %v7073_v6 }
 0x9dd   : > { %6515 = vmatprep.mubr.msk.bf16.mxu0 %vm6928_vm0, %v6927_v1 }
 0xa9f   : > { %v1650_v38 = vpop.f32.mrb[32].mxu0 }
 0xaa0   : > { %v1656_v40 = vpack.c.bf16 %v1650_v38, %v1650_v38  ;;  %v6475_v41 = vpop.f32.mrb[33].mxu0 }
 0xaa1   : > { %v1653_v42 = vpop.f32.mrb[34].mxu0  ;;  %v6918_v41 = vld [vmem:[%s7069_s23] sm:$0xff] }
 0xaa2   : > { %v6476_v43 = vpop.f32.mrb[35].mxu0  ;;  %6480 = vmatmul.mubr.msk.bf16.vlgmr.msra.gmra.mrb[32].mxu1 %vm845_vm2, %v1656_v40 }
 0xaa3   : > { %6492 = vmatpush3.bf16.msra.mxu1 %v6722_v39  ;;  %6495 = vmatprep.mubr.msk.bf16.mxu1 %vm6928_vm0, %v6927_v1 }
 0xaa4   : > { %6493 = vmatprep.subr.bf16.mxu1 %v6927_v1 }
 0xaa7   : > { %6494 = vmatpush3.bf16.msra.mxu1 %v6723_v44  ;;  %v1765_v45 = vpop.f32.mrb[36].mxu0 }
 0xaa8   : > { %6507 = vmatprep.subr.bf16.mxu1 %v6927_v1  ;;  %v6489_v46 = vpop.f32.mrb[37].mxu0  ;;  %v1766_v63 = vadd.f32 %v5738_v59, %v1765_v45  ;;  %v5765_v59 = vld [vmem:[%s8249_s6] ss:$0 sm:$0xff] }
 0xaa9   : > { %v1768_v47 = vpop.f32.mrb[38].mxu0 }
 0xaaa   : > { %6496 = vmatmul.mubr.msk.bf16.vlgmr.msra.gmra.mrb[36].mxu1 %vm669_vm1, %v7073_v6  ;;  %v6490_v48 = vpop.f32.mrb[39].mxu0  ;;  %v1901_v0 = vpack.c.bf16 %v1766_v63, %v1766_v63 }
 0xaab   : > { %6509 = vmatprep.mubr.msk.bf16.mxu1 %vm6928_vm0, %v6927_v1 }
 0xaaf   : > { %v1895_v6 = vpop.f32.mrb[40].mxu0 }
 0xab0   : > { %v6505_v16 = vpop.f32.mrb[41].mxu0  ;;  %v1896_v20 = vadd.f32 %v5756_v18, %v1895_v6  ;;  %v6732_v6 = vld [vmem:[%s8251_s8 + $0x10] sm:$0xff]   ;;  %v6733_v18 = vld [vmem:[%s8251_s8 + $0x18] sm:$0xff]  }
 0xab1   : > { %v1898_v17 = vpop.f32.mrb[42].mxu0 }
 0xab2   : > { %v6506_v19 = vpop.f32.mrb[43].mxu0  ;;  %v1962_v21 = vpack.c.bf16 %v1896_v20, %v1896_v20  ;;  %v6735_v20 = vld [vmem:[%s8251_s8 + $0x88] sm:$0xff]  }
 0xab3   : > { %v6734_v19 = vld [vmem:[%s8251_s8 + $0x80] sm:$0xff]  }
 0xab4   : > { %v1967_v22 = vsel %vm909_vm3, %v1962_v21, 0 }
 0xab5   : > { %6514 = vmatpush3.bf16.msra.mxu0 %v1967_v22 }
 0xab6   : > { %6525 = vmatprep.subr.bf16.mxu0 %v6927_v1 }
 0xb75   : > { %v1699_v49 = vpop.f32.mrb[32].mxu1 }
 0xb76   : > { %v7286_v50 = vadd.f32 %v1699_v49, %v7223_v60  ;;  %v6481_v51 = vpop.f32.mrb[33].mxu1  ;;  %v6728_v49 = vld [vmem:[%s8251_s8 + $0x40] sm:$0xff]  }
 0xb77   : > { %v1702_v52 = vpop.f32.mrb[34].mxu1  ;;  %v644_v51 = vld [vmem:[%s637_s4] sm:$0xff] }
 0xb78   : > { %v6482_v53 = vpop.f32.mrb[35].mxu1  ;;  %v7347_v52 = vpack.c.bf16 %v644_v51, %v644_v51 }
 0xb79   : > { %v6730_v53 = vld [vmem:[%s8251_s8] sm:$0xff]  }
 0xb7d   : > { %v1830_v55 = vpop.f32.mrb[36].mxu1 }
 0xb7e   : > { %v1831_v56 = vadd.f32 %v5747_v54, %v1830_v55  ;;  %v6497_v57 = vpop.f32.mrb[37].mxu1  ;;  %v6731_v54 = vld [vmem:[%s8251_s8 + $0x8] sm:$0xff]  }
 0xb7f   : > { %v1833_v58 = vpop.f32.mrb[38].mxu1 }
 0xb80   : > { %v1902_v61 = vpack.c.bf16 %v1831_v56, %v1831_v56  ;;  %v6498_v62 = vpop.f32.mrb[39].mxu1 }
 0xb81   : > { %v5766_v62 = vld [vmem:[%s8250_s7] ss:$0 sm:$0xff] }
 0xb82   : > { %v1907_v60 = vsel %vm845_vm2, %v1902_v61, 0 }
 0xb83   : > { %6508 = vmatpush3.bf16.xpose.msra.mxu1 %v1907_v60 }
 0xb84   : > { %6519 = vmatprep.subr.bf16.mxu1 %v6927_v1 }
 0xb8a   : > { %6510 = vmatmul.mubr.msk.bf16.vlgmr.msra.gmra.mrb[40].mxu1 %vm845_vm2, %v1901_v0 }
 0xb8b   : > { %6521 = vmatprep.mubr.msk.bf16.mxu1 %vm6928_vm0, %v6927_v1  ;;  %6520 = vmatpush3.bf16.msra.mxu1 %v2016_v24 }
 0xb8c   : > { %6533 = vmatprep.subr.bf16.mxu1 %v6927_v1 }
 0xc5d   : > { %v1943_v4 = vpop.f32.mrb[40].mxu1 }
 0xc5e   : > { %v1949_v5 = vmul.f32 0.35355338, %v1943_v4  ;;  %v6511_v7 = vpop.f32.mrb[41].mxu1 }
 0xc5f   : > { %v1946_v8 = vpop.f32.mrb[42].mxu1 }
 0xc60   : > { %v6512_v9 = vpop.f32.mrb[43].mxu1  ;;  %v1950_v10 = vsel %vm845_vm2, %v1949_v5, -inf }
 0xc61   : > { %1951 = vmax.xlane.f32.xlu0 %v1950_v10 }
 0xcee   : > { %v1952_v11 = vpop.xlane.xlu0 %1951 }
 0xcef   : > { %v1953_v12 = vsub.f32 %v1949_v5, %v1952_v11  ;;  %v5767_v11 = vld [vmem:[%s8252_s9] ss:$0 sm:$0xff] }
 0xcf1   : > { %v1954_v13 = vmul.f32 1.442695, %v1953_v12 }
 0xcf3   : > { %6892 = vpow2.f32 %v1954_v13 }
 0xcfd   : > { %v6893_v14 = vpop.eup %6892 }
 0xcfe   : > { %v1956_v15 = vsel %vm845_vm2, %v6893_v14, 0.0 }
 0xcff   : > { %1957 = vadd.xlane.f32.xlu1 %v1956_v15 }
 0xd8c   : > { %v1958_v25 = vpop.xlane.xlu1 %1957 }
 0xd8d   : > { %6894 = vrcp.f32 %v1958_v25 }
 0xd97   : > { %v6895_v26 = vpop.eup %6894 }
 0xd98   : > { %v1960_v27 = vmul.f32 %v6895_v26, %v6893_v14 }
 0xd9a   : > { %v1961_v28 = vpack.c.bf16 %v1960_v27, %v1960_v27 }
 0xd9c   : > { %6516 = vmatmul.mubr.msk.bf16.vlgmr.msra.gmra.mrb[44].mxu0 %vm845_vm2, %v1961_v28 }
 0xd9d   : > { %6529 = vmatprep.mubr.msk.bf16.mxu0 %vm6928_vm0, %v6927_v1  ;;  %6526 = vmatpush3.bf16.msra.mxu0 %v6730_v53 }
 0xd9e   : > { %6527 = vmatprep.subr.bf16.mxu0 %v6927_v1 }
 0xda1   : > { %6528 = vmatpush3.bf16.msra.mxu0 %v6731_v54 }
 0xda2   : > { %6541 = vmatprep.subr.bf16.mxu0 %v6927_v1 }
 0xe6f   : > { %v2003_v29 = vpop.f32.mrb[44].mxu0 }
 0xe70   : > { %v2009_v30 = vpack.c.bf16 %v2003_v29, %v2003_v29  ;;  %v6517_v31 = vpop.f32.mrb[45].mxu0 }
 0xe71   : > { %v2006_v32 = vpop.f32.mrb[46].mxu0 }
 0xe72   : > { %v6518_v33 = vpop.f32.mrb[47].mxu0  ;;  %6522 = vmatmul.mubr.msk.bf16.vlgmr.msra.gmra.mrb[44].mxu1 %vm845_vm2, %v2009_v30 }
 0xe73   : > { %6537 = vmatprep.mubr.msk.bf16.mxu1 %vm6928_vm0, %v6927_v1  ;;  %6534 = vmatpush3.bf16.msra.mxu1 %v6728_v49  ;;  %v6737_v49 = vld [vmem:[%s8251_s8 + $0x58] sm:$0xff]  }
 0xe74   : > { %6535 = vmatprep.subr.bf16.mxu1 %v6927_v1 }
 0xf45   : > { %v2052_v34 = vpop.f32.mrb[44].mxu1 }
 0xf46   : > { %v2058_v36 = vadd.f32 %v2052_v34, %v7286_v50  ;;  %v6523_v37 = vpop.f32.mrb[45].mxu1  ;;  %v6729_v50 = vld [vmem:[%s8251_s8 + $0x48] sm:$0xff]  }
 0xf47   : > { %v2055_v38 = vpop.f32.mrb[46].mxu1  ;;  %6536 = vmatpush3.bf16.msra.mxu1 %v6729_v50 }
 0xf48   : > { %v2066_v39 = vadd.f32 %v5764_v35, %v2058_v36  ;;  %v6524_v40 = vpop.f32.mrb[47].mxu1  ;;  %6549 = vmatprep.subr.bf16.mxu1 %v6927_v1 }
 0xf4a   : > { %v2067_v42 = vadd.f32 %v6918_v41, %v2066_v39  ;;  %6538 = vmatmul.mubr.msk.bf16.vlgmr.msra.gmra.mrb[48].mxu1 %vm669_vm1, %v7347_v52  ;;  %v5785_v39 = vld [vmem:[%s8252_s9 + $0x8] ss:$0 sm:$0xff] }
 0xf4b   : > { %6551 = vmatprep.mubr.msk.bf16.mxu1 %vm6928_vm0, %v6927_v1 }
 0xf4c   : > { %v2068_v43 = vsel %vm669_vm1, %v2067_v42, 0.0 }
 0xf4d   : > { %2069 = vadd.xlane.f32.xlu0 %v2068_v43 }
 0xfda   : > { %v2070_v44 = vpop.xlane.xlu0 %2069 }
 0xfdb   : > { %v2072_v45 = vmul.f32 0.03125, %v2070_v44 }
 0xfdd   : > { %v2073_v46 = vsub.f32 %v2067_v42, %v2072_v45 }
 0xfdf   : > { %v2074_v47 = vmul.f32 %v2073_v46, %v2073_v46 }
 0xfe1   : > { %v2075_v48 = vsel %vm669_vm1, %v2074_v47, 0.0  ;;  %v6736_v47 = vld [vmem:[%s8251_s8 + $0x50] sm:$0xff]  }
 0xfe2   : > { %2076 = vadd.xlane.f32.xlu1 %v2075_v48 }
0x101d   : > { %v2228_v3 = vpop.f32.mrb[48].mxu1 }
0x101e   : > { %v2229_v4 = vadd.f32 %v5776_v2, %v2228_v3  ;;  %v6539_v5 = vpop.f32.mrb[49].mxu1 }
0x101f   : > { %v2231_v7 = vpop.f32.mrb[50].mxu1  ;;  %v6738_v5 = vld [vmem:[%s8251_s8 + $0x90] sm:$0xff]  }
0x1020   : > { %v2300_v8 = vpack.c.bf16 %v2229_v4, %v2229_v4  ;;  %v6540_v9 = vpop.f32.mrb[51].mxu1  ;;  %v6739_v7 = vld [vmem:[%s8251_s8 + $0x98] sm:$0xff]  }
0x1022   : > { %v2305_v10 = vsel %vm845_vm2, %v2300_v8, 0 }
0x1023   : > { %6550 = vmatpush3.bf16.xpose.msra.mxu1 %v2305_v10 }
0x1024   : > { %6561 = vmatprep.subr.bf16.mxu1 %v6927_v1 }
0x106f   : > { %v2077_v55 = vpop.xlane.xlu1 %2076 }
0x1070   : > { %v2078_v56 = vmul.f32 0.03125, %v2077_v55  ;;  %v5805_v55 = vld [vmem:[%s8252_s9 + $0x5] ss:$0 sm:$0xff] }
0x1072   : > { %v2079_v57 = vadd.f32 1e-05, %v2078_v56 }
0x1074   : > { %6896 = vrsqrt.f32 %v2079_v57 }
0x107e   : > { %v6897_v58 = vpop.eup %6896 }
0x107f   : > { %v2081_v61 = vmul.f32 %v6897_v58, %v2073_v46 }
0x1081   : > { %v2089_v60 = vmul.f32 %v5765_v59, %v2081_v61 }
0x1083   : > { %v7368_v63 = vadd.f32 %v5766_v62, %v2089_v60  ;;  %v5796_v60 = vld [vmem:[%s8252_s9 + $0x1] ss:$0 sm:$0xff] }
0x1085   : > { %v7372_v0 = vpack.c.bf16 %v7368_v63, %v7368_v63 }
0x1087   : > { %6530 = vmatmul.mubr.msk.bf16.vlgmr.msra.gmra.mrb[48].mxu0 %vm669_vm1, %v7372_v0 }
0x1088   : > { %6545 = vmatprep.mubr.msk.bf16.mxu0 %vm6928_vm0, %v6927_v1  ;;  %6542 = vmatpush3.bf16.msra.mxu0 %v6734_v19 }
0x1089   : > { %6543 = vmatprep.subr.bf16.mxu0 %v6927_v1 }
0x108c   : > { %6544 = vmatpush3.bf16.msra.mxu0 %v6735_v20 }
0x108d   : > { %6555 = vmatprep.subr.bf16.mxu0 %v6927_v1 }
0x108f   : > { %6546 = vmatmul.mubr.msk.bf16.vlgmr.msra.gmra.mrb[52].mxu0 %vm669_vm1, %v7347_v52 }
0x1090   : > { %6557 = vmatprep.mubr.msk.bf16.mxu0 %vm6928_vm0, %v6927_v1 }
0x115a   : > { %v2160_v12 = vpop.f32.mrb[48].mxu0 }
0x115b   : > { %v2161_v13 = vadd.f32 %v5767_v11, %v2160_v12  ;;  %v6531_v14 = vpop.f32.mrb[49].mxu0 }
0x115c   : > { %v2163_v15 = vpop.f32.mrb[50].mxu0  ;;  %v5814_v14 = vld [vmem:[%s8252_s9 + $0x9] ss:$0 sm:$0xff] }
0x115d   : > { %v2299_v16 = vpack.c.bf16 %v2161_v13, %v2161_v13  ;;  %v6532_v17 = vpop.f32.mrb[51].mxu0 }
0x115f   : > { %6552 = vmatmul.mubr.msk.bf16.vlgmr.msra.gmra.mrb[52].mxu1 %vm845_vm2, %v2299_v16 }
0x1160   : > { %6562 = vmatpush3.bf16.msra.mxu1 %v6732_v6  ;;  %6565 = vmatprep.mubr.msk.bf16.mxu1 %vm6928_vm0, %v6927_v1 }
0x1161   : > { %6563 = vmatprep.subr.bf16.mxu1 %v6927_v1 }
0x1162   : > { %v2293_v36 = vpop.f32.mrb[52].mxu0 }
0x1163   : > { %v6547_v37 = vpop.f32.mrb[53].mxu0  ;;  %v2294_v41 = vadd.f32 %v5785_v39, %v2293_v36  ;;  %v6741_v36 = vld [vmem:[%s8251_s8 + $0x68] sm:$0xff]  }
0x1164   : > { %6564 = vmatpush3.bf16.msra.mxu1 %v6733_v18  ;;  %v2296_v38 = vpop.f32.mrb[54].mxu0 }
0x1165   : > { %6577 = vmatprep.subr.bf16.mxu1 %v6927_v1  ;;  %v6548_v40 = vpop.f32.mrb[55].mxu0  ;;  %v2360_v42 = vpack.c.bf16 %v2294_v41, %v2294_v41  ;;  %v6742_v38 = vld [vmem:[%s8251_s8 + $0x20] sm:$0xff]  }
0x1167   : > { %6566 = vmatmul.mubr.msk.bf16.vlgmr.msra.gmra.mrb[56].mxu1 %vm669_vm1, %v7372_v0  ;;  %v2365_v43 = vsel %vm909_vm3, %v2360_v42, 0 }
0x1168   : > { %6581 = vmatprep.mubr.msk.bf16.mxu1 %vm6928_vm0, %v6927_v1  ;;  %6556 = vmatpush3.bf16.msra.mxu0 %v2365_v43  ;;  %v6743_v43 = vld [vmem:[%s8251_s8 + $0x28] sm:$0xff]  }
0x1169   : > { %6569 = vmatprep.subr.bf16.mxu0 %v6927_v1  ;;  %6578 = vmatpush3.bf16.msra.mxu1 %v6738_v5 }
0x116a   : > { %6579 = vmatprep.subr.bf16.mxu1 %v6927_v1 }
0x116d   : > { %6580 = vmatpush3.bf16.msra.mxu1 %v6739_v7 }
0x116e   : > { %6591 = vmatprep.subr.bf16.mxu1 %v6927_v1 }
0x1170   : > { %6582 = vmatmul.mubr.msk.bf16.vlgmr.msra.gmra.mrb[60].mxu1 %vm669_vm1, %v7347_v52 }
0x1171   : > { %6593 = vmatprep.mubr.msk.bf16.mxu1 %vm6928_vm0, %v6927_v1 }
0x1232   : > { %v2341_v21 = vpop.f32.mrb[52].mxu1 }
0x1233   : > { %v2347_v22 = vmul.f32 0.35355338, %v2341_v21  ;;  %v6553_v23 = vpop.f32.mrb[53].mxu1 }
0x1234   : > { %v2344_v24 = vpop.f32.mrb[54].mxu1 }
0x1235   : > { %v6554_v25 = vpop.f32.mrb[55].mxu1  ;;  %v2348_v26 = vsel %vm845_vm2, %v2347_v22, -inf }
0x1236   : > { %2349 = vmax.xlane.f32.xlu0 %v2348_v26  ;;  %v5820_v26 = vld [vmem:[%s8253_s10 + $0x4] sm:$0xf] }
0x123a   : > { %v2468_v27 = vpop.f32.mrb[56].mxu1 }
0x123b   : > { %v6567_v28 = vpop.f32.mrb[57].mxu1  ;;  %v2469_v3 = vadd.f32 %v5796_v60, %v2468_v27  ;;  %v2719_v27 = vsel %vm909_vm3, %v5820_v26, 0  ;;  %v5828_v60 = vld [vmem:[%s8252_s9 + $0x2] ss:$0 sm:$0xff] }
0x123c   : > { %v2471_v29 = vpop.f32.mrb[58].mxu1 }
0x123d   : > { %v6568_v30 = vpop.f32.mrb[59].mxu1  ;;  %v2604_v4 = vpack.c.bf16 %v2469_v3, %v2469_v3 }
0x123e   : > { %v2408_v30 = vld [vmem:[%s8253_s10] sm:$0xf] }
0x1243   : > { %v2598_v15 = vpop.f32.mrb[60].mxu1 }
0x1244   : > { %v2599_v6 = vadd.f32 %v5814_v14, %v2598_v15  ;;  %v6583_v16 = vpop.f32.mrb[61].mxu1 }
0x1245   : > { %v2601_v17 = vpop.f32.mrb[62].mxu1 }
0x1246   : > { %v2665_v18 = vpack.c.bf16 %v2599_v6, %v2599_v6  ;;  %v6584_v19 = vpop.f32.mrb[63].mxu1 }
0x1248   : > { %v2670_v20 = vsel %vm909_vm3, %v2665_v18, 0 }
0x1249   : > { %6592 = vmatpush3.bf16.msra.mxu1 %v2670_v20 }
0x124a   : > { %6603 = vmatprep.subr.bf16.mxu1 %v6927_v1 }
0x12c3   : > { %v2350_v31 = vpop.xlane.xlu0 %2349 }
0x12c4   : > { %v2351_v32 = vsub.f32 %v2347_v22, %v2350_v31 }
0x12c6   : > { %v2352_v33 = vmul.f32 1.442695, %v2351_v32 }
0x12c8   : > { %6898 = vpow2.f32 %v2352_v33  ;;  %v2765_v33 = vsel %vm909_vm3, %v2408_v30, 0 }
0x12d2   : > { %v6899_v34 = vpop.eup %6898 }
0x12d3   : > { %v2354_v35 = vsel %vm845_vm2, %v6899_v34, 0.0 }
0x12d4   : > { %2355 = vadd.xlane.f32.xlu1 %v2354_v35 }
0x1361   : > { %v2356_v44 = vpop.xlane.xlu1 %2355 }
0x1362   : > { %6900 = vrcp.f32 %v2356_v44 }
0x136c   : > { %v6901_v45 = vpop.eup %6900 }
0x136d   : > { %v2358_v46 = vmul.f32 %v6901_v45, %v6899_v34  ;;  %v6740_v34 = vld [vmem:[%s8251_s8 + $0x60] sm:$0xff]  }
0x136f   : > { %v2359_v48 = vpack.c.bf16 %v2358_v46, %v2358_v46 }
0x1371   : > { %6558 = vmatmul.mubr.msk.bf16.vlgmr.msra.gmra.mrb[56].mxu0 %vm845_vm2, %v2359_v48  ;;  %v5837_v48 = vld [vmem:[%s8252_s9 + $0x6] ss:$0 sm:$0xff] }
0x1372   : > { %6570 = vmatpush3.bf16.msra.mxu0 %v6736_v47  ;;  %6573 = vmatprep.mubr.msk.bf16.mxu0 %vm6928_vm0, %v6927_v1 }
0x1373   : > { %6571 = vmatprep.subr.bf16.mxu0 %v6927_v1 }
0x1376   : > { %6572 = vmatpush3.bf16.msra.mxu0 %v6737_v49 }
0x1377   : > { %6585 = vmatprep.subr.bf16.mxu0 %v6927_v1 }
0x1379   : > { %6574 = vmatmul.mubr.msk.bf16.vlgmr.msra.gmra.mrb[60].mxu0 %vm669_vm1, %v7347_v52 }
0x137a   : > { %6587 = vmatprep.mubr.msk.bf16.mxu0 %vm6928_vm0, %v6927_v1 }
0x1444   : > { %v7435_v50 = vpop.f32.mrb[56].mxu0 }
0x1445   : > { %v6559_v51 = vpop.f32.mrb[57].mxu0  ;;  %v2407_v35 = vpack.c.bf16 %v7435_v50, %v7435_v50 }
0x1446   : > { %v2404_v53 = vpop.f32.mrb[58].mxu0 }
0x1447   : > { %v6560_v54 = vpop.f32.mrb[59].mxu0 }
0x144c   : > { %v2533_v56 = vpop.f32.mrb[60].mxu0 }
0x144d   : > { %v2534_v57 = vadd.f32 %v5805_v55, %v2533_v56  ;;  %v6575_v58 = vpop.f32.mrb[61].mxu0 }
0x144e   : > { %v2536_v59 = vpop.f32.mrb[62].mxu0 }
0x144f   : > { %v2605_v61 = vpack.c.bf16 %v2534_v57, %v2534_v57  ;;  %v6576_v62 = vpop.f32.mrb[63].mxu0 }
0x1451   : > { %v2610_v2 = vsel %vm845_vm2, %v2605_v61, 0 }
0x1452   : > { %6586 = vmatpush3.bf16.xpose.msra.mxu0 %v2610_v2 }
0x1453   : > { %6597 = vmatprep.subr.bf16.mxu0 %v6927_v1 }
0x1459   : > { %6588 = vmatmul.mubr.msk.bf16.vlgmr.msra.gmra.mrb[64].mxu0 %vm845_vm2, %v2604_v4 }
0x145a   : > { %6599 = vmatprep.mubr.msk.bf16.mxu0 %vm6928_vm0, %v6927_v1  ;;  %6598 = vmatpush3.bf16.msra.mxu0 %v2719_v27 }
0x145b   : > { %6609 = vmatprep.subr.bf16.mxu0 %v6927_v1 }
0x152c   : > { %v2646_v8 = vpop.f32.mrb[64].mxu0 }
0x152d   : > { %v2652_v9 = vmul.f32 0.35355338, %v2646_v8  ;;  %v6589_v10 = vpop.f32.mrb[65].mxu0 }
0x152e   : > { %v2649_v11 = vpop.f32.mrb[66].mxu0  ;;  %v6745_v10 = vld [vmem:[%s8251_s8 + $0xa8] sm:$0xff]  }
0x152f   : > { %v6590_v12 = vpop.f32.mrb[67].mxu0  ;;  %v2653_v13 = vsel %vm845_vm2, %v2652_v9, -inf }
0x1530   : > { %2654 = vmax.xlane.f32.xlu0 %v2653_v13 }
0x15bd   : > { %v2655_v21 = vpop.xlane.xlu0 %2654 }
0x15be   : > { %v2656_v22 = vsub.f32 %v2652_v9, %v2655_v21  ;;  %v6744_v9 = vld [vmem:[%s8251_s8 + $0xa0] sm:$0xff]  }
0x15c0   : > { %v2657_v23 = vmul.f32 1.442695, %v2656_v22 }
0x15c2   : > { %6902 = vpow2.f32 %v2657_v23 }
0x15cc   : > { %v6903_v24 = vpop.eup %6902 }
0x15cd   : > { %v2659_v25 = vsel %vm845_vm2, %v6903_v24, 0.0 }
0x15ce   : > { %2660 = vadd.xlane.f32.xlu1 %v2659_v25 }
0x165b   : > { %v2661_v28 = vpop.xlane.xlu1 %2660 }
0x165c   : > { %6904 = vrcp.f32 %v2661_v28 }
0x1666   : > { %v6905_v29 = vpop.eup %6904 }
0x1667   : > { %v2663_v31 = vmul.f32 %v6905_v29, %v6903_v24  ;;  %v5846_v24 = vld [vmem:[%s8252_s9 + $0xa] ss:$0 sm:$0xff] }
0x1668   : > { %v5852_v29 = vld [vmem:[%s8253_s10 + $0x8] sm:$0xf] }
0x1669   : > { %v2664_v32 = vpack.c.bf16 %v2663_v31, %v2663_v31  ;;  %v3117_v30 = vsel %vm909_vm3, %v5852_v29, 0 }
0x166b   : > { %6594 = vmatmul.mubr.msk.bf16.vlgmr.msra.gmra.mrb[64].mxu1 %vm845_vm2, %v2664_v32 }
0x166c   : > { %6604 = vmatpush3.bf16.msra.mxu1 %v2765_v33  ;;  %6605 = vmatprep.mubr.msk.bf16.mxu1 %vm6928_vm0, %v6927_v1 }
0x166d   : > { %6617 = vmatprep.subr.bf16.mxu1 %v6927_v1 }
0x1673   : > { %6606 = vmatmul.mubr.msk.bf16.vlgmr.msra.gmra.mrb[68].mxu1 %vm845_vm2, %v2407_v35 }
0x1674   : > { %6618 = vmatpush3.bf16.msra.mxu1 %v6740_v34  ;;  %6621 = vmatprep.mubr.msk.bf16.mxu1 %vm6928_vm0, %v6927_v1  ;;  %v6746_v34 = vld [vmem:[%s8251_s8 + $0x30] sm:$0xff]  }
0x1675   : > { %6619 = vmatprep.subr.bf16.mxu1 %v6927_v1 }
0x1678   : > { %6620 = vmatpush3.bf16.msra.mxu1 %v6741_v36  ;;  %v6747_v36 = vld [vmem:[%s8251_s8 + $0x38] sm:$0xff]  }
0x1679   : > { %6633 = vmatprep.subr.bf16.mxu1 %v6927_v1 }
0x167b   : > { %6622 = vmatmul.mubr.msk.bf16.vlgmr.msra.gmra.mrb[72].mxu1 %vm669_vm1, %v7347_v52 }
0x167c   : > { %6635 = vmatprep.mubr.msk.bf16.mxu1 %vm6928_vm0, %v6927_v1 }
0x173e   : > { %v2706_v37 = vpop.f32.mrb[64].mxu1 }
0x173f   : > { %v2712_v39 = vpack.c.bf16 %v2706_v37, %v2706_v37  ;;  %v6595_v40 = vpop.f32.mrb[65].mxu1 }
0x1740   : > { %v2709_v41 = vpop.f32.mrb[66].mxu1 }
0x1741   : > { %v6596_v42 = vpop.f32.mrb[67].mxu1  ;;  %6600 = vmatmul.mubr.msk.bf16.vlgmr.msra.gmra.mrb[68].mxu0 %vm845_vm2, %v2712_v39 }
0x1742   : > { %6610 = vmatpush3.bf16.msra.mxu0 %v6742_v38  ;;  %6613 = vmatprep.mubr.msk.bf16.mxu0 %vm6928_vm0, %v6927_v1  ;;  %v6748_v38 = vld [vmem:[%s8251_s8 + $0x70] sm:$0xff]  }
0x1743   : > { %6611 = vmatprep.subr.bf16.mxu0 %v6927_v1 }
0x1746   : > { %v2801_v44 = vpop.f32.mrb[68].mxu1  ;;  %6612 = vmatpush3.bf16.msra.mxu0 %v6743_v43  ;;  %v6749_v43 = vld [vmem:[%s8251_s8 + $0x78] sm:$0xff]  }
0x1747   : > { %v6607_v45 = vpop.f32.mrb[69].mxu1  ;;  %6625 = vmatprep.subr.bf16.mxu0 %v6927_v1 }
0x1748   : > { %v2804_v46 = vpop.f32.mrb[70].mxu1 }
0x1749   : > { %v6608_v47 = vpop.f32.mrb[71].mxu1  ;;  %6614 = vmatmul.mubr.msk.bf16.vlgmr.msra.gmra.mrb[72].mxu0 %vm669_vm1, %v7372_v0 }
0x174a   : > { %6629 = vmatprep.mubr.msk.bf16.mxu0 %vm6928_vm0, %v6927_v1  ;;  %6626 = vmatpush3.bf16.msra.mxu0 %v6744_v9 }
0x174b   : > { %6627 = vmatprep.subr.bf16.mxu0 %v6927_v1 }
0x174e   : > { %v2931_v49 = vpop.f32.mrb[72].mxu1  ;;  %6628 = vmatpush3.bf16.msra.mxu0 %v6745_v10 }
0x174f   : > { %v2932_v50 = vadd.f32 %v5837_v48, %v2931_v49  ;;  %v6623_v51 = vpop.f32.mrb[73].mxu1  ;;  %6639 = vmatprep.subr.bf16.mxu0 %v6927_v1 }
0x1750   : > { %v2934_v53 = vpop.f32.mrb[74].mxu1 }
0x1751   : > { %v3003_v54 = vpack.c.bf16 %v2932_v50, %v2932_v50  ;;  %v6624_v55 = vpop.f32.mrb[75].mxu1  ;;  %6630 = vmatmul.mubr.msk.bf16.vlgmr.msra.gmra.mrb[76].mxu0 %vm669_vm1, %v7347_v52  ;;  %v5868_v53 = vld [vmem:[%s8252_s9 + $0x7] ss:$0 sm:$0xff] }
0x1752   : > { %6641 = vmatprep.mubr.msk.bf16.mxu0 %vm6928_vm0, %v6927_v1 }
0x1753   : > { %v3008_v56 = vsel %vm845_vm2, %v3003_v54, 0 }
0x1754   : > { %6634 = vmatpush3.bf16.xpose.msra.mxu1 %v3008_v56 }
0x1755   : > { %6645 = vmatprep.subr.bf16.mxu1 %v6927_v1 }
0x1814   : > { %v2755_v57 = vpop.f32.mrb[68].mxu0 }
0x1815   : > { %v7517_v58 = vadd.f32 %v2801_v44, %v2755_v57  ;;  %v6601_v59 = vpop.f32.mrb[69].mxu0 }
0x1816   : > { %v2758_v61 = vpop.f32.mrb[70].mxu0 }
0x1817   : > { %v6602_v62 = vpop.f32.mrb[71].mxu0 }
0x1818   : > { %v5859_v62 = vld [vmem:[%s8252_s9 + $0x3] ss:$0 sm:$0xff] }
0x181c   : > { %v2866_v2 = vpop.f32.mrb[72].mxu0 }
0x181d   : > { %v2867_v3 = vadd.f32 %v5828_v60, %v2866_v2  ;;  %v6615_v4 = vpop.f32.mrb[73].mxu0 }
0x181e   : > { %v2869_v5 = vpop.f32.mrb[74].mxu0  ;;  %v6751_v4 = vld [vmem:[%s8251_s8 + $0xb8] sm:$0xff]  }
0x181f   : > { %v3002_v7 = vpack.c.bf16 %v2867_v3, %v2867_v3  ;;  %v6616_v8 = vpop.f32.mrb[75].mxu0  ;;  %v6750_v3 = vld [vmem:[%s8251_s8 + $0xb0] sm:$0xff]  }
0x1821   : > { %6636 = vmatmul.mubr.msk.bf16.vlgmr.msra.gmra.mrb[76].mxu1 %vm845_vm2, %v3002_v7 }
0x1822   : > { %6647 = vmatprep.mubr.msk.bf16.mxu1 %vm6928_vm0, %v6927_v1  ;;  %6646 = vmatpush3.bf16.msra.mxu1 %v3117_v30 }
0x1823   : > { %6659 = vmatprep.subr.bf16.mxu1 %v6927_v1 }
0x1824   : > { %v2996_v21 = vpop.f32.mrb[76].mxu0 }
0x1825   : > { %v6631_v22 = vpop.f32.mrb[77].mxu0  ;;  %v2997_v26 = vadd.f32 %v5846_v24, %v2996_v21 }
0x1826   : > { %v2999_v23 = vpop.f32.mrb[78].mxu0  ;;  %v5883_v22 = vld [vmem:[%s8253_s10 + $0xc] sm:$0xf] }
0x1827   : > { %v6632_v25 = vpop.f32.mrb[79].mxu0  ;;  %v3063_v27 = vpack.c.bf16 %v2997_v26, %v2997_v26  ;;  %v3470_v23 = vsel %vm909_vm3, %v5883_v22, 0 }
0x1829   : > { %v3068_v28 = vsel %vm909_vm3, %v3063_v27, 0 }
0x182a   : > { %6640 = vmatpush3.bf16.msra.mxu0 %v3068_v28 }
0x182b   : > { %6651 = vmatprep.subr.bf16.mxu0 %v6927_v1 }
0x18f4   : > { %v3044_v11 = vpop.f32.mrb[76].mxu1 }
0x18f5   : > { %v3050_v12 = vmul.f32 0.35355338, %v3044_v11  ;;  %v6637_v13 = vpop.f32.mrb[77].mxu1 }
0x18f6   : > { %v3047_v14 = vpop.f32.mrb[78].mxu1 }
0x18f7   : > { %v6638_v15 = vpop.f32.mrb[79].mxu1  ;;  %v3051_v6 = vsel %vm845_vm2, %v3050_v12, -inf }
0x18f8   : > { %3052 = vmax.xlane.f32.xlu0 %v3051_v6 }
0x1985   : > { %v3053_v16 = vpop.xlane.xlu0 %3052 }
0x1986   : > { %v3054_v17 = vsub.f32 %v3050_v12, %v3053_v16 }
0x1988   : > { %v3055_v18 = vmul.f32 1.442695, %v3054_v17 }
0x198a   : > { %6906 = vpow2.f32 %v3055_v18 }
0x1994   : > { %v6907_v19 = vpop.eup %6906 }
0x1995   : > { %v3057_v20 = vsel %vm845_vm2, %v6907_v19, 0.0 }
0x1996   : > { %3058 = vadd.xlane.f32.xlu1 %v3057_v20 }
0x1a23   : > { %v3059_v31 = vpop.xlane.xlu1 %3058 }
0x1a24   : > { %6908 = vrcp.f32 %v3059_v31 }
0x1a2e   : > { %v6909_v32 = vpop.eup %6908 }
0x1a2f   : > { %v3061_v33 = vmul.f32 %v6909_v32, %v6907_v19 }
0x1a31   : > { %v3062_v35 = vpack.c.bf16 %v3061_v33, %v3061_v33 }
0x1a33   : > { %6642 = vmatmul.mubr.msk.bf16.vlgmr.msra.gmra.mrb[80].mxu0 %vm845_vm2, %v3062_v35 }
0x1a34   : > { %6652 = vmatpush3.bf16.msra.mxu0 %v6746_v34  ;;  %6655 = vmatprep.mubr.msk.bf16.mxu0 %vm6928_vm0, %v6927_v1  ;;  %v5885_v34 = vld [vmem:[%s8254_s11] ss:$0 sm:$0xff] }
0x1a35   : > { %6653 = vmatprep.subr.bf16.mxu0 %v6927_v1 }
0x1a38   : > { %6654 = vmatpush3.bf16.msra.mxu0 %v6747_v36 }
0x1a39   : > { %6667 = vmatprep.subr.bf16.mxu0 %v6927_v1 }
0x1a3b   : > { %6656 = vmatmul.mubr.msk.bf16.vlgmr.msra.gmra.mrb[84].mxu0 %vm669_vm1, %v7372_v0 }
0x1a3c   : > { %6671 = vmatprep.mubr.msk.bf16.mxu0 %vm6928_vm0, %v6927_v1  ;;  %6668 = vmatpush3.bf16.msra.mxu0 %v6750_v3  ;;  %v3555_v3 = vld [vmem:[%s8257_s14 + $0x18] sm:$0xff] }
0x1a3d   : > { %6669 = vmatprep.subr.bf16.mxu0 %v6927_v1 }
0x1a40   : > { %6670 = vmatpush3.bf16.msra.mxu0 %v6751_v4 }
0x1a41   : > { %6681 = vmatprep.subr.bf16.mxu0 %v6927_v1 }
0x1a43   : > { %6672 = vmatmul.mubr.msk.bf16.vlgmr.msra.gmra.mrb[88].mxu0 %vm669_vm1, %v7347_v52 }
0x1a44   : > { %6683 = vmatprep.mubr.msk.bf16.mxu0 %vm6928_vm0, %v6927_v1 }
0x1b06   : > { %v3104_v37 = vpop.f32.mrb[80].mxu0 }
0x1b07   : > { %v3110_v39 = vpack.c.bf16 %v3104_v37, %v3104_v37  ;;  %v6643_v40 = vpop.f32.mrb[81].mxu0 }
0x1b08   : > { %v3107_v41 = vpop.f32.mrb[82].mxu0 }
0x1b09   : > { %v6644_v42 = vpop.f32.mrb[83].mxu0  ;;  %6648 = vmatmul.mubr.msk.bf16.vlgmr.msra.gmra.mrb[80].mxu1 %vm845_vm2, %v3110_v39 }
0x1b0a   : > { %6660 = vmatpush3.bf16.msra.mxu1 %v6748_v38  ;;  %6663 = vmatprep.mubr.msk.bf16.mxu1 %vm6928_vm0, %v6927_v1 }
0x1b0b   : > { %6661 = vmatprep.subr.bf16.mxu1 %v6927_v1 }
0x1b0e   : > { %v3219_v0 = vpop.f32.mrb[84].mxu0  ;;  %6662 = vmatpush3.bf16.msra.mxu1 %v6749_v43 }
0x1b0f   : > { %v6657_v44 = vpop.f32.mrb[85].mxu0  ;;  %6675 = vmatprep.subr.bf16.mxu1 %v6927_v1  ;;  %v3220_v60 = vadd.f32 %v5859_v62, %v3219_v0 }
0x1b10   : > { %v3222_v45 = vpop.f32.mrb[86].mxu0 }
0x1b11   : > { %v6658_v46 = vpop.f32.mrb[87].mxu0  ;;  %6664 = vmatmul.mubr.msk.bf16.vlgmr.msra.gmra.mrb[84].mxu1 %vm669_vm1, %v7347_v52  ;;  %v3355_v2 = vpack.c.bf16 %v3220_v60, %v3220_v60  ;;  %v3554_v60 = vld [vmem:[%s8257_s14 + $0x10] sm:$0xff] }
0x1b12   : > { %6677 = vmatprep.mubr.msk.bf16.mxu1 %vm6928_vm0, %v6927_v1  ;;  %v3552_v46 = vld [vmem:[%s8257_s14] sm:$0xff] }
0x1b16   : > { %v3349_v52 = vpop.f32.mrb[88].mxu0 }
0x1b17   : > { %v6673_v16 = vpop.f32.mrb[89].mxu0 }
0x1b18   : > { %v3352_v17 = vpop.f32.mrb[90].mxu0 }
0x1b19   : > { %v6674_v18 = vpop.f32.mrb[91].mxu0  ;;  %v3570_v17 = vld [vmem:[%s8257_s14 + $0x90] sm:$0xff] }
0x1b1a   : > { %v3571_v18 = vld [vmem:[%s8257_s14 + $0x98] sm:$0xff] }
0x1bdc   : > { %v3153_v47 = vpop.f32.mrb[80].mxu1 }
0x1bdd   : > { %v7580_v48 = vadd.f32 %v3153_v47, %v7517_v58  ;;  %v6649_v49 = vpop.f32.mrb[81].mxu1  ;;  %v3560_v47 = vld [vmem:[%s8257_s14 + $0x40] sm:$0xff] }
0x1bde   : > { %v3156_v50 = vpop.f32.mrb[82].mxu1  ;;  %v3561_v49 = vld [vmem:[%s8257_s14 + $0x48] sm:$0xff] }
0x1bdf   : > { %v6650_v51 = vpop.f32.mrb[83].mxu1  ;;  %v5888_v50 = vcombine.low %v3552_v46, %v3560_v47 }
0x1be4   : > { %v3284_v54 = vpop.f32.mrb[84].mxu1 }
0x1be5   : > { %v3285_v55 = vadd.f32 %v5868_v53, %v3284_v54  ;;  %v6665_v56 = vpop.f32.mrb[85].mxu1  ;;  %v3568_v54 = vld [vmem:[%s8257_s14 + $0x80] sm:$0xff] }
0x1be6   : > { %v3287_v57 = vpop.f32.mrb[86].mxu1  ;;  %v3569_v56 = vld [vmem:[%s8257_s14 + $0x88] sm:$0xff] }
0x1be7   : > { %v3356_v59 = vpack.c.bf16 %v3285_v55, %v3285_v55  ;;  %v6666_v61 = vpop.f32.mrb[87].mxu1  ;;  %v3576_v55 = vld [vmem:[%s8257_s14 + $0xc0] sm:$0xff] }
0x1be8   : > { %v5905_v57 = vcombine.high %v3568_v54, %v3576_v55  ;;  %v5904_v61 = vcombine.low %v3568_v54, %v3576_v55 }
0x1be9   : > { %v3361_v58 = vsel %vm845_vm2, %v3356_v59, 0  ;;  %v3577_v59 = vld [vmem:[%s8257_s14 + $0xc8] sm:$0xff] }
0x1bea   : > { %6676 = vmatpush3.bf16.xpose.msra.mxu1 %v3361_v58  ;;  %v5906_v62 = vcombine.low %v3569_v56, %v3577_v59  ;;  %v5907_v58 = vcombine.high %v3569_v56, %v3577_v59  ;;  %v6753_v59 = vld [vmem:[%s8259_s16 + $0xc0] sm:$0xff]  }
0x1beb   : > { %6687 = vmatprep.subr.bf16.mxu1 %v6927_v1 }
0x1bf1   : > { %6678 = vmatmul.mubr.msk.bf16.vlgmr.msra.gmra.mrb[88].mxu1 %vm845_vm2, %v3355_v2  ;;  %v3562_v2 = vld [vmem:[%s8257_s14 + $0x50] sm:$0xff] }
0x1bf2   : > { %6689 = vmatprep.mubr.msk.bf16.mxu1 %vm6928_vm0, %v6927_v1  ;;  %v5877_v1 = vld [vmem:[%s8252_s9 + $0xb] ss:$0 sm:$0xff]  ;;  %6688 = vmatpush3.bf16.msra.mxu1 %v3470_v23  ;;  %v5893_v4 = vcombine.high %v3554_v60, %v3562_v2 }
0x1bf3   : > { %v3350_v19 = vadd.f32 %v5877_v1, %v3349_v52  ;;  %v5887_v52 = vld [vmem:[%s8256_s13] ss:$0 sm:$0xff]  ;;  %v3578_v1 = vld [vmem:[%s8257_s14 + $0xd0] sm:$0xff] }
0x1bf4   : > { %v5909_v22 = vcombine.high %v3570_v17, %v3578_v1 }
0x1bf5   : > { %v3416_v20 = vpack.c.bf16 %v3350_v19, %v3350_v19  ;;  %v3579_v19 = vld [vmem:[%s8257_s14 + $0xd8] sm:$0xff] }
0x1bf6   : > { %v5911_v23 = vcombine.high %v3571_v18, %v3579_v19 }
0x1bf7   : > { %v3421_v21 = vsel %vm909_vm3, %v3416_v20, 0 }
0x1bf8   : > { %6682 = vmatpush3.bf16.msra.mxu0 %v3421_v21 }
0x1cc4   : > { %v3397_v5 = vpop.f32.mrb[88].mxu1 }
0x1cc5   : > { %v3403_v7 = vmul.f32 0.35355338, %v3397_v5  ;;  %v6679_v8 = vpop.f32.mrb[89].mxu1  ;;  %v3563_v5 = vld [vmem:[%s8257_s14 + $0x58] sm:$0xff] }
0x1cc6   : > { %v3400_v9 = vpop.f32.mrb[90].mxu1  ;;  %v5892_v8 = vcombine.low %v3554_v60, %v3562_v2  ;;  %v6757_v60 = vld [vmem:[%s8259_s16 + $0xc8] sm:$0xff]  }
0x1cc7   : > { %v6680_v10 = vpop.f32.mrb[91].mxu1  ;;  %v3404_v11 = vsel %vm845_vm2, %v3403_v7, -inf  ;;  %v5894_v9 = vcombine.low %v3555_v3, %v3563_v5  ;;  %v6758_v2 = vld [vmem:[%s8259_s16 + $0x8] sm:$0xff]  }
0x1cc8   : > { %3405 = vmax.xlane.f32.xlu0 %v3404_v11  ;;  %v5895_v10 = vcombine.high %v3555_v3, %v3563_v5  ;;  %v6759_v3 = vld [vmem:[%s8259_s16 + $0x88] sm:$0xff]   ;;  %v6761_v5 = vld [vmem:[%s8259_s16 + $0xd0] sm:$0xff]  }
0x1d55   : > { %v3406_v12 = vpop.xlane.xlu0 %3405 }
0x1d56   : > { %v3407_v13 = vsub.f32 %v3403_v7, %v3406_v12  ;;  %v6929_v7 = vmov 0  }
0x1d58   : > { %v3408_v14 = vmul.f32 1.442695, %v3407_v13 }
0x1d5a   : > { %6910 = vpow2.f32 %v3408_v14 }
0x1d64   : > { %v6911_v15 = vpop.eup %6910 }
0x1d65   : > { %v3410_v6 = vsel %vm845_vm2, %v6911_v15, 0.0 }
0x1d66   : > { %3411 = vadd.xlane.f32.xlu1 %v3410_v6 }
0x1df3   : > { %v3412_v24 = vpop.xlane.xlu1 %3411 }
0x1df4   : > { %6912 = vrcp.f32 %v3412_v24  ;;  %v3556_v24 = vld [vmem:[%s8257_s14 + $0x20] sm:$0xff] }
0x1dfe   : > { %v6913_v25 = vpop.eup %6912 }
0x1dff   : > { %v3414_v26 = vmul.f32 %v6913_v25, %v6911_v15  ;;  %v5886_v15 = vld [vmem:[%s8255_s12] ss:$0 sm:$0xff] }
0x1e00   : > { %v3564_v25 = vld [vmem:[%s8257_s14 + $0x60] sm:$0xff] }
0x1e01   : > { %v3415_v27 = vpack.c.bf16 %v3414_v26, %v3414_v26  ;;  %v3557_v26 = vld [vmem:[%s8257_s14 + $0x28] sm:$0xff] }
0x1e03   : > { %6684 = vmatmul.mubr.msk.bf16.vlgmr.msra.gmra.mrb[92].mxu0 %vm845_vm2, %v3415_v27  ;;  %v3565_v27 = vld [vmem:[%s8257_s14 + $0x68] sm:$0xff] }
0x1e04   : > { %3863 = vmatprep.mubr.bf16.mxu0 %v6929_v7 }
0x1ed6   : > { %v3457_v28 = vpop.f32.mrb[92].mxu0 }
0x1ed7   : > { %v3463_v29 = vpack.c.bf16 %v3457_v28, %v3457_v28  ;;  %v6685_v30 = vpop.f32.mrb[93].mxu0  ;;  %v5908_v28 = vcombine.low %v3570_v17, %v3578_v1  ;;  %v6774_v17 = vld [vmem:[%s8259_s16 + $0x28] sm:$0xff]  }
0x1ed8   : > { %v3460_v31 = vpop.f32.mrb[94].mxu0  ;;  %v5897_v30 = vcombine.high %v3556_v24, %v3564_v25  ;;  %v6775_v1 = vld [vmem:[%s8259_s16 + $0xa8] sm:$0xff]  }
0x1ed9   : > { %v6686_v32 = vpop.f32.mrb[95].mxu0  ;;  %6690 = vmatmul.mubr.msk.bf16.vlgmr.msra.gmra.mrb[92].mxu1 %vm845_vm2, %v3463_v29  ;;  %v5910_v29 = vcombine.low %v3571_v18, %v3579_v19  ;;  %v5899_v31 = vcombine.high %v3557_v26, %v3565_v27  ;;  %v6776_v18 = vld [vmem:[%s8259_s16 + $0x70] sm:$0xff]  }
0x1eda   : > { %3904 = vmatprep.mubr.bf16.mxu1 %v6929_v7  ;;  %v3572_v32 = vld [vmem:[%s8257_s14 + $0xa0] sm:$0xff]  ;;  %v6777_v19 = vld [vmem:[%s8259_s16 + $0xf0] sm:$0xff]  }
0x1fac   : > { %v3506_v33 = vpop.f32.mrb[92].mxu1 }
0x1fad   : > { %v3512_v35 = vadd.f32 %v3506_v33, %v7580_v48  ;;  %v6691_v36 = vpop.f32.mrb[93].mxu1  ;;  %v5889_v48 = vcombine.high %v3552_v46, %v3560_v47  ;;  %v3580_v33 = vld [vmem:[%s8257_s14 + $0xe0] sm:$0xff]  ;;  %v3574_v47 = vld [vmem:[%s8257_s14 + $0xb0] sm:$0xff] }
0x1fae   : > { %v3509_v37 = vpop.f32.mrb[94].mxu1  ;;  %v5896_v36 = vcombine.low %v3556_v24, %v3564_v25  ;;  %v6781_v24 = vld [vmem:[%s8259_s16 + $0xf8] sm:$0xff]  }
0x1faf   : > { %v3520_v38 = vadd.f32 %v5885_v34, %v3512_v35  ;;  %v6692_v39 = vpop.f32.mrb[95].mxu1  ;;  %3831 = vmatprep.subr.bf16.mxu0 %v5889_v48  ;;  %v3573_v34 = vld [vmem:[%s8257_s14 + $0xa8] sm:$0xff]  ;;  %v5898_v37 = vcombine.low %v3557_v26, %v3565_v27  ;;  %v3575_v48 = vld [vmem:[%s8257_s14 + $0xb8] sm:$0xff]  ;;  %v6784_v27 = vld [vmem:[%s8259_s16 + $0x140] sm:$0xff]  }
0x1fb0   : > { %3832 = vmatpush1.bf16.msra.mxu0 %v5888_v50  ;;  %v3581_v35 = vld [vmem:[%s8257_s14 + $0xe8] sm:$0xff]  ;;  %v6782_v25 = vld [vmem:[%s8259_s16 + $0x38] sm:$0xff]  }
0x1fb1   : > { %v3521_v40 = vadd.f32 %v3520_v38, %v7368_v63  ;;  %v3553_v63 = vld [vmem:[%s8257_s14 + $0x8] sm:$0xff]  ;;  %3833 = vmatprep.subr.bf16.mxu0 %v5905_v57  ;;  %v5913_v38 = vcombine.high %v3572_v32, %v3580_v33  ;;  %v5915_v39 = vcombine.high %v3573_v34, %v3581_v35  ;;  %v6752_v57 = vld [vmem:[%s8259_s16 + $0x40] sm:$0xff]   ;;  %v6783_v26 = vld [vmem:[%s8259_s16 + $0xb8] sm:$0xff]  }
0x1fb2   : > { %v5890_v51 = vcombine.low %v3553_v63, %v3561_v49  ;;  %v5891_v53 = vcombine.high %v3553_v63, %v3561_v49  ;;  %v3582_v63 = vld [vmem:[%s8257_s14 + $0xf0] sm:$0xff]  ;;  %v3583_v49 = vld [vmem:[%s8257_s14 + $0xf8] sm:$0xff] }
0x1fb3   : > { %v3522_v41 = vsel %vm669_vm1, %v3521_v40, 0.0  ;;  %v5919_v54 = vcombine.high %v3575_v48, %v3583_v49  ;;  %v5916_v55 = vcombine.low %v3574_v47, %v3582_v63  ;;  %v5918_v56 = vcombine.low %v3575_v48, %v3583_v49 }
0x1fb4   : > { %3523 = vadd.xlane.f32.xlu0 %v3522_v41  ;;  %3872 = vmatprep.subr.bf16.mxu1 %v5891_v53  ;;  %v3566_v41 = vld [vmem:[%s8257_s14 + $0x70] sm:$0xff]  ;;  %v5917_v53 = vcombine.high %v3574_v47, %v3582_v63 }
0x1fb5   : > { %3873 = vmatpush1.bf16.msra.mxu1 %v5890_v51  ;;  %3834 = vmatpush1.bf16.msra.mxu0 %v5904_v61  ;;  %v6754_v61 = vld [vmem:[%s8259_s16] sm:$0xff]  }
0x1fb6   : > { %3874 = vmatprep.subr.bf16.mxu1 %v5907_v58  ;;  %3913 = vmatprep.subr.bf16.mxu0 %v5893_v4  ;;  %v6756_v58 = vld [vmem:[%s8259_s16 + $0x48] sm:$0xff]   ;;  %v6760_v4 = vld [vmem:[%s8259_s16 + $0x50] sm:$0xff]  }
0x1fb9   : > { %3875 = vmatpush1.bf16.msra.mxu1 %v5906_v62  ;;  %v6755_v62 = vld [vmem:[%s8259_s16 + $0x80] sm:$0xff]  }
0x1fba   : > { %3954 = vmatprep.subr.bf16.mxu1 %v5895_v10  ;;  %v6765_v10 = vld [vmem:[%s8259_s16 + $0xd8] sm:$0xff]  }
0x2041   : > { %v3524_v42 = vpop.xlane.xlu0 %3523 }
0x2042   : > { %v3525_v43 = vmul.f32 0.03125, %v3524_v42  ;;  %v3559_v42 = vld [vmem:[%s8257_s14 + $0x38] sm:$0xff] }
0x2044   : > { %v3526_v0 = vsub.f32 %v3521_v40, %v3525_v43  ;;  %v3558_v40 = vld [vmem:[%s8257_s14 + $0x30] sm:$0xff]  ;;  %v3567_v43 = vld [vmem:[%s8257_s14 + $0x78] sm:$0xff] }
0x2045   : > { %v5903_v46 = vcombine.high %v3559_v42, %v3567_v43  ;;  %v5900_v50 = vcombine.low %v3558_v40, %v3566_v41  ;;  %v5902_v51 = vcombine.low %v3559_v42, %v3567_v43 }
0x2046   : > { %v3527_v44 = vmul.f32 %v3526_v0, %v3526_v0 }
0x2048   : > { %v3528_v45 = vsel %vm669_vm1, %v3527_v44, 0.0  ;;  %v5914_v44 = vcombine.low %v3573_v34, %v3581_v35 }
0x2049   : > { %3529 = vadd.xlane.f32.xlu1 %v3528_v45  ;;  %v5901_v45 = vcombine.high %v3558_v40, %v3566_v41 }
0x20d6   : > { %v3530_v11 = vpop.xlane.xlu1 %3529 }
0x20d7   : > { %v3531_v12 = vmul.f32 0.03125, %v3530_v11  ;;  %v6766_v11 = vld [vmem:[%s8259_s16 + $0x18] sm:$0xff]  }
0x20d9   : > { %v3532_v13 = vadd.f32 1e-05, %v3531_v12  ;;  %v6767_v12 = vld [vmem:[%s8259_s16 + $0x98] sm:$0xff]  }
0x20db   : > { %6914 = vrsqrt.f32 %v3532_v13  ;;  %v6768_v13 = vld [vmem:[%s8259_s16 + $0x60] sm:$0xff]  }
0x20e5   : > { %v6915_v14 = vpop.eup %6914 }
0x20e6   : > { %v3534_v6 = vmul.f32 %v6915_v14, %v3526_v0  ;;  %v5912_v0 = vcombine.low %v3572_v32, %v3580_v33  ;;  %v6769_v14 = vld [vmem:[%s8259_s16 + $0xe0] sm:$0xff]   ;;  %v7864_v32 = vld [vmem:[%s8258_s15 + $0x8] sm:$0xff] }
0x20e8   : > { %v3542_v16 = vmul.f32 %v5886_v15, %v3534_v6  ;;  %v6770_v15 = vld [vmem:[%s8259_s16 + $0x20] sm:$0xff]  }
0x20e9   : > { %v6771_v6 = vld [vmem:[%s8259_s16 + $0xa0] sm:$0xff]  }
0x20ea   : > { %v7680_v20 = vadd.f32 %v5887_v52, %v3542_v16  ;;  %v6772_v52 = vld [vmem:[%s8259_s16 + $0x68] sm:$0xff]  }
0x20eb   : > { %v6773_v16 = vld [vmem:[%s8259_s16 + $0xe8] sm:$0xff]  }
0x20ec   : > { %v7684_v21 = vpack.c.bf16 %v7680_v20, %v7680_v20 }
0x20ee   : > { %5920 = vmatmul.mubr.msk.bf16.vlgmr.msra.gmra.mrb[96].mxu0 %vm669_vm1, %v7684_v21  ;;  %5921 = vmatmul.mubr.msk.bf16.vlgmr.msra.gmra.mrb[96].mxu1 %vm669_vm1, %v7684_v21 }
0x20ef   : > { %3914 = vmatpush1.bf16.msra.mxu0 %v5892_v8  ;;  %3955 = vmatpush1.bf16.msra.mxu1 %v5894_v9  ;;  %v6763_v8 = vld [vmem:[%s8259_s16 + $0x90] sm:$0xff]   ;;  %v6764_v9 = vld [vmem:[%s8259_s16 + $0x58] sm:$0xff]  }
0x20f0   : > { %3915 = vmatprep.subr.bf16.mxu0 %v5909_v22  ;;  %3956 = vmatprep.subr.bf16.mxu1 %v5911_v23  ;;  %v6779_v22 = vld [vmem:[%s8259_s16 + $0xb0] sm:$0xff]   ;;  %v6780_v23 = vld [vmem:[%s8259_s16 + $0x78] sm:$0xff]  }
0x20f1   : > { %3945 = vmatprep.mubr.bf16.mxu0 %v6929_v7  ;;  %3986 = vmatprep.mubr.bf16.mxu1 %v6929_v7 }
0x20f3   : > { %3916 = vmatpush1.bf16.msra.mxu0 %v5908_v28  ;;  %3957 = vmatpush1.bf16.msra.mxu1 %v5910_v29  ;;  %v6785_v28 = vld [vmem:[%s8259_s16 + $0x1c0] sm:$0xff]   ;;  %v3588_v29 = vlaneseq }
0x20f4   : > { %3995 = vmatprep.subr.bf16.mxu0 %v5897_v30  ;;  %4036 = vmatprep.subr.bf16.mxu1 %v5899_v31 }
0x20f5   : > { %v7858_v30 = vshrl.u32 %v3588_v29, 7  ;;  %v6795_v29 = vld [vmem:[%s8259_s16 + $0x190] sm:$0xff]  }
0x20f6   : > { %5922 = vmatmul.mubr.msk.bf16.vlgmr.msra.gmra.mrb[100].mxu0 %vm669_vm1, %v7684_v21  ;;  %5923 = vmatmul.mubr.msk.bf16.vlgmr.msra.gmra.mrb[100].mxu1 %vm669_vm1, %v7684_v21 }
0x20f7   : > { %3996 = vmatpush1.bf16.msra.mxu0 %v5896_v36  ;;  %4037 = vmatpush1.bf16.msra.mxu1 %v5898_v37  ;;  %v3614_v31 = vsub.s32 6, %v7858_v30  ;;  %v3590_v34 = vsub.s32 0, %v7858_v30  ;;  %v3598_v35 = vsub.s32 2, %v7858_v30  ;;  %v7876_v36 = vld [vmem:[%s8258_s15] sm:$0xff]  ;;  %v3594_v37 = vsub.s32 1, %v7858_v30 }
0x20f8   : > { %3997 = vmatprep.subr.bf16.mxu0 %v5913_v38  ;;  %4038 = vmatprep.subr.bf16.mxu1 %v5915_v39  ;;  %v3602_v38 = vsub.s32 3, %v7858_v30 }
0x20f9   : > { %4027 = vmatprep.mubr.bf16.mxu0 %v6929_v7  ;;  %4068 = vmatprep.mubr.bf16.mxu1 %v6929_v7  ;;  %v7869_v33 = vrot.slane %v7864_v32, %v3614_v31  ;;  %v3591_v39 = vrot.slane %v7876_v36, %v3590_v34  ;;  %v3599_v40 = vrot.slane %v7876_v36, %v3598_v35 }
0x20fa   : > { %v3595_v41 = vrot.slane %v7876_v36, %v3594_v37  ;;  %v3603_v42 = vrot.slane %v7876_v36, %v3602_v38 }
0x20fb   : > { %3998 = vmatpush1.bf16.msra.mxu0 %v5912_v0  ;;  %4039 = vmatpush1.bf16.msra.mxu1 %v5914_v44 }
0x20fc   : > { %4077 = vmatprep.subr.bf16.mxu0 %v5901_v45  ;;  %4118 = vmatprep.subr.bf16.mxu1 %v5903_v46 }
0x20fe   : > { %5924 = vmatmul.mubr.msk.bf16.vlgmr.msra.gmra.mrb[104].mxu0 %vm669_vm1, %v7684_v21  ;;  %5925 = vmatmul.mubr.msk.bf16.vlgmr.msra.gmra.mrb[104].mxu1 %vm669_vm1, %v7684_v21 }
0x20ff   : > { %4078 = vmatpush1.bf16.msra.mxu0 %v5900_v50  ;;  %4119 = vmatpush1.bf16.msra.mxu1 %v5902_v51  ;;  %v3610_v51 = vsub.s32 5, %v7858_v30 }
0x2100   : > { %4079 = vmatprep.subr.bf16.mxu0 %v5917_v53  ;;  %4120 = vmatprep.subr.bf16.mxu1 %v5919_v54  ;;  %v3618_v53 = vsub.s32 7, %v7858_v30 }
0x2101   : > { %4109 = vmatprep.mubr.bf16.mxu0 %v6929_v7  ;;  %4150 = vmatprep.mubr.bf16.mxu1 %v6929_v7  ;;  %v6762_v7 = vld [vmem:[%s8259_s16 + $0x10] sm:$0xff]  }
0x2103   : > { %4080 = vmatpush1.bf16.msra.mxu0 %v5916_v55  ;;  %4121 = vmatpush1.bf16.msra.mxu1 %v5918_v56 }
0x2104   : > { %6181 = vmatprep.subr.bf16.mxu0 %v6752_v57  ;;  %6203 = vmatprep.subr.bf16.mxu1 %v6753_v59 }
0x2106   : > { %5926 = vmatmul.mubr.msk.bf16.vlgmr.msra.gmra.mrb[108].mxu0 %vm669_vm1, %v7684_v21  ;;  %5927 = vmatmul.mubr.msk.bf16.vlgmr.msra.gmra.mrb[108].mxu1 %vm669_vm1, %v7684_v21  ;;  %v6778_v21 = vld [vmem:[%s8259_s16 + $0x30] sm:$0xff]  }
0x2107   : > { %6182 = vmatpush3.bf16.msra.mxu0 %v6754_v61  ;;  %6204 = vmatpush3.bf16.msra.mxu1 %v6755_v62 }
0x2108   : > { %6183 = vmatprep.subr.bf16.mxu0 %v6756_v58  ;;  %6205 = vmatprep.subr.bf16.mxu1 %v6757_v60  ;;  %v3611_v60 = vrot.slane %v7876_v36, %v3610_v51 }
0x210b   : > { %6184 = vmatpush3.bf16.msra.mxu0 %v6758_v2  ;;  %6206 = vmatpush3.bf16.msra.mxu1 %v6759_v3  ;;  %v3619_v2 = vrot.slane %v7876_v36, %v3618_v53  ;;  %v6786_v3 = vld [vmem:[%s8259_s16 + $0x100] sm:$0xff]  }
0x210c   : > { %6185 = vmatprep.subr.bf16.mxu0 %v6760_v4  ;;  %6207 = vmatprep.subr.bf16.mxu1 %v6761_v5  ;;  %v6787_v4 = vld [vmem:[%s8259_s16 + $0x180] sm:$0xff]  }
0x210f   : > { %6186 = vmatpush3.bf16.msra.mxu0 %v6762_v7  ;;  %6208 = vmatpush3.bf16.msra.mxu1 %v6763_v8  ;;  %v6788_v8 = vld [vmem:[%s8259_s16 + $0x148] sm:$0xff]  }
0x2110   : > { %6187 = vmatprep.subr.bf16.mxu0 %v6764_v9  ;;  %6209 = vmatprep.subr.bf16.mxu1 %v6765_v10  ;;  %v6789_v9 = vld [vmem:[%s8259_s16 + $0x1c8] sm:$0xff]  }
0x2113   : > { %6188 = vmatpush3.bf16.msra.mxu0 %v6766_v11  ;;  %6210 = vmatpush3.bf16.msra.mxu1 %v6767_v12 }
0x2114   : > { %6189 = vmatprep.subr.bf16.mxu0 %v6768_v13  ;;  %6211 = vmatprep.subr.bf16.mxu1 %v6769_v14 }
0x2117   : > { %6190 = vmatpush3.bf16.msra.mxu0 %v6770_v15  ;;  %6212 = vmatpush3.bf16.msra.mxu1 %v6771_v6 }
0x2118   : > { %6191 = vmatprep.subr.bf16.mxu0 %v6772_v52  ;;  %6213 = vmatprep.subr.bf16.mxu1 %v6773_v16  ;;  %v6790_v16 = vld [vmem:[%s8259_s16 + $0x108] sm:$0xff]  }
0x211b   : > { %6192 = vmatpush3.bf16.msra.mxu0 %v6774_v17  ;;  %6214 = vmatpush3.bf16.msra.mxu1 %v6775_v1  ;;  %v6791_v17 = vld [vmem:[%s8259_s16 + $0x188] sm:$0xff]  }
0x211c   : > { %6193 = vmatprep.subr.bf16.mxu0 %v6776_v18  ;;  %6215 = vmatprep.subr.bf16.mxu1 %v6777_v19  ;;  %v6792_v19 = vld [vmem:[%s8259_s16 + $0x150] sm:$0xff]  }
0x211f   : > { %6194 = vmatpush3.bf16.msra.mxu0 %v6778_v21  ;;  %6216 = vmatpush3.bf16.msra.mxu1 %v6779_v22  ;;  %v6793_v21 = vld [vmem:[%s8259_s16 + $0x1d0] sm:$0xff]  }
0x2120   : > { %6195 = vmatprep.subr.bf16.mxu0 %v6780_v23  ;;  %6217 = vmatprep.subr.bf16.mxu1 %v6781_v24  ;;  %v3623_v24 = vrot.slane %v7864_v32, %v3590_v34  ;;  %v6796_v34 = vld [vmem:[%s8259_s16 + $0x158] sm:$0xff]  }
0x2123   : > { %6196 = vmatpush3.bf16.msra.mxu0 %v6782_v25  ;;  %6218 = vmatpush3.bf16.msra.mxu1 %v6783_v26  ;;  %v3631_v25 = vrot.slane %v7864_v32, %v3598_v35  ;;  %v6797_v35 = vld [vmem:[%s8259_s16 + $0x1d8] sm:$0xff]  }
0x2124   : > { %6225 = vmatprep.subr.bf16.mxu0 %v6784_v27  ;;  %6247 = vmatprep.subr.bf16.mxu1 %v6785_v28  ;;  %v6794_v28 = vld [vmem:[%s8259_s16 + $0x110] sm:$0xff]  }
0x21c1   : > { %v3865_v43 = vpop.f32.mrb[96].mxu0  ;;  %v3906_v0 = vpop.f32.mrb[96].mxu1 }
0x21c2   : > { %v3866_v44 = vadd.f32 %v3865_v43, %v3591_v39  ;;  %v3907_v45 = vadd.f32 %v3906_v0, %v3599_v40  ;;  %v3867_v46 = vpop.f32.mrb[97].mxu0  ;;  %v3908_v47 = vpop.f32.mrb[97].mxu1 }
0x21c3   : > { %v3868_v63 = vadd.f32 %v3867_v46, %v3595_v41  ;;  %v3909_v48 = vadd.f32 %v3908_v47, %v3603_v42  ;;  %v3869_v49 = vpop.f32.mrb[98].mxu0  ;;  %v3910_v50 = vpop.f32.mrb[98].mxu1  ;;  %v6798_v46 = vld [vmem:[%s8259_s16 + $0x118] sm:$0xff]  }
0x21c4   : > { %v4159_v54 = vmax.f32 %v3866_v44, 0.0  ;;  %v4161_v55 = vmax.f32 %v3907_v45, 0.0  ;;  %v3870_v56 = vpop.f32.mrb[99].mxu0  ;;  %v3911_v57 = vpop.f32.mrb[99].mxu1  ;;  %v6799_v47 = vld [vmem:[%s8259_s16 + $0x198] sm:$0xff]   ;;  %v6800_v50 = vld [vmem:[%s8259_s16 + $0x160] sm:$0xff]  }
0x21c5   : > { %v4160_v59 = vmax.f32 %v3868_v63, 0.0  ;;  %v4162_v61 = vmax.f32 %v3909_v48, 0.0  ;;  %v3606_v63 = vsub.s32 4, %v7858_v30  ;;  %v6802_v56 = vld [vmem:[%s8259_s16 + $0x120] sm:$0xff]   ;;  %v6845_v30 = vld [vmem:[%s8259_s16 + $0x2f8] sm:$0xff]  }
0x21c6   : > { %v4175_v5 = vpack.c.bf16 %v4159_v54, %v4159_v54  ;;  %v4177_v7 = vpack.c.bf16 %v4161_v55, %v4161_v55  ;;  %v6801_v54 = vld [vmem:[%s8259_s16 + $0x1e0] sm:$0xff]  }
0x21c7   : > { %v4176_v62 = vpack.c.bf16 %v4160_v59, %v4160_v59  ;;  %v4178_v58 = vpack.c.bf16 %v4162_v61, %v4162_v61  ;;  %v3639_v55 = vrot.slane %v7864_v32, %v3606_v63  ;;  %v6803_v57 = vld [vmem:[%s8259_s16 + $0x1a0] sm:$0xff]   ;;  %v6804_v59 = vld [vmem:[%s8259_s16 + $0x168] sm:$0xff]  }
0x21c8   : > { %v6805_v61 = vld [vmem:[%s8259_s16 + $0x1e8] sm:$0xff]  }
0x21c9   : > { %v7908_v10 = vpop.f32.mrb[100].mxu0  ;;  %v7910_v11 = vpop.f32.mrb[100].mxu1  ;;  %5254 = vmatprep.mubr.bf16.mxu0 %v4176_v62  ;;  %5294 = vmatprep.mubr.bf16.mxu1 %v4178_v58 }
0x21ca   : > { %v3949_v12 = vpop.f32.mrb[101].mxu0  ;;  %v3990_v13 = vpop.f32.mrb[101].mxu1  ;;  %5255 = vmatmul.mubr.bf16.vlgmr.msra.gmra.mrb[112].mxu0 %v4175_v5  ;;  %5295 = vmatmul.mubr.bf16.vlgmr.msra.gmra.mrb[112].mxu1 %v4177_v7 }
0x21cb   : > { %v3950_v14 = vadd.f32 %v3949_v12, %v3611_v60  ;;  %v3991_v15 = vadd.f32 %v3990_v13, %v3619_v2  ;;  %6226 = vmatpush3.bf16.msra.mxu0 %v6786_v3  ;;  %6248 = vmatpush3.bf16.msra.mxu1 %v6787_v4  ;;  %v3951_v6 = vpop.f32.mrb[102].mxu0  ;;  %v3992_v52 = vpop.f32.mrb[102].mxu1  ;;  %v3607_v12 = vrot.slane %v7876_v36, %v3606_v63  ;;  %v6827_v63 = vld [vmem:[%s8259_s16 + $0x290] sm:$0xff]  }
0x21cc   : > { %v3952_v1 = vpop.f32.mrb[103].mxu0  ;;  %v3993_v18 = vpop.f32.mrb[103].mxu1  ;;  %6227 = vmatprep.subr.bf16.mxu0 %v6788_v8  ;;  %6249 = vmatprep.subr.bf16.mxu1 %v6789_v9  ;;  %v6806_v8 = vld [vmem:[%s8259_s16 + $0x128] sm:$0xff]   ;;  %v6809_v6 = vld [vmem:[%s8259_s16 + $0x1f0] sm:$0xff]   ;;  %v3627_v52 = vrot.slane %v7864_v32, %v3594_v37  ;;  %v6812_v37 = vld [vmem:[%s8259_s16 + $0x178] sm:$0xff]  }
0x21cd   : > { %v4164_v22 = vmax.f32 %v3950_v14, 0.0  ;;  %v4166_v23 = vmax.f32 %v3991_v15, 0.0  ;;  %v6807_v9 = vld [vmem:[%s8259_s16 + $0x1a8] sm:$0xff]   ;;  %v6808_v15 = vld [vmem:[%s8259_s16 + $0x170] sm:$0xff]  }
0x21cf   : > { %v4180_v26 = vpack.c.bf16 %v4164_v22, %v4164_v22  ;;  %v4182_v27 = vpack.c.bf16 %v4166_v23, %v4166_v23  ;;  %6228 = vmatpush3.bf16.msra.mxu0 %v6790_v16  ;;  %6250 = vmatpush3.bf16.msra.mxu1 %v6791_v17  ;;  %v6811_v16 = vld [vmem:[%s8259_s16 + $0x1b0] sm:$0xff]   ;;  %v3948_v17 = vadd.f32 %v7908_v10, %v3607_v12  ;;  %v6814_v10 = vld [vmem:[%s8259_s16 + $0x138] sm:$0xff]   ;;  %v6816_v23 = vld [vmem:[%s8259_s16 + $0x240] sm:$0xff]  }
0x21d0   : > { %6229 = vmatprep.subr.bf16.mxu0 %v6792_v19  ;;  %6251 = vmatprep.subr.bf16.mxu1 %v6793_v21  ;;  %v3651_v12 = vrot.slane %v7864_v32, %v3618_v53  ;;  %v6846_v53 = vld [vmem:[%s8259_s16 + $0x238] sm:$0xff]  }
0x21d1   : > { %v4029_v39 = vpop.f32.mrb[104].mxu0  ;;  %v4070_v40 = vpop.f32.mrb[104].mxu1  ;;  %5334 = vmatprep.mubr.bf16.mxu0 %v4180_v26  ;;  %5374 = vmatprep.mubr.bf16.mxu1 %v4182_v27  ;;  %v4163_v21 = vmax.f32 %v3948_v17, 0.0  ;;  %v6818_v27 = vld [vmem:[%s8259_s16 + $0x200] sm:$0xff]  }
0x21d2   : > { %v7938_v41 = vadd.f32 %v4029_v39, %v3623_v24  ;;  %v7940_v42 = vadd.f32 %v4070_v40, %v3631_v25  ;;  %v4031_v43 = vpop.f32.mrb[105].mxu0  ;;  %v4072_v0 = vpop.f32.mrb[105].mxu1  ;;  %v6817_v24 = vld [vmem:[%s8259_s16 + $0x2c0] sm:$0xff]   ;;  %v6820_v39 = vld [vmem:[%s8259_s16 + $0x248] sm:$0xff]  }
0x21d3   : > { %6230 = vmatpush3.bf16.msra.mxu0 %v6794_v28  ;;  %6252 = vmatpush3.bf16.msra.mxu1 %v6795_v29  ;;  %v4033_v44 = vpop.f32.mrb[106].mxu0  ;;  %v4074_v45 = vpop.f32.mrb[106].mxu1  ;;  %v4032_v18 = vadd.f32 %v4031_v43, %v3627_v52  ;;  %v4179_v28 = vpack.c.bf16 %v4163_v21, %v4163_v21  ;;  %v6821_v40 = vld [vmem:[%s8259_s16 + $0x2c8] sm:$0xff]   ;;  %v6848_v52 = vld [vmem:[%s8259_s16 + $0x340] sm:$0xff]   ;;  %v6857_v21 = vld [vmem:[%s8259_s16 + $0x3d0] sm:$0xff]  }
0x21d4   : > { %v4034_v48 = vpop.f32.mrb[107].mxu0  ;;  %v4075_v49 = vpop.f32.mrb[107].mxu1  ;;  %6231 = vmatprep.subr.bf16.mxu0 %v6796_v34  ;;  %6253 = vmatprep.subr.bf16.mxu1 %v6797_v35  ;;  %v6819_v34 = vld [vmem:[%s8259_s16 + $0x280] sm:$0xff]   ;;  %v6823_v44 = vld [vmem:[%s8259_s16 + $0x288] sm:$0xff]   ;;  %v6824_v45 = vld [vmem:[%s8259_s16 + $0x250] sm:$0xff]  }
0x21d5   : > { %v4168_v25 = vmax.f32 %v4032_v18, 0.0  ;;  %v6828_v48 = vld [vmem:[%s8259_s16 + $0x258] sm:$0xff]   ;;  %v6851_v17 = vld [vmem:[%s8259_s16 + $0x380] sm:$0xff]  }
0x21d6   : > { %v6829_v49 = vld [vmem:[%s8259_s16 + $0x2d8] sm:$0xff]  }
0x21d7   : > { %6232 = vmatpush3.bf16.msra.mxu0 %v6798_v46  ;;  %6254 = vmatpush3.bf16.msra.mxu1 %v6799_v47  ;;  %v4184_v35 = vpack.c.bf16 %v4168_v25, %v4168_v25  ;;  %v6825_v46 = vld [vmem:[%s8259_s16 + $0x2d0] sm:$0xff]   ;;  %v6861_v25 = vld [vmem:[%s8259_s16 + $0x3d8] sm:$0xff]  }
0x21d8   : > { %6233 = vmatprep.subr.bf16.mxu0 %v6800_v50  ;;  %6255 = vmatprep.subr.bf16.mxu1 %v6801_v54  ;;  %v6826_v47 = vld [vmem:[%s8259_s16 + $0x210] sm:$0xff]   ;;  %v6830_v50 = vld [vmem:[%s8259_s16 + $0x218] sm:$0xff]  }
0x21d9   : > { %v4111_v62 = vpop.f32.mrb[108].mxu0  ;;  %v4152_v58 = vpop.f32.mrb[108].mxu1  ;;  %v6831_v54 = vld [vmem:[%s8259_s16 + $0x298] sm:$0xff]  }
0x21da   : > { %v7968_v60 = vadd.f32 %v4111_v62, %v3639_v55  ;;  %v7971_v2 = vadd.f32 %v4152_v58, %v7869_v33  ;;  %v7973_v3 = vpop.f32.mrb[109].mxu0  ;;  %v7975_v4 = vpop.f32.mrb[109].mxu1  ;;  %v3615_v33 = vrot.slane %v7876_v36, %v3614_v31  ;;  %v3635_v31 = vrot.slane %v7864_v32, %v3602_v38  ;;  %v6810_v36 = vld [vmem:[%s8259_s16 + $0x130] sm:$0xff]   ;;  %v6813_v38 = vld [vmem:[%s8259_s16 + $0x1f8] sm:$0xff]   ;;  %v6832_v55 = vld [vmem:[%s8259_s16 + $0x260] sm:$0xff]  }
0x21db   : > { %6234 = vmatpush3.bf16.msra.mxu0 %v6802_v56  ;;  %6256 = vmatpush3.bf16.msra.mxu1 %v6803_v57  ;;  %v4115_v5 = vpop.f32.mrb[110].mxu0  ;;  %v4156_v7 = vpop.f32.mrb[110].mxu1  ;;  %v6833_v56 = vld [vmem:[%s8259_s16 + $0x2e0] sm:$0xff]   ;;  %v6837_v62 = vld [vmem:[%s8259_s16 + $0x2e8] sm:$0xff]  }
0x21dc   : > { %v4116_v13 = vpop.f32.mrb[111].mxu0  ;;  %v4157_v14 = vpop.f32.mrb[111].mxu1  ;;  %6235 = vmatprep.subr.bf16.mxu0 %v6804_v59  ;;  %6257 = vmatprep.subr.bf16.mxu1 %v6805_v61  ;;  %v3989_v1 = vadd.f32 %v7910_v11, %v3615_v33  ;;  %v4073_v19 = vadd.f32 %v4072_v0, %v3635_v31  ;;  %v6815_v11 = vld [vmem:[%s8259_s16 + $0x1b8] sm:$0xff]   ;;  %v6822_v0 = vld [vmem:[%s8259_s16 + $0x208] sm:$0xff]   ;;  %v6834_v57 = vld [vmem:[%s8259_s16 + $0x220] sm:$0xff]  }
0x21dd   : > { %v6835_v59 = vld [vmem:[%s8259_s16 + $0x2a0] sm:$0xff]   ;;  %v6836_v61 = vld [vmem:[%s8259_s16 + $0x268] sm:$0xff]   ;;  %v6840_v7 = vld [vmem:[%s8259_s16 + $0x270] sm:$0xff]  }
0x21de   : > { %v4165_v22 = vmax.f32 %v3989_v1, 0.0  ;;  %v4170_v26 = vmax.f32 %v4073_v19, 0.0  ;;  %v6838_v58 = vld [vmem:[%s8259_s16 + $0x228] sm:$0xff]   ;;  %v6842_v33 = vld [vmem:[%s8259_s16 + $0x230] sm:$0xff]   ;;  %v6844_v14 = vld [vmem:[%s8259_s16 + $0x278] sm:$0xff]  }
0x21df   : > { %6236 = vmatpush3.bf16.msra.mxu0 %v6806_v8  ;;  %6258 = vmatpush3.bf16.msra.mxu1 %v6807_v9  ;;  %v6839_v5 = vld [vmem:[%s8259_s16 + $0x2a8] sm:$0xff]   ;;  %v6841_v8 = vld [vmem:[%s8259_s16 + $0x2f0] sm:$0xff]   ;;  %v3643_v9 = vrot.slane %v7864_v32, %v3610_v51  ;;  %v4155_v51 = vadd.f32 %v7975_v4, %v3651_v12  ;;  %v6849_v4 = vld [vmem:[%s8259_s16 + $0x3c0] sm:$0xff]  }
0x21e0   : > { %6237 = vmatprep.subr.bf16.mxu0 %v6808_v15  ;;  %6259 = vmatprep.subr.bf16.mxu1 %v6809_v6  ;;  %v4181_v29 = vpack.c.bf16 %v4165_v22, %v4165_v22  ;;  %v4186_v43 = vpack.c.bf16 %v4170_v26, %v4170_v26  ;;  %v6843_v13 = vld [vmem:[%s8259_s16 + $0x2b0] sm:$0xff]   ;;  %v4167_v15 = vmax.f32 %v7938_v41, 0.0  ;;  %v6847_v6 = vld [vmem:[%s8259_s16 + $0x2b8] sm:$0xff]   ;;  %v6850_v41 = vld [vmem:[%s8259_s16 + $0x300] sm:$0xff]  }
0x21e1   : > { %v4114_v32 = vadd.f32 %v7973_v3, %v3643_v9  ;;  %v4169_v3 = vmax.f32 %v7940_v42, 0.0  ;;  %v6852_v1 = vld [vmem:[%s8259_s16 + $0x348] sm:$0xff]   ;;  %v6858_v22 = vld [vmem:[%s8259_s16 + $0x310] sm:$0xff]   ;;  %v6862_v26 = vld [vmem:[%s8259_s16 + $0x318] sm:$0xff]  }
0x21e2   : > { %v6854_v19 = vld [vmem:[%s8259_s16 + $0x308] sm:$0xff]  }
0x21e3   : > { %6238 = vmatpush3.bf16.msra.mxu0 %v6810_v36  ;;  %6260 = vmatpush3.bf16.msra.mxu1 %v6811_v16  ;;  %v4172_v31 = vmax.f32 %v4114_v32, 0.0  ;;  %v4174_v36 = vmax.f32 %v4155_v51, 0.0  ;;  %v4183_v16 = vpack.c.bf16 %v4167_v15, %v4167_v15  ;;  %v4185_v42 = vpack.c.bf16 %v4169_v3, %v4169_v3 }
0x21e4   : > { %6239 = vmatprep.subr.bf16.mxu0 %v6812_v37  ;;  %6261 = vmatprep.subr.bf16.mxu1 %v6813_v38  ;;  %v6853_v38 = vld [vmem:[%s8259_s16 + $0x3c8] sm:$0xff]  }
0x21e5   : > { %v4188_v37 = vpack.c.bf16 %v4172_v31, %v4172_v31  ;;  %v4190_v18 = vpack.c.bf16 %v4174_v36, %v4174_v36 }
0x21e7   : > { %6240 = vmatpush3.bf16.msra.mxu0 %v6814_v10  ;;  %6262 = vmatpush3.bf16.msra.mxu1 %v6815_v11  ;;  %v6855_v10 = vld [vmem:[%s8259_s16 + $0x388] sm:$0xff]   ;;  %v6856_v11 = vld [vmem:[%s8259_s16 + $0x350] sm:$0xff]  }
0x21e8   : > { %6269 = vmatprep.subr.bf16.mxu0 %v6816_v23  ;;  %6291 = vmatprep.subr.bf16.mxu1 %v6817_v24  ;;  %v6859_v23 = vld [vmem:[%s8259_s16 + $0x390] sm:$0xff]   ;;  %v6860_v24 = vld [vmem:[%s8259_s16 + $0x358] sm:$0xff]  }
0x21ea   : > { %5335 = vmatmul.mubr.bf16.vlgmr.msra.gmra.mrb[116].mxu0 %v4179_v28  ;;  %5375 = vmatmul.mubr.bf16.vlgmr.msra.gmra.mrb[116].mxu1 %v4181_v29  ;;  %v6864_v28 = vld [vmem:[%s8259_s16 + $0x360] sm:$0xff]  }
0x21eb   : > { %6270 = vmatpush3.bf16.msra.mxu0 %v6818_v27  ;;  %5414 = vmatprep.mubr.bf16.mxu0 %v4184_v35  ;;  %v6863_v27 = vld [vmem:[%s8259_s16 + $0x398] sm:$0xff]   ;;  %v6865_v29 = vld [vmem:[%s8259_s16 + $0x3e0] sm:$0xff]  }
0x21ec   : > { %6292 = vmatpush3.bf16.msra.mxu1 %v6819_v34  ;;  %5454 = vmatprep.mubr.bf16.mxu1 %v4186_v43  ;;  %v6866_v34 = vld [vmem:[%s8259_s16 + $0x320] sm:$0xff]   ;;  %v6870_v43 = vld [vmem:[%s8259_s16 + $0x328] sm:$0xff]  }
0x21ed   : > { %6271 = vmatprep.subr.bf16.mxu0 %v6820_v39  ;;  %6293 = vmatprep.subr.bf16.mxu1 %v6821_v40  ;;  %v6867_v35 = vld [vmem:[%s8259_s16 + $0x3a0] sm:$0xff]   ;;  %v6868_v39 = vld [vmem:[%s8259_s16 + $0x368] sm:$0xff]  }
0x21ee   : > { %v6869_v40 = vld [vmem:[%s8259_s16 + $0x3e8] sm:$0xff]  }
0x21ef   : > { %6272 = vmatpush3.bf16.msra.mxu0 %v6822_v0  ;;  %v6871_v0 = vld [vmem:[%s8259_s16 + $0x3a8] sm:$0xff]  }
0x21f0   : > { %6294 = vmatpush3.bf16.msra.mxu1 %v6823_v44  ;;  %6273 = vmatprep.subr.bf16.mxu0 %v6824_v45  ;;  %v6872_v44 = vld [vmem:[%s8259_s16 + $0x370] sm:$0xff]  }
0x21f1   : > { %6295 = vmatprep.subr.bf16.mxu1 %v6825_v46  ;;  %v6873_v45 = vld [vmem:[%s8259_s16 + $0x3f0] sm:$0xff]  }
0x21f2   : > { %v6874_v46 = vld [vmem:[%s8259_s16 + $0x330] sm:$0xff]  }
0x21f3   : > { %6274 = vmatpush3.bf16.msra.mxu0 %v6826_v47  ;;  %v6875_v47 = vld [vmem:[%s8259_s16 + $0x3b0] sm:$0xff]  }
0x21f4   : > { %6296 = vmatpush3.bf16.msra.mxu1 %v6827_v63  ;;  %6275 = vmatprep.subr.bf16.mxu0 %v6828_v48  ;;  %v6876_v63 = vld [vmem:[%s8259_s16 + $0x378] sm:$0xff]  }
0x21f5   : > { %6297 = vmatprep.subr.bf16.mxu1 %v6829_v49  ;;  %v6877_v48 = vld [vmem:[%s8259_s16 + $0x3f8] sm:$0xff]  }
0x21f6   : > { %v6878_v49 = vld [vmem:[%s8259_s16 + $0x338] sm:$0xff]  }
0x21f7   : > { %6276 = vmatpush3.bf16.msra.mxu0 %v6830_v50  ;;  %v4171_v50 = vmax.f32 %v7968_v60, 0.0  ;;  %v5928_v60 = vld [vmem:[%s8260_s17] ss:$0 sm:$0xff] }
0x21f8   : > { %6298 = vmatpush3.bf16.msra.mxu1 %v6831_v54  ;;  %6277 = vmatprep.subr.bf16.mxu0 %v6832_v55  ;;  %v6879_v54 = vld [vmem:[%s8259_s16 + $0x3b8] sm:$0xff]   ;;  %v4173_v55 = vmax.f32 %v7971_v2, 0.0 }
0x21f9   : > { %6299 = vmatprep.subr.bf16.mxu1 %v6833_v56  ;;  %v4187_v56 = vpack.c.bf16 %v4171_v50, %v4171_v50 }
0x21fb   : > { %6278 = vmatpush3.bf16.msra.mxu0 %v6834_v57  ;;  %v4189_v57 = vpack.c.bf16 %v4173_v55, %v4173_v55 }
0x21fc   : > { %6300 = vmatpush3.bf16.msra.mxu1 %v6835_v59  ;;  %6279 = vmatprep.subr.bf16.mxu0 %v6836_v61 }
0x21fd   : > { %6301 = vmatprep.subr.bf16.mxu1 %v6837_v62 }
0x21ff   : > { %6280 = vmatpush3.bf16.msra.mxu0 %v6838_v58 }
0x2200   : > { %6302 = vmatpush3.bf16.msra.mxu1 %v6839_v5  ;;  %6281 = vmatprep.subr.bf16.mxu0 %v6840_v7 }
0x2201   : > { %6303 = vmatprep.subr.bf16.mxu1 %v6841_v8 }
0x2203   : > { %6282 = vmatpush3.bf16.msra.mxu0 %v6842_v33 }
0x2204   : > { %6304 = vmatpush3.bf16.msra.mxu1 %v6843_v13  ;;  %6283 = vmatprep.subr.bf16.mxu0 %v6844_v14 }
0x2205   : > { %6305 = vmatprep.subr.bf16.mxu1 %v6845_v30 }
0x2207   : > { %6284 = vmatpush3.bf16.msra.mxu0 %v6846_v53 }
0x2208   : > { %6306 = vmatpush3.bf16.msra.mxu1 %v6847_v6  ;;  %6313 = vmatprep.subr.bf16.mxu0 %v6848_v52 }
0x2209   : > { %6335 = vmatprep.subr.bf16.mxu1 %v6849_v4 }
0x220a   : > { %5415 = vmatmul.mubr.bf16.vlgmr.msra.gmra.mrb[120].mxu0 %v4183_v16 }
0x220b   : > { %5455 = vmatmul.mubr.bf16.vlgmr.msra.gmra.mrb[120].mxu1 %v4185_v42  ;;  %6314 = vmatpush3.bf16.msra.mxu0 %v6850_v41 }
0x220c   : > { %5494 = vmatprep.mubr.bf16.mxu0 %v4188_v37  ;;  %6336 = vmatpush3.bf16.msra.mxu1 %v6851_v17 }
0x220d   : > { %5534 = vmatprep.mubr.bf16.mxu1 %v4190_v18  ;;  %6315 = vmatprep.subr.bf16.mxu0 %v6852_v1 }
0x220e   : > { %6337 = vmatprep.subr.bf16.mxu1 %v6853_v38 }
0x220f   : > { %6316 = vmatpush3.bf16.msra.mxu0 %v6854_v19 }
0x2210   : > { %6338 = vmatpush3.bf16.msra.mxu1 %v6855_v10  ;;  %6317 = vmatprep.subr.bf16.mxu0 %v6856_v11 }
0x2211   : > { %6339 = vmatprep.subr.bf16.mxu1 %v6857_v21 }
0x2213   : > { %6318 = vmatpush3.bf16.msra.mxu0 %v6858_v22 }
0x2214   : > { %6340 = vmatpush3.bf16.msra.mxu1 %v6859_v23  ;;  %6319 = vmatprep.subr.bf16.mxu0 %v6860_v24 }
0x2215   : > { %6341 = vmatprep.subr.bf16.mxu1 %v6861_v25 }
0x2217   : > { %6320 = vmatpush3.bf16.msra.mxu0 %v6862_v26 }
0x2218   : > { %6342 = vmatpush3.bf16.msra.mxu1 %v6863_v27  ;;  %6321 = vmatprep.subr.bf16.mxu0 %v6864_v28 }
0x2219   : > { %6343 = vmatprep.subr.bf16.mxu1 %v6865_v29 }
0x221b   : > { %6322 = vmatpush3.bf16.msra.mxu0 %v6866_v34 }
0x221c   : > { %6344 = vmatpush3.bf16.msra.mxu1 %v6867_v35  ;;  %6323 = vmatprep.subr.bf16.mxu0 %v6868_v39 }
0x221d   : > { %6345 = vmatprep.subr.bf16.mxu1 %v6869_v40 }
0x221f   : > { %6324 = vmatpush3.bf16.msra.mxu0 %v6870_v43 }
0x2220   : > { %6346 = vmatpush3.bf16.msra.mxu1 %v6871_v0  ;;  %6325 = vmatprep.subr.bf16.mxu0 %v6872_v44 }
0x2221   : > { %6347 = vmatprep.subr.bf16.mxu1 %v6873_v45 }
0x2223   : > { %6326 = vmatpush3.bf16.msra.mxu0 %v6874_v46 }
0x2224   : > { %6348 = vmatpush3.bf16.msra.mxu1 %v6875_v47  ;;  %6327 = vmatprep.subr.bf16.mxu0 %v6876_v63 }
0x2225   : > { %6349 = vmatprep.subr.bf16.mxu1 %v6877_v48 }
0x2227   : > { %6328 = vmatpush3.bf16.msra.mxu0 %v6878_v49 }
0x2228   : > { %6350 = vmatpush3.bf16.msra.mxu1 %v6879_v54 }
0x222a   : > { %5495 = vmatmul.mubr.bf16.vlgmr.msra.gmra.mrb[124].mxu0 %v4187_v56  ;;  %v6058_v56 = vld [vmem:[%s8262_s19] ss:$0 sm:$0xff] }
0x222b   : > { %5535 = vmatmul.mubr.bf16.vlgmr.msra.gmra.mrb[124].mxu1 %v4189_v57 }
0x229d   : > { %v6197_v59 = vpop.f32.mrb[112].mxu0  ;;  %v6219_v61 = vpop.f32.mrb[112].mxu1 }
0x229e   : > { %v6198_v62 = vpop.f32.mrb[113].mxu0  ;;  %v6220_v58 = vpop.f32.mrb[113].mxu1 }
0x229f   : > { %v6199_v5 = vadd.f32 %v6198_v62, %v6197_v59  ;;  %v6221_v7 = vadd.f32 %v6220_v58, %v6219_v61  ;;  %v6200_v8 = vpop.f32.mrb[114].mxu0  ;;  %v6222_v9 = vpop.f32.mrb[114].mxu1 }
0x22a0   : > { %v6201_v2 = vpop.f32.mrb[115].mxu0  ;;  %v6223_v12 = vpop.f32.mrb[115].mxu1 }
0x22a1   : > { %v5257_v33 = vadd.f32 %v6199_v5, %v5928_v60 }
0x22a3   : > { %v5297_v13 = vadd.f32 %v6221_v7, %v5257_v33 }
0x22bd   : > { %v6241_v14 = vpop.f32.mrb[116].mxu0  ;;  %v6263_v30 = vpop.f32.mrb[116].mxu1 }
0x22be   : > { %v6242_v32 = vpop.f32.mrb[117].mxu0  ;;  %v6264_v51 = vpop.f32.mrb[117].mxu1 }
0x22bf   : > { %v6243_v53 = vadd.f32 %v6242_v32, %v6241_v14  ;;  %v6265_v15 = vadd.f32 %v6264_v51, %v6263_v30  ;;  %v6244_v6 = vpop.f32.mrb[118].mxu0  ;;  %v6266_v52 = vpop.f32.mrb[118].mxu1 }
0x22c0   : > { %v6245_v3 = vpop.f32.mrb[119].mxu0  ;;  %v6267_v4 = vpop.f32.mrb[119].mxu1 }
0x22c1   : > { %v5337_v31 = vadd.f32 %v6243_v53, %v5297_v13 }
0x22c3   : > { %v5377_v36 = vadd.f32 %v6265_v15, %v5337_v31 }
0x22dd   : > { %v6285_v41 = vpop.f32.mrb[120].mxu0 }
0x22de   : > { %v6307_v16 = vpop.f32.mrb[120].mxu1  ;;  %v6286_v17 = vpop.f32.mrb[121].mxu0 }
0x22df   : > { %v6287_v42 = vadd.f32 %v6286_v17, %v6285_v41  ;;  %v6308_v1 = vpop.f32.mrb[121].mxu1  ;;  %v6288_v37 = vpop.f32.mrb[122].mxu0 }
0x22e0   : > { %v6309_v38 = vadd.f32 %v6308_v1, %v6307_v16  ;;  %v6310_v18 = vpop.f32.mrb[122].mxu1  ;;  %v6289_v19 = vpop.f32.mrb[123].mxu0 }
0x22e1   : > { %v5417_v10 = vadd.f32 %v6287_v42, %v5377_v36  ;;  %v6311_v11 = vpop.f32.mrb[123].mxu1 }
0x22e3   : > { %v5457_v21 = vadd.f32 %v6309_v38, %v5417_v10 }
0x22fd   : > { %v6329_v22 = vpop.f32.mrb[124].mxu0 }
0x22fe   : > { %v6351_v23 = vpop.f32.mrb[124].mxu1  ;;  %v6330_v24 = vpop.f32.mrb[125].mxu0 }
0x22ff   : > { %v6331_v25 = vadd.f32 %v6330_v24, %v6329_v22  ;;  %v6352_v26 = vpop.f32.mrb[125].mxu1  ;;  %v6332_v27 = vpop.f32.mrb[126].mxu0 }
0x2300   : > { %v6353_v28 = vadd.f32 %v6352_v26, %v6351_v23  ;;  %v6354_v29 = vpop.f32.mrb[126].mxu1  ;;  %v6333_v34 = vpop.f32.mrb[127].mxu0 }
0x2301   : > { %v5497_v35 = vadd.f32 %v6331_v25, %v5457_v21  ;;  %v6355_v39 = vpop.f32.mrb[127].mxu1 }
0x2303   : > { %v5537_v40 = vadd.f32 %v6353_v28, %v5497_v35 }
0x2305   : > { %v5542_v43 = vadd.f32 %v5537_v40, %v7680_v20  ;;  %v6057_v20 = vld [vmem:[%s8261_s18] ss:$0 sm:$0xff] }
0x2307   : > { %v5543_v0 = vsel %vm669_vm1, %v5542_v43, 0.0 }
0x2308   : > { %5544 = vadd.xlane.f32.xlu0 %v5543_v0 }
0x2395   : > { %v5545_v44 = vpop.xlane.xlu0 %5544 }
0x2396   : > { %v5546_v45 = vmul.f32 0.03125, %v5545_v44 }
0x2398   : > { %v5547_v46 = vsub.f32 %v5542_v43, %v5546_v45 }
0x239a   : > { %v5548_v47 = vmul.f32 %v5547_v46, %v5547_v46 }
0x239c   : > { %v5549_v63 = vsel %vm669_vm1, %v5548_v47, 0.0 }
0x239d   : > { %5550 = vadd.xlane.f32.xlu1 %v5549_v63 }
0x242a   : > { %v5551_v48 = vpop.xlane.xlu1 %5550 }
0x242b   : > { %v5552_v49 = vmul.f32 0.03125, %v5551_v48 }
0x242d   : > { %v5553_v50 = vadd.f32 1e-05, %v5552_v49 }
0x242f   : > { %6916 = vrsqrt.f32 %v5553_v50 }
0x2439   : > { %v6917_v54 = vpop.eup %6916 }
0x243a   : > { %v5555_v55 = vmul.f32 %v6917_v54, %v5547_v46 }
0x243c   : > { %v5563_v57 = vmul.f32 %v6057_v20, %v5555_v55 }
0x243e   : > { %v5571_v59 = vadd.f32 %v6058_v56, %v5563_v57 }
0x2440   : > { %5572 = vst.msk [vmem:[%s641_s28] sm:$0xff] %vm669_vm1, %v5571_v59 }
0x2441 PF: > { %s30_s1 = sadd.s32 1, %s6925_s1  }
0x2442   : > { %p27_p4 = scmp.ge.s32.totalorder %s30_s1, 4  }
0x2444   :  { %29 = sbr.rel (!%p27_p4) target bundleno = 6 (0x6), region = 183 }

</bundles_post_ra>
